<compile_context>
chip_gen: v7x
topology: tpu7x:2x2x1
jax: 0.10.0
libtpu: 0.0.40
codegen_flags: <defaults>
</compile_context>

<pallas_src>
import jax
import jax.numpy as jnp
import numpy as np
from jax.experimental import pallas as pl
from jax.experimental.pallas import tpu as pltpu

# ----------------------------- configuration --------------------------------
C_IN = 3        # input image channels
C_FEAT = 16     # backbone feature channels (256 in torchvision, small here)
KH = KW = 3     # backbone conv kernel
POOL = 7        # ROI pool output size (7x7, as in torchvision)
NUM_ROIS = 4    # fixed ROIs per frame (quadrants)
REP = 128       # box_head representation size (1024 in torchvision, small here)

VMEM_LIMIT = 32 * 1024 * 1024   # safe on v5e/v6e/v7x


def _round_up(x, m):
    return ((x + m - 1) // m) * m


# --------------------- Kernel A: conv + ReLU + ROI pool ----------------------
def conv_roi_pool(x, conv_w, conv_b, pool_mat, *, H, W):
    """Fused 3x3 conv + ReLU + quadrant ROI adaptive-avg-pool, one frame/step.

    x:        [BT, (H+2)*(W+2), C_IN]  f32 zero-padded NHWC frames (flat spatial)
    conv_w:   [KH*KW*C_IN, C_FEAT]     bf16
    conv_b:   [1, C_FEAT]              f32
    pool_mat: [NUM_ROIS*POOL*POOL, R]  bf16, R = H*(W+2) - (KW-1)
    returns:  [BT, NUM_ROIS*POOL*POOL, C_FEAT]  bf16
    """
    BT, HWp, C = x.shape
    Wp = W + 2
    assert HWp == (H + 2) * Wp
    R = H * Wp - (KW - 1)                 # conv output rows computed per frame
    NP = NUM_ROIS * POOL * POOL
    assert pool_mat.shape == (NP, R)

    def kernel(x_ref, wc_ref, bc_ref, pmat_ref, o_ref):
        # 3x3 conv as 9 shifted (R, C_IN) @ (C_IN, C_FEAT) bf16 matmuls with a
        # single f32 accumulator (im2col only ever exists implicitly, in VMEM).
        acc = jnp.zeros((R, C_FEAT), jnp.float32)
        k = 0
        for dh in range(KH):
            for dw in range(KW):
                off = dh * Wp + dw
                patch = x_ref[0, off:off + R, :].astype(jnp.bfloat16)
                wk = wc_ref[k * C:(k + 1) * C, :]
                acc = acc + jnp.dot(patch, wk,
                                    preferred_element_type=jnp.float32)
                k += 1
        feat = jnp.maximum(acc + bc_ref[...], 0.0).astype(jnp.bfloat16)
        # Quadrant-ROI adaptive 7x7 average pool as one MXU matmul; pool_mat
        # also zero-masks the (KW-1) wrap-around columns of each image row.
        pooled = jnp.dot(pmat_ref[...], feat,
                         preferred_element_type=jnp.float32)
        o_ref[0] = pooled.astype(o_ref.dtype)

    flops = 2 * BT * C_FEAT * (R * KH * KW * C + NP * R)
    bytes_accessed = (x.size * 4 + conv_w.size * 2 + conv_b.size * 4
                      + pool_mat.size * 2 + BT * NP * C_FEAT * 2)

    return pl.pallas_call(
        kernel,
        out_shape=jax.ShapeDtypeStruct((BT, NP, C_FEAT), jnp.bfloat16),
        grid=(BT,),
        in_specs=[
            pl.BlockSpec((1, HWp, C), lambda i: (i, 0, 0)),
            pl.BlockSpec((KH * KW * C, C_FEAT), lambda i: (0, 0)),
            pl.BlockSpec((1, C_FEAT), lambda i: (0, 0)),
            pl.BlockSpec((NP, R), lambda i: (0, 0)),
        ],
        out_specs=pl.BlockSpec((1, NP, C_FEAT), lambda i: (i, 0, 0)),
        compiler_params=pltpu.CompilerParams(
            dimension_semantics=("parallel",),
            vmem_limit_bytes=VMEM_LIMIT),
        cost_estimate=pl.CostEstimate(
            flops=flops, transcendentals=0, bytes_accessed=bytes_accessed),
    )(x, conv_w, conv_b, pool_mat)


# ------------------------- Kernel B: TwoMLPHead ------------------------------
def _box_head_kernel(x_ref, w6_ref, b6_ref, w7_ref, b7_ref, o_ref):
    # h = relu(fc6(x)); feature = fc7(h)  -- the fc7 hook fires on the Linear
    # output, i.e. before TwoMLPHead's functional ReLU.
    h = jnp.dot(x_ref[...], w6_ref[...], preferred_element_type=jnp.float32)
    h = jnp.maximum(h + b6_ref[...], 0.0).astype(jnp.bfloat16)
    o = jnp.dot(h, w7_ref[...], preferred_element_type=jnp.float32)
    o_ref[...] = (o + b7_ref[...]).astype(o_ref.dtype)


def box_head_fc7(x, w6, b6, w7, b7, *, tm=256):
    """x: [M, K] bf16 -> fc7 output [M, REP] f32, M-tiled parallel grid."""
    M, K = x.shape
    Hd = w6.shape[1]
    N = w7.shape[1]
    tm = min(tm, _round_up(M, 8))
    Mp = _round_up(M, tm)
    if Mp != M:
        x = jnp.pad(x, ((0, Mp - M), (0, 0)))

    # TODO(synk): at torchvision sizes (K=256*7*7, REP=1024) additionally tile
    # K/N with a pl.when-initialised f32 VMEM accumulator instead of keeping
    # w6 fully resident.
    flops = 2 * Mp * Hd * (K + N)
    bytes_accessed = (Mp * K * 2 + K * Hd * 2 + Hd * N * 2
                      + (Hd + N) * 4 + Mp * N * 4)

    out = pl.pallas_call(
        _box_head_kernel,
        out_shape=jax.ShapeDtypeStruct((Mp, N), jnp.float32),
        grid=(Mp // tm,),
        in_specs=[
            pl.BlockSpec((tm, K), lambda i: (i, 0)),
            pl.BlockSpec((K, Hd), lambda i: (0, 0)),
            pl.BlockSpec((1, Hd), lambda i: (0, 0)),
            pl.BlockSpec((Hd, N), lambda i: (0, 0)),
            pl.BlockSpec((1, N), lambda i: (0, 0)),
        ],
        out_specs=pl.BlockSpec((tm, N), lambda i: (i, 0)),
        compiler_params=pltpu.CompilerParams(
            dimension_semantics=("parallel",),
            vmem_limit_bytes=VMEM_LIMIT),
        cost_estimate=pl.CostEstimate(
            flops=flops, transcendentals=0, bytes_accessed=bytes_accessed),
    )(x, w6, b6, w7, b7)
    return out[:M] if Mp != M else out


# ------------------------------- glue (JAX) ----------------------------------
def build_pool_matrix(H, W):
    """Constant matrix realizing the quadrant-ROI adaptive 7x7 average pool
    over conv feature rows laid out as r = h*(W+2) + w (padded-row stride)."""
    Wp = W + 2
    R = H * Wp - (KW - 1)
    qh, qw = H // 2, W // 2
    assert H % 2 == 0 and W % 2 == 0 and qh % POOL == 0 and qw % POOL == 0, (
        "quadrant ROI pooling requires H, W even and H/2, W/2 multiples of 7")
    ph, pw = qh // POOL, qw // POOL
    P = np.zeros((NUM_ROIS * POOL * POOL, R), np.float32)
    inv = 1.0 / (ph * pw)
    for a in range(2):                       # ROI order matches (row-half, col-half)
        for b in range(2):
            roi = a * 2 + b
            for pi in range(POOL):
                for pj in range(POOL):
                    row = roi * POOL * POOL + pi * POOL + pj
                    for u in range(ph):
                        for v in range(pw):
                            h = a * qh + pi * ph + u
                            w = b * qw + pj * pw + v
                            P[row, h * Wp + w] = inv
    return jnp.asarray(P, jnp.bfloat16)


def init_params(key):
    k1, k2, k3 = jax.random.split(key, 3)
    return {
        "conv_w": jax.random.normal(k1, (KH * KW * C_IN, C_FEAT), jnp.float32) * 0.1,
        "conv_b": jnp.zeros((1, C_FEAT), jnp.float32),
        # fc6 weight rows in torchvision channels-first (C, 7, 7) flatten order
        "w6": jax.random.normal(k2, (C_FEAT * POOL * POOL, REP), jnp.float32) * 0.02,
        "b6": jnp.zeros((1, REP), jnp.float32),
        "w7": jax.random.normal(k3, (REP, REP), jnp.float32) * 0.02,
        "b7": jnp.zeros((1, REP), jnp.float32),
    }


def prepare_params(params):
    """One-time prep: cast matmul operands to bf16 and permute fc6 rows from
    channels-first (C, 7, 7) to the channels-last (7, 7, C) order produced by
    the fused conv/pool kernel, removing the per-forward activation transpose."""
    w6 = params["w6"].reshape(C_FEAT, POOL, POOL, REP)
    w6 = w6.transpose(1, 2, 0, 3).reshape(POOL * POOL * C_FEAT, REP)
    return {
        "conv_w": params["conv_w"].astype(jnp.bfloat16),
        "conv_b": params["conv_b"],
        "w6": w6.astype(jnp.bfloat16),
        "b6": params["b6"],
        "w7": params["w7"].astype(jnp.bfloat16),
        "b7": params["b7"],
    }


def encoder_forward(frames, params, pool_mat):
    """frames: [B, T, C, H, W] f32 -> [B, T, NUM_ROIS, REP] f32."""
    B, T, C, H, W = frames.shape
    BT = B * T

    # NCHW -> NHWC, zero-pad for "same" 3x3 conv, flatten spatial.
    x = frames.reshape(BT, C, H, W).transpose(0, 2, 3, 1)
    x = jnp.pad(x, ((0, 0), (1, 1), (1, 1), (0, 0)))
    x = x.reshape(BT, (H + 2) * (W + 2), C)

    # Fused backbone conv + ReLU + quadrant ROI pool; the full-resolution
    # feature map never touches HBM.
    pooled = conv_roi_pool(x, params["conv_w"], params["conv_b"], pool_mat,
                           H=H, W=W)                 # [BT, 4*49, C_FEAT] bf16

    # Contiguous reshape only (no transpose): (7, 7, C) channel-last flatten,
    # matched by the row-permuted w6.
    rois = pooled.reshape(BT * NUM_ROIS, POOL * POOL * C_FEAT)

    fc7 = box_head_fc7(rois, params["w6"], params["b6"],
                       params["w7"], params["b7"])   # [BT*NUM_ROIS, REP] f32
    return fc7.reshape(B, T, NUM_ROIS, REP)


# --------------------------------- main --------------------------------------
if __name__ == "__main__":
    key = jax.random.PRNGKey(0)
    kf, kp = jax.random.split(key)

    B, T, H, W = 2, 3, 28, 28
    frames = jax.random.normal(kf, (B, T, C_IN, H, W), jnp.float32)

    params = prepare_params(init_params(kp))
    pool_mat = build_pool_matrix(H, W)

    fwd = jax.jit(encoder_forward)
    out = jax.block_until_ready(fwd(frames, params, pool_mat))

    assert out.shape == (B, T, NUM_ROIS, REP), out.shape
    assert out.dtype == jnp.float32
    assert bool(jnp.all(jnp.isfinite(out)))
    print("KERNEL_OK")
</pallas_src>

<mosaic_0001>
module attributes {stable_mosaic.version = 11 : i64} {
  func.func @kernel(%arg0: i32, %arg1: memref<1x900x3xf32, #tpu.memory_space<vmem>>, %arg2: memref<27x16xbf16, #tpu.memory_space<vmem>>, %arg3: memref<1x16xf32, #tpu.memory_space<vmem>>, %arg4: memref<196x838xbf16, #tpu.memory_space<vmem>>, %arg5: memref<1x196x16xbf16, #tpu.memory_space<vmem>>) attributes {dimension_semantics = [#tpu.dimension_semantics<parallel>], iteration_bounds = array<i64: 6>, scalar_prefetch = 0 : i64, scratch_operands = 0 : i64, tpu.core_type = #tpu.core_type<tc>, window_params = [{transform_indices = @transform_0, window_bounds = array<i64: 1, 900, 3>}, {pipeline_mode = #tpu.pipeline_mode<synchronous>, transform_indices = @transform_1, window_bounds = array<i64: 27, 16>}, {pipeline_mode = #tpu.pipeline_mode<synchronous>, transform_indices = @transform_2, window_bounds = array<i64: 1, 16>}, {pipeline_mode = #tpu.pipeline_mode<synchronous>, transform_indices = @transform_3, window_bounds = array<i64: 196, 838>}, {transform_indices = @transform_4, window_bounds = array<i64: 1, 196, 16>}]} {
    %cst = arith.constant 0.000000e+00 : f32
    %0 = vector.broadcast %cst : f32 to vector<838x16xf32>
    %c0 = arith.constant 0 : index
    %c0_0 = arith.constant 0 : index
    %c0_1 = arith.constant 0 : index
    %1 = vector.load %arg1[%c0, %c0_0, %c0_1] : memref<1x900x3xf32, #tpu.memory_space<vmem>>, vector<1x838x3xf32>
    %2 = vector.shape_cast %1 : vector<1x838x3xf32> to vector<838x3xf32>
    %3 = arith.truncf %2 : vector<838x3xf32> to vector<838x3xbf16>
    %c0_2 = arith.constant 0 : index
    %c0_3 = arith.constant 0 : index
    %4 = vector.load %arg2[%c0_2, %c0_3] : memref<27x16xbf16, #tpu.memory_space<vmem>>, vector<3x16xbf16>
    %cst_4 = arith.constant dense<0.000000e+00> : vector<838x16xf32>
    %5 = tpu.matmul %3, %4, %cst_4 {dimension_numbers = #tpu.dot_dimension_numbers<[1], [0], [0], [1], [0, 0, 1, 1], [], []>} : vector<838x3xbf16>, vector<3x16xbf16>, vector<838x16xf32> -> vector<838x16xf32>
    %6 = arith.addf %0, %5 : vector<838x16xf32>
    %c0_5 = arith.constant 0 : index
    %c1 = arith.constant 1 : index
    %c0_6 = arith.constant 0 : index
    %7 = vector.load %arg1[%c0_5, %c1, %c0_6] : memref<1x900x3xf32, #tpu.memory_space<vmem>>, vector<1x838x3xf32>
    %8 = vector.shape_cast %7 : vector<1x838x3xf32> to vector<838x3xf32>
    %9 = arith.truncf %8 : vector<838x3xf32> to vector<838x3xbf16>
    %c3 = arith.constant 3 : index
    %c0_7 = arith.constant 0 : index
    %10 = vector.load %arg2[%c3, %c0_7] : memref<27x16xbf16, #tpu.memory_space<vmem>>, vector<3x16xbf16>
    %cst_8 = arith.constant dense<0.000000e+00> : vector<838x16xf32>
    %11 = tpu.matmul %9, %10, %cst_8 {dimension_numbers = #tpu.dot_dimension_numbers<[1], [0], [0], [1], [0, 0, 1, 1], [], []>} : vector<838x3xbf16>, vector<3x16xbf16>, vector<838x16xf32> -> vector<838x16xf32>
    %12 = arith.addf %6, %11 : vector<838x16xf32>
    %c0_9 = arith.constant 0 : index
    %c2 = arith.constant 2 : index
    %c0_10 = arith.constant 0 : index
    %13 = vector.load %arg1[%c0_9, %c2, %c0_10] : memref<1x900x3xf32, #tpu.memory_space<vmem>>, vector<1x838x3xf32>
    %14 = vector.shape_cast %13 : vector<1x838x3xf32> to vector<838x3xf32>
    %15 = arith.truncf %14 : vector<838x3xf32> to vector<838x3xbf16>
    %c6 = arith.constant 6 : index
    %c0_11 = arith.constant 0 : index
    %16 = vector.load %arg2[%c6, %c0_11] : memref<27x16xbf16, #tpu.memory_space<vmem>>, vector<3x16xbf16>
    %cst_12 = arith.constant dense<0.000000e+00> : vector<838x16xf32>
    %17 = tpu.matmul %15, %16, %cst_12 {dimension_numbers = #tpu.dot_dimension_numbers<[1], [0], [0], [1], [0, 0, 1, 1], [], []>} : vector<838x3xbf16>, vector<3x16xbf16>, vector<838x16xf32> -> vector<838x16xf32>
    %18 = arith.addf %12, %17 : vector<838x16xf32>
    %c0_13 = arith.constant 0 : index
    %c30 = arith.constant 30 : index
    %c0_14 = arith.constant 0 : index
    %19 = vector.load %arg1[%c0_13, %c30, %c0_14] : memref<1x900x3xf32, #tpu.memory_space<vmem>>, vector<1x838x3xf32>
    %20 = vector.shape_cast %19 : vector<1x838x3xf32> to vector<838x3xf32>
    %21 = arith.truncf %20 : vector<838x3xf32> to vector<838x3xbf16>
    %c9 = arith.constant 9 : index
    %c0_15 = arith.constant 0 : index
    %22 = vector.load %arg2[%c9, %c0_15] : memref<27x16xbf16, #tpu.memory_space<vmem>>, vector<3x16xbf16>
    %cst_16 = arith.constant dense<0.000000e+00> : vector<838x16xf32>
    %23 = tpu.matmul %21, %22, %cst_16 {dimension_numbers = #tpu.dot_dimension_numbers<[1], [0], [0], [1], [0, 0, 1, 1], [], []>} : vector<838x3xbf16>, vector<3x16xbf16>, vector<838x16xf32> -> vector<838x16xf32>
    %24 = arith.addf %18, %23 : vector<838x16xf32>
    %c0_17 = arith.constant 0 : index
    %c31 = arith.constant 31 : index
    %c0_18 = arith.constant 0 : index
    %25 = vector.load %arg1[%c0_17, %c31, %c0_18] : memref<1x900x3xf32, #tpu.memory_space<vmem>>, vector<1x838x3xf32>
    %26 = vector.shape_cast %25 : vector<1x838x3xf32> to vector<838x3xf32>
    %27 = arith.truncf %26 : vector<838x3xf32> to vector<838x3xbf16>
    %c12 = arith.constant 12 : index
    %c0_19 = arith.constant 0 : index
    %28 = vector.load %arg2[%c12, %c0_19] : memref<27x16xbf16, #tpu.memory_space<vmem>>, vector<3x16xbf16>
    %cst_20 = arith.constant dense<0.000000e+00> : vector<838x16xf32>
    %29 = tpu.matmul %27, %28, %cst_20 {dimension_numbers = #tpu.dot_dimension_numbers<[1], [0], [0], [1], [0, 0, 1, 1], [], []>} : vector<838x3xbf16>, vector<3x16xbf16>, vector<838x16xf32> -> vector<838x16xf32>
    %30 = arith.addf %24, %29 : vector<838x16xf32>
    %c0_21 = arith.constant 0 : index
    %c32 = arith.constant 32 : index
    %c0_22 = arith.constant 0 : index
    %31 = vector.load %arg1[%c0_21, %c32, %c0_22] : memref<1x900x3xf32, #tpu.memory_space<vmem>>, vector<1x838x3xf32>
    %32 = vector.shape_cast %31 : vector<1x838x3xf32> to vector<838x3xf32>
    %33 = arith.truncf %32 : vector<838x3xf32> to vector<838x3xbf16>
    %c15 = arith.constant 15 : index
    %c0_23 = arith.constant 0 : index
    %34 = vector.load %arg2[%c15, %c0_23] : memref<27x16xbf16, #tpu.memory_space<vmem>>, vector<3x16xbf16>
    %cst_24 = arith.constant dense<0.000000e+00> : vector<838x16xf32>
    %35 = tpu.matmul %33, %34, %cst_24 {dimension_numbers = #tpu.dot_dimension_numbers<[1], [0], [0], [1], [0, 0, 1, 1], [], []>} : vector<838x3xbf16>, vector<3x16xbf16>, vector<838x16xf32> -> vector<838x16xf32>
    %36 = arith.addf %30, %35 : vector<838x16xf32>
    %c0_25 = arith.constant 0 : index
    %c60 = arith.constant 60 : index
    %c0_26 = arith.constant 0 : index
    %37 = vector.load %arg1[%c0_25, %c60, %c0_26] : memref<1x900x3xf32, #tpu.memory_space<vmem>>, vector<1x838x3xf32>
    %38 = vector.shape_cast %37 : vector<1x838x3xf32> to vector<838x3xf32>
    %39 = arith.truncf %38 : vector<838x3xf32> to vector<838x3xbf16>
    %c18 = arith.constant 18 : index
    %c0_27 = arith.constant 0 : index
    %40 = vector.load %arg2[%c18, %c0_27] : memref<27x16xbf16, #tpu.memory_space<vmem>>, vector<3x16xbf16>
    %cst_28 = arith.constant dense<0.000000e+00> : vector<838x16xf32>
    %41 = tpu.matmul %39, %40, %cst_28 {dimension_numbers = #tpu.dot_dimension_numbers<[1], [0], [0], [1], [0, 0, 1, 1], [], []>} : vector<838x3xbf16>, vector<3x16xbf16>, vector<838x16xf32> -> vector<838x16xf32>
    %42 = arith.addf %36, %41 : vector<838x16xf32>
    %c0_29 = arith.constant 0 : index
    %c61 = arith.constant 61 : index
    %c0_30 = arith.constant 0 : index
    %43 = vector.load %arg1[%c0_29, %c61, %c0_30] : memref<1x900x3xf32, #tpu.memory_space<vmem>>, vector<1x838x3xf32>
    %44 = vector.shape_cast %43 : vector<1x838x3xf32> to vector<838x3xf32>
    %45 = arith.truncf %44 : vector<838x3xf32> to vector<838x3xbf16>
    %c21 = arith.constant 21 : index
    %c0_31 = arith.constant 0 : index
    %46 = vector.load %arg2[%c21, %c0_31] : memref<27x16xbf16, #tpu.memory_space<vmem>>, vector<3x16xbf16>
    %cst_32 = arith.constant dense<0.000000e+00> : vector<838x16xf32>
    %47 = tpu.matmul %45, %46, %cst_32 {dimension_numbers = #tpu.dot_dimension_numbers<[1], [0], [0], [1], [0, 0, 1, 1], [], []>} : vector<838x3xbf16>, vector<3x16xbf16>, vector<838x16xf32> -> vector<838x16xf32>
    %48 = arith.addf %42, %47 : vector<838x16xf32>
    %c0_33 = arith.constant 0 : index
    %c62 = arith.constant 62 : index
    %c0_34 = arith.constant 0 : index
    %49 = vector.load %arg1[%c0_33, %c62, %c0_34] : memref<1x900x3xf32, #tpu.memory_space<vmem>>, vector<1x838x3xf32>
    %50 = vector.shape_cast %49 : vector<1x838x3xf32> to vector<838x3xf32>
    %51 = arith.truncf %50 : vector<838x3xf32> to vector<838x3xbf16>
    %c24 = arith.constant 24 : index
    %c0_35 = arith.constant 0 : index
    %52 = vector.load %arg2[%c24, %c0_35] : memref<27x16xbf16, #tpu.memory_space<vmem>>, vector<3x16xbf16>
    %cst_36 = arith.constant dense<0.000000e+00> : vector<838x16xf32>
    %53 = tpu.matmul %51, %52, %cst_36 {dimension_numbers = #tpu.dot_dimension_numbers<[1], [0], [0], [1], [0, 0, 1, 1], [], []>} : vector<838x3xbf16>, vector<3x16xbf16>, vector<838x16xf32> -> vector<838x16xf32>
    %54 = arith.addf %48, %53 : vector<838x16xf32>
    %c0_37 = arith.constant 0 : index
    %c0_38 = arith.constant 0 : index
    %55 = vector.load %arg3[%c0_37, %c0_38] : memref<1x16xf32, #tpu.memory_space<vmem>>, vector<1x16xf32>
    %56 = vector.broadcast %55 : vector<1x16xf32> to vector<838x16xf32>
    %57 = arith.addf %54, %56 : vector<838x16xf32>
    %cst_39 = arith.constant 0.000000e+00 : f32
    %58 = vector.broadcast %cst_39 : f32 to vector<838x16xf32>
    %59 = arith.maximumf %57, %58 : vector<838x16xf32>
    %60 = arith.truncf %59 : vector<838x16xf32> to vector<838x16xbf16>
    %c0_40 = arith.constant 0 : index
    %c0_41 = arith.constant 0 : index
    %61 = vector.load %arg4[%c0_40, %c0_41] : memref<196x838xbf16, #tpu.memory_space<vmem>>, vector<196x838xbf16>
    %cst_42 = arith.constant dense<0.000000e+00> : vector<196x16xf32>
    %62 = tpu.matmul %61, %60, %cst_42 {dimension_numbers = #tpu.dot_dimension_numbers<[1], [0], [0], [1], [0, 0, 1, 1], [], []>} : vector<196x838xbf16>, vector<838x16xbf16>, vector<196x16xf32> -> vector<196x16xf32>
    %63 = arith.truncf %62 : vector<196x16xf32> to vector<196x16xbf16>
    %c0_43 = arith.constant 0 : index
    %c0_44 = arith.constant 0 : index
    %c0_45 = arith.constant 0 : index
    %64 = vector.load %arg5[%c0_43, %c0_44, %c0_45] : memref<1x196x16xbf16, #tpu.memory_space<vmem>>, vector<1x196x16xbf16>
    %65 = vector.shape_cast %64 : vector<1x196x16xbf16> to vector<196x16xbf16>
    %66 = vector.shape_cast %63 : vector<196x16xbf16> to vector<1x196x16xbf16>
    tpu.vector_store %arg5[%c0_43, %c0_44, %c0_45], %66 {strides = array<i32>} : memref<1x196x16xbf16, #tpu.memory_space<vmem>>, vector<1x196x16xbf16>,
    return
  }
  func.func @transform_0(%arg0: i32) -> (i32, i32, i32) {
    %c0_i32 = arith.constant 0 : i32
    %c0_i32_0 = arith.constant 0 : i32
    %c0_i32_1 = arith.constant 0 : i32
    return %arg0, %c0_i32, %c0_i32_0 : i32, i32, i32
  }
  func.func @transform_1(%arg0: i32) -> (i32, i32) {
    %c0_i32 = arith.constant 0 : i32
    %c0_i32_0 = arith.constant 0 : i32
    %c0_i32_1 = arith.constant 0 : i32
    return %c0_i32, %c0_i32_0 : i32, i32
  }
  func.func @transform_2(%arg0: i32) -> (i32, i32) {
    %c0_i32 = arith.constant 0 : i32
    %c0_i32_0 = arith.constant 0 : i32
    %c0_i32_1 = arith.constant 0 : i32
    return %c0_i32, %c0_i32_0 : i32, i32
  }
  func.func @transform_3(%arg0: i32) -> (i32, i32) {
    %c0_i32 = arith.constant 0 : i32
    %c0_i32_0 = arith.constant 0 : i32
    %c0_i32_1 = arith.constant 0 : i32
    return %c0_i32, %c0_i32_0 : i32, i32
  }
  func.func @transform_4(%arg0: i32) -> (i32, i32, i32) {
    %c0_i32 = arith.constant 0 : i32
    %c0_i32_0 = arith.constant 0 : i32
    %c0_i32_1 = arith.constant 0 : i32
    return %arg0, %c0_i32, %c0_i32_0 : i32, i32, i32
  }
}

module attributes {stable_mosaic.version = 11 : i64} {
  func.func @_box_head_kernel(%arg0: i32, %arg1: memref<24x784xbf16, #tpu.memory_space<vmem>>, %arg2: memref<784x128xbf16, #tpu.memory_space<vmem>>, %arg3: memref<1x128xf32, #tpu.memory_space<vmem>>, %arg4: memref<128x128xbf16, #tpu.memory_space<vmem>>, %arg5: memref<1x128xf32, #tpu.memory_space<vmem>>, %arg6: memref<24x128xf32, #tpu.memory_space<vmem>>) attributes {dimension_semantics = [#tpu.dimension_semantics<parallel>], iteration_bounds = array<i64: 1>, scalar_prefetch = 0 : i64, scratch_operands = 0 : i64, tpu.core_type = #tpu.core_type<tc>, window_params = [{transform_indices = @transform_0, window_bounds = array<i64: 24, 784>}, {pipeline_mode = #tpu.pipeline_mode<synchronous>, transform_indices = @transform_1, window_bounds = array<i64: 784, 128>}, {pipeline_mode = #tpu.pipeline_mode<synchronous>, transform_indices = @transform_2, window_bounds = array<i64: 1, 128>}, {pipeline_mode = #tpu.pipeline_mode<synchronous>, transform_indices = @transform_3, window_bounds = array<i64: 128, 128>}, {pipeline_mode = #tpu.pipeline_mode<synchronous>, transform_indices = @transform_4, window_bounds = array<i64: 1, 128>}, {transform_indices = @transform_5, window_bounds = array<i64: 24, 128>}]} {
    %c0 = arith.constant 0 : index
    %c0_0 = arith.constant 0 : index
    %0 = vector.load %arg1[%c0, %c0_0] : memref<24x784xbf16, #tpu.memory_space<vmem>>, vector<24x784xbf16>
    %c0_1 = arith.constant 0 : index
    %c0_2 = arith.constant 0 : index
    %1 = vector.load %arg2[%c0_1, %c0_2] : memref<784x128xbf16, #tpu.memory_space<vmem>>, vector<784x128xbf16>
    %cst = arith.constant dense<0.000000e+00> : vector<24x128xf32>
    %2 = tpu.matmul %0, %1, %cst {dimension_numbers = #tpu.dot_dimension_numbers<[1], [0], [0], [1], [0, 0, 1, 1], [], []>} : vector<24x784xbf16>, vector<784x128xbf16>, vector<24x128xf32> -> vector<24x128xf32>
    %c0_3 = arith.constant 0 : index
    %c0_4 = arith.constant 0 : index
    %3 = vector.load %arg3[%c0_3, %c0_4] : memref<1x128xf32, #tpu.memory_space<vmem>>, vector<1x128xf32>
    %4 = vector.broadcast %3 : vector<1x128xf32> to vector<24x128xf32>
    %5 = arith.addf %2, %4 : vector<24x128xf32>
    %cst_5 = arith.constant 0.000000e+00 : f32
    %6 = vector.broadcast %cst_5 : f32 to vector<24x128xf32>
    %7 = arith.maximumf %5, %6 : vector<24x128xf32>
    %8 = arith.truncf %7 : vector<24x128xf32> to vector<24x128xbf16>
    %c0_6 = arith.constant 0 : index
    %c0_7 = arith.constant 0 : index
    %9 = vector.load %arg4[%c0_6, %c0_7] : memref<128x128xbf16, #tpu.memory_space<vmem>>, vector<128x128xbf16>
    %cst_8 = arith.constant dense<0.000000e+00> : vector<24x128xf32>
    %10 = tpu.matmul %8, %9, %cst_8 {dimension_numbers = #tpu.dot_dimension_numbers<[1], [0], [0], [1], [0, 0, 1, 1], [], []>} : vector<24x128xbf16>, vector<128x128xbf16>, vector<24x128xf32> -> vector<24x128xf32>
    %c0_9 = arith.constant 0 : index
    %c0_10 = arith.constant 0 : index
    %11 = vector.load %arg5[%c0_9, %c0_10] : memref<1x128xf32, #tpu.memory_space<vmem>>, vector<1x128xf32>
    %12 = vector.broadcast %11 : vector<1x128xf32> to vector<24x128xf32>
    %13 = arith.addf %10, %12 : vector<24x128xf32>
    %c0_11 = arith.constant 0 : index
    %c0_12 = arith.constant 0 : index
    %14 = vector.load %arg6[%c0_11, %c0_12] : memref<24x128xf32, #tpu.memory_space<vmem>>, vector<24x128xf32>
    tpu.vector_store %arg6[%c0_11, %c0_12], %13 {strides = array<i32>} : memref<24x128xf32, #tpu.memory_space<vmem>>, vector<24x128xf32>,
    return
  }
  func.func @transform_0(%arg0: i32) -> (i32, i32) {
    %c0_i32 = arith.constant 0 : i32
    %c0_i32_0 = arith.constant 0 : i32
    return %arg0, %c0_i32 : i32, i32
  }
  func.func @transform_1(%arg0: i32) -> (i32, i32) {
    %c0_i32 = arith.constant 0 : i32
    %c0_i32_0 = arith.constant 0 : i32
    %c0_i32_1 = arith.constant 0 : i32
    return %c0_i32, %c0_i32_0 : i32, i32
  }
  func.func @transform_2(%arg0: i32) -> (i32, i32) {
    %c0_i32 = arith.constant 0 : i32
    %c0_i32_0 = arith.constant 0 : i32
    %c0_i32_1 = arith.constant 0 : i32
    return %c0_i32, %c0_i32_0 : i32, i32
  }
  func.func @transform_3(%arg0: i32) -> (i32, i32) {
    %c0_i32 = arith.constant 0 : i32
    %c0_i32_0 = arith.constant 0 : i32
    %c0_i32_1 = arith.constant 0 : i32
    return %c0_i32, %c0_i32_0 : i32, i32
  }
  func.func @transform_4(%arg0: i32) -> (i32, i32) {
    %c0_i32 = arith.constant 0 : i32
    %c0_i32_0 = arith.constant 0 : i32
    %c0_i32_1 = arith.constant 0 : i32
    return %c0_i32, %c0_i32_0 : i32, i32
  }
  func.func @transform_5(%arg0: i32) -> (i32, i32) {
    %c0_i32 = arith.constant 0 : i32
    %c0_i32_0 = arith.constant 0 : i32
    return %arg0, %c0_i32 : i32, i32
  }
}

</mosaic_0001>

<bundles_post_ra>
// kernel: encoder_forward.3
= control target key start
LH: loop header
LB: loop body
LE: loop exit
PB: predicated region body
PF: predicated region fallthrough
CT: control target
= control target key end

     0   :  { %vm492_vm0 = vcmask 130048   ;;  %s1388_s0 = inlined_call_operand.vmem [shape: bf16[24,784], index: 0, kind: input, shape index: {}]   ;;  %s1389_s1 = inlined_call_operand.vmem [shape: bf16[784,128], index: 1, kind: input, shape index: {}]   ;;  %s1390_s2 = inlined_call_operand.vmem [shape: f32[1,128], index: 2, kind: input, shape index: {}]   ;;  %s1391_s3 = inlined_call_operand.vmem [shape: bf16[128,128], index: 3, kind: input, shape index: {}]   ;;  %s1392_s4 = inlined_call_operand.vmem [shape: f32[1,128], index: 4, kind: input, shape index: {}]   ;;  %s1393_s5 = inlined_call_operand.hbm [shape: f32[24,128], index: 5, kind: output, shape index: {}]  }
   0x1   :  { %v1035_v0 = vld [vmem:[%s1389_s1 + $0x40] sm:$0xff]   ;;  %v1039_v4 = vld [vmem:[%s1389_s1 + $0x48] sm:$0xff]   ;;  %v1043_v8 = vld [vmem:[%s1389_s1 + $0x50] sm:$0xff]  }
   0x2   :  { %v1036_v1 = vld [vmem:[%s1389_s1] sm:$0xff]   ;;  %909 = vmatprep.subr.bf16.mxu0 %v1035_v0  ;;  %v1040_v5 = vld [vmem:[%s1389_s1 + $0x8] sm:$0xff]   ;;  %v1044_v9 = vld [vmem:[%s1389_s1 + $0x10] sm:$0xff]  }
   0x3   :  { %v1037_v2 = vld [vmem:[%s1389_s1 + $0xc0] sm:$0xff]   ;;  %910 = vmatpush3.bf16.msra.mxu0 %v1036_v1  ;;  %v1041_v6 = vld [vmem:[%s1389_s1 + $0xc8] sm:$0xff]   ;;  %v1045_v10 = vld [vmem:[%s1389_s1 + $0xd0] sm:$0xff]  }
   0x4   :  { %v1038_v3 = vld [vmem:[%s1389_s1 + $0x80] sm:$0xff]   ;;  %937 = vmatprep.subr.bf16.mxu1 %v1037_v2  ;;  %911 = vmatprep.subr.bf16.mxu0 %v1039_v4  ;;  %v1042_v7 = vld [vmem:[%s1389_s1 + $0x88] sm:$0xff]   ;;  %v1046_v11 = vld [vmem:[%s1389_s1 + $0x90] sm:$0xff]  }
   0x5   :  { %938 = vmatpush3.bf16.msra.mxu1 %v1038_v3  ;;  %v1047_v12 = vld [vmem:[%s1389_s1 + $0x58] sm:$0xff]   ;;  %v1051_v16 = vld [vmem:[%s1389_s1 + $0x60] sm:$0xff]   ;;  %v1055_v20 = vld [vmem:[%s1389_s1 + $0x68] sm:$0xff]  }
   0x6   :  { %939 = vmatprep.subr.bf16.mxu1 %v1041_v6  ;;  %v1048_v13 = vld [vmem:[%s1389_s1 + $0x18] sm:$0xff]   ;;  %v1052_v17 = vld [vmem:[%s1389_s1 + $0x20] sm:$0xff]   ;;  %v1056_v21 = vld [vmem:[%s1389_s1 + $0x28] sm:$0xff]  }
   0x7   :  { %912 = vmatpush3.bf16.msra.mxu0 %v1040_v5  ;;  %v1049_v14 = vld [vmem:[%s1389_s1 + $0xd8] sm:$0xff]   ;;  %v1053_v18 = vld [vmem:[%s1389_s1 + $0xe0] sm:$0xff]   ;;  %v1057_v22 = vld [vmem:[%s1389_s1 + $0xe8] sm:$0xff]  }
   0x8   :  { %913 = vmatprep.subr.bf16.mxu0 %v1043_v8  ;;  %v1050_v15 = vld [vmem:[%s1389_s1 + $0x98] sm:$0xff]   ;;  %v1054_v19 = vld [vmem:[%s1389_s1 + $0xa0] sm:$0xff]   ;;  %v1058_v23 = vld [vmem:[%s1389_s1 + $0xa8] sm:$0xff]  }
   0x9   :  { %940 = vmatpush3.bf16.msra.mxu1 %v1042_v7  ;;  %v1059_v24 = vld [vmem:[%s1389_s1 + $0x70] sm:$0xff]   ;;  %v1063_v28 = vld [vmem:[%s1389_s1 + $0x78] sm:$0xff]   ;;  %v1068_v32 = vld [vmem:[%s1388_s0 + $0x4] ss:$28 sps:$4 sm:$0xff]  }
   0xa   :  { %941 = vmatprep.subr.bf16.mxu1 %v1045_v10  ;;  %v1060_v25 = vld [vmem:[%s1389_s1 + $0x30] sm:$0xff]   ;;  %v1064_v29 = vld [vmem:[%s1389_s1 + $0x38] sm:$0xff]   ;;  %531 = vmatprep.mubr.bf16.mxu0 %v1068_v32  ;;  %v1070_v34 = vld [vmem:[%s1389_s1 + $0x140] sm:$0xff]  }
   0xb   :  { %914 = vmatpush3.bf16.msra.mxu0 %v1044_v9  ;;  %v1061_v26 = vld [vmem:[%s1389_s1 + $0xf0] sm:$0xff]   ;;  %v1065_v30 = vld [vmem:[%s1389_s1 + $0xf8] sm:$0xff]   ;;  %v1071_v35 = vld [vmem:[%s1388_s0 + $0x8] ss:$28 sps:$4 sm:$0xff]  }
   0xc   :  { %915 = vmatprep.subr.bf16.mxu0 %v1047_v12  ;;  %v1062_v27 = vld [vmem:[%s1389_s1 + $0xb0] sm:$0xff]   ;;  %v1066_v31 = vld [vmem:[%s1388_s0] ss:$28 sps:$4 sm:$0xff]   ;;  %v1073_v36 = vld [vmem:[%s1388_s0 + $0xc] ss:$28 sps:$4 sm:$0xff]  }
   0xd   :  { %942 = vmatpush3.bf16.msra.mxu1 %v1046_v11  ;;  %v1069_v33 = vld [vmem:[%s1389_s1 + $0xb8] sm:$0xff]   ;;  %v1074_v37 = vld [vmem:[%s1389_s1 + $0x100] sm:$0xff]   ;;  %579 = vmatprep.mubr.bf16.mxu1 %v1073_v36  ;;  %v1075_v38 = vld [vmem:[%s1389_s1 + $0x148] sm:$0xff]  }
   0xe   :  { %943 = vmatprep.subr.bf16.mxu1 %v1049_v14  ;;  %v1076_v39 = vld [vmem:[%s1389_s1 + $0x108] sm:$0xff]   ;;  %v1077_v40 = vld [vmem:[%s1389_s1 + $0x150] sm:$0xff]   ;;  %v1079_v42 = vld [vmem:[%s1389_s1 + $0x158] sm:$0xff]  }
   0xf   :  { %916 = vmatpush3.bf16.msra.mxu0 %v1048_v13  ;;  %v1078_v41 = vld [vmem:[%s1389_s1 + $0x110] sm:$0xff]   ;;  %v30_v43 = vld [vmem:[%s1388_s0 + $0x38] sm:$0xff]  ;;  %v1081_v47 = vld [vmem:[%s1389_s1 + $0x160] sm:$0xff]  }
  0x10   :  { %917 = vmatprep.subr.bf16.mxu0 %v1051_v16  ;;  %v1080_v44 = vld [vmem:[%s1389_s1 + $0x118] sm:$0xff]   ;;  %v843_v45 = vcombine.high %v30_v43, %v30_v43  ;;  %v842_v46 = vcombine.low %v30_v43, %v30_v43  ;;  %v31_v48 = vld [vmem:[%s1388_s0 + $0x40] sm:$0xff]  ;;  %v1084_v53 = vld [vmem:[%s1389_s1 + $0x168] sm:$0xff]  }
  0x11   :  { %944 = vmatpush3.bf16.msra.mxu1 %v1050_v15  ;;  %v845_v49 = vcombine.high %v31_v48, %v31_v48  ;;  %v844_v50 = vcombine.low %v31_v48, %v31_v48  ;;  %v1089_v51 = vld [vmem:[%s1389_s1 + $0x180] sm:$0xff]   ;;  %v1086_v54 = vld [vmem:[%s1389_s1 + $0x128] sm:$0xff]   ;;  %v1096_v55 = vld [vmem:[%s1388_s0 + $0x14] ss:$28 sps:$4 sm:$0xff]  }
  0x12   :  { %945 = vmatprep.subr.bf16.mxu1 %v1053_v18  ;;  %v1082_v52 = vld [vmem:[%s1389_s1 + $0x120] sm:$0xff]   ;;  %v1097_v56 = vld [vmem:[%s1388_s0 + $0x18] ss:$28 sps:$4 sm:$0xff]   ;;  %v1098_v58 = vld [vmem:[%s1388_s0 + $0x50] ss:$0 sps:$4 sm:$0xff]  }
  0x13   :  { %918 = vmatpush3.bf16.msra.mxu0 %v1052_v17  ;;  %v1088_v57 = vld [vmem:[%s1389_s1 + $0x170] sm:$0xff]   ;;  %v1092_v60 = vld [vmem:[%s1389_s1 + $0x178] sm:$0xff]  }
  0x14   :  { %919 = vmatprep.subr.bf16.mxu0 %v1055_v20  ;;  %v1091_v59 = vld [vmem:[%s1389_s1 + $0x130] sm:$0xff]  }
  0x15   :  { %946 = vmatpush3.bf16.msra.mxu1 %v1054_v19 }
  0x16   :  { %947 = vmatprep.subr.bf16.mxu1 %v1057_v22 }
  0x17   :  { %920 = vmatpush3.bf16.msra.mxu0 %v1056_v21 }
  0x18   :  { %921 = vmatprep.subr.bf16.mxu0 %v1059_v24 }
  0x19   :  { %948 = vmatpush3.bf16.msra.mxu1 %v1058_v23 }
  0x1a   :  { %949 = vmatprep.subr.bf16.mxu1 %v1061_v26 }
  0x1b   :  { %922 = vmatpush3.bf16.msra.mxu0 %v1060_v25 }
  0x1c   :  { %923 = vmatprep.subr.bf16.mxu0 %v1063_v28 }
  0x1d   :  { %950 = vmatpush3.bf16.msra.mxu1 %v1062_v27 }
  0x1e   :  { %951 = vmatprep.subr.bf16.mxu1 %v1065_v30 }
  0x1f   :  { %924 = vmatpush3.bf16.msra.mxu0 %v1064_v29 }
  0x20   :  { %965 = vmatprep.subr.bf16.mxu0 %v1070_v34 }
  0x21   :  { %952 = vmatpush3.bf16.msra.mxu1 %v1069_v33 }
  0x22   :  { %532 = vmatmul.mubr.bf16.vlgmr.msra.gmra.mrb[0].mxu0 %v1066_v31  ;;  %1006 = vmatprep.subr.bf16.mxu1 %v1089_v51 }
  0x23   :  { %966 = vmatpush3.bf16.msra.mxu0 %v1074_v37  ;;  %539 = vmatprep.mubr.bf16.mxu0 %v843_v45 }
  0x24   :  { %580 = vmatmul.mubr.bf16.vlgmr.msra.gmra.mrb[0].mxu1 %v1071_v35  ;;  %967 = vmatprep.subr.bf16.mxu0 %v1075_v38 }
  0x25   :  { %587 = vmatprep.mubr.bf16.mxu1 %v845_v49  ;;  %1007 = vmatpush3.bf16.msra.mxu1 %v1089_v51 }
  0x27   :  { %968 = vmatpush3.bf16.msra.mxu0 %v1076_v39 }
  0x28   :  { %969 = vmatprep.subr.bf16.mxu0 %v1077_v40 }
  0x2a   :  { %540 = vmatmul.mubr.bf16.gmra.mrb[4].mxu0 %v842_v46 }
  0x2b   :  { %970 = vmatpush3.bf16.msra.mxu0 %v1078_v41  ;;  %627 = vmatprep.mubr.bf16.mxu0 %v1096_v55 }
  0x2c   :  { %971 = vmatprep.subr.bf16.mxu0 %v1079_v42  ;;  %588 = vmatmul.mubr.bf16.gmra.mrb[4].mxu1 %v844_v50 }
  0x2d   :  { %1008 = vmatprep.mubr.msk.bf16.mxu1 %vm492_vm0, %v1097_v56 }
  0x2f   :  { %972 = vmatpush3.bf16.msra.mxu0 %v1080_v44 }
  0x30   :  { %973 = vmatprep.subr.bf16.mxu0 %v1081_v47 }
  0x33   :  { %974 = vmatpush3.bf16.msra.mxu0 %v1082_v52 }
  0x34   :  { %975 = vmatprep.subr.bf16.mxu0 %v1084_v53  ;;  %1009 = vmatmul.mubr.msk.bf16.vlgmr.msra.gmra.mrb[8].mxu1 %vm492_vm0, %v1098_v58 }
  0x37   :  { %976 = vmatpush3.bf16.msra.mxu0 %v1086_v54 }
  0x38   :  { %977 = vmatprep.subr.bf16.mxu0 %v1088_v57 }
  0x39   :  { %10 = vsyncpa [#allocation3], 0  ;;  %v1093_v61 = vld [vmem:[%s1389_s1 + $0x138] sm:$0xff]   ;;  %v32_v62 = vld [vmem:[%s1388_s0 + $0x48] sm:$0xff]  ;;  %s1133_s29 = smov [#allocation2]  }
  0x3a   :  { %v1094_v63 = vld [vmem:[%s1388_s0 + $0x10] ss:$28 sps:$4 sm:$0xff]   ;;  %v847_v0 = vcombine.high %v32_v62, %v32_v62  ;;  %v846_v1 = vcombine.low %v32_v62, %v32_v62  ;;  %v1101_v2 = vld [vmem:[%s1391_s3] sm:$0xff]   ;;  %v1104_v5 = vld [vmem:[%s1391_s3 + $0x18] sm:$0xff]   ;;  %s823_s30 = sshll.u32 %s1133_s29, 4  ;;  %s824_s30 = int_to_ptr.vmem [resolvable:$true] %s823_s30 }
  0x3b   :  { %978 = vmatpush3.bf16.msra.mxu0 %v1091_v59  ;;  %1012 = vmatprep.subr.bf16.mxu1 %v1101_v2  ;;  %v1102_v3 = vld [vmem:[%s1391_s3 + $0x8] sm:$0xff]   ;;  %v1103_v4 = vld [vmem:[%s1391_s3 + $0x10] sm:$0xff]   ;;  %v1105_v6 = vld [vmem:[%s1391_s3 + $0x20] sm:$0xff]   ;;  %s1109_s6 = scalar_lea.vmem %s824_s30, 384  ;;  %p1114_p1 = scmp.lt.s32.totalorder %s824_s30, %s824_s30 }
  0x3c   :  { %979 = vmatprep.subr.bf16.mxu0 %v1092_v60  ;;  %1013 = vmatpush3.bf16.msra.mxu1 %v1101_v2  ;;  %v1106_v7 = vld [vmem:[%s1391_s3 + $0x28] sm:$0xff]   ;;  %v1107_v8 = vld [vmem:[%s1391_s3 + $0x30] sm:$0xff]   ;;  %v1108_v9 = vld [vmem:[%s1391_s3 + $0x38] sm:$0xff]   ;;  %p1110_p0 = scmp.ne.s32.totalorder %s824_s30, %s1109_s6  ;;  %p1115_p2 = scmp.lt.s32.totalorder %s1109_s6, %s1109_s6 }
  0x3d   :  { %1014 = vmatprep.subr.bf16.mxu1 %v1102_v3  ;;  %v834_v11 = vld [vmem:[%s1390_s2] ss:$0 sm:$0xff] }
  0x3e   :  { %p1116_p3 = por %p1115_p2, %p1114_p1 }
  0x3f   :  { %980 = vmatpush3.bf16.msra.mxu0 %v1093_v61 }
  0x40   :  { %1015 = vmatpush3.bf16.msra.mxu1 %v1102_v3  ;;  %p1117_p4 = pnand %p1116_p3, %p1110_p0 }
  0x41   :  { %1016 = vmatprep.subr.bf16.mxu1 %v1103_v4 }
  0x42   :  { %628 = vmatmul.mubr.bf16.vlgmr.msra.gmra.mrb[8].mxu0 %v1094_v63 }
  0x43   :  { %635 = vmatprep.mubr.bf16.mxu0 %v847_v0 }
  0x44   :  { %1017 = vmatpush3.bf16.msra.mxu1 %v1103_v4 }
  0x45   :  { %1018 = vmatprep.subr.bf16.mxu1 %v1104_v5 }
  0x48   :  { %1019 = vmatpush3.bf16.msra.mxu1 %v1104_v5 }
  0x49   :  { %1020 = vmatprep.subr.bf16.mxu1 %v1105_v6 }
  0x4a   :  { %636 = vmatmul.mubr.bf16.gmra.mrb[12].mxu0 %v846_v1  ;;  %v900_v1 = vld [vmem:[%s1392_s4] ss:$0 sm:$0xff] }
  0x4c   :  { %1021 = vmatpush3.bf16.msra.mxu1 %v1105_v6 }
  0x4d   :  { %1022 = vmatprep.subr.bf16.mxu1 %v1106_v7 }
  0x50   :  { %1023 = vmatpush3.bf16.msra.mxu1 %v1106_v7 }
  0x51   :  { %1024 = vmatprep.subr.bf16.mxu1 %v1107_v8 }
  0x54   :  { %1025 = vmatpush3.bf16.msra.mxu1 %v1107_v8 }
  0x55   :  { %1026 = vmatprep.subr.bf16.mxu1 %v1108_v9 }
  0x58   :  { %1027 = vmatpush3.bf16.msra.mxu1 %v1108_v9 }
  0xf5   :  { %v925_v10 = vpop.f32.mrb[0].mxu0 }
  0xf6   :  { %v926_v12 = vpop.f32.mrb[1].mxu0 }
  0xf7   :  { %v927_v13 = vadd.f32 %v926_v12, %v925_v10  ;;  %v928_v14 = vpop.f32.mrb[2].mxu0  ;;  %v953_v15 = vpop.f32.mrb[0].mxu1 }
  0xf8   :  { %v929_v16 = vpop.f32.mrb[3].mxu0  ;;  %v954_v19 = vpop.f32.mrb[1].mxu1 }
  0xf9   :  { %v534_v17 = vadd.f32 %v927_v13, %v834_v11  ;;  %v930_v18 = vadd.f32 %v929_v16, %v928_v14  ;;  %v955_v20 = vadd.f32 %v954_v19, %v953_v15  ;;  %v956_v21 = vpop.f32.mrb[2].mxu1 }
  0xfa   :  { %v957_v23 = vpop.f32.mrb[3].mxu1 }
  0xfb   :  { %v537_v22 = vadd.f32 %v930_v18, %v834_v11  ;;  %v582_v24 = vadd.f32 %v955_v20, %v534_v17  ;;  %v958_v25 = vadd.f32 %v957_v23, %v956_v21 }
  0xfd   :  { %v585_v26 = vadd.f32 %v958_v25, %v537_v22  ;;  %v931_v27 = vpop.f32.mrb[4].mxu0 }
  0xfe   :  { %v932_v28 = vpop.f32.mrb[5].mxu0 }
  0xff   :  { %v933_v29 = vadd.f32 %v932_v28, %v931_v27  ;;  %v934_v30 = vpop.f32.mrb[6].mxu0  ;;  %v959_v33 = vpop.f32.mrb[4].mxu1 }
 0x100   :  { %v935_v31 = vpop.f32.mrb[7].mxu0  ;;  %v960_v34 = vpop.f32.mrb[5].mxu1 }
 0x101   :  { %v542_v32 = vadd.f32 %v933_v29, %v834_v11  ;;  %v961_v35 = vadd.f32 %v960_v34, %v959_v33  ;;  %v962_v36 = vpop.f32.mrb[6].mxu1 }
 0x102   :  { %v963_v37 = vpop.f32.mrb[7].mxu1 }
 0x103   :  { %v590_v38 = vadd.f32 %v961_v35, %v542_v32 }
 0x107   :  { %v1010_v39 = vpop.f32.mrb[8].mxu1 }
 0x108   :  { %v677_v40 = vpop.f32.mrb[9].mxu1 }
 0x109   :  { %v1011_v41 = vpop.f32.mrb[10].mxu1 }
 0x10a   :  { %v680_v42 = vpop.f32.mrb[11].mxu1 }
 0x115   :  { %v981_v43 = vpop.f32.mrb[8].mxu0 }
 0x116   :  { %v982_v44 = vpop.f32.mrb[9].mxu0 }
 0x117   :  { %v983_v45 = vadd.f32 %v982_v44, %v981_v43  ;;  %v984_v46 = vpop.f32.mrb[10].mxu0 }
 0x118   :  { %v985_v47 = vpop.f32.mrb[11].mxu0 }
 0x119   :  { %v986_v48 = vadd.f32 %v985_v47, %v984_v46  ;;  %v630_v49 = vadd.f32 %v983_v45, %v582_v24 }
 0x11b   :  { %v678_v50 = vadd.f32 %v677_v40, %v630_v49  ;;  %v633_v51 = vadd.f32 %v986_v48, %v585_v26 }
 0x11d   :  { %v681_v52 = vadd.f32 %v680_v42, %v633_v51  ;;  %v987_v53 = vpop.f32.mrb[12].mxu0  ;;  %v691_v55 = vmax.f32 %v678_v50, 0.0 }
 0x11e   :  { %v988_v54 = vpop.f32.mrb[13].mxu0 }
 0x11f   :  { %v692_v56 = vmax.f32 %v681_v52, 0.0  ;;  %v989_v57 = vadd.f32 %v988_v54, %v987_v53  ;;  %v990_v58 = vpop.f32.mrb[14].mxu0 }
 0x120   :  { %v991_v59 = vpop.f32.mrb[15].mxu0 }
 0x121   :  { %v694_v60 = vpack.c.bf16 %v692_v56, %v691_v55  ;;  %v638_v61 = vadd.f32 %v989_v57, %v590_v38 }
 0x123   :  { %v686_v62 = vadd.f32 %v1010_v39, %v638_v61  ;;  %1028 = vmatprep.mubr.bf16.mxu1 %v694_v60 }
 0x125   :  { %v693_v63 = vmax.f32 %v686_v62, 0.0 }
 0x127   :  { %v695_v0 = vpack.c.bf16 %v693_v63, %v693_v63 }
 0x129   :  { %1029 = vmatmul.mubr.bf16.vlgmr.msra.gmra.mrb[12].mxu1 %v695_v0 }
 0x1fc   :  { %v1030_v2 = vpop.f32.mrb[12].mxu1 }
 0x1fd   :  { %v810_v3 = vadd.f32 %v1030_v2, %v900_v1  ;;  %v801_v4 = vpop.f32.mrb[13].mxu1 }
 0x1fe   :  { %v802_v5 = vadd.f32 %v900_v1, %v801_v4  ;;  %v1031_v6 = vpop.f32.mrb[14].mxu1 }
 0x1ff   :  { %817 = vst [vmem:[#allocation2 + $0x10] sm:$0xff] %v810_v3  ;;  %v804_v7 = vpop.f32.mrb[15].mxu1 }
 0x200   :  { %815 = vst [vmem:[#allocation2] sm:$0xff] %v802_v5  ;;  %v805_v8 = vadd.f32 %v900_v1, %v804_v7 }
 0x202   :  { %816 = vst [vmem:[#allocation2 + $0x8] sm:$0xff] %v805_v8 }
 0x203   :  { %1120 = shalt.err (!%p1117_p4)
}
 0x204   :  { %s1121_s8 = scalar_lea.hbm %s1393_s5, 384 }
 0x205   :  { %p1122_p5 = scmp.ne.s32.totalorder %s1393_s5, %s1121_s8  ;;  %p1125_p6 = scmp.lt.u32.totalorder %s1121_s8, %s1393_s5 }
 0x207   :  { %p1127_p7 = pnand %p1125_p6, %p1122_p5 }
 0x209   :  { %1130 = shalt.err (!%p1127_p7)
}
 0x20a   :  { %s1134_s13 = smov 128   ;;  %s1135_s14 = smov 8  }
 0x20b   :  { %829 = dma.vmem_to_hbm [thread:$0]  %s824_s30, 384, %s1393_s5, [#allocation3], %s1134_s13, %s1134_s13, %s1135_s14  }
 0x20c   :  { %1131 = dma.done.wait [#allocation3], 384  }
 0x20d   :  { %1132 = vsyncadd [#allocation3], 4294966912 }
 0x20e   :  { %833 = vsyncpa [#allocation3], 1 }

// kernel: encoder_forward.2
= control target key start
LH: loop header
LB: loop body
LE: loop exit
PB: predicated region body
PF: predicated region fallthrough
CT: control target
= control target key end

     0   :  { %s13184_s15 = smov 0   ;;  %s17661_s0 = inlined_call_operand.vmem [shape: f32[6,900,3], index: 0, kind: input, shape index: {}]   ;;  %s17662_s1 = inlined_call_operand.vmem [shape: bf16[27,16], index: 1, kind: input, shape index: {}]   ;;  %s17663_s2 = inlined_call_operand.vmem [shape: f32[1,16], index: 2, kind: input, shape index: {}]   ;;  %s17664_s3 = inlined_call_operand.vmem [shape: bf16[196,838], index: 3, kind: input, shape index: {}]   ;;  %s17665_s4 = inlined_call_operand.vmem [shape: bf16[6,196,16], index: 4, kind: output, shape index: {}]  }
   0x1 LB: > { %s9578_s16 = sadd.s32 4294967295, %s13154_s15   ;;  %p9582_p0 = scmp.ge.s32.totalorder %s13154_s15, 1  ;;  %s13154_s15 = sphi %s13184_s15, %s14_s15  }
   0x2   : > { %p162_p1 = scmp.lt.s32.totalorder %s13154_s15, 7 }
   0x4   : > { %p163_p2 = pnand %p9582_p0, %p162_p1 }
   0x6   : > { %166 = sbr.rel (%p163_p2) target bundleno = 2740 (0xab4), region = 36 }
   0xd   : > { %v13013_v0 = vld [vmem:[%s17662_s1] ss:$0 sps:$4 sm:$0x66]   ;;  %v17666_v1 = vmov 0.0   ;;  %vm688_vm0 = vcmask 1040384   ;;  %vm689_vm1 = vcmask 1041408  }
   0xe   : > { %11012 = vmatprep.subr.bf16.mxu0 %v17666_v1  ;;  %11226 = vmatprep.subr.bf16.mxu1 %v17666_v1  ;;  %v357_v2 = vld [vmem:[%s17662_s1] sm:$0x3]  ;;  %v521_v3 = vshrl.u32 %v13013_v0, 16  ;;  %v524_v4 = vshll.u32 %v13013_v0, 16  ;;  %v13157_v5 = vmov 65535   ;;  %vm13158_vm2 = vmmov 0  }
   0xf   : > { %v690_v6 = vsel %vm688_vm0, 4294967295, %v13157_v5  ;;  %11014 = vmatprep.mubr.msk.bf16.mxu0 %vm13158_vm2, %v17666_v1  ;;  %11228 = vmatprep.mubr.msk.bf16.mxu1 %vm13158_vm2, %v17666_v1  ;;  %p188_p3 = scmp.lt.s32.totalorder %s9578_s16, 5  ;;  %vm528_vm3 = vcmask 23552   ;;  %vm8847_vm4 = vcmask 1042432   ;;  %vm8807_vm5 = vcmask 572416  }
  0x10   : > { %v13204_v7 = vsel %vm689_vm1, %v690_v6, 0  ;;  %v523_v8 = vrot.slane %v521_v3, 1  ;;  %v526_v9 = vrot.slane %v524_v4, 2  ;;  %vm9496_vm6 = vcmask 125952  }
  0x11   : > { %v1311_v10 = vand.u32 %v13204_v7, %v357_v2  ;;  %s18150_s16 = smov (!%p188_p3, %s9578_s16), 5  ;;  %vm9521_vm7 = vcmask 123904  }
  0x12   : > { %v527_v11 = vor.u32 %v526_v9, %v523_v8  ;;  %s13000_s21 = smul.u32 904, %s18150_s16 }
  0x13   : > { %11227 = vmatpush3.bf16.msra.mxu1 %v1311_v10  ;;  %s13001_s29 = smul.u32 100, %s18150_s16 }
  0x14   : > { %11654 = vmatprep.subr.bf16.mxu1 %v17666_v1  ;;  %v693_v12 = vand.u32 %v13204_v7, %v527_v11  ;;  %s13215_s24 = scalar_lea.vmem %s17661_s0, %s13000_s21 }
  0x15   : > { %v358_v13 = vld [vmem:[%s13215_s24 + $0x1] sm:$0xff]  ;;  %v359_v14 = vld [vmem:[%s13215_s24 + $0x9] sm:$0xff]  ;;  %v360_v19 = vld [vmem:[%s13215_s24 + $0x11] sm:$0xff]  ;;  %s17583_s6 = scalar_lea.vmem %s17665_s4, %s13001_s29 }
  0x16   : > { %v199_v15 = vld [vmem:[%s13215_s24] sm:$0xff]  ;;  %11013 = vmatpush3.bf16.msra.mxu0 %v693_v12  ;;  %v463_v16 = vpack.c.bf16 %v359_v14, %v358_v13  ;;  %v200_v17 = vld [vmem:[%s13215_s24 + $0x8] sm:$0xff]  ;;  %v201_v21 = vld [vmem:[%s13215_s24 + $0x10] sm:$0xff] }
  0x17   : > { %v304_v18 = vpack.c.bf16 %v200_v17, %v199_v15  ;;  %11440 = vmatprep.subr.bf16.mxu0 %v17666_v1  ;;  %v361_v20 = vld [vmem:[%s13215_s24 + $0x19] sm:$0xff]  ;;  %v362_v25 = vld [vmem:[%s13215_s24 + $0x21] sm:$0xff]  ;;  %v363_v26 = vld [vmem:[%s13215_s24 + $0x29] sm:$0xff] }
  0x18   : > { %v202_v22 = vld [vmem:[%s13215_s24 + $0x18] sm:$0xff]  ;;  %v464_v23 = vpack.c.bf16 %v361_v20, %v360_v19  ;;  %v203_v27 = vld [vmem:[%s13215_s24 + $0x20] sm:$0xff]  ;;  %v204_v28 = vld [vmem:[%s13215_s24 + $0x28] sm:$0xff]  ;;  %v465_v29 = vpack.c.bf16 %v363_v26, %v362_v25 }
  0x19   : > { %11015 = vmatmul.mubr.msk.bf16.vlgmr.msra.gmra.mrb[0].mxu0 %vm528_vm3, %v463_v16  ;;  %11229 = vmatmul.mubr.msk.bf16.vlgmr.msra.gmra.mrb[0].mxu1 %vm528_vm3, %v304_v18  ;;  %v305_v24 = vpack.c.bf16 %v202_v22, %v201_v21  ;;  %v306_v30 = vpack.c.bf16 %v204_v28, %v203_v27  ;;  %v364_v31 = vld [vmem:[%s13215_s24 + $0x31] sm:$0xff]  ;;  %v365_v32 = vld [vmem:[%s13215_s24 + $0x39] sm:$0xff]  ;;  %v366_v37 = vld [vmem:[%s13215_s24 + $0x41] sm:$0xff] }
  0x1a   : > { %11018 = vmatprep.mubr.msk.bf16.mxu0 %vm13158_vm2, %v17666_v1  ;;  %11232 = vmatprep.mubr.msk.bf16.mxu1 %vm13158_vm2, %v17666_v1  ;;  %v205_v33 = vld [vmem:[%s13215_s24 + $0x30] sm:$0xff]  ;;  %v206_v34 = vld [vmem:[%s13215_s24 + $0x38] sm:$0xff]  ;;  %v466_v35 = vpack.c.bf16 %v365_v32, %v364_v31  ;;  %v207_v39 = vld [vmem:[%s13215_s24 + $0x40] sm:$0xff] }
  0x1b   : > { %v307_v36 = vpack.c.bf16 %v206_v34, %v205_v33  ;;  %v367_v38 = vld [vmem:[%s13215_s24 + $0x49] sm:$0xff]  ;;  %v368_v43 = vld [vmem:[%s13215_s24 + $0x51] sm:$0xff]  ;;  %v369_v44 = vld [vmem:[%s13215_s24 + $0x59] sm:$0xff] }
  0x1c   : > { %v208_v40 = vld [vmem:[%s13215_s24 + $0x48] sm:$0xff]  ;;  %v467_v41 = vpack.c.bf16 %v367_v38, %v366_v37  ;;  %v209_v45 = vld [vmem:[%s13215_s24 + $0x50] sm:$0xff]  ;;  %v210_v46 = vld [vmem:[%s13215_s24 + $0x58] sm:$0xff]  ;;  %v468_v47 = vpack.c.bf16 %v369_v44, %v368_v43 }
  0x1d   : > { %v308_v42 = vpack.c.bf16 %v208_v40, %v207_v39  ;;  %v309_v48 = vpack.c.bf16 %v210_v46, %v209_v45  ;;  %v370_v49 = vld [vmem:[%s13215_s24 + $0x61] sm:$0xff]  ;;  %v371_v50 = vld [vmem:[%s13215_s24 + $0x69] sm:$0xff]  ;;  %v372_v55 = vld [vmem:[%s13215_s24 + $0x71] sm:$0xff] }
  0x1e   : > { %v211_v51 = vld [vmem:[%s13215_s24 + $0x60] sm:$0xff]  ;;  %v212_v52 = vld [vmem:[%s13215_s24 + $0x68] sm:$0xff]  ;;  %v469_v53 = vpack.c.bf16 %v371_v50, %v370_v49  ;;  %v213_v57 = vld [vmem:[%s13215_s24 + $0x70] sm:$0xff] }
  0x1f   : > { %v310_v54 = vpack.c.bf16 %v212_v52, %v211_v51  ;;  %v373_v56 = vld [vmem:[%s13215_s24 + $0x79] sm:$0xff]  ;;  %v374_v61 = vld [vmem:[%s13215_s24 + $0x81] sm:$0xff]  ;;  %v375_v62 = vld [vmem:[%s13215_s24 + $0x89] sm:$0xff] }
  0x20   : > { %v214_v58 = vld [vmem:[%s13215_s24 + $0x78] sm:$0xff]  ;;  %v470_v59 = vpack.c.bf16 %v373_v56, %v372_v55  ;;  %v215_v63 = vld [vmem:[%s13215_s24 + $0x80] sm:$0xff]  ;;  %v216_v0 = vld [vmem:[%s13215_s24 + $0x88] sm:$0xff]  ;;  %v471_v2 = vpack.c.bf16 %v375_v62, %v374_v61 }
  0x21   : > { %11019 = vmatmul.mubr.msk.bf16.gmra.mrb[4].mxu0 %vm528_vm3, %v464_v23  ;;  %11233 = vmatmul.mubr.msk.bf16.gmra.mrb[4].mxu1 %vm528_vm3, %v305_v24  ;;  %v311_v60 = vpack.c.bf16 %v214_v58, %v213_v57  ;;  %v312_v3 = vpack.c.bf16 %v216_v0, %v215_v63  ;;  %v376_v4 = vld [vmem:[%s13215_s24 + $0x91] sm:$0xff]  ;;  %v377_v5 = vld [vmem:[%s13215_s24 + $0x99] sm:$0xff]  ;;  %v378_v11 = vld [vmem:[%s13215_s24 + $0xa1] sm:$0xff] }
  0x22   : > { %11022 = vmatprep.mubr.msk.bf16.mxu0 %vm13158_vm2, %v17666_v1  ;;  %11236 = vmatprep.mubr.msk.bf16.mxu1 %vm13158_vm2, %v17666_v1  ;;  %v217_v6 = vld [vmem:[%s13215_s24 + $0x90] sm:$0xff]  ;;  %v218_v8 = vld [vmem:[%s13215_s24 + $0x98] sm:$0xff]  ;;  %v472_v9 = vpack.c.bf16 %v377_v5, %v376_v4  ;;  %v219_v13 = vld [vmem:[%s13215_s24 + $0xa0] sm:$0xff] }
  0x23   : > { %v313_v10 = vpack.c.bf16 %v218_v8, %v217_v6  ;;  %v379_v12 = vld [vmem:[%s13215_s24 + $0xa9] sm:$0xff]  ;;  %v380_v17 = vld [vmem:[%s13215_s24 + $0xb1] sm:$0xff]  ;;  %v381_v18 = vld [vmem:[%s13215_s24 + $0xb9] sm:$0xff] }
  0x24   : > { %v220_v14 = vld [vmem:[%s13215_s24 + $0xa8] sm:$0xff]  ;;  %v473_v15 = vpack.c.bf16 %v379_v12, %v378_v11  ;;  %v221_v19 = vld [vmem:[%s13215_s24 + $0xb0] sm:$0xff]  ;;  %v222_v20 = vld [vmem:[%s13215_s24 + $0xb8] sm:$0xff]  ;;  %v474_v21 = vpack.c.bf16 %v381_v18, %v380_v17 }
  0x25   : > { %v314_v16 = vpack.c.bf16 %v220_v14, %v219_v13  ;;  %v315_v22 = vpack.c.bf16 %v222_v20, %v221_v19  ;;  %v382_v23 = vld [vmem:[%s13215_s24 + $0xc1] sm:$0xff]  ;;  %v383_v24 = vld [vmem:[%s13215_s24 + $0xc9] sm:$0xff]  ;;  %v226_v32 = vld [vmem:[%s13215_s24 + $0xd8] sm:$0xff] }
  0x26   : > { %v223_v25 = vld [vmem:[%s13215_s24 + $0xc0] sm:$0xff]  ;;  %v224_v26 = vld [vmem:[%s13215_s24 + $0xc8] sm:$0xff]  ;;  %v475_v27 = vpack.c.bf16 %v383_v24, %v382_v23  ;;  %v225_v31 = vld [vmem:[%s13215_s24 + $0xd0] sm:$0xff] }
  0x27   : > { %v316_v28 = vpack.c.bf16 %v224_v26, %v223_v25  ;;  %v317_v34 = vpack.c.bf16 %v226_v32, %v225_v31  ;;  %v227_v37 = vld [vmem:[%s13215_s24 + $0xe0] sm:$0xff]  ;;  %v228_v38 = vld [vmem:[%s13215_s24 + $0xe8] sm:$0xff]  ;;  %v229_v43 = vld [vmem:[%s13215_s24 + $0xf0] sm:$0xff] }
  0x28   : > { %v318_v40 = vpack.c.bf16 %v228_v38, %v227_v37  ;;  %v230_v44 = vld [vmem:[%s13215_s24 + $0xf8] sm:$0xff]  ;;  %v231_v49 = vld [vmem:[%s13215_s24 + $0x100] sm:$0xff]  ;;  %v232_v50 = vld [vmem:[%s13215_s24 + $0x108] sm:$0xff] }
  0x29   : > { %11023 = vmatmul.mubr.msk.bf16.gmra.mrb[8].mxu0 %vm528_vm3, %v465_v29  ;;  %11237 = vmatmul.mubr.msk.bf16.gmra.mrb[8].mxu1 %vm528_vm3, %v306_v30  ;;  %v384_v29 = vld [vmem:[%s13215_s24 + $0xd1] sm:$0xff]  ;;  %v385_v30 = vld [vmem:[%s13215_s24 + $0xd9] sm:$0xff]  ;;  %v319_v46 = vpack.c.bf16 %v230_v44, %v229_v43  ;;  %v320_v52 = vpack.c.bf16 %v232_v50, %v231_v49  ;;  %v236_v62 = vld [vmem:[%s13215_s24 + $0x128] sm:$0xff] }
  0x2a   : > { %11026 = vmatprep.mubr.msk.bf16.mxu0 %vm13158_vm2, %v17666_v1  ;;  %11240 = vmatprep.mubr.msk.bf16.mxu1 %vm13158_vm2, %v17666_v1  ;;  %v476_v33 = vpack.c.bf16 %v385_v30, %v384_v29  ;;  %v233_v55 = vld [vmem:[%s13215_s24 + $0x110] sm:$0xff]  ;;  %v234_v56 = vld [vmem:[%s13215_s24 + $0x118] sm:$0xff]  ;;  %v235_v61 = vld [vmem:[%s13215_s24 + $0x120] sm:$0xff] }
  0x2b   : > { %v321_v58 = vpack.c.bf16 %v234_v56, %v233_v55  ;;  %v322_v0 = vpack.c.bf16 %v236_v62, %v235_v61  ;;  %v237_v4 = vld [vmem:[%s13215_s24 + $0x130] sm:$0xff]  ;;  %v238_v5 = vld [vmem:[%s13215_s24 + $0x138] sm:$0xff]  ;;  %v239_v11 = vld [vmem:[%s13215_s24 + $0x140] sm:$0xff] }
  0x2c   : > { %v323_v8 = vpack.c.bf16 %v238_v5, %v237_v4  ;;  %v240_v12 = vld [vmem:[%s13215_s24 + $0x148] sm:$0xff]  ;;  %v241_v17 = vld [vmem:[%s13215_s24 + $0x150] sm:$0xff]  ;;  %v242_v18 = vld [vmem:[%s13215_s24 + $0x158] sm:$0xff] }
  0x2d   : > { %v324_v14 = vpack.c.bf16 %v240_v12, %v239_v11  ;;  %v325_v20 = vpack.c.bf16 %v242_v18, %v241_v17  ;;  %v243_v23 = vld [vmem:[%s13215_s24 + $0x160] sm:$0xff]  ;;  %v244_v24 = vld [vmem:[%s13215_s24 + $0x168] sm:$0xff]  ;;  %v245_v29 = vld [vmem:[%s13215_s24 + $0x170] sm:$0xff] }
  0x2e   : > { %v326_v26 = vpack.c.bf16 %v244_v24, %v243_v23  ;;  %v246_v30 = vld [vmem:[%s13215_s24 + $0x178] sm:$0xff]  ;;  %v249_v43 = vld [vmem:[%s13215_s24 + $0x190] sm:$0xff]  ;;  %v251_v50 = vld [vmem:[%s13215_s24 + $0x1a0] sm:$0xff] }
  0x2f   : > { %v327_v32 = vpack.c.bf16 %v246_v30, %v245_v29  ;;  %v250_v44 = vld [vmem:[%s13215_s24 + $0x198] sm:$0xff]  ;;  %v411_v49 = vld [vmem:[%s13215_s24 + $0x1a9] sm:$0xff] }
  0x30   : > { %v413_v55 = vld [vmem:[%s13215_s24 + $0x1b9] sm:$0xff]  ;;  %v253_v56 = vld [vmem:[%s13215_s24 + $0x1b0] sm:$0xff]  ;;  %v256_v11 = vld [vmem:[%s13215_s24 + $0x1c8] sm:$0xff] }
  0x31   : > { %11027 = vmatmul.mubr.msk.bf16.gmra.mrb[12].mxu0 %vm528_vm3, %v466_v35  ;;  %11241 = vmatmul.mubr.msk.bf16.gmra.mrb[12].mxu1 %vm528_vm3, %v307_v36  ;;  %v386_v35 = vld [vmem:[%s13215_s24 + $0xe1] sm:$0xff]  ;;  %v387_v36 = vld [vmem:[%s13215_s24 + $0xe9] sm:$0xff]  ;;  %v416_v24 = vld [vmem:[%s13215_s24 + $0x1d1] sm:$0xff] }
  0x32   : > { %11030 = vmatprep.mubr.msk.bf16.mxu0 %vm13158_vm2, %v17666_v1  ;;  %11244 = vmatprep.mubr.msk.bf16.mxu1 %vm13158_vm2, %v17666_v1  ;;  %v477_v39 = vpack.c.bf16 %v387_v36, %v386_v35  ;;  %v247_v35 = vld [vmem:[%s13215_s24 + $0x180] sm:$0xff]  ;;  %v248_v36 = vld [vmem:[%s13215_s24 + $0x188] sm:$0xff] }
  0x33   : > { %v328_v38 = vpack.c.bf16 %v248_v36, %v247_v35 }
  0x39   : > { %11031 = vmatmul.mubr.msk.bf16.gmra.mrb[16].mxu0 %vm528_vm3, %v467_v41  ;;  %11245 = vmatmul.mubr.msk.bf16.gmra.mrb[16].mxu1 %vm528_vm3, %v308_v42  ;;  %v388_v41 = vld [vmem:[%s13215_s24 + $0xf1] sm:$0xff]  ;;  %v389_v42 = vld [vmem:[%s13215_s24 + $0xf9] sm:$0xff] }
  0x3a   : > { %11034 = vmatprep.mubr.msk.bf16.mxu0 %vm13158_vm2, %v17666_v1  ;;  %11248 = vmatprep.mubr.msk.bf16.mxu1 %vm13158_vm2, %v17666_v1  ;;  %v478_v45 = vpack.c.bf16 %v389_v42, %v388_v41  ;;  %v409_v42 = vld [vmem:[%s13215_s24 + $0x199] sm:$0xff] }
  0x41   : > { %11035 = vmatmul.mubr.msk.bf16.gmra.mrb[20].mxu0 %vm528_vm3, %v468_v47  ;;  %11249 = vmatmul.mubr.msk.bf16.gmra.mrb[20].mxu1 %vm528_vm3, %v309_v48  ;;  %v390_v47 = vld [vmem:[%s13215_s24 + $0x101] sm:$0xff]  ;;  %v391_v48 = vld [vmem:[%s13215_s24 + $0x109] sm:$0xff] }
  0x42   : > { %11038 = vmatprep.mubr.msk.bf16.mxu0 %vm13158_vm2, %v17666_v1  ;;  %11252 = vmatprep.mubr.msk.bf16.mxu1 %vm13158_vm2, %v17666_v1  ;;  %v479_v51 = vpack.c.bf16 %v391_v48, %v390_v47  ;;  %v329_v47 = vpack.c.bf16 %v250_v44, %v249_v43  ;;  %v410_v48 = vld [vmem:[%s13215_s24 + $0x1a1] sm:$0xff] }
  0x43   : > { %v260_v43 = vld [vmem:[%s13215_s24 + $0x1e8] sm:$0xff] }
  0x49   : > { %11039 = vmatmul.mubr.msk.bf16.gmra.mrb[24].mxu0 %vm528_vm3, %v469_v53  ;;  %11253 = vmatmul.mubr.msk.bf16.gmra.mrb[24].mxu1 %vm528_vm3, %v310_v54  ;;  %v392_v53 = vld [vmem:[%s13215_s24 + $0x111] sm:$0xff]  ;;  %v393_v54 = vld [vmem:[%s13215_s24 + $0x119] sm:$0xff] }
  0x4a   : > { %11042 = vmatprep.mubr.msk.bf16.mxu0 %vm13158_vm2, %v17666_v1  ;;  %11256 = vmatprep.mubr.msk.bf16.mxu1 %vm13158_vm2, %v17666_v1  ;;  %v480_v57 = vpack.c.bf16 %v393_v54, %v392_v53  ;;  %v412_v54 = vld [vmem:[%s13215_s24 + $0x1b1] sm:$0xff] }
  0x51   : > { %11043 = vmatmul.mubr.msk.bf16.gmra.mrb[28].mxu0 %vm528_vm3, %v470_v59  ;;  %11257 = vmatmul.mubr.msk.bf16.gmra.mrb[28].mxu1 %vm528_vm3, %v311_v60  ;;  %v394_v59 = vld [vmem:[%s13215_s24 + $0x121] sm:$0xff]  ;;  %v395_v60 = vld [vmem:[%s13215_s24 + $0x129] sm:$0xff] }
  0x52   : > { %11046 = vmatprep.mubr.msk.bf16.mxu0 %vm13158_vm2, %v17666_v1  ;;  %11260 = vmatprep.mubr.msk.bf16.mxu1 %vm13158_vm2, %v17666_v1  ;;  %v481_v63 = vpack.c.bf16 %v395_v60, %v394_v59 }
  0x59   : > { %11047 = vmatmul.mubr.msk.bf16.gmra.mrb[32].mxu0 %vm528_vm3, %v471_v2  ;;  %11261 = vmatmul.mubr.msk.bf16.gmra.mrb[32].mxu1 %vm528_vm3, %v312_v3  ;;  %v396_v2 = vld [vmem:[%s13215_s24 + $0x131] sm:$0xff]  ;;  %v397_v3 = vld [vmem:[%s13215_s24 + $0x139] sm:$0xff] }
  0x5a   : > { %11050 = vmatprep.mubr.msk.bf16.mxu0 %vm13158_vm2, %v17666_v1  ;;  %11264 = vmatprep.mubr.msk.bf16.mxu1 %vm13158_vm2, %v17666_v1  ;;  %v482_v6 = vpack.c.bf16 %v397_v3, %v396_v2 }
  0x61   : > { %11051 = vmatmul.mubr.msk.bf16.gmra.mrb[36].mxu0 %vm528_vm3, %v472_v9  ;;  %11265 = vmatmul.mubr.msk.bf16.gmra.mrb[36].mxu1 %vm528_vm3, %v313_v10  ;;  %v398_v9 = vld [vmem:[%s13215_s24 + $0x141] sm:$0xff]  ;;  %v399_v10 = vld [vmem:[%s13215_s24 + $0x149] sm:$0xff] }
  0x62   : > { %11054 = vmatprep.mubr.msk.bf16.mxu0 %vm13158_vm2, %v17666_v1  ;;  %11268 = vmatprep.mubr.msk.bf16.mxu1 %vm13158_vm2, %v17666_v1  ;;  %v483_v13 = vpack.c.bf16 %v399_v10, %v398_v9  ;;  %v415_v9 = vld [vmem:[%s13215_s24 + $0x1c9] sm:$0xff]  ;;  %v255_v10 = vld [vmem:[%s13215_s24 + $0x1c0] sm:$0xff] }
  0x63   : > { %v332_v18 = vpack.c.bf16 %v256_v11, %v255_v10 }
  0x69   : > { %11055 = vmatmul.mubr.msk.bf16.gmra.mrb[40].mxu0 %vm528_vm3, %v473_v15  ;;  %11269 = vmatmul.mubr.msk.bf16.gmra.mrb[40].mxu1 %vm528_vm3, %v314_v16  ;;  %v400_v15 = vld [vmem:[%s13215_s24 + $0x151] sm:$0xff]  ;;  %v401_v16 = vld [vmem:[%s13215_s24 + $0x159] sm:$0xff] }
  0x6a   : > { %11058 = vmatprep.mubr.msk.bf16.mxu0 %vm13158_vm2, %v17666_v1  ;;  %11272 = vmatprep.mubr.msk.bf16.mxu1 %vm13158_vm2, %v17666_v1  ;;  %v484_v19 = vpack.c.bf16 %v401_v16, %v400_v15 }
  0x71   : > { %11059 = vmatmul.mubr.msk.bf16.gmra.mrb[44].mxu0 %vm528_vm3, %v474_v21  ;;  %11273 = vmatmul.mubr.msk.bf16.gmra.mrb[44].mxu1 %vm528_vm3, %v315_v22  ;;  %v402_v21 = vld [vmem:[%s13215_s24 + $0x161] sm:$0xff]  ;;  %v403_v22 = vld [vmem:[%s13215_s24 + $0x169] sm:$0xff] }
  0x72   : > { %11062 = vmatprep.mubr.msk.bf16.mxu0 %vm13158_vm2, %v17666_v1  ;;  %11276 = vmatprep.mubr.msk.bf16.mxu1 %vm13158_vm2, %v17666_v1  ;;  %v485_v25 = vpack.c.bf16 %v403_v22, %v402_v21 }
  0x79   : > { %11063 = vmatmul.mubr.msk.bf16.gmra.mrb[48].mxu0 %vm528_vm3, %v475_v27  ;;  %11277 = vmatmul.mubr.msk.bf16.gmra.mrb[48].mxu1 %vm528_vm3, %v316_v28  ;;  %v404_v27 = vld [vmem:[%s13215_s24 + $0x171] sm:$0xff]  ;;  %v405_v28 = vld [vmem:[%s13215_s24 + $0x179] sm:$0xff] }
  0x7a   : > { %11066 = vmatprep.mubr.msk.bf16.mxu0 %vm13158_vm2, %v17666_v1  ;;  %11280 = vmatprep.mubr.msk.bf16.mxu1 %vm13158_vm2, %v17666_v1  ;;  %v486_v31 = vpack.c.bf16 %v405_v28, %v404_v27  ;;  %v258_v27 = vld [vmem:[%s13215_s24 + $0x1d8] sm:$0xff] }
  0x81   : > { %11067 = vmatmul.mubr.msk.bf16.gmra.mrb[52].mxu0 %vm528_vm3, %v476_v33  ;;  %11281 = vmatmul.mubr.msk.bf16.gmra.mrb[52].mxu1 %vm528_vm3, %v317_v34  ;;  %v406_v33 = vld [vmem:[%s13215_s24 + $0x181] sm:$0xff]  ;;  %v407_v34 = vld [vmem:[%s13215_s24 + $0x189] sm:$0xff] }
  0x82   : > { %11070 = vmatprep.mubr.msk.bf16.mxu0 %vm13158_vm2, %v17666_v1  ;;  %11284 = vmatprep.mubr.msk.bf16.mxu1 %vm13158_vm2, %v17666_v1  ;;  %v487_v37 = vpack.c.bf16 %v407_v34, %v406_v33 }
  0x89   : > { %11071 = vmatmul.mubr.msk.bf16.gmra.mrb[56].mxu0 %vm528_vm3, %v477_v39  ;;  %11285 = vmatmul.mubr.msk.bf16.gmra.mrb[56].mxu1 %vm528_vm3, %v318_v40  ;;  %v13014_v39 = vld [vmem:[%s17662_s1] sm:$0x18]   ;;  %v408_v40 = vld [vmem:[%s13215_s24 + $0x191] sm:$0xff] }
  0x8a   : > { %11074 = vmatprep.mubr.msk.bf16.mxu0 %vm13158_vm2, %v17666_v1  ;;  %11288 = vmatprep.mubr.msk.bf16.mxu1 %vm13158_vm2, %v17666_v1  ;;  %v1934_v41 = vrot.slane %v13014_v39, 3 }
  0x91   : > { %11075 = vmatmul.mubr.msk.bf16.gmra.mrb[60].mxu0 %vm528_vm3, %v478_v45  ;;  %11289 = vmatmul.mubr.msk.bf16.gmra.mrb[60].mxu1 %vm528_vm3, %v319_v46  ;;  %v2095_v45 = vand.u32 %v1934_v41, %v13204_v7  ;;  %v488_v46 = vpack.c.bf16 %v409_v42, %v408_v40  ;;  %v418_v40 = vld [vmem:[%s13215_s24 + $0x1e1] sm:$0xff]  ;;  %v419_v41 = vld [vmem:[%s13215_s24 + $0x1e9] sm:$0xff] }
  0x92   : > { %11078 = vmatprep.mubr.msk.bf16.mxu0 %vm13158_vm2, %v17666_v1  ;;  %11292 = vmatprep.mubr.msk.bf16.mxu1 %vm13158_vm2, %v17666_v1  ;;  %v259_v42 = vld [vmem:[%s13215_s24 + $0x1e0] sm:$0xff] }
  0x93   : > { %11441 = vmatpush3.bf16.msra.mxu0 %v2095_v45 }
  0x94   : > { %11868 = vmatprep.subr.bf16.mxu0 %v17666_v1 }
  0x99   : > { %11079 = vmatmul.mubr.msk.bf16.gmra.mrb[64].mxu0 %vm528_vm3, %v479_v51  ;;  %11293 = vmatmul.mubr.msk.bf16.gmra.mrb[64].mxu1 %vm528_vm3, %v320_v52  ;;  %v252_v51 = vld [vmem:[%s13215_s24 + $0x1a8] sm:$0xff]  ;;  %v489_v52 = vpack.c.bf16 %v411_v49, %v410_v48  ;;  %v493_v49 = vpack.c.bf16 %v419_v41, %v418_v40 }
  0x9a   : > { %11082 = vmatprep.mubr.msk.bf16.mxu0 %vm13158_vm2, %v17666_v1  ;;  %11296 = vmatprep.mubr.msk.bf16.mxu1 %vm13158_vm2, %v17666_v1  ;;  %v330_v53 = vpack.c.bf16 %v252_v51, %v251_v50  ;;  %v334_v50 = vpack.c.bf16 %v260_v43, %v259_v42 }
  0xa1   : > { %11083 = vmatmul.mubr.msk.bf16.gmra.mrb[68].mxu0 %vm528_vm3, %v480_v57  ;;  %11297 = vmatmul.mubr.msk.bf16.gmra.mrb[68].mxu1 %vm528_vm3, %v321_v58  ;;  %v254_v57 = vld [vmem:[%s13215_s24 + $0x1b8] sm:$0xff] }
  0xa2   : > { %11086 = vmatprep.mubr.msk.bf16.mxu0 %vm13158_vm2, %v17666_v1  ;;  %11300 = vmatprep.mubr.msk.bf16.mxu1 %vm13158_vm2, %v17666_v1 }
  0xa9   : > { %11087 = vmatmul.mubr.msk.bf16.gmra.mrb[72].mxu0 %vm528_vm3, %v481_v63  ;;  %11301 = vmatmul.mubr.msk.bf16.gmra.mrb[72].mxu1 %vm528_vm3, %v322_v0  ;;  %v490_v63 = vpack.c.bf16 %v413_v55, %v412_v54  ;;  %v331_v0 = vpack.c.bf16 %v254_v57, %v253_v56  ;;  %v420_v56 = vld [vmem:[%s13215_s24 + $0x1f1] sm:$0xff]  ;;  %v421_v57 = vld [vmem:[%s13215_s24 + $0x1f9] sm:$0xff] }
  0xaa   : > { %11090 = vmatprep.mubr.msk.bf16.mxu0 %vm13158_vm2, %v17666_v1  ;;  %11304 = vmatprep.mubr.msk.bf16.mxu1 %vm13158_vm2, %v17666_v1 }
  0xb1   : > { %11091 = vmatmul.mubr.msk.bf16.gmra.mrb[76].mxu0 %vm528_vm3, %v482_v6  ;;  %11305 = vmatmul.mubr.msk.bf16.gmra.mrb[76].mxu1 %vm528_vm3, %v323_v8  ;;  %v414_v8 = vld [vmem:[%s13215_s24 + $0x1c1] sm:$0xff] }
  0xb2   : > { %11094 = vmatprep.mubr.msk.bf16.mxu0 %vm13158_vm2, %v17666_v1  ;;  %11308 = vmatprep.mubr.msk.bf16.mxu1 %vm13158_vm2, %v17666_v1  ;;  %v491_v17 = vpack.c.bf16 %v415_v9, %v414_v8 }
  0xb9   : > { %11095 = vmatmul.mubr.msk.bf16.gmra.mrb[80].mxu0 %vm528_vm3, %v483_v13  ;;  %11309 = vmatmul.mubr.msk.bf16.gmra.mrb[80].mxu1 %vm528_vm3, %v324_v14 }
  0xba   : > { %11098 = vmatprep.mubr.msk.bf16.mxu0 %vm13158_vm2, %v17666_v1  ;;  %11312 = vmatprep.mubr.msk.bf16.mxu1 %vm13158_vm2, %v17666_v1 }
  0xc1   : > { %11099 = vmatmul.mubr.msk.bf16.gmra.mrb[84].mxu0 %vm528_vm3, %v484_v19  ;;  %11313 = vmatmul.mubr.msk.bf16.gmra.mrb[84].mxu1 %vm528_vm3, %v325_v20 }
  0xc2   : > { %11102 = vmatprep.mubr.msk.bf16.mxu0 %vm13158_vm2, %v17666_v1  ;;  %11316 = vmatprep.mubr.msk.bf16.mxu1 %vm13158_vm2, %v17666_v1 }
  0xc9   : > { %11103 = vmatmul.mubr.msk.bf16.gmra.mrb[88].mxu0 %vm528_vm3, %v485_v25  ;;  %11317 = vmatmul.mubr.msk.bf16.gmra.mrb[88].mxu1 %vm528_vm3, %v326_v26  ;;  %v417_v25 = vld [vmem:[%s13215_s24 + $0x1d9] sm:$0xff]  ;;  %v257_v26 = vld [vmem:[%s13215_s24 + $0x1d0] sm:$0xff] }
  0xca   : > { %11106 = vmatprep.mubr.msk.bf16.mxu0 %vm13158_vm2, %v17666_v1  ;;  %11320 = vmatprep.mubr.msk.bf16.mxu1 %vm13158_vm2, %v17666_v1  ;;  %v492_v33 = vpack.c.bf16 %v417_v25, %v416_v24  ;;  %v333_v34 = vpack.c.bf16 %v258_v27, %v257_v26 }
  0xd1   : > { %11107 = vmatmul.mubr.msk.bf16.gmra.mrb[92].mxu0 %vm528_vm3, %v486_v31  ;;  %11321 = vmatmul.mubr.msk.bf16.gmra.mrb[92].mxu1 %vm528_vm3, %v327_v32 }
  0xd2   : > { %11110 = vmatprep.mubr.msk.bf16.mxu0 %vm13158_vm2, %v17666_v1  ;;  %11324 = vmatprep.mubr.msk.bf16.mxu1 %vm13158_vm2, %v17666_v1 }
  0xd9   : > { %11111 = vmatmul.mubr.msk.bf16.gmra.mrb[96].mxu0 %vm528_vm3, %v487_v37  ;;  %11325 = vmatmul.mubr.msk.bf16.gmra.mrb[96].mxu1 %vm528_vm3, %v328_v38 }
  0xda   : > { %11114 = vmatprep.mubr.msk.bf16.mxu0 %vm13158_vm2, %v17666_v1  ;;  %11328 = vmatprep.mubr.msk.bf16.mxu1 %vm13158_vm2, %v17666_v1 }
  0xe1   : > { %11115 = vmatmul.mubr.msk.bf16.gmra.mrb[100].mxu0 %vm528_vm3, %v488_v46  ;;  %11329 = vmatmul.mubr.msk.bf16.gmra.mrb[100].mxu1 %vm528_vm3, %v329_v47 }
  0xe2   : > { %11118 = vmatprep.mubr.msk.bf16.mxu0 %vm13158_vm2, %v17666_v1  ;;  %11332 = vmatprep.mubr.msk.bf16.mxu1 %vm13158_vm2, %v17666_v1 }
  0xe9   : > { %11119 = vmatmul.mubr.msk.bf16.gmra.mrb[104].mxu0 %vm528_vm3, %v489_v52  ;;  %11333 = vmatmul.mubr.msk.bf16.gmra.mrb[104].mxu1 %vm528_vm3, %v330_v53 }
  0xea   : > { %11122 = vmatprep.mubr.msk.bf16.mxu0 %vm13158_vm2, %v17666_v1  ;;  %11336 = vmatprep.mubr.msk.bf16.mxu1 %vm13158_vm2, %v17666_v1 }
  0xec   : > { %v729_v58 = vpop.f32.mrb[0].mxu0  ;;  %v1347_v59 = vpop.f32.mrb[0].mxu1 }
  0xed   : > { %v13497_v60 = vadd.f32 %v1347_v59, %v729_v58  ;;  %v11016_v61 = vpop.f32.mrb[1].mxu0  ;;  %v11230_v62 = vpop.f32.mrb[1].mxu1  ;;  %v261_v58 = vld [vmem:[%s13215_s24 + $0x1f0] sm:$0xff]  ;;  %v262_v59 = vld [vmem:[%s13215_s24 + $0x1f8] sm:$0xff] }
  0xee   : > { %v732_v2 = vpop.f32.mrb[2].mxu0  ;;  %v1350_v3 = vpop.f32.mrb[2].mxu1 }
  0xef   : > { %v13499_v4 = vadd.f32 %v1350_v3, %v732_v2  ;;  %v11017_v5 = vpop.f32.mrb[3].mxu0  ;;  %v11231_v6 = vpop.f32.mrb[3].mxu1  ;;  %v494_v3 = vpack.c.bf16 %v421_v57, %v420_v56 }
  0xf0   : > { %v335_v5 = vpack.c.bf16 %v262_v59, %v261_v58 }
  0xf1   : > { %11123 = vmatmul.mubr.msk.bf16.gmra.mrb[108].mxu0 %vm528_vm3, %v490_v63  ;;  %11337 = vmatmul.mubr.msk.bf16.gmra.mrb[108].mxu1 %vm528_vm3, %v331_v0 }
  0xf2   : > { %11126 = vmatprep.mubr.msk.bf16.mxu0 %vm13158_vm2, %v17666_v1  ;;  %11340 = vmatprep.mubr.msk.bf16.mxu1 %vm13158_vm2, %v17666_v1 }
  0xf4   : > { %v737_v12 = vpop.f32.mrb[4].mxu0  ;;  %v1355_v13 = vpop.f32.mrb[4].mxu1 }
  0xf5   : > { %v13511_v14 = vadd.f32 %v1355_v13, %v737_v12  ;;  %v11020_v15 = vpop.f32.mrb[5].mxu0  ;;  %v11234_v16 = vpop.f32.mrb[5].mxu1  ;;  %v422_v12 = vld [vmem:[%s13215_s24 + $0x201] sm:$0xff]  ;;  %v423_v13 = vld [vmem:[%s13215_s24 + $0x209] sm:$0xff] }
  0xf6   : > { %v740_v19 = vpop.f32.mrb[6].mxu0  ;;  %v1358_v20 = vpop.f32.mrb[6].mxu1  ;;  %v263_v15 = vld [vmem:[%s13215_s24 + $0x200] sm:$0xff]  ;;  %v264_v16 = vld [vmem:[%s13215_s24 + $0x208] sm:$0xff] }
  0xf7   : > { %v13513_v21 = vadd.f32 %v1358_v20, %v740_v19  ;;  %v11021_v22 = vpop.f32.mrb[7].mxu0  ;;  %v11235_v23 = vpop.f32.mrb[7].mxu1  ;;  %v336_v24 = vpack.c.bf16 %v264_v16, %v263_v15 }
  0xf8   : > { %v495_v23 = vpack.c.bf16 %v423_v13, %v422_v12 }
  0xf9   : > { %11127 = vmatmul.mubr.msk.bf16.gmra.mrb[112].mxu0 %vm528_vm3, %v491_v17  ;;  %11341 = vmatmul.mubr.msk.bf16.gmra.mrb[112].mxu1 %vm528_vm3, %v332_v18 }
  0xfa   : > { %11130 = vmatprep.mubr.msk.bf16.mxu0 %vm13158_vm2, %v17666_v1  ;;  %11344 = vmatprep.mubr.msk.bf16.mxu1 %vm13158_vm2, %v17666_v1 }
  0xfc   : > { %v745_v28 = vpop.f32.mrb[8].mxu0  ;;  %v1363_v29 = vpop.f32.mrb[8].mxu1 }
  0xfd   : > { %v13525_v30 = vadd.f32 %v1363_v29, %v745_v28  ;;  %v11024_v31 = vpop.f32.mrb[9].mxu0  ;;  %v11238_v32 = vpop.f32.mrb[9].mxu1 }
  0xfe   : > { %v748_v35 = vpop.f32.mrb[10].mxu0  ;;  %v1366_v36 = vpop.f32.mrb[10].mxu1  ;;  %v424_v31 = vld [vmem:[%s13215_s24 + $0x211] sm:$0xff]  ;;  %v425_v32 = vld [vmem:[%s13215_s24 + $0x219] sm:$0xff] }
  0xff   : > { %v13527_v37 = vadd.f32 %v1366_v36, %v748_v35  ;;  %v11025_v38 = vpop.f32.mrb[11].mxu0  ;;  %v11239_v39 = vpop.f32.mrb[11].mxu1  ;;  %v496_v41 = vpack.c.bf16 %v425_v32, %v424_v31  ;;  %v271_v31 = vld [vmem:[%s13215_s24 + $0x240] sm:$0xff]  ;;  %v272_v32 = vld [vmem:[%s13215_s24 + $0x248] sm:$0xff] }
 0x101   : > { %11131 = vmatmul.mubr.msk.bf16.gmra.mrb[116].mxu0 %vm528_vm3, %v492_v33  ;;  %11345 = vmatmul.mubr.msk.bf16.gmra.mrb[116].mxu1 %vm528_vm3, %v333_v34  ;;  %v265_v33 = vld [vmem:[%s13215_s24 + $0x210] sm:$0xff]  ;;  %v266_v34 = vld [vmem:[%s13215_s24 + $0x218] sm:$0xff] }
 0x102   : > { %11134 = vmatprep.mubr.msk.bf16.mxu0 %vm13158_vm2, %v17666_v1  ;;  %11348 = vmatprep.mubr.msk.bf16.mxu1 %vm13158_vm2, %v17666_v1  ;;  %v337_v42 = vpack.c.bf16 %v266_v34, %v265_v33 }
 0x104   : > { %v753_v44 = vpop.f32.mrb[12].mxu0  ;;  %v1371_v45 = vpop.f32.mrb[12].mxu1 }
 0x105   : > { %v13539_v46 = vadd.f32 %v1371_v45, %v753_v44  ;;  %v11028_v47 = vpop.f32.mrb[13].mxu0  ;;  %v11242_v48 = vpop.f32.mrb[13].mxu1 }
 0x106   : > { %v756_v51 = vpop.f32.mrb[14].mxu0  ;;  %v1374_v52 = vpop.f32.mrb[14].mxu1 }
 0x107   : > { %v13541_v53 = vadd.f32 %v1374_v52, %v756_v51  ;;  %v11029_v54 = vpop.f32.mrb[15].mxu0  ;;  %v11243_v55 = vpop.f32.mrb[15].mxu1  ;;  %v267_v51 = vld [vmem:[%s13215_s24 + $0x220] sm:$0xff]  ;;  %v268_v52 = vld [vmem:[%s13215_s24 + $0x228] sm:$0xff] }
 0x109   : > { %11135 = vmatmul.mubr.msk.bf16.gmra.mrb[120].mxu0 %vm528_vm3, %v493_v49  ;;  %11349 = vmatmul.mubr.msk.bf16.gmra.mrb[120].mxu1 %vm528_vm3, %v334_v50  ;;  %v426_v49 = vld [vmem:[%s13215_s24 + $0x221] sm:$0xff]  ;;  %v427_v50 = vld [vmem:[%s13215_s24 + $0x229] sm:$0xff] }
 0x10a   : > { %11138 = vmatprep.mubr.msk.bf16.mxu0 %vm13158_vm2, %v17666_v1  ;;  %11352 = vmatprep.mubr.msk.bf16.mxu1 %vm13158_vm2, %v17666_v1  ;;  %v497_v59 = vpack.c.bf16 %v427_v50, %v426_v49  ;;  %v13015_v49 = vld [vmem:[%s17662_s1 + $0x4] ss:$0 sps:$4 sm:$0x33]   ;;  %v432_v50 = vld [vmem:[%s13215_s24 + $0x251] sm:$0xff] }
 0x10c   : > { %v761_v61 = vpop.f32.mrb[16].mxu0  ;;  %v1379_v62 = vpop.f32.mrb[16].mxu1 }
 0x10d   : > { %v13553_v63 = vadd.f32 %v1379_v62, %v761_v61  ;;  %v11032_v0 = vpop.f32.mrb[17].mxu0  ;;  %v11246_v2 = vpop.f32.mrb[17].mxu1  ;;  %v338_v61 = vpack.c.bf16 %v268_v52, %v267_v51  ;;  %v2823_v51 = vshll.u32 %v13015_v49, 16  ;;  %v433_v52 = vld [vmem:[%s13215_s24 + $0x259] sm:$0xff] }
 0x10e   : > { %v764_v6 = vpop.f32.mrb[18].mxu0  ;;  %v1382_v8 = vpop.f32.mrb[18].mxu1 }
 0x10f   : > { %v13555_v9 = vadd.f32 %v1382_v8, %v764_v6  ;;  %v11033_v10 = vpop.f32.mrb[19].mxu0  ;;  %v11247_v11 = vpop.f32.mrb[19].mxu1  ;;  %v428_v6 = vld [vmem:[%s13215_s24 + $0x231] sm:$0xff]  ;;  %v429_v8 = vld [vmem:[%s13215_s24 + $0x239] sm:$0xff] }
 0x110   : > { %v269_v10 = vld [vmem:[%s13215_s24 + $0x230] sm:$0xff]  ;;  %v270_v11 = vld [vmem:[%s13215_s24 + $0x238] sm:$0xff] }
 0x111   : > { %11139 = vmatmul.mubr.msk.bf16.gmra.mrb[124].mxu0 %vm528_vm3, %v494_v3  ;;  %11353 = vmatmul.mubr.msk.bf16.gmra.mrb[124].mxu1 %vm528_vm3, %v335_v5 }
 0x112   : > { %11142 = vmatprep.mubr.msk.bf16.mxu0 %vm13158_vm2, %v17666_v1  ;;  %11356 = vmatprep.mubr.msk.bf16.mxu1 %vm13158_vm2, %v17666_v1 }
 0x114   : > { %v769_v17 = vpop.f32.mrb[20].mxu0  ;;  %v1387_v18 = vpop.f32.mrb[20].mxu1 }
 0x115   : > { %v13567_v19 = vadd.f32 %v1387_v18, %v769_v17  ;;  %v11036_v20 = vpop.f32.mrb[21].mxu0  ;;  %v11250_v22 = vpop.f32.mrb[21].mxu1  ;;  %v498_v18 = vpack.c.bf16 %v429_v8, %v428_v6 }
 0x116   : > { %v772_v25 = vpop.f32.mrb[22].mxu0  ;;  %v1390_v26 = vpop.f32.mrb[22].mxu1  ;;  %v339_v20 = vpack.c.bf16 %v270_v11, %v269_v10 }
 0x117   : > { %v13569_v27 = vadd.f32 %v1390_v26, %v772_v25  ;;  %v11037_v28 = vpop.f32.mrb[23].mxu0  ;;  %v11251_v29 = vpop.f32.mrb[23].mxu1 }
 0x118   : > { %v430_v28 = vld [vmem:[%s13215_s24 + $0x241] sm:$0xff]  ;;  %v431_v29 = vld [vmem:[%s13215_s24 + $0x249] sm:$0xff] }
 0x119   : > { %11143 = vmatmul.mubr.msk.bf16.gmra.mrb[128].mxu0 %vm528_vm3, %v495_v23  ;;  %11357 = vmatmul.mubr.msk.bf16.gmra.mrb[128].mxu1 %vm528_vm3, %v336_v24 }
 0x11a   : > { %11146 = vmatprep.mubr.msk.bf16.mxu0 %vm13158_vm2, %v17666_v1  ;;  %11360 = vmatprep.mubr.msk.bf16.mxu1 %vm13158_vm2, %v17666_v1 }
 0x11c   : > { %v777_v35 = vpop.f32.mrb[24].mxu0  ;;  %v1395_v36 = vpop.f32.mrb[24].mxu1 }
 0x11d   : > { %v13581_v38 = vadd.f32 %v1395_v36, %v777_v35  ;;  %v11040_v39 = vpop.f32.mrb[25].mxu0  ;;  %v11254_v40 = vpop.f32.mrb[25].mxu1 }
 0x11e   : > { %v780_v43 = vpop.f32.mrb[26].mxu0  ;;  %v1398_v44 = vpop.f32.mrb[26].mxu1  ;;  %v499_v40 = vpack.c.bf16 %v431_v29, %v430_v28 }
 0x11f   : > { %v13583_v45 = vadd.f32 %v1398_v44, %v780_v43  ;;  %v11041_v47 = vpop.f32.mrb[27].mxu0  ;;  %v11255_v48 = vpop.f32.mrb[27].mxu1 }
 0x121   : > { %11147 = vmatmul.mubr.msk.bf16.gmra.mrb[132].mxu0 %vm528_vm3, %v496_v41  ;;  %11361 = vmatmul.mubr.msk.bf16.gmra.mrb[132].mxu1 %vm528_vm3, %v337_v42  ;;  %v340_v41 = vpack.c.bf16 %v272_v32, %v271_v31 }
 0x122   : > { %11150 = vmatprep.mubr.msk.bf16.mxu0 %vm13158_vm2, %v17666_v1  ;;  %11364 = vmatprep.mubr.msk.bf16.mxu1 %vm13158_vm2, %v17666_v1 }
 0x124   : > { %v785_v54 = vpop.f32.mrb[28].mxu0  ;;  %v1403_v55 = vpop.f32.mrb[28].mxu1 }
 0x125   : > { %v13595_v56 = vadd.f32 %v1403_v55, %v785_v54  ;;  %v11044_v57 = vpop.f32.mrb[29].mxu0  ;;  %v11258_v58 = vpop.f32.mrb[29].mxu1  ;;  %v273_v54 = vld [vmem:[%s13215_s24 + $0x250] sm:$0xff]  ;;  %v274_v55 = vld [vmem:[%s13215_s24 + $0x258] sm:$0xff] }
 0x126   : > { %v788_v62 = vpop.f32.mrb[30].mxu0  ;;  %v1406_v0 = vpop.f32.mrb[30].mxu1  ;;  %v2821_v57 = vshrl.u32 %v13015_v49, 16  ;;  %v2825_v58 = vrot.slane %v2823_v51, 1  ;;  %v341_v6 = vpack.c.bf16 %v274_v55, %v273_v54 }
 0x127   : > { %v13597_v2 = vadd.f32 %v1406_v0, %v788_v62  ;;  %v11045_v3 = vpop.f32.mrb[31].mxu0  ;;  %v11259_v5 = vpop.f32.mrb[31].mxu1 }
 0x128   : > { %v500_v5 = vpack.c.bf16 %v433_v52, %v432_v50  ;;  %v2826_v8 = vor.u32 %v2825_v58, %v2821_v57 }
 0x129   : > { %11151 = vmatmul.mubr.msk.bf16.gmra.mrb[136].mxu0 %vm528_vm3, %v497_v59  ;;  %11365 = vmatmul.mubr.msk.bf16.gmra.mrb[136].mxu1 %vm528_vm3, %v338_v61 }
 0x12a   : > { %11154 = vmatprep.mubr.msk.bf16.mxu0 %vm13158_vm2, %v17666_v1  ;;  %11368 = vmatprep.mubr.msk.bf16.mxu1 %vm13158_vm2, %v17666_v1 }
 0x12c   : > { %v793_v12 = vpop.f32.mrb[32].mxu0  ;;  %v1411_v13 = vpop.f32.mrb[32].mxu1 }
 0x12d   : > { %v13609_v15 = vadd.f32 %v1411_v13, %v793_v12  ;;  %v11048_v16 = vpop.f32.mrb[33].mxu0  ;;  %v11262_v17 = vpop.f32.mrb[33].mxu1 }
 0x12e   : > { %v796_v22 = vpop.f32.mrb[34].mxu0  ;;  %v1414_v23 = vpop.f32.mrb[34].mxu1  ;;  %v2987_v17 = vand.u32 %v2826_v8, %v13204_v7  ;;  %v279_v8 = vld [vmem:[%s13215_s24 + $0x280] sm:$0xff] }
 0x12f   : > { %v13611_v24 = vadd.f32 %v1414_v23, %v796_v22  ;;  %v11049_v25 = vpop.f32.mrb[35].mxu0  ;;  %v11263_v26 = vpop.f32.mrb[35].mxu1  ;;  %v275_v22 = vld [vmem:[%s13215_s24 + $0x260] sm:$0xff]  ;;  %v276_v23 = vld [vmem:[%s13215_s24 + $0x268] sm:$0xff] }
 0x130   : > { %11655 = vmatpush3.bf16.msra.mxu1 %v2987_v17 }
 0x131   : > { %11155 = vmatmul.mubr.msk.bf16.gmra.mrb[140].mxu0 %vm528_vm3, %v498_v18  ;;  %11369 = vmatmul.mubr.msk.bf16.gmra.mrb[140].mxu1 %vm528_vm3, %v339_v20  ;;  %v434_v18 = vld [vmem:[%s13215_s24 + $0x261] sm:$0xff]  ;;  %v435_v20 = vld [vmem:[%s13215_s24 + $0x269] sm:$0xff] }
 0x132   : > { %11158 = vmatprep.mubr.msk.bf16.mxu0 %vm13158_vm2, %v17666_v1  ;;  %11372 = vmatprep.mubr.msk.bf16.mxu1 %vm13158_vm2, %v17666_v1  ;;  %v501_v32 = vpack.c.bf16 %v435_v20, %v434_v18 }
 0x133   : > { %12082 = vmatprep.subr.bf16.mxu1 %v17666_v1 }
 0x134   : > { %v801_v33 = vpop.f32.mrb[36].mxu0  ;;  %v1419_v34 = vpop.f32.mrb[36].mxu1 }
 0x135   : > { %v13623_v35 = vadd.f32 %v1419_v34, %v801_v33  ;;  %v11052_v36 = vpop.f32.mrb[37].mxu0  ;;  %v11266_v39 = vpop.f32.mrb[37].mxu1  ;;  %v342_v33 = vpack.c.bf16 %v276_v23, %v275_v22 }
 0x136   : > { %v804_v42 = vpop.f32.mrb[38].mxu0  ;;  %v1422_v43 = vpop.f32.mrb[38].mxu1 }
 0x137   : > { %v13625_v44 = vadd.f32 %v1422_v43, %v804_v42  ;;  %v11053_v47 = vpop.f32.mrb[39].mxu0  ;;  %v11267_v48 = vpop.f32.mrb[39].mxu1  ;;  %v436_v42 = vld [vmem:[%s13215_s24 + $0x271] sm:$0xff]  ;;  %v437_v43 = vld [vmem:[%s13215_s24 + $0x279] sm:$0xff] }
 0x138   : > { %v277_v47 = vld [vmem:[%s13215_s24 + $0x270] sm:$0xff]  ;;  %v278_v48 = vld [vmem:[%s13215_s24 + $0x278] sm:$0xff]  ;;  %v502_v55 = vpack.c.bf16 %v437_v43, %v436_v42 }
 0x139   : > { %11159 = vmatmul.mubr.msk.bf16.gmra.mrb[144].mxu0 %vm528_vm3, %v499_v40  ;;  %11373 = vmatmul.mubr.msk.bf16.gmra.mrb[144].mxu1 %vm528_vm3, %v340_v41  ;;  %v343_v57 = vpack.c.bf16 %v278_v48, %v277_v47 }
 0x13a   : > { %11162 = vmatprep.mubr.msk.bf16.mxu0 %vm13158_vm2, %v17666_v1  ;;  %11376 = vmatprep.mubr.msk.bf16.mxu1 %vm13158_vm2, %v17666_v1 }
 0x13c   : > { %v809_v59 = vpop.f32.mrb[40].mxu0  ;;  %v1427_v61 = vpop.f32.mrb[40].mxu1 }
 0x13d   : > { %v13640_v62 = vadd.f32 %v1427_v61, %v809_v59  ;;  %v11056_v0 = vpop.f32.mrb[41].mxu0  ;;  %v11270_v3 = vpop.f32.mrb[41].mxu1 }
 0x13e   : > { %v812_v10 = vpop.f32.mrb[42].mxu0  ;;  %v1430_v11 = vpop.f32.mrb[42].mxu1 }
 0x13f   : > { %v13642_v12 = vadd.f32 %v1430_v11, %v812_v10  ;;  %v11057_v13 = vpop.f32.mrb[43].mxu0  ;;  %v11271_v16 = vpop.f32.mrb[43].mxu1  ;;  %v280_v10 = vld [vmem:[%s13215_s24 + $0x288] sm:$0xff] }
 0x140   : > { %v344_v22 = vpack.c.bf16 %v280_v10, %v279_v8 }
 0x141   : > { %11163 = vmatmul.mubr.msk.bf16.gmra.mrb[148].mxu0 %vm528_vm3, %v500_v5  ;;  %11377 = vmatmul.mubr.msk.bf16.gmra.mrb[148].mxu1 %vm528_vm3, %v341_v6  ;;  %v438_v5 = vld [vmem:[%s13215_s24 + $0x281] sm:$0xff]  ;;  %v439_v6 = vld [vmem:[%s13215_s24 + $0x289] sm:$0xff] }
 0x142   : > { %11166 = vmatprep.mubr.msk.bf16.mxu0 %vm13158_vm2, %v17666_v1  ;;  %11380 = vmatprep.mubr.msk.bf16.mxu1 %vm13158_vm2, %v17666_v1  ;;  %v503_v20 = vpack.c.bf16 %v439_v6, %v438_v5 }
 0x144   : > { %v817_v25 = vpop.f32.mrb[44].mxu0  ;;  %v1435_v26 = vpop.f32.mrb[44].mxu1 }
 0x145   : > { %v13656_v28 = vadd.f32 %v1435_v26, %v817_v25  ;;  %v11060_v29 = vpop.f32.mrb[45].mxu0  ;;  %v11274_v31 = vpop.f32.mrb[45].mxu1 }
 0x146   : > { %v820_v34 = vpop.f32.mrb[46].mxu0  ;;  %v1438_v36 = vpop.f32.mrb[46].mxu1 }
 0x147   : > { %v13658_v39 = vadd.f32 %v1438_v36, %v820_v34  ;;  %v11061_v40 = vpop.f32.mrb[47].mxu0  ;;  %v11275_v41 = vpop.f32.mrb[47].mxu1  ;;  %v281_v34 = vld [vmem:[%s13215_s24 + $0x290] sm:$0xff]  ;;  %v282_v36 = vld [vmem:[%s13215_s24 + $0x298] sm:$0xff] }
 0x149   : > { %11167 = vmatmul.mubr.msk.bf16.gmra.mrb[152].mxu0 %vm528_vm3, %v501_v32  ;;  %11381 = vmatmul.mubr.msk.bf16.gmra.mrb[152].mxu1 %vm528_vm3, %v342_v33  ;;  %v440_v32 = vld [vmem:[%s13215_s24 + $0x291] sm:$0xff]  ;;  %v441_v33 = vld [vmem:[%s13215_s24 + $0x299] sm:$0xff] }
 0x14a   : > { %11170 = vmatprep.mubr.msk.bf16.mxu0 %vm13158_vm2, %v17666_v1  ;;  %11384 = vmatprep.mubr.msk.bf16.mxu1 %vm13158_vm2, %v17666_v1  ;;  %v504_v48 = vpack.c.bf16 %v441_v33, %v440_v32  ;;  %v285_v32 = vld [vmem:[%s13215_s24 + $0x2b0] sm:$0xff]  ;;  %v286_v33 = vld [vmem:[%s13215_s24 + $0x2b8] sm:$0xff] }
 0x14c   : > { %v825_v49 = vpop.f32.mrb[48].mxu0  ;;  %v1443_v50 = vpop.f32.mrb[48].mxu1 }
 0x14d   : > { %v13670_v51 = vadd.f32 %v1443_v50, %v825_v49  ;;  %v11064_v52 = vpop.f32.mrb[49].mxu0  ;;  %v11278_v54 = vpop.f32.mrb[49].mxu1  ;;  %v345_v49 = vpack.c.bf16 %v282_v36, %v281_v34 }
 0x14e   : > { %v828_v58 = vpop.f32.mrb[50].mxu0  ;;  %v1446_v59 = vpop.f32.mrb[50].mxu1 }
 0x14f   : > { %v13672_v61 = vadd.f32 %v1446_v59, %v828_v58  ;;  %v11065_v0 = vpop.f32.mrb[51].mxu0  ;;  %v11279_v3 = vpop.f32.mrb[51].mxu1  ;;  %v442_v58 = vld [vmem:[%s13215_s24 + $0x2a1] sm:$0xff]  ;;  %v443_v59 = vld [vmem:[%s13215_s24 + $0x2a9] sm:$0xff] }
 0x150   : > { %v283_v0 = vld [vmem:[%s13215_s24 + $0x2a0] sm:$0xff]  ;;  %v284_v3 = vld [vmem:[%s13215_s24 + $0x2a8] sm:$0xff] }
 0x151   : > { %11171 = vmatmul.mubr.msk.bf16.gmra.mrb[156].mxu0 %vm528_vm3, %v502_v55  ;;  %11385 = vmatmul.mubr.msk.bf16.gmra.mrb[156].mxu1 %vm528_vm3, %v343_v57 }
 0x152   : > { %11174 = vmatprep.mubr.msk.bf16.mxu0 %vm13158_vm2, %v17666_v1  ;;  %11388 = vmatprep.mubr.msk.bf16.mxu1 %vm13158_vm2, %v17666_v1 }
 0x154   : > { %v833_v11 = vpop.f32.mrb[52].mxu0  ;;  %v1451_v13 = vpop.f32.mrb[52].mxu1 }
 0x155   : > { %v13684_v16 = vadd.f32 %v1451_v13, %v833_v11  ;;  %v11068_v17 = vpop.f32.mrb[53].mxu0  ;;  %v11282_v18 = vpop.f32.mrb[53].mxu1  ;;  %v505_v13 = vpack.c.bf16 %v443_v59, %v442_v58  ;;  %v446_v58 = vld [vmem:[%s13215_s24 + $0x2c1] sm:$0xff]  ;;  %v447_v59 = vld [vmem:[%s13215_s24 + $0x2c9] sm:$0xff] }
 0x156   : > { %v836_v23 = vpop.f32.mrb[54].mxu0  ;;  %v1454_v25 = vpop.f32.mrb[54].mxu1  ;;  %v346_v17 = vpack.c.bf16 %v284_v3, %v283_v0  ;;  %v287_v0 = vld [vmem:[%s13215_s24 + $0x2c0] sm:$0xff]  ;;  %v288_v3 = vld [vmem:[%s13215_s24 + $0x2c8] sm:$0xff] }
 0x157   : > { %v13686_v26 = vadd.f32 %v1454_v25, %v836_v23  ;;  %v11069_v29 = vpop.f32.mrb[55].mxu0  ;;  %v11283_v31 = vpop.f32.mrb[55].mxu1 }
 0x158   : > { %v444_v29 = vld [vmem:[%s13215_s24 + $0x2b1] sm:$0xff]  ;;  %v445_v31 = vld [vmem:[%s13215_s24 + $0x2b9] sm:$0xff] }
 0x159   : > { %11175 = vmatmul.mubr.msk.bf16.gmra.mrb[160].mxu0 %vm528_vm3, %v503_v20  ;;  %11389 = vmatmul.mubr.msk.bf16.gmra.mrb[160].mxu1 %vm528_vm3, %v344_v22 }
 0x15a   : > { %11178 = vmatprep.mubr.msk.bf16.mxu0 %vm13158_vm2, %v17666_v1  ;;  %11392 = vmatprep.mubr.msk.bf16.mxu1 %vm13158_vm2, %v17666_v1 }
 0x15c   : > { %v841_v40 = vpop.f32.mrb[56].mxu0  ;;  %v1459_v41 = vpop.f32.mrb[56].mxu1 }
 0x15d   : > { %v13698_v42 = vadd.f32 %v1459_v41, %v841_v40  ;;  %v11072_v43 = vpop.f32.mrb[57].mxu0  ;;  %v11286_v47 = vpop.f32.mrb[57].mxu1 }
 0x15e   : > { %v844_v50 = vpop.f32.mrb[58].mxu0  ;;  %v1462_v52 = vpop.f32.mrb[58].mxu1  ;;  %v506_v47 = vpack.c.bf16 %v445_v31, %v444_v29 }
 0x15f   : > { %v13700_v54 = vadd.f32 %v1462_v52, %v844_v50  ;;  %v11073_v55 = vpop.f32.mrb[59].mxu0  ;;  %v11287_v57 = vpop.f32.mrb[59].mxu1 }
 0x161   : > { %11179 = vmatmul.mubr.msk.bf16.gmra.mrb[164].mxu0 %vm528_vm3, %v504_v48  ;;  %11393 = vmatmul.mubr.msk.bf16.gmra.mrb[164].mxu1 %vm528_vm3, %v345_v49  ;;  %v347_v48 = vpack.c.bf16 %v286_v33, %v285_v32  ;;  %v448_v32 = vld [vmem:[%s13215_s24 + $0x2d1] sm:$0xff]  ;;  %v449_v33 = vld [vmem:[%s13215_s24 + $0x2d9] sm:$0xff] }
 0x162   : > { %11182 = vmatprep.mubr.msk.bf16.mxu0 %vm13158_vm2, %v17666_v1  ;;  %11396 = vmatprep.mubr.msk.bf16.mxu1 %vm13158_vm2, %v17666_v1 }
 0x164   : > { %v849_v5 = vpop.f32.mrb[60].mxu0  ;;  %v1467_v6 = vpop.f32.mrb[60].mxu1 }
 0x165   : > { %v13712_v8 = vadd.f32 %v1467_v6, %v849_v5  ;;  %v11076_v10 = vpop.f32.mrb[61].mxu0  ;;  %v11290_v11 = vpop.f32.mrb[61].mxu1 }
 0x166   : > { %v852_v18 = vpop.f32.mrb[62].mxu0  ;;  %v1470_v20 = vpop.f32.mrb[62].mxu1 }
 0x167   : > { %v13714_v22 = vadd.f32 %v1470_v20, %v852_v18  ;;  %v11077_v23 = vpop.f32.mrb[63].mxu0  ;;  %v11291_v25 = vpop.f32.mrb[63].mxu1  ;;  %v348_v18 = vpack.c.bf16 %v288_v3, %v287_v0 }
 0x169   : > { %11183 = vmatmul.mubr.msk.bf16.gmra.mrb[168].mxu0 %vm528_vm3, %v505_v13  ;;  %11397 = vmatmul.mubr.msk.bf16.gmra.mrb[168].mxu1 %vm528_vm3, %v346_v17  ;;  %v507_v17 = vpack.c.bf16 %v447_v59, %v446_v58 }
 0x16a   : > { %11186 = vmatprep.mubr.msk.bf16.mxu0 %vm13158_vm2, %v17666_v1  ;;  %11400 = vmatprep.mubr.msk.bf16.mxu1 %vm13158_vm2, %v17666_v1 }
 0x16c   : > { %v857_v34 = vpop.f32.mrb[64].mxu0  ;;  %v1475_v36 = vpop.f32.mrb[64].mxu1 }
 0x16d   : > { %v13726_v40 = vadd.f32 %v1475_v36, %v857_v34  ;;  %v11080_v41 = vpop.f32.mrb[65].mxu0  ;;  %v11294_v43 = vpop.f32.mrb[65].mxu1  ;;  %v289_v34 = vld [vmem:[%s13215_s24 + $0x2d0] sm:$0xff]  ;;  %v290_v36 = vld [vmem:[%s13215_s24 + $0x2d8] sm:$0xff] }
 0x16e   : > { %v860_v49 = vpop.f32.mrb[66].mxu0  ;;  %v1478_v50 = vpop.f32.mrb[66].mxu1 }
 0x16f   : > { %v13728_v52 = vadd.f32 %v1478_v50, %v860_v49  ;;  %v11081_v55 = vpop.f32.mrb[67].mxu0  ;;  %v11295_v57 = vpop.f32.mrb[67].mxu1  ;;  %v508_v50 = vpack.c.bf16 %v449_v33, %v448_v32 }
 0x170   : > { %v349_v55 = vpack.c.bf16 %v290_v36, %v289_v34 }
 0x171   : > { %11187 = vmatmul.mubr.msk.bf16.gmra.mrb[172].mxu0 %vm528_vm3, %v506_v47  ;;  %11401 = vmatmul.mubr.msk.bf16.gmra.mrb[172].mxu1 %vm528_vm3, %v347_v48 }
 0x172   : > { %11190 = vmatprep.mubr.msk.bf16.mxu0 %vm13158_vm2, %v17666_v1  ;;  %11404 = vmatprep.mubr.msk.bf16.mxu1 %vm13158_vm2, %v17666_v1 }
 0x174   : > { %v865_v5 = vpop.f32.mrb[68].mxu0  ;;  %v1483_v6 = vpop.f32.mrb[68].mxu1 }
 0x175   : > { %v13740_v10 = vadd.f32 %v1483_v6, %v865_v5  ;;  %v11084_v11 = vpop.f32.mrb[69].mxu0  ;;  %v11298_v13 = vpop.f32.mrb[69].mxu1  ;;  %v450_v5 = vld [vmem:[%s13215_s24 + $0x2e1] sm:$0xff]  ;;  %v451_v6 = vld [vmem:[%s13215_s24 + $0x2e9] sm:$0xff] }
 0x176   : > { %v868_v20 = vpop.f32.mrb[70].mxu0  ;;  %v1486_v23 = vpop.f32.mrb[70].mxu1  ;;  %v291_v11 = vld [vmem:[%s13215_s24 + $0x2e0] sm:$0xff]  ;;  %v292_v13 = vld [vmem:[%s13215_s24 + $0x2e8] sm:$0xff] }
 0x177   : > { %v13742_v25 = vadd.f32 %v1486_v23, %v868_v20  ;;  %v11085_v29 = vpop.f32.mrb[71].mxu0  ;;  %v11299_v31 = vpop.f32.mrb[71].mxu1  ;;  %v350_v32 = vpack.c.bf16 %v292_v13, %v291_v11 }
 0x178   : > { %v509_v31 = vpack.c.bf16 %v451_v6, %v450_v5 }
 0x179   : > { %11191 = vmatmul.mubr.msk.bf16.gmra.mrb[176].mxu0 %vm528_vm3, %v507_v17  ;;  %11405 = vmatmul.mubr.msk.bf16.gmra.mrb[176].mxu1 %vm528_vm3, %v348_v18 }
 0x17a   : > { %11194 = vmatprep.mubr.msk.bf16.mxu0 %vm13158_vm2, %v17666_v1  ;;  %11408 = vmatprep.mubr.msk.bf16.mxu1 %vm13158_vm2, %v17666_v1 }
 0x17c   : > { %v873_v41 = vpop.f32.mrb[72].mxu0  ;;  %v1491_v43 = vpop.f32.mrb[72].mxu1 }
 0x17d   : > { %v13754_v47 = vadd.f32 %v1491_v43, %v873_v41  ;;  %v11088_v48 = vpop.f32.mrb[73].mxu0  ;;  %v11302_v49 = vpop.f32.mrb[73].mxu1 }
 0x17e   : > { %v876_v57 = vpop.f32.mrb[74].mxu0  ;;  %v1494_v58 = vpop.f32.mrb[74].mxu1  ;;  %v452_v48 = vld [vmem:[%s13215_s24 + $0x2f1] sm:$0xff]  ;;  %v453_v49 = vld [vmem:[%s13215_s24 + $0x2f9] sm:$0xff] }
 0x17f   : > { %v13756_v59 = vadd.f32 %v1494_v58, %v876_v57  ;;  %v11089_v0 = vpop.f32.mrb[75].mxu0  ;;  %v11303_v3 = vpop.f32.mrb[75].mxu1  ;;  %v510_v6 = vpack.c.bf16 %v453_v49, %v452_v48 }
 0x181   : > { %11195 = vmatmul.mubr.msk.bf16.gmra.mrb[180].mxu0 %vm528_vm3, %v508_v50  ;;  %11409 = vmatmul.mubr.msk.bf16.gmra.mrb[180].mxu1 %vm528_vm3, %v349_v55  ;;  %v293_v50 = vld [vmem:[%s13215_s24 + $0x2f0] sm:$0xff]  ;;  %v294_v55 = vld [vmem:[%s13215_s24 + $0x2f8] sm:$0xff] }
 0x182   : > { %11198 = vmatprep.mubr.msk.bf16.mxu0 %vm13158_vm2, %v17666_v1  ;;  %11412 = vmatprep.mubr.msk.bf16.mxu1 %vm13158_vm2, %v17666_v1  ;;  %v351_v11 = vpack.c.bf16 %v294_v55, %v293_v50 }
 0x184   : > { %v881_v17 = vpop.f32.mrb[76].mxu0  ;;  %v1499_v18 = vpop.f32.mrb[76].mxu1 }
 0x185   : > { %v13768_v20 = vadd.f32 %v1499_v18, %v881_v17  ;;  %v11092_v23 = vpop.f32.mrb[77].mxu0  ;;  %v11306_v29 = vpop.f32.mrb[77].mxu1 }
 0x186   : > { %v884_v33 = vpop.f32.mrb[78].mxu0  ;;  %v1502_v34 = vpop.f32.mrb[78].mxu1 }
 0x187   : > { %v13770_v36 = vadd.f32 %v1502_v34, %v884_v33  ;;  %v11093_v41 = vpop.f32.mrb[79].mxu0  ;;  %v11307_v43 = vpop.f32.mrb[79].mxu1  ;;  %v295_v33 = vld [vmem:[%s13215_s24 + $0x300] sm:$0xff]  ;;  %v296_v34 = vld [vmem:[%s13215_s24 + $0x308] sm:$0xff] }
 0x189   : > { %11199 = vmatmul.mubr.msk.bf16.gmra.mrb[184].mxu0 %vm528_vm3, %v509_v31  ;;  %11413 = vmatmul.mubr.msk.bf16.gmra.mrb[184].mxu1 %vm528_vm3, %v350_v32  ;;  %v454_v31 = vld [vmem:[%s13215_s24 + $0x301] sm:$0xff]  ;;  %v455_v32 = vld [vmem:[%s13215_s24 + $0x309] sm:$0xff] }
 0x18a   : > { %11202 = vmatprep.mubr.msk.bf16.mxu0 %vm13158_vm2, %v17666_v1  ;;  %11416 = vmatprep.mubr.msk.bf16.mxu1 %vm13158_vm2, %v17666_v1  ;;  %v511_v55 = vpack.c.bf16 %v455_v32, %v454_v31 }
 0x18c   : > { %v889_v57 = vpop.f32.mrb[80].mxu0  ;;  %v1507_v58 = vpop.f32.mrb[80].mxu1 }
 0x18d   : > { %v13782_v0 = vadd.f32 %v1507_v58, %v889_v57  ;;  %v11096_v3 = vpop.f32.mrb[81].mxu0  ;;  %v11310_v5 = vpop.f32.mrb[81].mxu1  ;;  %v352_v57 = vpack.c.bf16 %v296_v34, %v295_v33 }
 0x18e   : > { %v892_v13 = vpop.f32.mrb[82].mxu0  ;;  %v1510_v17 = vpop.f32.mrb[82].mxu1 }
 0x18f   : > { %v13784_v18 = vadd.f32 %v1510_v17, %v892_v13  ;;  %v11097_v23 = vpop.f32.mrb[83].mxu0  ;;  %v11311_v29 = vpop.f32.mrb[83].mxu1  ;;  %v456_v13 = vld [vmem:[%s13215_s24 + $0x311] sm:$0xff]  ;;  %v457_v17 = vld [vmem:[%s13215_s24 + $0x319] sm:$0xff] }
 0x190   : > { %v297_v23 = vld [vmem:[%s13215_s24 + $0x310] sm:$0xff]  ;;  %v298_v29 = vld [vmem:[%s13215_s24 + $0x318] sm:$0xff] }
 0x191   : > { %11203 = vmatmul.mubr.msk.bf16.gmra.mrb[188].mxu0 %vm528_vm3, %v510_v6  ;;  %11417 = vmatmul.mubr.msk.bf16.gmra.mrb[188].mxu1 %vm528_vm3, %v351_v11 }
 0x192   : > { %11206 = vmatprep.mubr.msk.bf16.mxu0 %vm13158_vm2, %v17666_v1  ;;  %11420 = vmatprep.mubr.msk.bf16.mxu1 %vm13158_vm2, %v17666_v1 }
 0x194   : > { %v897_v41 = vpop.f32.mrb[84].mxu0  ;;  %v1515_v43 = vpop.f32.mrb[84].mxu1 }
 0x195   : > { %v13796_v48 = vadd.f32 %v1515_v43, %v897_v41  ;;  %v11100_v49 = vpop.f32.mrb[85].mxu0  ;;  %v11314_v50 = vpop.f32.mrb[85].mxu1  ;;  %v512_v43 = vpack.c.bf16 %v457_v17, %v456_v13  ;;  %v299_v13 = vld [vmem:[%s13215_s24 + $0x320] sm:$0xff]  ;;  %v300_v17 = vld [vmem:[%s13215_s24 + $0x328] sm:$0xff] }
 0x196   : > { %v900_v58 = vpop.f32.mrb[86].mxu0  ;;  %v1518_v3 = vpop.f32.mrb[86].mxu1  ;;  %v353_v49 = vpack.c.bf16 %v298_v29, %v297_v23 }
 0x197   : > { %v13798_v5 = vadd.f32 %v1518_v3, %v900_v58  ;;  %v11101_v6 = vpop.f32.mrb[87].mxu0  ;;  %v11315_v11 = vpop.f32.mrb[87].mxu1 }
 0x198   : > { %v458_v6 = vld [vmem:[%s13215_s24 + $0x321] sm:$0xff]  ;;  %v459_v11 = vld [vmem:[%s13215_s24 + $0x329] sm:$0xff] }
 0x199   : > { %11207 = vmatmul.mubr.msk.bf16.gmra.mrb[192].mxu0 %vm528_vm3, %v511_v55  ;;  %11421 = vmatmul.mubr.msk.bf16.gmra.mrb[192].mxu1 %vm528_vm3, %v352_v57 }
 0x19a   : > { %11210 = vmatprep.mubr.msk.bf16.mxu0 %vm13158_vm2, %v17666_v1  ;;  %11424 = vmatprep.mubr.msk.bf16.mxu1 %vm13158_vm2, %v17666_v1 }
 0x19c   : > { %v905_v31 = vpop.f32.mrb[88].mxu0  ;;  %v1523_v32 = vpop.f32.mrb[88].mxu1 }
 0x19d   : > { %v13810_v33 = vadd.f32 %v1523_v32, %v905_v31  ;;  %v11104_v34 = vpop.f32.mrb[89].mxu0  ;;  %v11318_v41 = vpop.f32.mrb[89].mxu1 }
 0x19e   : > { %v908_v50 = vpop.f32.mrb[90].mxu0  ;;  %v1526_v55 = vpop.f32.mrb[90].mxu1  ;;  %v513_v41 = vpack.c.bf16 %v459_v11, %v458_v6  ;;  %v301_v6 = vld [vmem:[%s13215_s24 + $0x330] sm:$0xff]  ;;  %v302_v11 = vld [vmem:[%s13215_s24 + $0x338] sm:$0xff] }
 0x19f   : > { %17668 = vst [vmem:[#allocation2_spill] sm:$0xff] %v13810_v33  ;;  %v13812_v57 = vadd.f32 %v1526_v55, %v908_v50  ;;  %v11105_v58 = vpop.f32.mrb[91].mxu0  ;;  %v11319_v3 = vpop.f32.mrb[91].mxu1 }
 0x1a1   : > { %17669 = vst [vmem:[#allocation3_spill] sm:$0xff] %v13812_v57  ;;  %11211 = vmatmul.mubr.msk.bf16.gmra.mrb[196].mxu0 %vm528_vm3, %v512_v43  ;;  %11425 = vmatmul.mubr.msk.bf16.gmra.mrb[196].mxu1 %vm528_vm3, %v353_v49  ;;  %v354_v43 = vpack.c.bf16 %v300_v17, %v299_v13  ;;  %v17672_v57 = vmov 0.0  }
 0x1a2   : > { %11214 = vmatprep.mubr.msk.bf16.mxu0 %vm13158_vm2, %v17666_v1  ;;  %11428 = vmatprep.mubr.msk.bf16.mxu1 %vm13158_vm2, %v17666_v1  ;;  %v460_v1 = vld [vmem:[%s13215_s24 + $0x331] sm:$0xff] }
 0x1a4   : > { %v913_v23 = vpop.f32.mrb[92].mxu0  ;;  %v1531_v29 = vpop.f32.mrb[92].mxu1 }
 0x1a5   : > { %v13824_v31 = vadd.f32 %v1531_v29, %v913_v23  ;;  %v11108_v32 = vpop.f32.mrb[93].mxu0  ;;  %v11322_v34 = vpop.f32.mrb[93].mxu1  ;;  %v461_v23 = vld [vmem:[%s13215_s24 + $0x339] sm:$0xff] }
 0x1a6   : > { %v916_v49 = vpop.f32.mrb[94].mxu0  ;;  %v1534_v50 = vpop.f32.mrb[94].mxu1 }
 0x1a7   : > { %17670 = vst [vmem:[#allocation4_spill] sm:$0xff] %v13824_v31  ;;  %v13826_v55 = vadd.f32 %v1534_v50, %v916_v49  ;;  %v11109_v58 = vpop.f32.mrb[95].mxu0  ;;  %v11323_v3 = vpop.f32.mrb[95].mxu1  ;;  %v1771_v31 = vld [vmem:[%s13215_s24 + $0x12] sm:$0xff] }
 0x1a9   : > { %17671 = vst [vmem:[#allocation5_spill] sm:$0xff] %v13826_v55  ;;  %11215 = vmatmul.mubr.msk.bf16.gmra.mrb[200].mxu0 %vm528_vm3, %v513_v41  ;;  %11429 = vmatmul.mubr.msk.bf16.gmra.mrb[200].mxu1 %vm528_vm3, %v354_v43  ;;  %v514_v41 = vpack.c.bf16 %v461_v23, %v460_v1  ;;  %v355_v43 = vpack.c.bf16 %v302_v11, %v301_v6  ;;  %v303_v1 = vld [vmem:[%s13215_s24 + $0x340] sm:$0x3f] }
 0x1aa   : > { %11218 = vmatprep.mubr.msk.bf16.mxu0 %vm13158_vm2, %v17672_v57  ;;  %11432 = vmatprep.mubr.msk.bf16.mxu1 %vm13158_vm2, %v17672_v57 }
 0x1ac   : > { %v921_v13 = vpop.f32.mrb[96].mxu0  ;;  %v1539_v17 = vpop.f32.mrb[96].mxu1 }
 0x1ad   : > { %v13838_v29 = vadd.f32 %v1539_v17, %v921_v13  ;;  %v11112_v32 = vpop.f32.mrb[97].mxu0  ;;  %v11326_v34 = vpop.f32.mrb[97].mxu1  ;;  %v462_v13 = vld [vmem:[%s13215_s24 + $0x341] sm:$0x3f] }
 0x1ae   : > { %v924_v49 = vpop.f32.mrb[98].mxu0  ;;  %v1542_v50 = vpop.f32.mrb[98].mxu1  ;;  %v515_v32 = vpack.c.bf16 %v462_v13, %v462_v13  ;;  %v356_v34 = vpack.c.bf16 %v303_v1, %v303_v1  ;;  %v2658_v13 = vld [vmem:[%s13215_s24 + $0x1e] sm:$0xff]  ;;  %v2659_v1 = vld [vmem:[%s13215_s24 + $0x26] sm:$0xff] }
 0x1af   : > { %17673 = vst [vmem:[#allocation6_spill] sm:$0xff] %v13838_v29  ;;  %v13840_v58 = vadd.f32 %v1542_v50, %v924_v49  ;;  %v11113_v3 = vpop.f32.mrb[99].mxu0  ;;  %v11327_v55 = vpop.f32.mrb[99].mxu1 }
 0x1b1   : > { %17674 = vst [vmem:[#allocation7_spill] sm:$0xff] %v13840_v58  ;;  %11219 = vmatmul.mubr.msk.bf16.gmra.mrb[204].mxu0 %vm528_vm3, %v514_v41  ;;  %11433 = vmatmul.mubr.msk.bf16.gmra.mrb[204].mxu1 %vm528_vm3, %v355_v43  ;;  %v1769_v58 = vld [vmem:[%s13215_s24 + $0x2] sm:$0xff] }
 0x1b2   : > { %11222 = vmatprep.mubr.msk.bf16.mxu0 %vm13158_vm2, %v17672_v57  ;;  %11436 = vmatprep.mubr.msk.bf16.mxu1 %vm13158_vm2, %v17672_v57 }
 0x1b4   : > { %v929_v23 = vpop.f32.mrb[100].mxu0  ;;  %v1547_v6 = vpop.f32.mrb[100].mxu1 }
 0x1b5   : > { %v13850_v11 = vadd.f32 %v1547_v6, %v929_v23  ;;  %v11116_v55 = vpop.f32.mrb[101].mxu0  ;;  %v11330_v17 = vpop.f32.mrb[101].mxu1  ;;  %v1770_v23 = vld [vmem:[%s13215_s24 + $0xa] sm:$0xff] }
 0x1b6   : > { %v932_v41 = vpop.f32.mrb[102].mxu0  ;;  %v1550_v43 = vpop.f32.mrb[102].mxu1 }
 0x1b7   : > { %17675 = vst [vmem:[#allocation8_spill] sm:$0xff] %v13850_v11  ;;  %v13852_v49 = vadd.f32 %v1550_v43, %v932_v41  ;;  %v11117_v50 = vpop.f32.mrb[103].mxu0  ;;  %v11331_v3 = vpop.f32.mrb[103].mxu1  ;;  %v1874_v41 = vpack.c.bf16 %v1770_v23, %v1769_v58  ;;  %v2763_v43 = vpack.c.bf16 %v2659_v1, %v2658_v13  ;;  %v2660_v58 = vld [vmem:[%s13215_s24 + $0x2e] sm:$0xff]  ;;  %v2661_v23 = vld [vmem:[%s13215_s24 + $0x36] sm:$0xff] }
 0x1b9   : > { %17676 = vst [vmem:[#allocation9_spill] sm:$0xff] %v13852_v49  ;;  %11223 = vmatmul.mubr.msk.bf16.gmra.mrb[208].mxu0 %vm528_vm3, %v515_v32  ;;  %11437 = vmatmul.mubr.msk.bf16.gmra.mrb[208].mxu1 %vm528_vm3, %v356_v34 }
 0x1ba   : > { %11442 = vmatprep.mubr.msk.bf16.mxu0 %vm13158_vm2, %v17672_v57  ;;  %11656 = vmatprep.mubr.msk.bf16.mxu1 %vm13158_vm2, %v17672_v57 }
 0x1bc   : > { %v937_v6 = vpop.f32.mrb[104].mxu0  ;;  %v1555_v55 = vpop.f32.mrb[104].mxu1 }
 0x1bd   : > { %v13864_v17 = vadd.f32 %v1555_v55, %v937_v6  ;;  %v11120_v32 = vpop.f32.mrb[105].mxu0  ;;  %v11334_v34 = vpop.f32.mrb[105].mxu1  ;;  %v1772_v6 = vld [vmem:[%s13215_s24 + $0x1a] sm:$0xff] }
 0x1be   : > { %v940_v50 = vpop.f32.mrb[106].mxu0  ;;  %v1558_v3 = vpop.f32.mrb[106].mxu1  ;;  %v1875_v32 = vpack.c.bf16 %v1772_v6, %v1771_v31  ;;  %v2764_v34 = vpack.c.bf16 %v2661_v23, %v2660_v58  ;;  %v2662_v31 = vld [vmem:[%s13215_s24 + $0x3e] sm:$0xff]  ;;  %v2663_v6 = vld [vmem:[%s13215_s24 + $0x46] sm:$0xff] }
 0x1bf   : > { %17677 = vst [vmem:[#allocation10_spill] sm:$0xff] %v13864_v17  ;;  %v13866_v49 = vadd.f32 %v1558_v3, %v940_v50  ;;  %v11121_v11 = vpop.f32.mrb[107].mxu0  ;;  %v11335_v29 = vpop.f32.mrb[107].mxu1  ;;  %v1773_v17 = vld [vmem:[%s13215_s24 + $0x22] sm:$0xff] }
 0x1c1   : > { %17678 = vst [vmem:[#allocation11_spill] sm:$0xff] %v13866_v49  ;;  %11443 = vmatmul.mubr.msk.bf16.vlgmr.msra.gmra.mrb[212].mxu0 %vm528_vm3, %v1874_v41  ;;  %11657 = vmatmul.mubr.msk.bf16.vlgmr.msra.gmra.mrb[212].mxu1 %vm528_vm3, %v2763_v43 }
 0x1c2   : > { %11446 = vmatprep.mubr.msk.bf16.mxu0 %vm13158_vm2, %v17672_v57  ;;  %11660 = vmatprep.mubr.msk.bf16.mxu1 %vm13158_vm2, %v17672_v57 }
 0x1c4   : > { %v945_v13 = vpop.f32.mrb[108].mxu0  ;;  %v1563_v1 = vpop.f32.mrb[108].mxu1 }
 0x1c5   : > { %v13878_v11 = vadd.f32 %v1563_v1, %v945_v13  ;;  %v11124_v29 = vpop.f32.mrb[109].mxu0  ;;  %v11338_v55 = vpop.f32.mrb[109].mxu1  ;;  %v1774_v13 = vld [vmem:[%s13215_s24 + $0x2a] sm:$0xff] }
 0x1c6   : > { %v948_v41 = vpop.f32.mrb[110].mxu0  ;;  %v1566_v43 = vpop.f32.mrb[110].mxu1  ;;  %v1876_v55 = vpack.c.bf16 %v1774_v13, %v1773_v17  ;;  %v2664_v17 = vld [vmem:[%s13215_s24 + $0x4e] sm:$0xff]  ;;  %v2665_v13 = vld [vmem:[%s13215_s24 + $0x56] sm:$0xff] }
 0x1c7   : > { %17679 = vst [vmem:[#allocation12_spill] sm:$0xff] %v13878_v11  ;;  %v13880_v50 = vadd.f32 %v1566_v43, %v948_v41  ;;  %v11125_v3 = vpop.f32.mrb[111].mxu0  ;;  %v11339_v49 = vpop.f32.mrb[111].mxu1  ;;  %v1775_v11 = vld [vmem:[%s13215_s24 + $0x32] sm:$0xff] }
 0x1c9   : > { %17680 = vst [vmem:[#allocation13_spill] sm:$0xff] %v13880_v50  ;;  %11447 = vmatmul.mubr.msk.bf16.gmra.mrb[216].mxu0 %vm528_vm3, %v1875_v32  ;;  %11661 = vmatmul.mubr.msk.bf16.gmra.mrb[216].mxu1 %vm528_vm3, %v2764_v34  ;;  %v2765_v32 = vpack.c.bf16 %v2663_v6, %v2662_v31 }
 0x1ca   : > { %11450 = vmatprep.mubr.msk.bf16.mxu0 %vm13158_vm2, %v17672_v57  ;;  %11664 = vmatprep.mubr.msk.bf16.mxu1 %vm13158_vm2, %v17672_v57 }
 0x1cc   : > { %v953_v58 = vpop.f32.mrb[112].mxu0  ;;  %v1571_v23 = vpop.f32.mrb[112].mxu1 }
 0x1cd   : > { %v13892_v1 = vadd.f32 %v1571_v23, %v953_v58  ;;  %v11128_v49 = vpop.f32.mrb[113].mxu0  ;;  %v11342_v29 = vpop.f32.mrb[113].mxu1  ;;  %v1776_v58 = vld [vmem:[%s13215_s24 + $0x3a] sm:$0xff] }
 0x1ce   : > { %v956_v34 = vpop.f32.mrb[114].mxu0  ;;  %v1574_v41 = vpop.f32.mrb[114].mxu1  ;;  %v1877_v29 = vpack.c.bf16 %v1776_v58, %v1775_v11  ;;  %v2666_v11 = vld [vmem:[%s13215_s24 + $0x5e] sm:$0xff]  ;;  %v2667_v58 = vld [vmem:[%s13215_s24 + $0x66] sm:$0xff] }
 0x1cf   : > { %17681 = vst [vmem:[#allocation14_spill] sm:$0xff] %v13892_v1  ;;  %v13894_v43 = vadd.f32 %v1574_v41, %v956_v34  ;;  %v11129_v3 = vpop.f32.mrb[115].mxu0  ;;  %v11343_v50 = vpop.f32.mrb[115].mxu1  ;;  %v1777_v1 = vld [vmem:[%s13215_s24 + $0x42] sm:$0xff] }
 0x1d1   : > { %17682 = vst [vmem:[#allocation15_spill] sm:$0xff] %v13894_v43  ;;  %11451 = vmatmul.mubr.msk.bf16.gmra.mrb[220].mxu0 %vm528_vm3, %v1876_v55  ;;  %11665 = vmatmul.mubr.msk.bf16.gmra.mrb[220].mxu1 %vm528_vm3, %v2765_v32  ;;  %v2766_v55 = vpack.c.bf16 %v2665_v13, %v2664_v17 }
 0x1d2   : > { %11454 = vmatprep.mubr.msk.bf16.mxu0 %vm13158_vm2, %v17672_v57  ;;  %11668 = vmatprep.mubr.msk.bf16.mxu1 %vm13158_vm2, %v17672_v57 }
 0x1d4   : > { %v961_v31 = vpop.f32.mrb[116].mxu0  ;;  %v1579_v6 = vpop.f32.mrb[116].mxu1 }
 0x1d5   : > { %v13906_v23 = vadd.f32 %v1579_v6, %v961_v31  ;;  %v11132_v50 = vpop.f32.mrb[117].mxu0  ;;  %v11346_v49 = vpop.f32.mrb[117].mxu1  ;;  %v1778_v31 = vld [vmem:[%s13215_s24 + $0x4a] sm:$0xff] }
 0x1d6   : > { %v964_v32 = vpop.f32.mrb[118].mxu0  ;;  %v1582_v34 = vpop.f32.mrb[118].mxu1  ;;  %v1878_v49 = vpack.c.bf16 %v1778_v31, %v1777_v1  ;;  %v2668_v1 = vld [vmem:[%s13215_s24 + $0x6e] sm:$0xff]  ;;  %v2669_v31 = vld [vmem:[%s13215_s24 + $0x76] sm:$0xff] }
 0x1d7   : > { %17683 = vst [vmem:[#allocation16_spill] sm:$0xff] %v13906_v23  ;;  %v13908_v41 = vadd.f32 %v1582_v34, %v964_v32  ;;  %v11133_v3 = vpop.f32.mrb[119].mxu0  ;;  %v11347_v43 = vpop.f32.mrb[119].mxu1  ;;  %v1779_v23 = vld [vmem:[%s13215_s24 + $0x52] sm:$0xff] }
 0x1d9   : > { %17684 = vst [vmem:[#allocation17_spill] sm:$0xff] %v13908_v41  ;;  %11455 = vmatmul.mubr.msk.bf16.gmra.mrb[224].mxu0 %vm528_vm3, %v1877_v29  ;;  %11669 = vmatmul.mubr.msk.bf16.gmra.mrb[224].mxu1 %vm528_vm3, %v2766_v55  ;;  %v2767_v29 = vpack.c.bf16 %v2667_v58, %v2666_v11 }
 0x1da   : > { %11458 = vmatprep.mubr.msk.bf16.mxu0 %vm13158_vm2, %v17672_v57  ;;  %11672 = vmatprep.mubr.msk.bf16.mxu1 %vm13158_vm2, %v17672_v57 }
 0x1dc   : > { %v969_v17 = vpop.f32.mrb[120].mxu0  ;;  %v1587_v13 = vpop.f32.mrb[120].mxu1 }
 0x1dd   : > { %v13920_v6 = vadd.f32 %v1587_v13, %v969_v17  ;;  %v11136_v43 = vpop.f32.mrb[121].mxu0  ;;  %v11350_v50 = vpop.f32.mrb[121].mxu1  ;;  %v1780_v17 = vld [vmem:[%s13215_s24 + $0x5a] sm:$0xff] }
 0x1de   : > { %v972_v55 = vpop.f32.mrb[122].mxu0  ;;  %v1590_v32 = vpop.f32.mrb[122].mxu1  ;;  %v1879_v50 = vpack.c.bf16 %v1780_v17, %v1779_v23  ;;  %v2670_v23 = vld [vmem:[%s13215_s24 + $0x7e] sm:$0xff]  ;;  %v2671_v17 = vld [vmem:[%s13215_s24 + $0x86] sm:$0xff] }
 0x1df   : > { %17685 = vst [vmem:[#allocation18_spill] sm:$0xff] %v13920_v6  ;;  %v13922_v34 = vadd.f32 %v1590_v32, %v972_v55  ;;  %v11137_v3 = vpop.f32.mrb[123].mxu0  ;;  %v11351_v41 = vpop.f32.mrb[123].mxu1  ;;  %v1781_v6 = vld [vmem:[%s13215_s24 + $0x62] sm:$0xff] }
 0x1e1   : > { %17686 = vst [vmem:[#allocation19_spill] sm:$0xff] %v13922_v34  ;;  %11459 = vmatmul.mubr.msk.bf16.gmra.mrb[228].mxu0 %vm528_vm3, %v1878_v49  ;;  %11673 = vmatmul.mubr.msk.bf16.gmra.mrb[228].mxu1 %vm528_vm3, %v2767_v29  ;;  %v2768_v49 = vpack.c.bf16 %v2669_v31, %v2668_v1 }
 0x1e2   : > { %11462 = vmatprep.mubr.msk.bf16.mxu0 %vm13158_vm2, %v17672_v57  ;;  %11676 = vmatprep.mubr.msk.bf16.mxu1 %vm13158_vm2, %v17672_v57 }
 0x1e4   : > { %v977_v11 = vpop.f32.mrb[124].mxu0  ;;  %v1595_v58 = vpop.f32.mrb[124].mxu1 }
 0x1e5   : > { %v13934_v13 = vadd.f32 %v1595_v58, %v977_v11  ;;  %v11140_v41 = vpop.f32.mrb[125].mxu0  ;;  %v11354_v43 = vpop.f32.mrb[125].mxu1  ;;  %v1782_v11 = vld [vmem:[%s13215_s24 + $0x6a] sm:$0xff] }
 0x1e6   : > { %v980_v29 = vpop.f32.mrb[126].mxu0  ;;  %v1598_v55 = vpop.f32.mrb[126].mxu1  ;;  %v1880_v43 = vpack.c.bf16 %v1782_v11, %v1781_v6  ;;  %v2672_v6 = vld [vmem:[%s13215_s24 + $0x8e] sm:$0xff]  ;;  %v2673_v11 = vld [vmem:[%s13215_s24 + $0x96] sm:$0xff] }
 0x1e7   : > { %17687 = vst [vmem:[#allocation20_spill] sm:$0xff] %v13934_v13  ;;  %v13936_v32 = vadd.f32 %v1598_v55, %v980_v29  ;;  %v11141_v3 = vpop.f32.mrb[127].mxu0  ;;  %v11355_v34 = vpop.f32.mrb[127].mxu1  ;;  %v1783_v13 = vld [vmem:[%s13215_s24 + $0x72] sm:$0xff] }
 0x1e9   : > { %17688 = vst [vmem:[#allocation21_spill] sm:$0xff] %v13936_v32  ;;  %11463 = vmatmul.mubr.msk.bf16.gmra.mrb[232].mxu0 %vm528_vm3, %v1879_v50  ;;  %11677 = vmatmul.mubr.msk.bf16.gmra.mrb[232].mxu1 %vm528_vm3, %v2768_v49  ;;  %v2769_v50 = vpack.c.bf16 %v2671_v17, %v2670_v23 }
 0x1ea   : > { %11466 = vmatprep.mubr.msk.bf16.mxu0 %vm13158_vm2, %v17672_v57  ;;  %11680 = vmatprep.mubr.msk.bf16.mxu1 %vm13158_vm2, %v17672_v57 }
 0x1ec   : > { %v985_v1 = vpop.f32.mrb[128].mxu0  ;;  %v1603_v31 = vpop.f32.mrb[128].mxu1 }
 0x1ed   : > { %v13948_v58 = vadd.f32 %v1603_v31, %v985_v1  ;;  %v11144_v34 = vpop.f32.mrb[129].mxu0  ;;  %v11358_v41 = vpop.f32.mrb[129].mxu1  ;;  %v1784_v1 = vld [vmem:[%s13215_s24 + $0x7a] sm:$0xff] }
 0x1ee   : > { %v988_v49 = vpop.f32.mrb[130].mxu0  ;;  %v1606_v29 = vpop.f32.mrb[130].mxu1  ;;  %v1881_v41 = vpack.c.bf16 %v1784_v1, %v1783_v13  ;;  %v2674_v13 = vld [vmem:[%s13215_s24 + $0x9e] sm:$0xff]  ;;  %v2675_v1 = vld [vmem:[%s13215_s24 + $0xa6] sm:$0xff] }
 0x1ef   : > { %17689 = vst [vmem:[#allocation22_spill] sm:$0xff] %v13948_v58  ;;  %v13950_v55 = vadd.f32 %v1606_v29, %v988_v49  ;;  %v11145_v3 = vpop.f32.mrb[131].mxu0  ;;  %v11359_v32 = vpop.f32.mrb[131].mxu1  ;;  %v1785_v58 = vld [vmem:[%s13215_s24 + $0x82] sm:$0xff] }
 0x1f1   : > { %17690 = vst [vmem:[#allocation23_spill] sm:$0xff] %v13950_v55  ;;  %11467 = vmatmul.mubr.msk.bf16.gmra.mrb[236].mxu0 %vm528_vm3, %v1880_v43  ;;  %11681 = vmatmul.mubr.msk.bf16.gmra.mrb[236].mxu1 %vm528_vm3, %v2769_v50  ;;  %v2770_v43 = vpack.c.bf16 %v2673_v11, %v2672_v6 }
 0x1f2   : > { %11470 = vmatprep.mubr.msk.bf16.mxu0 %vm13158_vm2, %v17672_v57  ;;  %11684 = vmatprep.mubr.msk.bf16.mxu1 %vm13158_vm2, %v17672_v57 }
 0x1f4   : > { %v993_v23 = vpop.f32.mrb[132].mxu0  ;;  %v1611_v17 = vpop.f32.mrb[132].mxu1 }
 0x1f5   : > { %v13962_v31 = vadd.f32 %v1611_v17, %v993_v23  ;;  %v11148_v32 = vpop.f32.mrb[133].mxu0  ;;  %v11362_v34 = vpop.f32.mrb[133].mxu1  ;;  %v1786_v23 = vld [vmem:[%s13215_s24 + $0x8a] sm:$0xff] }
 0x1f6   : > { %v996_v50 = vpop.f32.mrb[134].mxu0  ;;  %v1614_v49 = vpop.f32.mrb[134].mxu1  ;;  %v1882_v34 = vpack.c.bf16 %v1786_v23, %v1785_v58  ;;  %v2676_v58 = vld [vmem:[%s13215_s24 + $0xae] sm:$0xff]  ;;  %v2677_v23 = vld [vmem:[%s13215_s24 + $0xb6] sm:$0xff] }
 0x1f7   : > { %17691 = vst [vmem:[#allocation24_spill] sm:$0xff] %v13962_v31  ;;  %v13964_v29 = vadd.f32 %v1614_v49, %v996_v50  ;;  %v11149_v3 = vpop.f32.mrb[135].mxu0  ;;  %v11363_v55 = vpop.f32.mrb[135].mxu1  ;;  %v1787_v31 = vld [vmem:[%s13215_s24 + $0x92] sm:$0xff] }
 0x1f9   : > { %17692 = vst [vmem:[#allocation25_spill] sm:$0xff] %v13964_v29  ;;  %11471 = vmatmul.mubr.msk.bf16.gmra.mrb[240].mxu0 %vm528_vm3, %v1881_v41  ;;  %11685 = vmatmul.mubr.msk.bf16.gmra.mrb[240].mxu1 %vm528_vm3, %v2770_v43  ;;  %v2771_v41 = vpack.c.bf16 %v2675_v1, %v2674_v13 }
 0x1fa   : > { %11474 = vmatprep.mubr.msk.bf16.mxu0 %vm13158_vm2, %v17672_v57  ;;  %11688 = vmatprep.mubr.msk.bf16.mxu1 %vm13158_vm2, %v17672_v57 }
 0x1fc   : > { %v1001_v6 = vpop.f32.mrb[136].mxu0  ;;  %v1619_v11 = vpop.f32.mrb[136].mxu1 }
 0x1fd   : > { %v13976_v17 = vadd.f32 %v1619_v11, %v1001_v6  ;;  %v11152_v55 = vpop.f32.mrb[137].mxu0  ;;  %v11366_v32 = vpop.f32.mrb[137].mxu1  ;;  %v1788_v6 = vld [vmem:[%s13215_s24 + $0x9a] sm:$0xff] }
 0x1fe   : > { %v1004_v43 = vpop.f32.mrb[138].mxu0  ;;  %v1622_v50 = vpop.f32.mrb[138].mxu1  ;;  %v1883_v32 = vpack.c.bf16 %v1788_v6, %v1787_v31  ;;  %v2678_v31 = vld [vmem:[%s13215_s24 + $0xbe] sm:$0xff]  ;;  %v2679_v6 = vld [vmem:[%s13215_s24 + $0xc6] sm:$0xff] }
 0x1ff   : > { %17693 = vst [vmem:[#allocation26_spill] sm:$0xff] %v13976_v17  ;;  %v13978_v49 = vadd.f32 %v1622_v50, %v1004_v43  ;;  %v11153_v3 = vpop.f32.mrb[139].mxu0  ;;  %v11367_v29 = vpop.f32.mrb[139].mxu1  ;;  %v1789_v17 = vld [vmem:[%s13215_s24 + $0xa2] sm:$0xff] }
 0x201   : > { %17694 = vst [vmem:[#allocation27_spill] sm:$0xff] %v13978_v49  ;;  %11475 = vmatmul.mubr.msk.bf16.gmra.mrb[244].mxu0 %vm528_vm3, %v1882_v34  ;;  %11689 = vmatmul.mubr.msk.bf16.gmra.mrb[244].mxu1 %vm528_vm3, %v2771_v41  ;;  %v2772_v34 = vpack.c.bf16 %v2677_v23, %v2676_v58 }
 0x202   : > { %11478 = vmatprep.mubr.msk.bf16.mxu0 %vm13158_vm2, %v17672_v57  ;;  %11692 = vmatprep.mubr.msk.bf16.mxu1 %vm13158_vm2, %v17672_v57 }
 0x204   : > { %v1009_v13 = vpop.f32.mrb[140].mxu0  ;;  %v1627_v1 = vpop.f32.mrb[140].mxu1 }
 0x205   : > { %v13990_v11 = vadd.f32 %v1627_v1, %v1009_v13  ;;  %v11156_v29 = vpop.f32.mrb[141].mxu0  ;;  %v11370_v55 = vpop.f32.mrb[141].mxu1  ;;  %v1790_v13 = vld [vmem:[%s13215_s24 + $0xaa] sm:$0xff] }
 0x206   : > { %v1012_v41 = vpop.f32.mrb[142].mxu0  ;;  %v1630_v43 = vpop.f32.mrb[142].mxu1  ;;  %v1884_v55 = vpack.c.bf16 %v1790_v13, %v1789_v17  ;;  %v2680_v17 = vld [vmem:[%s13215_s24 + $0xce] sm:$0xff]  ;;  %v2681_v13 = vld [vmem:[%s13215_s24 + $0xd6] sm:$0xff] }
 0x207   : > { %17695 = vst [vmem:[#allocation28_spill] sm:$0xff] %v13990_v11  ;;  %v13992_v50 = vadd.f32 %v1630_v43, %v1012_v41  ;;  %v11157_v3 = vpop.f32.mrb[143].mxu0  ;;  %v11371_v49 = vpop.f32.mrb[143].mxu1  ;;  %v1791_v11 = vld [vmem:[%s13215_s24 + $0xb2] sm:$0xff] }
 0x209   : > { %17696 = vst [vmem:[#allocation29_spill] sm:$0xff] %v13992_v50  ;;  %11479 = vmatmul.mubr.msk.bf16.gmra.mrb[248].mxu0 %vm528_vm3, %v1883_v32  ;;  %11693 = vmatmul.mubr.msk.bf16.gmra.mrb[248].mxu1 %vm528_vm3, %v2772_v34  ;;  %v2773_v32 = vpack.c.bf16 %v2679_v6, %v2678_v31 }
 0x20a   : > { %11482 = vmatprep.mubr.msk.bf16.mxu0 %vm13158_vm2, %v17672_v57  ;;  %11696 = vmatprep.mubr.msk.bf16.mxu1 %vm13158_vm2, %v17672_v57 }
 0x20c   : > { %v1017_v58 = vpop.f32.mrb[144].mxu0  ;;  %v1635_v23 = vpop.f32.mrb[144].mxu1 }
 0x20d   : > { %v14004_v1 = vadd.f32 %v1635_v23, %v1017_v58  ;;  %v11160_v49 = vpop.f32.mrb[145].mxu0  ;;  %v11374_v29 = vpop.f32.mrb[145].mxu1  ;;  %v1792_v58 = vld [vmem:[%s13215_s24 + $0xba] sm:$0xff] }
 0x20e   : > { %v1020_v34 = vpop.f32.mrb[146].mxu0  ;;  %v1638_v41 = vpop.f32.mrb[146].mxu1  ;;  %v1885_v29 = vpack.c.bf16 %v1792_v58, %v1791_v11  ;;  %v2682_v11 = vld [vmem:[%s13215_s24 + $0xde] sm:$0xff]  ;;  %v2683_v58 = vld [vmem:[%s13215_s24 + $0xe6] sm:$0xff] }
 0x20f   : > { %17697 = vst [vmem:[#allocation30_spill] sm:$0xff] %v14004_v1  ;;  %v14006_v43 = vadd.f32 %v1638_v41, %v1020_v34  ;;  %v11161_v3 = vpop.f32.mrb[147].mxu0  ;;  %v11375_v50 = vpop.f32.mrb[147].mxu1  ;;  %v1793_v1 = vld [vmem:[%s13215_s24 + $0xc2] sm:$0xff] }
 0x211   : > { %17698 = vst [vmem:[#allocation31_spill] sm:$0xff] %v14006_v43  ;;  %11483 = vmatmul.mubr.msk.bf16.gmra.mrb[252].mxu0 %vm528_vm3, %v1884_v55  ;;  %11697 = vmatmul.mubr.msk.bf16.gmra.mrb[252].mxu1 %vm528_vm3, %v2773_v32  ;;  %v2774_v55 = vpack.c.bf16 %v2681_v13, %v2680_v17 }
 0x212   : > { %11486 = vmatprep.mubr.msk.bf16.mxu0 %vm13158_vm2, %v17672_v57  ;;  %11700 = vmatprep.mubr.msk.bf16.mxu1 %vm13158_vm2, %v17672_v57 }
 0x214   : > { %v1025_v31 = vpop.f32.mrb[148].mxu0  ;;  %v1643_v6 = vpop.f32.mrb[148].mxu1 }
 0x215   : > { %v14018_v23 = vadd.f32 %v1643_v6, %v1025_v31  ;;  %v11164_v50 = vpop.f32.mrb[149].mxu0  ;;  %v11378_v49 = vpop.f32.mrb[149].mxu1  ;;  %v1794_v31 = vld [vmem:[%s13215_s24 + $0xca] sm:$0xff] }
 0x216   : > { %v1028_v32 = vpop.f32.mrb[150].mxu0  ;;  %v1646_v34 = vpop.f32.mrb[150].mxu1  ;;  %v1886_v49 = vpack.c.bf16 %v1794_v31, %v1793_v1  ;;  %v2684_v1 = vld [vmem:[%s13215_s24 + $0xee] sm:$0xff]  ;;  %v2685_v31 = vld [vmem:[%s13215_s24 + $0xf6] sm:$0xff] }
 0x217   : > { %17699 = vst [vmem:[#allocation32_spill] sm:$0xff] %v14018_v23  ;;  %v14020_v41 = vadd.f32 %v1646_v34, %v1028_v32  ;;  %v11165_v3 = vpop.f32.mrb[151].mxu0  ;;  %v11379_v43 = vpop.f32.mrb[151].mxu1  ;;  %v1795_v23 = vld [vmem:[%s13215_s24 + $0xd2] sm:$0xff] }
 0x219   : > { %17700 = vst [vmem:[#allocation33_spill] sm:$0xff] %v14020_v41  ;;  %11487 = vmatmul.mubr.msk.bf16.gmra.mrb[0].mxu0 %vm528_vm3, %v1885_v29  ;;  %11701 = vmatmul.mubr.msk.bf16.gmra.mrb[0].mxu1 %vm528_vm3, %v2774_v55  ;;  %v2775_v29 = vpack.c.bf16 %v2683_v58, %v2682_v11 }
 0x21a   : > { %11490 = vmatprep.mubr.msk.bf16.mxu0 %vm13158_vm2, %v17672_v57  ;;  %11704 = vmatprep.mubr.msk.bf16.mxu1 %vm13158_vm2, %v17672_v57 }
 0x21c   : > { %v1033_v17 = vpop.f32.mrb[152].mxu0  ;;  %v1651_v13 = vpop.f32.mrb[152].mxu1 }
 0x21d   : > { %v14032_v6 = vadd.f32 %v1651_v13, %v1033_v17  ;;  %v11168_v43 = vpop.f32.mrb[153].mxu0  ;;  %v11382_v50 = vpop.f32.mrb[153].mxu1  ;;  %v1796_v17 = vld [vmem:[%s13215_s24 + $0xda] sm:$0xff] }
 0x21e   : > { %v1036_v55 = vpop.f32.mrb[154].mxu0  ;;  %v1654_v32 = vpop.f32.mrb[154].mxu1  ;;  %v1887_v50 = vpack.c.bf16 %v1796_v17, %v1795_v23  ;;  %v2686_v23 = vld [vmem:[%s13215_s24 + $0xfe] sm:$0xff]  ;;  %v2687_v17 = vld [vmem:[%s13215_s24 + $0x106] sm:$0xff] }
 0x21f   : > { %17701 = vst [vmem:[#allocation34_spill] sm:$0xff] %v14032_v6  ;;  %v14034_v34 = vadd.f32 %v1654_v32, %v1036_v55  ;;  %v11169_v3 = vpop.f32.mrb[155].mxu0  ;;  %v11383_v41 = vpop.f32.mrb[155].mxu1  ;;  %v1797_v6 = vld [vmem:[%s13215_s24 + $0xe2] sm:$0xff] }
 0x221   : > { %17702 = vst [vmem:[#allocation35_spill] sm:$0xff] %v14034_v34  ;;  %11491 = vmatmul.mubr.msk.bf16.gmra.mrb[4].mxu0 %vm528_vm3, %v1886_v49  ;;  %11705 = vmatmul.mubr.msk.bf16.gmra.mrb[4].mxu1 %vm528_vm3, %v2775_v29  ;;  %v2776_v49 = vpack.c.bf16 %v2685_v31, %v2684_v1 }
 0x222   : > { %11494 = vmatprep.mubr.msk.bf16.mxu0 %vm13158_vm2, %v17672_v57  ;;  %11708 = vmatprep.mubr.msk.bf16.mxu1 %vm13158_vm2, %v17672_v57 }
 0x224   : > { %v1041_v11 = vpop.f32.mrb[156].mxu0  ;;  %v1659_v58 = vpop.f32.mrb[156].mxu1 }
 0x225   : > { %v14046_v13 = vadd.f32 %v1659_v58, %v1041_v11  ;;  %v11172_v41 = vpop.f32.mrb[157].mxu0  ;;  %v11386_v43 = vpop.f32.mrb[157].mxu1  ;;  %v1798_v11 = vld [vmem:[%s13215_s24 + $0xea] sm:$0xff] }
 0x226   : > { %v1044_v29 = vpop.f32.mrb[158].mxu0  ;;  %v1662_v55 = vpop.f32.mrb[158].mxu1  ;;  %v1888_v43 = vpack.c.bf16 %v1798_v11, %v1797_v6  ;;  %v2688_v6 = vld [vmem:[%s13215_s24 + $0x10e] sm:$0xff]  ;;  %v2689_v11 = vld [vmem:[%s13215_s24 + $0x116] sm:$0xff] }
 0x227   : > { %17703 = vst [vmem:[#allocation36_spill] sm:$0xff] %v14046_v13  ;;  %v14048_v32 = vadd.f32 %v1662_v55, %v1044_v29  ;;  %v11173_v3 = vpop.f32.mrb[159].mxu0  ;;  %v11387_v34 = vpop.f32.mrb[159].mxu1  ;;  %v1799_v13 = vld [vmem:[%s13215_s24 + $0xf2] sm:$0xff] }
 0x229   : > { %17704 = vst [vmem:[#allocation37_spill] sm:$0xff] %v14048_v32  ;;  %11495 = vmatmul.mubr.msk.bf16.gmra.mrb[8].mxu0 %vm528_vm3, %v1887_v50  ;;  %11709 = vmatmul.mubr.msk.bf16.gmra.mrb[8].mxu1 %vm528_vm3, %v2776_v49  ;;  %v2777_v50 = vpack.c.bf16 %v2687_v17, %v2686_v23 }
 0x22a   : > { %11498 = vmatprep.mubr.msk.bf16.mxu0 %vm13158_vm2, %v17672_v57  ;;  %11712 = vmatprep.mubr.msk.bf16.mxu1 %vm13158_vm2, %v17672_v57 }
 0x22c   : > { %v1049_v1 = vpop.f32.mrb[160].mxu0  ;;  %v1667_v31 = vpop.f32.mrb[160].mxu1 }
 0x22d   : > { %v14060_v58 = vadd.f32 %v1667_v31, %v1049_v1  ;;  %v11176_v34 = vpop.f32.mrb[161].mxu0  ;;  %v11390_v41 = vpop.f32.mrb[161].mxu1  ;;  %v1800_v1 = vld [vmem:[%s13215_s24 + $0xfa] sm:$0xff] }
 0x22e   : > { %v1052_v49 = vpop.f32.mrb[162].mxu0  ;;  %v1670_v29 = vpop.f32.mrb[162].mxu1  ;;  %v1889_v41 = vpack.c.bf16 %v1800_v1, %v1799_v13  ;;  %v2690_v13 = vld [vmem:[%s13215_s24 + $0x11e] sm:$0xff]  ;;  %v2691_v1 = vld [vmem:[%s13215_s24 + $0x126] sm:$0xff] }
 0x22f   : > { %17705 = vst [vmem:[#allocation38_spill] sm:$0xff] %v14060_v58  ;;  %v14062_v55 = vadd.f32 %v1670_v29, %v1052_v49  ;;  %v11177_v3 = vpop.f32.mrb[163].mxu0  ;;  %v11391_v32 = vpop.f32.mrb[163].mxu1  ;;  %v1801_v58 = vld [vmem:[%s13215_s24 + $0x102] sm:$0xff] }
 0x231   : > { %17706 = vst [vmem:[#allocation39_spill] sm:$0xff] %v14062_v55  ;;  %11499 = vmatmul.mubr.msk.bf16.gmra.mrb[12].mxu0 %vm528_vm3, %v1888_v43  ;;  %11713 = vmatmul.mubr.msk.bf16.gmra.mrb[12].mxu1 %vm528_vm3, %v2777_v50  ;;  %v2778_v43 = vpack.c.bf16 %v2689_v11, %v2688_v6 }
 0x232   : > { %11502 = vmatprep.mubr.msk.bf16.mxu0 %vm13158_vm2, %v17672_v57  ;;  %11716 = vmatprep.mubr.msk.bf16.mxu1 %vm13158_vm2, %v17672_v57 }
 0x234   : > { %v1057_v23 = vpop.f32.mrb[164].mxu0  ;;  %v1675_v17 = vpop.f32.mrb[164].mxu1 }
 0x235   : > { %v14074_v31 = vadd.f32 %v1675_v17, %v1057_v23  ;;  %v11180_v32 = vpop.f32.mrb[165].mxu0  ;;  %v11394_v34 = vpop.f32.mrb[165].mxu1  ;;  %v1802_v23 = vld [vmem:[%s13215_s24 + $0x10a] sm:$0xff] }
 0x236   : > { %v1060_v50 = vpop.f32.mrb[166].mxu0  ;;  %v1678_v49 = vpop.f32.mrb[166].mxu1  ;;  %v1890_v34 = vpack.c.bf16 %v1802_v23, %v1801_v58  ;;  %v2692_v58 = vld [vmem:[%s13215_s24 + $0x12e] sm:$0xff]  ;;  %v2693_v23 = vld [vmem:[%s13215_s24 + $0x136] sm:$0xff] }
 0x237   : > { %17707 = vst [vmem:[#allocation40_spill] sm:$0xff] %v14074_v31  ;;  %v14076_v29 = vadd.f32 %v1678_v49, %v1060_v50  ;;  %v11181_v3 = vpop.f32.mrb[167].mxu0  ;;  %v11395_v55 = vpop.f32.mrb[167].mxu1  ;;  %v1803_v31 = vld [vmem:[%s13215_s24 + $0x112] sm:$0xff] }
 0x239   : > { %17708 = vst [vmem:[#allocation41_spill] sm:$0xff] %v14076_v29  ;;  %11503 = vmatmul.mubr.msk.bf16.gmra.mrb[16].mxu0 %vm528_vm3, %v1889_v41  ;;  %11717 = vmatmul.mubr.msk.bf16.gmra.mrb[16].mxu1 %vm528_vm3, %v2778_v43  ;;  %v2779_v41 = vpack.c.bf16 %v2691_v1, %v2690_v13 }
 0x23a   : > { %11506 = vmatprep.mubr.msk.bf16.mxu0 %vm13158_vm2, %v17672_v57  ;;  %11720 = vmatprep.mubr.msk.bf16.mxu1 %vm13158_vm2, %v17672_v57 }
 0x23c   : > { %v1065_v6 = vpop.f32.mrb[168].mxu0  ;;  %v1683_v11 = vpop.f32.mrb[168].mxu1 }
 0x23d   : > { %v14088_v17 = vadd.f32 %v1683_v11, %v1065_v6  ;;  %v11184_v55 = vpop.f32.mrb[169].mxu0  ;;  %v11398_v32 = vpop.f32.mrb[169].mxu1  ;;  %v1804_v6 = vld [vmem:[%s13215_s24 + $0x11a] sm:$0xff] }
 0x23e   : > { %v1068_v43 = vpop.f32.mrb[170].mxu0  ;;  %v1686_v50 = vpop.f32.mrb[170].mxu1  ;;  %v1891_v32 = vpack.c.bf16 %v1804_v6, %v1803_v31  ;;  %v2694_v31 = vld [vmem:[%s13215_s24 + $0x13e] sm:$0xff]  ;;  %v2695_v6 = vld [vmem:[%s13215_s24 + $0x146] sm:$0xff] }
 0x23f   : > { %17709 = vst [vmem:[#allocation42_spill] sm:$0xff] %v14088_v17  ;;  %v14090_v49 = vadd.f32 %v1686_v50, %v1068_v43  ;;  %v11185_v3 = vpop.f32.mrb[171].mxu0  ;;  %v11399_v29 = vpop.f32.mrb[171].mxu1  ;;  %v1805_v17 = vld [vmem:[%s13215_s24 + $0x122] sm:$0xff] }
 0x241   : > { %17710 = vst [vmem:[#allocation43_spill] sm:$0xff] %v14090_v49  ;;  %11507 = vmatmul.mubr.msk.bf16.gmra.mrb[20].mxu0 %vm528_vm3, %v1890_v34  ;;  %11721 = vmatmul.mubr.msk.bf16.gmra.mrb[20].mxu1 %vm528_vm3, %v2779_v41  ;;  %v2780_v34 = vpack.c.bf16 %v2693_v23, %v2692_v58 }
 0x242   : > { %11510 = vmatprep.mubr.msk.bf16.mxu0 %vm13158_vm2, %v17672_v57  ;;  %11724 = vmatprep.mubr.msk.bf16.mxu1 %vm13158_vm2, %v17672_v57 }
 0x244   : > { %v1073_v13 = vpop.f32.mrb[172].mxu0  ;;  %v1691_v1 = vpop.f32.mrb[172].mxu1 }
 0x245   : > { %v14102_v11 = vadd.f32 %v1691_v1, %v1073_v13  ;;  %v11188_v29 = vpop.f32.mrb[173].mxu0  ;;  %v11402_v55 = vpop.f32.mrb[173].mxu1  ;;  %v1806_v13 = vld [vmem:[%s13215_s24 + $0x12a] sm:$0xff] }
 0x246   : > { %v1076_v41 = vpop.f32.mrb[174].mxu0  ;;  %v1694_v43 = vpop.f32.mrb[174].mxu1  ;;  %v1892_v55 = vpack.c.bf16 %v1806_v13, %v1805_v17  ;;  %v2696_v17 = vld [vmem:[%s13215_s24 + $0x14e] sm:$0xff]  ;;  %v2697_v13 = vld [vmem:[%s13215_s24 + $0x156] sm:$0xff] }
 0x247   : > { %17711 = vst [vmem:[#allocation44_spill] sm:$0xff] %v14102_v11  ;;  %v14104_v50 = vadd.f32 %v1694_v43, %v1076_v41  ;;  %v11189_v3 = vpop.f32.mrb[175].mxu0  ;;  %v11403_v49 = vpop.f32.mrb[175].mxu1  ;;  %v1807_v11 = vld [vmem:[%s13215_s24 + $0x132] sm:$0xff] }
 0x249   : > { %17712 = vst [vmem:[#allocation45_spill] sm:$0xff] %v14104_v50  ;;  %11511 = vmatmul.mubr.msk.bf16.gmra.mrb[24].mxu0 %vm528_vm3, %v1891_v32  ;;  %11725 = vmatmul.mubr.msk.bf16.gmra.mrb[24].mxu1 %vm528_vm3, %v2780_v34  ;;  %v2781_v32 = vpack.c.bf16 %v2695_v6, %v2694_v31 }
 0x24a   : > { %11514 = vmatprep.mubr.msk.bf16.mxu0 %vm13158_vm2, %v17672_v57  ;;  %11728 = vmatprep.mubr.msk.bf16.mxu1 %vm13158_vm2, %v17672_v57 }
 0x24c   : > { %v1081_v58 = vpop.f32.mrb[176].mxu0  ;;  %v1699_v23 = vpop.f32.mrb[176].mxu1 }
 0x24d   : > { %v14116_v1 = vadd.f32 %v1699_v23, %v1081_v58  ;;  %v11192_v49 = vpop.f32.mrb[177].mxu0  ;;  %v11406_v29 = vpop.f32.mrb[177].mxu1  ;;  %v1808_v58 = vld [vmem:[%s13215_s24 + $0x13a] sm:$0xff] }
 0x24e   : > { %v1084_v34 = vpop.f32.mrb[178].mxu0  ;;  %v1702_v41 = vpop.f32.mrb[178].mxu1  ;;  %v1893_v29 = vpack.c.bf16 %v1808_v58, %v1807_v11  ;;  %v2698_v11 = vld [vmem:[%s13215_s24 + $0x15e] sm:$0xff]  ;;  %v2699_v58 = vld [vmem:[%s13215_s24 + $0x166] sm:$0xff] }
 0x24f   : > { %17713 = vst [vmem:[#allocation46_spill] sm:$0xff] %v14116_v1  ;;  %v14118_v43 = vadd.f32 %v1702_v41, %v1084_v34  ;;  %v11193_v3 = vpop.f32.mrb[179].mxu0  ;;  %v11407_v50 = vpop.f32.mrb[179].mxu1  ;;  %v1809_v1 = vld [vmem:[%s13215_s24 + $0x142] sm:$0xff] }
 0x251   : > { %17714 = vst [vmem:[#allocation47_spill] sm:$0xff] %v14118_v43  ;;  %11515 = vmatmul.mubr.msk.bf16.gmra.mrb[28].mxu0 %vm528_vm3, %v1892_v55  ;;  %11729 = vmatmul.mubr.msk.bf16.gmra.mrb[28].mxu1 %vm528_vm3, %v2781_v32  ;;  %v2782_v55 = vpack.c.bf16 %v2697_v13, %v2696_v17 }
 0x252   : > { %11518 = vmatprep.mubr.msk.bf16.mxu0 %vm13158_vm2, %v17672_v57  ;;  %11732 = vmatprep.mubr.msk.bf16.mxu1 %vm13158_vm2, %v17672_v57 }
 0x254   : > { %v1089_v31 = vpop.f32.mrb[180].mxu0  ;;  %v1707_v6 = vpop.f32.mrb[180].mxu1 }
 0x255   : > { %v14130_v23 = vadd.f32 %v1707_v6, %v1089_v31  ;;  %v11196_v50 = vpop.f32.mrb[181].mxu0  ;;  %v11410_v49 = vpop.f32.mrb[181].mxu1  ;;  %v1810_v31 = vld [vmem:[%s13215_s24 + $0x14a] sm:$0xff] }
 0x256   : > { %v1092_v32 = vpop.f32.mrb[182].mxu0  ;;  %v1710_v34 = vpop.f32.mrb[182].mxu1  ;;  %v1894_v49 = vpack.c.bf16 %v1810_v31, %v1809_v1  ;;  %v2700_v1 = vld [vmem:[%s13215_s24 + $0x16e] sm:$0xff]  ;;  %v2701_v31 = vld [vmem:[%s13215_s24 + $0x176] sm:$0xff] }
 0x257   : > { %17715 = vst [vmem:[#allocation48_spill] sm:$0xff] %v14130_v23  ;;  %v14132_v41 = vadd.f32 %v1710_v34, %v1092_v32  ;;  %v11197_v3 = vpop.f32.mrb[183].mxu0  ;;  %v11411_v43 = vpop.f32.mrb[183].mxu1  ;;  %v1811_v23 = vld [vmem:[%s13215_s24 + $0x152] sm:$0xff] }
 0x259   : > { %17716 = vst [vmem:[#allocation49_spill] sm:$0xff] %v14132_v41  ;;  %11519 = vmatmul.mubr.msk.bf16.gmra.mrb[32].mxu0 %vm528_vm3, %v1893_v29  ;;  %11733 = vmatmul.mubr.msk.bf16.gmra.mrb[32].mxu1 %vm528_vm3, %v2782_v55  ;;  %v2783_v29 = vpack.c.bf16 %v2699_v58, %v2698_v11 }
 0x25a   : > { %11522 = vmatprep.mubr.msk.bf16.mxu0 %vm13158_vm2, %v17672_v57  ;;  %11736 = vmatprep.mubr.msk.bf16.mxu1 %vm13158_vm2, %v17672_v57 }
 0x25c   : > { %v1097_v17 = vpop.f32.mrb[184].mxu0  ;;  %v1715_v13 = vpop.f32.mrb[184].mxu1 }
 0x25d   : > { %v14144_v6 = vadd.f32 %v1715_v13, %v1097_v17  ;;  %v11200_v43 = vpop.f32.mrb[185].mxu0  ;;  %v11414_v50 = vpop.f32.mrb[185].mxu1  ;;  %v1812_v17 = vld [vmem:[%s13215_s24 + $0x15a] sm:$0xff] }
 0x25e   : > { %v1100_v55 = vpop.f32.mrb[186].mxu0  ;;  %v1718_v32 = vpop.f32.mrb[186].mxu1  ;;  %v1895_v50 = vpack.c.bf16 %v1812_v17, %v1811_v23  ;;  %v2702_v23 = vld [vmem:[%s13215_s24 + $0x17e] sm:$0xff]  ;;  %v2703_v17 = vld [vmem:[%s13215_s24 + $0x186] sm:$0xff] }
 0x25f   : > { %17717 = vst [vmem:[#allocation50_spill] sm:$0xff] %v14144_v6  ;;  %v14146_v34 = vadd.f32 %v1718_v32, %v1100_v55  ;;  %v11201_v3 = vpop.f32.mrb[187].mxu0  ;;  %v11415_v41 = vpop.f32.mrb[187].mxu1  ;;  %v1813_v6 = vld [vmem:[%s13215_s24 + $0x162] sm:$0xff] }
 0x261   : > { %17718 = vst [vmem:[#allocation51_spill] sm:$0xff] %v14146_v34  ;;  %11523 = vmatmul.mubr.msk.bf16.gmra.mrb[36].mxu0 %vm528_vm3, %v1894_v49  ;;  %11737 = vmatmul.mubr.msk.bf16.gmra.mrb[36].mxu1 %vm528_vm3, %v2783_v29  ;;  %v2784_v49 = vpack.c.bf16 %v2701_v31, %v2700_v1 }
 0x262   : > { %11526 = vmatprep.mubr.msk.bf16.mxu0 %vm13158_vm2, %v17672_v57  ;;  %11740 = vmatprep.mubr.msk.bf16.mxu1 %vm13158_vm2, %v17672_v57 }
 0x264   : > { %v1105_v11 = vpop.f32.mrb[188].mxu0  ;;  %v1723_v58 = vpop.f32.mrb[188].mxu1 }
 0x265   : > { %v14158_v13 = vadd.f32 %v1723_v58, %v1105_v11  ;;  %v11204_v41 = vpop.f32.mrb[189].mxu0  ;;  %v11418_v43 = vpop.f32.mrb[189].mxu1  ;;  %v1814_v11 = vld [vmem:[%s13215_s24 + $0x16a] sm:$0xff] }
 0x266   : > { %v1108_v29 = vpop.f32.mrb[190].mxu0  ;;  %v1726_v55 = vpop.f32.mrb[190].mxu1  ;;  %v1896_v43 = vpack.c.bf16 %v1814_v11, %v1813_v6  ;;  %v2704_v6 = vld [vmem:[%s13215_s24 + $0x18e] sm:$0xff]  ;;  %v2705_v11 = vld [vmem:[%s13215_s24 + $0x196] sm:$0xff] }
 0x267   : > { %17719 = vst [vmem:[#allocation52_spill] sm:$0xff] %v14158_v13  ;;  %v14160_v32 = vadd.f32 %v1726_v55, %v1108_v29  ;;  %v11205_v3 = vpop.f32.mrb[191].mxu0  ;;  %v11419_v34 = vpop.f32.mrb[191].mxu1  ;;  %v1815_v13 = vld [vmem:[%s13215_s24 + $0x172] sm:$0xff] }
 0x269   : > { %17720 = vst [vmem:[#allocation53_spill] sm:$0xff] %v14160_v32  ;;  %11527 = vmatmul.mubr.msk.bf16.gmra.mrb[40].mxu0 %vm528_vm3, %v1895_v50  ;;  %11741 = vmatmul.mubr.msk.bf16.gmra.mrb[40].mxu1 %vm528_vm3, %v2784_v49  ;;  %v2785_v50 = vpack.c.bf16 %v2703_v17, %v2702_v23 }
 0x26a   : > { %11530 = vmatprep.mubr.msk.bf16.mxu0 %vm13158_vm2, %v17672_v57  ;;  %11744 = vmatprep.mubr.msk.bf16.mxu1 %vm13158_vm2, %v17672_v57 }
 0x26c   : > { %v1113_v1 = vpop.f32.mrb[192].mxu0  ;;  %v1731_v31 = vpop.f32.mrb[192].mxu1 }
 0x26d   : > { %v14172_v58 = vadd.f32 %v1731_v31, %v1113_v1  ;;  %v11208_v34 = vpop.f32.mrb[193].mxu0  ;;  %v11422_v41 = vpop.f32.mrb[193].mxu1  ;;  %v1816_v1 = vld [vmem:[%s13215_s24 + $0x17a] sm:$0xff] }
 0x26e   : > { %v1116_v49 = vpop.f32.mrb[194].mxu0  ;;  %v1734_v29 = vpop.f32.mrb[194].mxu1  ;;  %v1897_v41 = vpack.c.bf16 %v1816_v1, %v1815_v13  ;;  %v2706_v13 = vld [vmem:[%s13215_s24 + $0x19e] sm:$0xff]  ;;  %v2707_v1 = vld [vmem:[%s13215_s24 + $0x1a6] sm:$0xff] }
 0x26f   : > { %17721 = vst [vmem:[#allocation54_spill] sm:$0xff] %v14172_v58  ;;  %v14174_v55 = vadd.f32 %v1734_v29, %v1116_v49  ;;  %v11209_v3 = vpop.f32.mrb[195].mxu0  ;;  %v11423_v32 = vpop.f32.mrb[195].mxu1  ;;  %v1817_v58 = vld [vmem:[%s13215_s24 + $0x182] sm:$0xff] }
 0x271   : > { %17722 = vst [vmem:[#allocation55_spill] sm:$0xff] %v14174_v55  ;;  %11531 = vmatmul.mubr.msk.bf16.gmra.mrb[44].mxu0 %vm528_vm3, %v1896_v43  ;;  %11745 = vmatmul.mubr.msk.bf16.gmra.mrb[44].mxu1 %vm528_vm3, %v2785_v50  ;;  %v2786_v43 = vpack.c.bf16 %v2705_v11, %v2704_v6 }
 0x272   : > { %11534 = vmatprep.mubr.msk.bf16.mxu0 %vm13158_vm2, %v17672_v57  ;;  %11748 = vmatprep.mubr.msk.bf16.mxu1 %vm13158_vm2, %v17672_v57 }
 0x274   : > { %v1121_v23 = vpop.f32.mrb[196].mxu0  ;;  %v1739_v17 = vpop.f32.mrb[196].mxu1 }
 0x275   : > { %v14186_v31 = vadd.f32 %v1739_v17, %v1121_v23  ;;  %v11212_v32 = vpop.f32.mrb[197].mxu0  ;;  %v11426_v34 = vpop.f32.mrb[197].mxu1  ;;  %v1818_v23 = vld [vmem:[%s13215_s24 + $0x18a] sm:$0xff] }
 0x276   : > { %v1124_v50 = vpop.f32.mrb[198].mxu0  ;;  %v1742_v49 = vpop.f32.mrb[198].mxu1  ;;  %v1898_v34 = vpack.c.bf16 %v1818_v23, %v1817_v58  ;;  %v1820_v58 = vld [vmem:[%s13215_s24 + $0x19a] sm:$0xff]  ;;  %v2708_v23 = vld [vmem:[%s13215_s24 + $0x1ae] sm:$0xff] }
 0x277   : > { %17723 = vst [vmem:[#allocation56_spill] sm:$0xff] %v14186_v31  ;;  %v14188_v29 = vadd.f32 %v1742_v49, %v1124_v50  ;;  %v11213_v3 = vpop.f32.mrb[199].mxu0  ;;  %v11427_v55 = vpop.f32.mrb[199].mxu1  ;;  %v13016_v31 = vld [vmem:[%s17662_s1 + $0x4] ss:$0 sps:$4 sm:$0xcc]  }
 0x279   : > { %17724 = vst [vmem:[#allocation57_spill] sm:$0xff] %v14188_v29  ;;  %11535 = vmatmul.mubr.msk.bf16.gmra.mrb[48].mxu0 %vm528_vm3, %v1897_v41  ;;  %11749 = vmatmul.mubr.msk.bf16.gmra.mrb[48].mxu1 %vm528_vm3, %v2786_v43  ;;  %v2787_v41 = vpack.c.bf16 %v2707_v1, %v2706_v13  ;;  %v2709_v13 = vld [vmem:[%s13215_s24 + $0x1b6] sm:$0xff] }
 0x27a   : > { %11538 = vmatprep.mubr.msk.bf16.mxu0 %vm13158_vm2, %v17672_v57  ;;  %11752 = vmatprep.mubr.msk.bf16.mxu1 %vm13158_vm2, %v17672_v57 }
 0x27c   : > { %v1129_v6 = vpop.f32.mrb[200].mxu0  ;;  %v1747_v11 = vpop.f32.mrb[200].mxu1 }
 0x27d   : > { %v14200_v17 = vadd.f32 %v1747_v11, %v1129_v6  ;;  %v11216_v55 = vpop.f32.mrb[201].mxu0  ;;  %v11430_v32 = vpop.f32.mrb[201].mxu1  ;;  %v1819_v6 = vld [vmem:[%s13215_s24 + $0x192] sm:$0xff]  ;;  %v3712_v11 = vrot.slane %v13016_v31, 2 }
 0x27e   : > { %v1132_v43 = vpop.f32.mrb[202].mxu0  ;;  %v1750_v50 = vpop.f32.mrb[202].mxu1  ;;  %v1899_v31 = vpack.c.bf16 %v1820_v58, %v1819_v6  ;;  %v1822_v6 = vld [vmem:[%s13215_s24 + $0x1aa] sm:$0xff]  ;;  %v2710_v58 = vld [vmem:[%s13215_s24 + $0x1be] sm:$0xff] }
 0x27f   : > { %17725 = vst [vmem:[#allocation58_spill] sm:$0xff] %v14200_v17  ;;  %v14202_v49 = vadd.f32 %v1750_v50, %v1132_v43  ;;  %v11217_v3 = vpop.f32.mrb[203].mxu0  ;;  %v11431_v29 = vpop.f32.mrb[203].mxu1  ;;  %v2788_v43 = vpack.c.bf16 %v2709_v13, %v2708_v23  ;;  %v2711_v23 = vld [vmem:[%s13215_s24 + $0x1c6] sm:$0xff] }
 0x280   : > { %v3873_v29 = vand.u32 %v3712_v11, %v13204_v7 }
 0x281   : > { %17726 = vst [vmem:[#allocation59_spill] sm:$0xff] %v14202_v49  ;;  %11539 = vmatmul.mubr.msk.bf16.gmra.mrb[52].mxu0 %vm528_vm3, %v1898_v34  ;;  %11753 = vmatmul.mubr.msk.bf16.gmra.mrb[52].mxu1 %vm528_vm3, %v2787_v41 }
 0x282   : > { %11542 = vmatprep.mubr.msk.bf16.mxu0 %vm13158_vm2, %v17672_v57  ;;  %11756 = vmatprep.mubr.msk.bf16.mxu1 %vm13158_vm2, %v17672_v57 }
 0x283   : > { %11869 = vmatpush3.bf16.msra.mxu0 %v3873_v29 }
 0x284   : > { %v1137_v1 = vpop.f32.mrb[204].mxu0  ;;  %v1755_v55 = vpop.f32.mrb[204].mxu1  ;;  %12296 = vmatprep.subr.bf16.mxu0 %v17672_v57 }
 0x285   : > { %v14218_v32 = vadd.f32 %v1755_v55, %v1137_v1  ;;  %v11220_v34 = vpop.f32.mrb[205].mxu0  ;;  %v11434_v41 = vpop.f32.mrb[205].mxu1  ;;  %v1821_v1 = vld [vmem:[%s13215_s24 + $0x1a2] sm:$0xff] }
 0x286   : > { %v1140_v50 = vpop.f32.mrb[206].mxu0  ;;  %v1758_v3 = vpop.f32.mrb[206].mxu1  ;;  %v1900_v34 = vpack.c.bf16 %v1822_v6, %v1821_v1  ;;  %v2713_v1 = vld [vmem:[%s13215_s24 + $0x1d6] sm:$0xff] }
 0x287   : > { %17727 = vst [vmem:[#allocation60_spill] sm:$0xff] %v14218_v32  ;;  %v14221_v49 = vadd.f32 %v1758_v3, %v1140_v50  ;;  %v11221_v11 = vpop.f32.mrb[207].mxu0  ;;  %v11435_v17 = vpop.f32.mrb[207].mxu1  ;;  %v1824_v32 = vld [vmem:[%s13215_s24 + $0x1ba] sm:$0xff] }
 0x289   : > { %17728 = vst [vmem:[#allocation61_spill] sm:$0xff] %v14221_v49  ;;  %11543 = vmatmul.mubr.msk.bf16.gmra.mrb[56].mxu0 %vm528_vm3, %v1899_v31  ;;  %11757 = vmatmul.mubr.msk.bf16.gmra.mrb[56].mxu1 %vm528_vm3, %v2788_v43  ;;  %v2789_v31 = vpack.c.bf16 %v2711_v23, %v2710_v58  ;;  %v1823_v49 = vld [vmem:[%s13215_s24 + $0x1b2] sm:$0xff] }
 0x28a   : > { %11546 = vmatprep.mubr.msk.bf16.mxu0 %vm13158_vm2, %v17672_v57  ;;  %11760 = vmatprep.mubr.msk.bf16.mxu1 %vm13158_vm2, %v17672_v57 }
 0x28c   : > { %v1145_v13 = vpop.f32.mrb[208].mxu0  ;;  %v1763_v29 = vpop.f32.mrb[208].mxu1 }
 0x28d   : > { %v14233_v17 = vadd.f32 %v1763_v29, %v1145_v13  ;;  %v11224_v55 = vpop.f32.mrb[209].mxu0  ;;  %v11438_v41 = vpop.f32.mrb[209].mxu1  ;;  %v2712_v13 = vld [vmem:[%s13215_s24 + $0x1ce] sm:$0xff] }
 0x28e   : > { %v1148_v43 = vpop.f32.mrb[210].mxu0  ;;  %v1766_v50 = vpop.f32.mrb[210].mxu1  ;;  %v2790_v41 = vpack.c.bf16 %v2713_v1, %v2712_v13 }
 0x28f   : > { %17729 = vst [vmem:[#allocation62_spill] sm:$0xff] %v14233_v17  ;;  %v11225_v3 = vpop.f32.mrb[211].mxu0  ;;  %v11439_v11 = vpop.f32.mrb[211].mxu1 }
 0x291   : > { %11547 = vmatmul.mubr.msk.bf16.gmra.mrb[60].mxu0 %vm528_vm3, %v1900_v34  ;;  %11761 = vmatmul.mubr.msk.bf16.gmra.mrb[60].mxu1 %vm528_vm3, %v2789_v31  ;;  %v1901_v34 = vpack.c.bf16 %v1824_v32, %v1823_v49  ;;  %v1826_v49 = vld [vmem:[%s13215_s24 + $0x1ca] sm:$0xff]  ;;  %v2714_v32 = vld [vmem:[%s13215_s24 + $0x1de] sm:$0xff] }
 0x292   : > { %11550 = vmatprep.mubr.msk.bf16.mxu0 %vm13158_vm2, %v17672_v57  ;;  %11764 = vmatprep.mubr.msk.bf16.mxu1 %vm13158_vm2, %v17672_v57 }
 0x294   : > { %v2131_v6 = vpop.f32.mrb[212].mxu0  ;;  %v3023_v58 = vpop.f32.mrb[212].mxu1 }
 0x295   : > { %v2553_v23 = vadd.f32 %v2131_v6, %v13497_v60  ;;  %v11444_v29 = vpop.f32.mrb[213].mxu0  ;;  %v11658_v55 = vpop.f32.mrb[213].mxu1  ;;  %v1825_v60 = vld [vmem:[%s13215_s24 + $0x1c2] sm:$0xff] }
 0x296   : > { %v2134_v31 = vpop.f32.mrb[214].mxu0  ;;  %v3026_v43 = vpop.f32.mrb[214].mxu1 }
 0x297   : > { %v2554_v50 = vadd.f32 %v2134_v31, %v13499_v4  ;;  %v14247_v3 = vadd.f32 %v3023_v58, %v2553_v23  ;;  %v11445_v11 = vpop.f32.mrb[215].mxu0  ;;  %v11659_v17 = vpop.f32.mrb[215].mxu1  ;;  %v2715_v4 = vld [vmem:[%s13215_s24 + $0x1e6] sm:$0xff]  ;;  %v1902_v23 = vpack.c.bf16 %v1826_v49, %v1825_v60  ;;  %v1828_v60 = vld [vmem:[%s13215_s24 + $0x1da] sm:$0xff]  ;;  %v2716_v49 = vld [vmem:[%s13215_s24 + $0x1ee] sm:$0xff] }
 0x298   : > { %v2791_v29 = vpack.c.bf16 %v2715_v4, %v2714_v32 }
 0x299   : > { %v14249_v33 = vadd.f32 %v3026_v43, %v2554_v50  ;;  %11551 = vmatmul.mubr.msk.bf16.gmra.mrb[64].mxu0 %vm528_vm3, %v1901_v34  ;;  %11765 = vmatmul.mubr.msk.bf16.gmra.mrb[64].mxu1 %vm528_vm3, %v2790_v41 }
 0x29a   : > { %11554 = vmatprep.mubr.msk.bf16.mxu0 %vm13158_vm2, %v17672_v57  ;;  %11768 = vmatprep.mubr.msk.bf16.mxu1 %vm13158_vm2, %v17672_v57 }
 0x29c   : > { %v2139_v13 = vpop.f32.mrb[216].mxu0  ;;  %v3031_v1 = vpop.f32.mrb[216].mxu1 }
 0x29d   : > { %v2555_v17 = vadd.f32 %v2139_v13, %v13511_v14  ;;  %v11448_v6 = vpop.f32.mrb[217].mxu0  ;;  %v11662_v58 = vpop.f32.mrb[217].mxu1  ;;  %v1827_v14 = vld [vmem:[%s13215_s24 + $0x1d2] sm:$0xff] }
 0x29e   : > { %v2142_v55 = vpop.f32.mrb[218].mxu0  ;;  %v3034_v34 = vpop.f32.mrb[218].mxu1  ;;  %v1903_v6 = vpack.c.bf16 %v1828_v60, %v1827_v14  ;;  %v1830_v14 = vld [vmem:[%s13215_s24 + $0x1ea] sm:$0xff]  ;;  %v2718_v60 = vld [vmem:[%s13215_s24 + $0x1fe] sm:$0xff] }
 0x29f   : > { %v2556_v41 = vadd.f32 %v2142_v55, %v13513_v21  ;;  %v14263_v31 = vadd.f32 %v3031_v1, %v2555_v17  ;;  %v11449_v43 = vpop.f32.mrb[219].mxu0  ;;  %v11663_v50 = vpop.f32.mrb[219].mxu1  ;;  %v2717_v21 = vld [vmem:[%s13215_s24 + $0x1f6] sm:$0xff] }
 0x2a0   : > { %v2792_v58 = vpack.c.bf16 %v2717_v21, %v2716_v49 }
 0x2a1   : > { %v14265_v11 = vadd.f32 %v3034_v34, %v2556_v41  ;;  %11555 = vmatmul.mubr.msk.bf16.gmra.mrb[68].mxu0 %vm528_vm3, %v1902_v23  ;;  %11769 = vmatmul.mubr.msk.bf16.gmra.mrb[68].mxu1 %vm528_vm3, %v2791_v29 }
 0x2a2   : > { %11558 = vmatprep.mubr.msk.bf16.mxu0 %vm13158_vm2, %v17672_v57  ;;  %11772 = vmatprep.mubr.msk.bf16.mxu1 %vm13158_vm2, %v17672_v57 }
 0x2a4   : > { %v2147_v32 = vpop.f32.mrb[220].mxu0  ;;  %v3039_v4 = vpop.f32.mrb[220].mxu1 }
 0x2a5   : > { %v2557_v13 = vadd.f32 %v2147_v32, %v13525_v30  ;;  %v11452_v1 = vpop.f32.mrb[221].mxu0  ;;  %v11666_v17 = vpop.f32.mrb[221].mxu1  ;;  %v1829_v30 = vld [vmem:[%s13215_s24 + $0x1e2] sm:$0xff] }
 0x2a6   : > { %v2150_v23 = vpop.f32.mrb[222].mxu0  ;;  %v3042_v29 = vpop.f32.mrb[222].mxu1  ;;  %v1904_v1 = vpack.c.bf16 %v1830_v14, %v1829_v30  ;;  %v1832_v30 = vld [vmem:[%s13215_s24 + $0x1fa] sm:$0xff]  ;;  %v2720_v14 = vld [vmem:[%s13215_s24 + $0x20e] sm:$0xff] }
 0x2a7   : > { %v2558_v55 = vadd.f32 %v2150_v23, %v13527_v37  ;;  %v14279_v34 = vadd.f32 %v3039_v4, %v2557_v13  ;;  %v11453_v41 = vpop.f32.mrb[223].mxu0  ;;  %v11667_v43 = vpop.f32.mrb[223].mxu1  ;;  %v2719_v37 = vld [vmem:[%s13215_s24 + $0x206] sm:$0xff] }
 0x2a8   : > { %v2793_v17 = vpack.c.bf16 %v2719_v37, %v2718_v60 }
 0x2a9   : > { %v14281_v50 = vadd.f32 %v3042_v29, %v2558_v55  ;;  %11559 = vmatmul.mubr.msk.bf16.gmra.mrb[72].mxu0 %vm528_vm3, %v1903_v6  ;;  %11773 = vmatmul.mubr.msk.bf16.gmra.mrb[72].mxu1 %vm528_vm3, %v2792_v58 }
 0x2aa   : > { %11562 = vmatprep.mubr.msk.bf16.mxu0 %vm13158_vm2, %v17672_v57  ;;  %11776 = vmatprep.mubr.msk.bf16.mxu1 %vm13158_vm2, %v17672_v57 }
 0x2ac   : > { %v2155_v49 = vpop.f32.mrb[224].mxu0  ;;  %v3047_v21 = vpop.f32.mrb[224].mxu1 }
 0x2ad   : > { %v2559_v32 = vadd.f32 %v2155_v49, %v13539_v46  ;;  %v11456_v4 = vpop.f32.mrb[225].mxu0  ;;  %v11670_v13 = vpop.f32.mrb[225].mxu1  ;;  %v1831_v46 = vld [vmem:[%s13215_s24 + $0x1f2] sm:$0xff] }
 0x2ae   : > { %v2158_v6 = vpop.f32.mrb[226].mxu0  ;;  %v3050_v58 = vpop.f32.mrb[226].mxu1  ;;  %v1905_v4 = vpack.c.bf16 %v1832_v30, %v1831_v46  ;;  %v1834_v46 = vld [vmem:[%s13215_s24 + $0x20a] sm:$0xff]  ;;  %v2722_v30 = vld [vmem:[%s13215_s24 + $0x21e] sm:$0xff] }
 0x2af   : > { %v2560_v23 = vadd.f32 %v2158_v6, %v13541_v53  ;;  %v14295_v29 = vadd.f32 %v3047_v21, %v2559_v32  ;;  %v11457_v55 = vpop.f32.mrb[227].mxu0  ;;  %v11671_v41 = vpop.f32.mrb[227].mxu1  ;;  %v2721_v53 = vld [vmem:[%s13215_s24 + $0x216] sm:$0xff] }
 0x2b0   : > { %v2794_v13 = vpack.c.bf16 %v2721_v53, %v2720_v14 }
 0x2b1   : > { %v14297_v43 = vadd.f32 %v3050_v58, %v2560_v23  ;;  %11563 = vmatmul.mubr.msk.bf16.gmra.mrb[76].mxu0 %vm528_vm3, %v1904_v1  ;;  %11777 = vmatmul.mubr.msk.bf16.gmra.mrb[76].mxu1 %vm528_vm3, %v2793_v17 }
 0x2b2   : > { %11566 = vmatprep.mubr.msk.bf16.mxu0 %vm13158_vm2, %v17672_v57  ;;  %11780 = vmatprep.mubr.msk.bf16.mxu1 %vm13158_vm2, %v17672_v57 }
 0x2b4   : > { %v2163_v60 = vpop.f32.mrb[228].mxu0  ;;  %v3055_v37 = vpop.f32.mrb[228].mxu1 }
 0x2b5   : > { %v2561_v49 = vadd.f32 %v2163_v60, %v13553_v63  ;;  %v11460_v21 = vpop.f32.mrb[229].mxu0  ;;  %v11674_v32 = vpop.f32.mrb[229].mxu1  ;;  %v1833_v63 = vld [vmem:[%s13215_s24 + $0x202] sm:$0xff] }
 0x2b6   : > { %v2166_v1 = vpop.f32.mrb[230].mxu0  ;;  %v3058_v17 = vpop.f32.mrb[230].mxu1  ;;  %v1906_v21 = vpack.c.bf16 %v1834_v46, %v1833_v63  ;;  %v1836_v63 = vld [vmem:[%s13215_s24 + $0x21a] sm:$0xff]  ;;  %v2724_v46 = vld [vmem:[%s13215_s24 + $0x22e] sm:$0xff] }
 0x2b7   : > { %v2562_v6 = vadd.f32 %v2166_v1, %v13555_v9  ;;  %v14311_v58 = vadd.f32 %v3055_v37, %v2561_v49  ;;  %v11461_v23 = vpop.f32.mrb[231].mxu0  ;;  %v11675_v55 = vpop.f32.mrb[231].mxu1  ;;  %v2723_v9 = vld [vmem:[%s13215_s24 + $0x226] sm:$0xff] }
 0x2b8   : > { %v2795_v32 = vpack.c.bf16 %v2723_v9, %v2722_v30 }
 0x2b9   : > { %v14313_v41 = vadd.f32 %v3058_v17, %v2562_v6  ;;  %11567 = vmatmul.mubr.msk.bf16.gmra.mrb[80].mxu0 %vm528_vm3, %v1905_v4  ;;  %11781 = vmatmul.mubr.msk.bf16.gmra.mrb[80].mxu1 %vm528_vm3, %v2794_v13 }
 0x2ba   : > { %11570 = vmatprep.mubr.msk.bf16.mxu0 %vm13158_vm2, %v17672_v57  ;;  %11784 = vmatprep.mubr.msk.bf16.mxu1 %vm13158_vm2, %v17672_v57 }
 0x2bc   : > { %v2171_v14 = vpop.f32.mrb[232].mxu0  ;;  %v3063_v53 = vpop.f32.mrb[232].mxu1 }
 0x2bd   : > { %v2563_v60 = vadd.f32 %v2171_v14, %v13567_v19  ;;  %v11464_v37 = vpop.f32.mrb[233].mxu0  ;;  %v11678_v49 = vpop.f32.mrb[233].mxu1  ;;  %v1835_v19 = vld [vmem:[%s13215_s24 + $0x212] sm:$0xff] }
 0x2be   : > { %v2174_v4 = vpop.f32.mrb[234].mxu0  ;;  %v3066_v13 = vpop.f32.mrb[234].mxu1  ;;  %v1907_v37 = vpack.c.bf16 %v1836_v63, %v1835_v19  ;;  %v1838_v19 = vld [vmem:[%s13215_s24 + $0x22a] sm:$0xff]  ;;  %v2726_v63 = vld [vmem:[%s13215_s24 + $0x23e] sm:$0xff] }
 0x2bf   : > { %v2564_v1 = vadd.f32 %v2174_v4, %v13569_v27  ;;  %v14327_v17 = vadd.f32 %v3063_v53, %v2563_v60  ;;  %v11465_v6 = vpop.f32.mrb[235].mxu0  ;;  %v11679_v23 = vpop.f32.mrb[235].mxu1  ;;  %v2725_v27 = vld [vmem:[%s13215_s24 + $0x236] sm:$0xff] }
 0x2c0   : > { %v2796_v49 = vpack.c.bf16 %v2725_v27, %v2724_v46 }
 0x2c1   : > { %v14329_v55 = vadd.f32 %v3066_v13, %v2564_v1  ;;  %11571 = vmatmul.mubr.msk.bf16.gmra.mrb[84].mxu0 %vm528_vm3, %v1906_v21  ;;  %11785 = vmatmul.mubr.msk.bf16.gmra.mrb[84].mxu1 %vm528_vm3, %v2795_v32 }
 0x2c2   : > { %11574 = vmatprep.mubr.msk.bf16.mxu0 %vm13158_vm2, %v17672_v57  ;;  %11788 = vmatprep.mubr.msk.bf16.mxu1 %vm13158_vm2, %v17672_v57 }
 0x2c4   : > { %v2179_v30 = vpop.f32.mrb[236].mxu0  ;;  %v3071_v9 = vpop.f32.mrb[236].mxu1 }
 0x2c5   : > { %v2565_v14 = vadd.f32 %v2179_v30, %v13581_v38  ;;  %v11468_v53 = vpop.f32.mrb[237].mxu0  ;;  %v11682_v60 = vpop.f32.mrb[237].mxu1  ;;  %v1837_v38 = vld [vmem:[%s13215_s24 + $0x222] sm:$0xff] }
 0x2c6   : > { %v2182_v21 = vpop.f32.mrb[238].mxu0  ;;  %v3074_v32 = vpop.f32.mrb[238].mxu1  ;;  %v1908_v53 = vpack.c.bf16 %v1838_v19, %v1837_v38  ;;  %v1840_v38 = vld [vmem:[%s13215_s24 + $0x23a] sm:$0xff]  ;;  %v2728_v19 = vld [vmem:[%s13215_s24 + $0x24e] sm:$0xff] }
 0x2c7   : > { %v2566_v4 = vadd.f32 %v2182_v21, %v13583_v45  ;;  %v14343_v13 = vadd.f32 %v3071_v9, %v2565_v14  ;;  %v11469_v1 = vpop.f32.mrb[239].mxu0  ;;  %v11683_v6 = vpop.f32.mrb[239].mxu1  ;;  %v2727_v45 = vld [vmem:[%s13215_s24 + $0x246] sm:$0xff] }
 0x2c8   : > { %v2797_v60 = vpack.c.bf16 %v2727_v45, %v2726_v63 }
 0x2c9   : > { %v14345_v23 = vadd.f32 %v3074_v32, %v2566_v4  ;;  %11575 = vmatmul.mubr.msk.bf16.gmra.mrb[88].mxu0 %vm528_vm3, %v1907_v37  ;;  %11789 = vmatmul.mubr.msk.bf16.gmra.mrb[88].mxu1 %vm528_vm3, %v2796_v49 }
 0x2ca   : > { %11578 = vmatprep.mubr.msk.bf16.mxu0 %vm13158_vm2, %v17672_v57  ;;  %11792 = vmatprep.mubr.msk.bf16.mxu1 %vm13158_vm2, %v17672_v57 }
 0x2cc   : > { %v2187_v46 = vpop.f32.mrb[240].mxu0  ;;  %v3079_v27 = vpop.f32.mrb[240].mxu1 }
 0x2cd   : > { %v2567_v30 = vadd.f32 %v2187_v46, %v13595_v56  ;;  %v11472_v9 = vpop.f32.mrb[241].mxu0  ;;  %v11686_v14 = vpop.f32.mrb[241].mxu1  ;;  %v1839_v56 = vld [vmem:[%s13215_s24 + $0x232] sm:$0xff] }
 0x2ce   : > { %v2190_v37 = vpop.f32.mrb[242].mxu0  ;;  %v3082_v49 = vpop.f32.mrb[242].mxu1  ;;  %v1909_v9 = vpack.c.bf16 %v1840_v38, %v1839_v56  ;;  %v1842_v56 = vld [vmem:[%s13215_s24 + $0x24a] sm:$0xff]  ;;  %v2730_v38 = vld [vmem:[%s13215_s24 + $0x25e] sm:$0xff] }
 0x2cf   : > { %v2568_v21 = vadd.f32 %v2190_v37, %v13597_v2  ;;  %v14359_v32 = vadd.f32 %v3079_v27, %v2567_v30  ;;  %v11473_v4 = vpop.f32.mrb[243].mxu0  ;;  %v11687_v1 = vpop.f32.mrb[243].mxu1  ;;  %v2729_v2 = vld [vmem:[%s13215_s24 + $0x256] sm:$0xff] }
 0x2d0   : > { %v2798_v14 = vpack.c.bf16 %v2729_v2, %v2728_v19 }
 0x2d1   : > { %v14361_v6 = vadd.f32 %v3082_v49, %v2568_v21  ;;  %11579 = vmatmul.mubr.msk.bf16.gmra.mrb[92].mxu0 %vm528_vm3, %v1908_v53  ;;  %11793 = vmatmul.mubr.msk.bf16.gmra.mrb[92].mxu1 %vm528_vm3, %v2797_v60 }
 0x2d2   : > { %11582 = vmatprep.mubr.msk.bf16.mxu0 %vm13158_vm2, %v17672_v57  ;;  %11796 = vmatprep.mubr.msk.bf16.mxu1 %vm13158_vm2, %v17672_v57 }
 0x2d4   : > { %v2195_v63 = vpop.f32.mrb[244].mxu0  ;;  %v3087_v45 = vpop.f32.mrb[244].mxu1 }
 0x2d5   : > { %v2569_v46 = vadd.f32 %v2195_v63, %v13609_v15  ;;  %v11476_v27 = vpop.f32.mrb[245].mxu0  ;;  %v11690_v30 = vpop.f32.mrb[245].mxu1  ;;  %v1841_v15 = vld [vmem:[%s13215_s24 + $0x242] sm:$0xff] }
 0x2d6   : > { %v2198_v53 = vpop.f32.mrb[246].mxu0  ;;  %v3090_v60 = vpop.f32.mrb[246].mxu1  ;;  %v1910_v27 = vpack.c.bf16 %v1842_v56, %v1841_v15  ;;  %v1843_v15 = vld [vmem:[%s13215_s24 + $0x252] sm:$0xff]  ;;  %v1844_v56 = vld [vmem:[%s13215_s24 + $0x25a] sm:$0xff] }
 0x2d7   : > { %v2570_v37 = vadd.f32 %v2198_v53, %v13611_v24  ;;  %v14375_v49 = vadd.f32 %v3087_v45, %v2569_v46  ;;  %v11477_v21 = vpop.f32.mrb[247].mxu0  ;;  %v11691_v4 = vpop.f32.mrb[247].mxu1  ;;  %v2731_v24 = vld [vmem:[%s13215_s24 + $0x266] sm:$0xff] }
 0x2d8   : > { %v2799_v30 = vpack.c.bf16 %v2731_v24, %v2730_v38  ;;  %v13017_v53 = vld [vmem:[%s17662_s1 + $0x4] sm:$0x18]   ;;  %v2733_v38 = vld [vmem:[%s13215_s24 + $0x276] sm:$0xff] }
 0x2d9   : > { %v14377_v1 = vadd.f32 %v3090_v60, %v2570_v37  ;;  %11583 = vmatmul.mubr.msk.bf16.gmra.mrb[96].mxu0 %vm528_vm3, %v1909_v9  ;;  %11797 = vmatmul.mubr.msk.bf16.gmra.mrb[96].mxu1 %vm528_vm3, %v2798_v14  ;;  %v4602_v4 = vshrl.u32 %v13017_v53, 16 }
 0x2da   : > { %11586 = vmatprep.mubr.msk.bf16.mxu0 %vm13158_vm2, %v17672_v57  ;;  %11800 = vmatprep.mubr.msk.bf16.mxu1 %vm13158_vm2, %v17672_v57 }
 0x2db   : > { %v4604_v24 = vrot.slane %v4602_v4, 3 }
 0x2dc   : > { %v2203_v19 = vpop.f32.mrb[248].mxu0  ;;  %v3095_v2 = vpop.f32.mrb[248].mxu1 }
 0x2dd   : > { %v2571_v63 = vadd.f32 %v2203_v19, %v13623_v35  ;;  %v11480_v45 = vpop.f32.mrb[249].mxu0  ;;  %v11694_v46 = vpop.f32.mrb[249].mxu1  ;;  %v4605_v19 = vshll.u32 %v13017_v53, 16  ;;  %v1911_v53 = vpack.c.bf16 %v1844_v56, %v1843_v15  ;;  %v1845_v15 = vld [vmem:[%s13215_s24 + $0x262] sm:$0xff]  ;;  %v1846_v56 = vld [vmem:[%s13215_s24 + $0x26a] sm:$0xff] }
 0x2de   : > { %v2206_v9 = vpop.f32.mrb[250].mxu0  ;;  %v3098_v14 = vpop.f32.mrb[250].mxu1 }
 0x2df   : > { %v2572_v60 = vadd.f32 %v2206_v9, %v13625_v44  ;;  %v14394_v37 = vadd.f32 %v3095_v2, %v2571_v63  ;;  %v11481_v21 = vpop.f32.mrb[251].mxu0  ;;  %v11695_v35 = vpop.f32.mrb[251].mxu1  ;;  %v2732_v44 = vld [vmem:[%s13215_s24 + $0x26e] sm:$0xff]  ;;  %v4607_v2 = vrot.slane %v4605_v19, 4 }
 0x2e1   : > { %17730 = vst [vmem:[#allocation63_spill] sm:$0xff] %v14394_v37  ;;  %v14396_v45 = vadd.f32 %v3098_v14, %v2572_v60  ;;  %11587 = vmatmul.mubr.msk.bf16.gmra.mrb[100].mxu0 %vm528_vm3, %v1910_v27  ;;  %11801 = vmatmul.mubr.msk.bf16.gmra.mrb[100].mxu1 %vm528_vm3, %v2799_v30  ;;  %v4608_v9 = vor.u32 %v4607_v2, %v4604_v24 }
 0x2e2   : > { %11590 = vmatprep.mubr.msk.bf16.mxu0 %vm13158_vm2, %v17672_v57  ;;  %11804 = vmatprep.mubr.msk.bf16.mxu1 %vm13158_vm2, %v17672_v57  ;;  %v2800_v60 = vpack.c.bf16 %v2733_v38, %v2732_v44  ;;  %v2735_v44 = vld [vmem:[%s13215_s24 + $0x286] sm:$0xff] }
 0x2e3   : > { %17731 = vst [vmem:[#allocation64_spill] sm:$0xff] %v14396_v45  ;;  %v4769_v45 = vand.u32 %v4608_v9, %v13204_v7 }
 0x2e4   : > { %v2211_v63 = vpop.f32.mrb[252].mxu0  ;;  %v3103_v46 = vpop.f32.mrb[252].mxu1 }
 0x2e5   : > { %v2573_v14 = vadd.f32 %v2211_v63, %v13640_v62  ;;  %v11484_v27 = vpop.f32.mrb[253].mxu0  ;;  %v11698_v30 = vpop.f32.mrb[253].mxu1  ;;  %12083 = vmatpush3.bf16.msra.mxu1 %v4769_v45 }
 0x2e6   : > { %v2214_v21 = vpop.f32.mrb[254].mxu0  ;;  %v3106_v35 = vpop.f32.mrb[254].mxu1  ;;  %12510 = vmatprep.subr.bf16.mxu1 %v17672_v57 }
 0x2e7   : > { %v2574_v4 = vadd.f32 %v2214_v21, %v13642_v12  ;;  %v14411_v19 = vadd.f32 %v3103_v46, %v2573_v14  ;;  %v11485_v37 = vpop.f32.mrb[255].mxu0  ;;  %v11699_v24 = vpop.f32.mrb[255].mxu1  ;;  %v2734_v12 = vld [vmem:[%s13215_s24 + $0x27e] sm:$0xff]  ;;  %v1912_v46 = vpack.c.bf16 %v1846_v56, %v1845_v15 }
 0x2e8   : > { %v2801_v9 = vpack.c.bf16 %v2735_v44, %v2734_v12  ;;  %v2736_v24 = vld [vmem:[%s13215_s24 + $0x28e] sm:$0xff] }
 0x2e9   : > { %v14413_v62 = vadd.f32 %v3106_v35, %v2574_v4  ;;  %11591 = vmatmul.mubr.msk.bf16.gmra.mrb[104].mxu0 %vm528_vm3, %v1911_v53  ;;  %11805 = vmatmul.mubr.msk.bf16.gmra.mrb[104].mxu1 %vm528_vm3, %v2800_v60  ;;  %v1848_v4 = vld [vmem:[%s13215_s24 + $0x27a] sm:$0xff] }
 0x2ea   : > { %11594 = vmatprep.mubr.msk.bf16.mxu0 %vm13158_vm2, %v17672_v57  ;;  %11808 = vmatprep.mubr.msk.bf16.mxu1 %vm13158_vm2, %v17672_v57 }
 0x2ec   : > { %v2219_v37 = vpop.f32.mrb[0].mxu0  ;;  %v3111_v45 = vpop.f32.mrb[0].mxu1 }
 0x2ed   : > { %v2575_v38 = vadd.f32 %v2219_v37, %v13656_v28  ;;  %v11488_v2 = vpop.f32.mrb[1].mxu0  ;;  %v11702_v63 = vpop.f32.mrb[1].mxu1  ;;  %v1847_v28 = vld [vmem:[%s13215_s24 + $0x272] sm:$0xff] }
 0x2ee   : > { %v2222_v14 = vpop.f32.mrb[2].mxu0  ;;  %v3114_v27 = vpop.f32.mrb[2].mxu1 }
 0x2ef   : > { %v2576_v30 = vadd.f32 %v2222_v14, %v13658_v39  ;;  %v14428_v53 = vadd.f32 %v3111_v45, %v2575_v38  ;;  %v11489_v60 = vpop.f32.mrb[3].mxu0  ;;  %v11703_v21 = vpop.f32.mrb[3].mxu1  ;;  %v2737_v39 = vld [vmem:[%s13215_s24 + $0x296] sm:$0xff]  ;;  %v1913_v45 = vpack.c.bf16 %v1848_v4, %v1847_v28 }
 0x2f0   : > { %v2802_v38 = vpack.c.bf16 %v2737_v39, %v2736_v24  ;;  %v1850_v60 = vld [vmem:[%s13215_s24 + $0x28a] sm:$0xff]  ;;  %v2738_v21 = vld [vmem:[%s13215_s24 + $0x29e] sm:$0xff] }
 0x2f1   : > { %v14430_v35 = vadd.f32 %v3114_v27, %v2576_v30  ;;  %11595 = vmatmul.mubr.msk.bf16.gmra.mrb[108].mxu0 %vm528_vm3, %v1912_v46  ;;  %11809 = vmatmul.mubr.msk.bf16.gmra.mrb[108].mxu1 %vm528_vm3, %v2801_v9 }
 0x2f2   : > { %11598 = vmatprep.mubr.msk.bf16.mxu0 %vm13158_vm2, %v17672_v57  ;;  %11812 = vmatprep.mubr.msk.bf16.mxu1 %vm13158_vm2, %v17672_v57 }
 0x2f4   : > { %v2227_v15 = vpop.f32.mrb[4].mxu0  ;;  %v3119_v56 = vpop.f32.mrb[4].mxu1 }
 0x2f5   : > { %v2577_v12 = vadd.f32 %v2227_v15, %v13670_v51  ;;  %v11492_v44 = vpop.f32.mrb[5].mxu0  ;;  %v11706_v37 = vpop.f32.mrb[5].mxu1  ;;  %v1849_v51 = vld [vmem:[%s13215_s24 + $0x282] sm:$0xff] }
 0x2f6   : > { %v2230_v2 = vpop.f32.mrb[6].mxu0  ;;  %v3122_v63 = vpop.f32.mrb[6].mxu1 }
 0x2f7   : > { %v2578_v46 = vadd.f32 %v2230_v2, %v13672_v61  ;;  %v14444_v9 = vadd.f32 %v3119_v56, %v2577_v12  ;;  %v11493_v14 = vpop.f32.mrb[7].mxu0  ;;  %v11707_v27 = vpop.f32.mrb[7].mxu1  ;;  %v2739_v61 = vld [vmem:[%s13215_s24 + $0x2a6] sm:$0xff]  ;;  %v1914_v56 = vpack.c.bf16 %v1850_v60, %v1849_v51 }
 0x2f8   : > { %v2803_v12 = vpack.c.bf16 %v2739_v61, %v2738_v21  ;;  %v1852_v14 = vld [vmem:[%s13215_s24 + $0x29a] sm:$0xff]  ;;  %v2740_v27 = vld [vmem:[%s13215_s24 + $0x2ae] sm:$0xff] }
 0x2f9   : > { %v14446_v30 = vadd.f32 %v3122_v63, %v2578_v46  ;;  %11599 = vmatmul.mubr.msk.bf16.gmra.mrb[112].mxu0 %vm528_vm3, %v1913_v45  ;;  %11813 = vmatmul.mubr.msk.bf16.gmra.mrb[112].mxu1 %vm528_vm3, %v2802_v38 }
 0x2fa   : > { %11602 = vmatprep.mubr.msk.bf16.mxu0 %vm13158_vm2, %v17672_v57  ;;  %11816 = vmatprep.mubr.msk.bf16.mxu1 %vm13158_vm2, %v17672_v57 }
 0x2fc   : > { %v2235_v28 = vpop.f32.mrb[8].mxu0  ;;  %v3127_v4 = vpop.f32.mrb[8].mxu1 }
 0x2fd   : > { %v2579_v24 = vadd.f32 %v2235_v28, %v13684_v16  ;;  %v11496_v39 = vpop.f32.mrb[9].mxu0  ;;  %v11710_v15 = vpop.f32.mrb[9].mxu1  ;;  %v1851_v16 = vld [vmem:[%s13215_s24 + $0x292] sm:$0xff] }
 0x2fe   : > { %v2238_v44 = vpop.f32.mrb[10].mxu0  ;;  %v3130_v37 = vpop.f32.mrb[10].mxu1 }
 0x2ff   : > { %v2580_v45 = vadd.f32 %v2238_v44, %v13686_v26  ;;  %v14460_v38 = vadd.f32 %v3127_v4, %v2579_v24  ;;  %v11497_v2 = vpop.f32.mrb[11].mxu0  ;;  %v11711_v63 = vpop.f32.mrb[11].mxu1  ;;  %v2741_v26 = vld [vmem:[%s13215_s24 + $0x2b6] sm:$0xff]  ;;  %v1915_v4 = vpack.c.bf16 %v1852_v14, %v1851_v16 }
 0x300   : > { %v2804_v24 = vpack.c.bf16 %v2741_v26, %v2740_v27  ;;  %v1854_v2 = vld [vmem:[%s13215_s24 + $0x2aa] sm:$0xff]  ;;  %v2742_v63 = vld [vmem:[%s13215_s24 + $0x2be] sm:$0xff] }
 0x301   : > { %v14462_v46 = vadd.f32 %v3130_v37, %v2580_v45  ;;  %11603 = vmatmul.mubr.msk.bf16.gmra.mrb[116].mxu0 %vm528_vm3, %v1914_v56  ;;  %11817 = vmatmul.mubr.msk.bf16.gmra.mrb[116].mxu1 %vm528_vm3, %v2803_v12 }
 0x302   : > { %11606 = vmatprep.mubr.msk.bf16.mxu0 %vm13158_vm2, %v17672_v57  ;;  %11820 = vmatprep.mubr.msk.bf16.mxu1 %vm13158_vm2, %v17672_v57 }
 0x304   : > { %v2243_v51 = vpop.f32.mrb[12].mxu0  ;;  %v3135_v60 = vpop.f32.mrb[12].mxu1 }
 0x305   : > { %v2581_v21 = vadd.f32 %v2243_v51, %v13698_v42  ;;  %v11500_v61 = vpop.f32.mrb[13].mxu0  ;;  %v11714_v28 = vpop.f32.mrb[13].mxu1  ;;  %v1853_v42 = vld [vmem:[%s13215_s24 + $0x2a2] sm:$0xff] }
 0x306   : > { %v2246_v39 = vpop.f32.mrb[14].mxu0  ;;  %v3138_v15 = vpop.f32.mrb[14].mxu1 }
 0x307   : > { %v2582_v56 = vadd.f32 %v2246_v39, %v13700_v54  ;;  %v14476_v12 = vadd.f32 %v3135_v60, %v2581_v21  ;;  %v11501_v44 = vpop.f32.mrb[15].mxu0  ;;  %v11715_v37 = vpop.f32.mrb[15].mxu1  ;;  %v2743_v54 = vld [vmem:[%s13215_s24 + $0x2c6] sm:$0xff]  ;;  %v1916_v60 = vpack.c.bf16 %v1854_v2, %v1853_v42 }
 0x308   : > { %v2805_v21 = vpack.c.bf16 %v2743_v54, %v2742_v63  ;;  %v1856_v44 = vld [vmem:[%s13215_s24 + $0x2ba] sm:$0xff]  ;;  %v2744_v37 = vld [vmem:[%s13215_s24 + $0x2ce] sm:$0xff] }
 0x309   : > { %v14478_v45 = vadd.f32 %v3138_v15, %v2582_v56  ;;  %11607 = vmatmul.mubr.msk.bf16.gmra.mrb[120].mxu0 %vm528_vm3, %v1915_v4  ;;  %11821 = vmatmul.mubr.msk.bf16.gmra.mrb[120].mxu1 %vm528_vm3, %v2804_v24 }
 0x30a   : > { %11610 = vmatprep.mubr.msk.bf16.mxu0 %vm13158_vm2, %v17672_v57  ;;  %11824 = vmatprep.mubr.msk.bf16.mxu1 %vm13158_vm2, %v17672_v57 }
 0x30c   : > { %v2251_v16 = vpop.f32.mrb[16].mxu0  ;;  %v3143_v14 = vpop.f32.mrb[16].mxu1 }
 0x30d   : > { %v2583_v27 = vadd.f32 %v2251_v16, %v13712_v8  ;;  %v11504_v26 = vpop.f32.mrb[17].mxu0  ;;  %v11718_v51 = vpop.f32.mrb[17].mxu1  ;;  %v1855_v8 = vld [vmem:[%s13215_s24 + $0x2b2] sm:$0xff] }
 0x30e   : > { %v2254_v61 = vpop.f32.mrb[18].mxu0  ;;  %v3146_v28 = vpop.f32.mrb[18].mxu1 }
 0x30f   : > { %v2584_v4 = vadd.f32 %v2254_v61, %v13714_v22  ;;  %v14492_v24 = vadd.f32 %v3143_v14, %v2583_v27  ;;  %v11505_v39 = vpop.f32.mrb[19].mxu0  ;;  %v11719_v15 = vpop.f32.mrb[19].mxu1  ;;  %v2745_v22 = vld [vmem:[%s13215_s24 + $0x2d6] sm:$0xff]  ;;  %v1917_v14 = vpack.c.bf16 %v1856_v44, %v1855_v8 }
 0x310   : > { %v2806_v27 = vpack.c.bf16 %v2745_v22, %v2744_v37  ;;  %v1858_v39 = vld [vmem:[%s13215_s24 + $0x2ca] sm:$0xff]  ;;  %v2746_v15 = vld [vmem:[%s13215_s24 + $0x2de] sm:$0xff] }
 0x311   : > { %v14494_v56 = vadd.f32 %v3146_v28, %v2584_v4  ;;  %11611 = vmatmul.mubr.msk.bf16.gmra.mrb[124].mxu0 %vm528_vm3, %v1916_v60  ;;  %11825 = vmatmul.mubr.msk.bf16.gmra.mrb[124].mxu1 %vm528_vm3, %v2805_v21 }
 0x312   : > { %11614 = vmatprep.mubr.msk.bf16.mxu0 %vm13158_vm2, %v17672_v57  ;;  %11828 = vmatprep.mubr.msk.bf16.mxu1 %vm13158_vm2, %v17672_v57 }
 0x314   : > { %v2259_v42 = vpop.f32.mrb[20].mxu0  ;;  %v3151_v2 = vpop.f32.mrb[20].mxu1 }
 0x315   : > { %v2585_v63 = vadd.f32 %v2259_v42, %v13726_v40  ;;  %v11508_v54 = vpop.f32.mrb[21].mxu0  ;;  %v11722_v16 = vpop.f32.mrb[21].mxu1  ;;  %v1857_v40 = vld [vmem:[%s13215_s24 + $0x2c2] sm:$0xff] }
 0x316   : > { %v2262_v26 = vpop.f32.mrb[22].mxu0  ;;  %v3154_v51 = vpop.f32.mrb[22].mxu1 }
 0x317   : > { %v2586_v60 = vadd.f32 %v2262_v26, %v13728_v52  ;;  %v14508_v21 = vadd.f32 %v3151_v2, %v2585_v63  ;;  %v11509_v61 = vpop.f32.mrb[23].mxu0  ;;  %v11723_v28 = vpop.f32.mrb[23].mxu1  ;;  %v2747_v52 = vld [vmem:[%s13215_s24 + $0x2e6] sm:$0xff]  ;;  %v1918_v2 = vpack.c.bf16 %v1858_v39, %v1857_v40 }
 0x318   : > { %v2807_v63 = vpack.c.bf16 %v2747_v52, %v2746_v15  ;;  %v1860_v61 = vld [vmem:[%s13215_s24 + $0x2da] sm:$0xff]  ;;  %v2748_v28 = vld [vmem:[%s13215_s24 + $0x2ee] sm:$0xff] }
 0x319   : > { %v14510_v4 = vadd.f32 %v3154_v51, %v2586_v60  ;;  %11615 = vmatmul.mubr.msk.bf16.gmra.mrb[128].mxu0 %vm528_vm3, %v1917_v14  ;;  %11829 = vmatmul.mubr.msk.bf16.gmra.mrb[128].mxu1 %vm528_vm3, %v2806_v27 }
 0x31a   : > { %11618 = vmatprep.mubr.msk.bf16.mxu0 %vm13158_vm2, %v17672_v57  ;;  %11832 = vmatprep.mubr.msk.bf16.mxu1 %vm13158_vm2, %v17672_v57 }
 0x31c   : > { %v2267_v8 = vpop.f32.mrb[24].mxu0  ;;  %v3159_v44 = vpop.f32.mrb[24].mxu1 }
 0x31d   : > { %v2587_v37 = vadd.f32 %v2267_v8, %v13740_v10  ;;  %v11512_v22 = vpop.f32.mrb[25].mxu0  ;;  %v11726_v42 = vpop.f32.mrb[25].mxu1  ;;  %v1859_v10 = vld [vmem:[%s13215_s24 + $0x2d2] sm:$0xff] }
 0x31e   : > { %v2270_v54 = vpop.f32.mrb[26].mxu0  ;;  %v3162_v16 = vpop.f32.mrb[26].mxu1 }
 0x31f   : > { %v2588_v14 = vadd.f32 %v2270_v54, %v13742_v25  ;;  %v14524_v27 = vadd.f32 %v3159_v44, %v2587_v37  ;;  %v11513_v26 = vpop.f32.mrb[27].mxu0  ;;  %v11727_v51 = vpop.f32.mrb[27].mxu1  ;;  %v2749_v25 = vld [vmem:[%s13215_s24 + $0x2f6] sm:$0xff]  ;;  %v1919_v44 = vpack.c.bf16 %v1860_v61, %v1859_v10 }
 0x320   : > { %v2808_v37 = vpack.c.bf16 %v2749_v25, %v2748_v28  ;;  %v1862_v26 = vld [vmem:[%s13215_s24 + $0x2ea] sm:$0xff]  ;;  %v2750_v51 = vld [vmem:[%s13215_s24 + $0x2fe] sm:$0xff] }
 0x321   : > { %v14526_v60 = vadd.f32 %v3162_v16, %v2588_v14  ;;  %11619 = vmatmul.mubr.msk.bf16.gmra.mrb[132].mxu0 %vm528_vm3, %v1918_v2  ;;  %11833 = vmatmul.mubr.msk.bf16.gmra.mrb[132].mxu1 %vm528_vm3, %v2807_v63 }
 0x322   : > { %11622 = vmatprep.mubr.msk.bf16.mxu0 %vm13158_vm2, %v17672_v57  ;;  %11836 = vmatprep.mubr.msk.bf16.mxu1 %vm13158_vm2, %v17672_v57 }
 0x324   : > { %v2275_v40 = vpop.f32.mrb[28].mxu0  ;;  %v3167_v39 = vpop.f32.mrb[28].mxu1 }
 0x325   : > { %v2589_v15 = vadd.f32 %v2275_v40, %v13754_v47  ;;  %v11516_v52 = vpop.f32.mrb[29].mxu0  ;;  %v11730_v8 = vpop.f32.mrb[29].mxu1  ;;  %v1861_v47 = vld [vmem:[%s13215_s24 + $0x2e2] sm:$0xff] }
 0x326   : > { %v2278_v22 = vpop.f32.mrb[30].mxu0  ;;  %v3170_v42 = vpop.f32.mrb[30].mxu1 }
 0x327   : > { %v2590_v2 = vadd.f32 %v2278_v22, %v13756_v59  ;;  %v14540_v63 = vadd.f32 %v3167_v39, %v2589_v15  ;;  %v11517_v54 = vpop.f32.mrb[31].mxu0  ;;  %v11731_v16 = vpop.f32.mrb[31].mxu1  ;;  %v2751_v59 = vld [vmem:[%s13215_s24 + $0x306] sm:$0xff]  ;;  %v1920_v39 = vpack.c.bf16 %v1862_v26, %v1861_v47 }
 0x328   : > { %v2809_v15 = vpack.c.bf16 %v2751_v59, %v2750_v51  ;;  %v1864_v54 = vld [vmem:[%s13215_s24 + $0x2fa] sm:$0xff]  ;;  %v2752_v16 = vld [vmem:[%s13215_s24 + $0x30e] sm:$0xff] }
 0x329   : > { %v14542_v14 = vadd.f32 %v3170_v42, %v2590_v2  ;;  %11623 = vmatmul.mubr.msk.bf16.gmra.mrb[136].mxu0 %vm528_vm3, %v1919_v44  ;;  %11837 = vmatmul.mubr.msk.bf16.gmra.mrb[136].mxu1 %vm528_vm3, %v2808_v37 }
 0x32a   : > { %11626 = vmatprep.mubr.msk.bf16.mxu0 %vm13158_vm2, %v17672_v57  ;;  %11840 = vmatprep.mubr.msk.bf16.mxu1 %vm13158_vm2, %v17672_v57 }
 0x32c   : > { %v2283_v10 = vpop.f32.mrb[32].mxu0  ;;  %v3175_v61 = vpop.f32.mrb[32].mxu1 }
 0x32d   : > { %v2591_v28 = vadd.f32 %v2283_v10, %v13768_v20  ;;  %v11520_v25 = vpop.f32.mrb[33].mxu0  ;;  %v11734_v40 = vpop.f32.mrb[33].mxu1  ;;  %v1863_v20 = vld [vmem:[%s13215_s24 + $0x2f2] sm:$0xff] }
 0x32e   : > { %v2286_v52 = vpop.f32.mrb[34].mxu0  ;;  %v3178_v8 = vpop.f32.mrb[34].mxu1 }
 0x32f   : > { %v2592_v44 = vadd.f32 %v2286_v52, %v13770_v36  ;;  %v14556_v37 = vadd.f32 %v3175_v61, %v2591_v28  ;;  %v11521_v22 = vpop.f32.mrb[35].mxu0  ;;  %v11735_v42 = vpop.f32.mrb[35].mxu1  ;;  %v2753_v36 = vld [vmem:[%s13215_s24 + $0x316] sm:$0xff]  ;;  %v1921_v61 = vpack.c.bf16 %v1864_v54, %v1863_v20 }
 0x330   : > { %v2810_v28 = vpack.c.bf16 %v2753_v36, %v2752_v16  ;;  %v1866_v22 = vld [vmem:[%s13215_s24 + $0x30a] sm:$0xff]  ;;  %v2754_v42 = vld [vmem:[%s13215_s24 + $0x31e] sm:$0xff] }
 0x331   : > { %v14558_v2 = vadd.f32 %v3178_v8, %v2592_v44  ;;  %11627 = vmatmul.mubr.msk.bf16.gmra.mrb[140].mxu0 %vm528_vm3, %v1920_v39  ;;  %11841 = vmatmul.mubr.msk.bf16.gmra.mrb[140].mxu1 %vm528_vm3, %v2809_v15 }
 0x332   : > { %11630 = vmatprep.mubr.msk.bf16.mxu0 %vm13158_vm2, %v17672_v57  ;;  %11844 = vmatprep.mubr.msk.bf16.mxu1 %vm13158_vm2, %v17672_v57 }
 0x334   : > { %v2291_v47 = vpop.f32.mrb[36].mxu0  ;;  %v3183_v26 = vpop.f32.mrb[36].mxu1 }
 0x335   : > { %v2593_v51 = vadd.f32 %v2291_v47, %v13782_v0  ;;  %v11524_v59 = vpop.f32.mrb[37].mxu0  ;;  %v11738_v10 = vpop.f32.mrb[37].mxu1  ;;  %v1865_v0 = vld [vmem:[%s13215_s24 + $0x302] sm:$0xff] }
 0x336   : > { %v2294_v25 = vpop.f32.mrb[38].mxu0  ;;  %v3186_v40 = vpop.f32.mrb[38].mxu1 }
 0x337   : > { %v2594_v39 = vadd.f32 %v2294_v25, %v13784_v18  ;;  %v14572_v15 = vadd.f32 %v3183_v26, %v2593_v51  ;;  %v11525_v52 = vpop.f32.mrb[39].mxu0  ;;  %v11739_v8 = vpop.f32.mrb[39].mxu1  ;;  %v2755_v18 = vld [vmem:[%s13215_s24 + $0x326] sm:$0xff]  ;;  %v1922_v26 = vpack.c.bf16 %v1866_v22, %v1865_v0 }
 0x338   : > { %v2811_v51 = vpack.c.bf16 %v2755_v18, %v2754_v42  ;;  %v1868_v52 = vld [vmem:[%s13215_s24 + $0x31a] sm:$0xff]  ;;  %v2756_v8 = vld [vmem:[%s13215_s24 + $0x32e] sm:$0xff] }
 0x339   : > { %v14574_v44 = vadd.f32 %v3186_v40, %v2594_v39  ;;  %11631 = vmatmul.mubr.msk.bf16.gmra.mrb[144].mxu0 %vm528_vm3, %v1921_v61  ;;  %11845 = vmatmul.mubr.msk.bf16.gmra.mrb[144].mxu1 %vm528_vm3, %v2810_v28  ;;  %v17732_v42 = vld [vmem:[#allocation2_spill] sm:$0xff] }
 0x33a   : > { %11634 = vmatprep.mubr.msk.bf16.mxu0 %vm13158_vm2, %v17672_v57  ;;  %11848 = vmatprep.mubr.msk.bf16.mxu1 %vm13158_vm2, %v17672_v57 }
 0x33c   : > { %v2299_v20 = vpop.f32.mrb[40].mxu0  ;;  %v3191_v54 = vpop.f32.mrb[40].mxu1 }
 0x33d   : > { %v2595_v16 = vadd.f32 %v2299_v20, %v13796_v48  ;;  %v11528_v36 = vpop.f32.mrb[41].mxu0  ;;  %v11742_v47 = vpop.f32.mrb[41].mxu1  ;;  %v1867_v48 = vld [vmem:[%s13215_s24 + $0x312] sm:$0xff] }
 0x33e   : > { %v2302_v59 = vpop.f32.mrb[42].mxu0  ;;  %v3194_v10 = vpop.f32.mrb[42].mxu1 }
 0x33f   : > { %v2596_v61 = vadd.f32 %v2302_v59, %v13798_v5  ;;  %v14588_v28 = vadd.f32 %v3191_v54, %v2595_v16  ;;  %v11529_v25 = vpop.f32.mrb[43].mxu0  ;;  %v11743_v40 = vpop.f32.mrb[43].mxu1  ;;  %v2757_v5 = vld [vmem:[%s13215_s24 + $0x336] sm:$0xff]  ;;  %v1923_v16 = vpack.c.bf16 %v1868_v52, %v1867_v48  ;;  %v1870_v48 = vld [vmem:[%s13215_s24 + $0x32a] sm:$0xff]  ;;  %v2758_v52 = vld [vmem:[%s13215_s24 + $0x33e] sm:$0xff] }
 0x340   : > { %v2812_v36 = vpack.c.bf16 %v2757_v5, %v2756_v8  ;;  %v2759_v8 = vld [vmem:[%s13215_s24 + $0x346] sm:$0xff] }
 0x341   : > { %v14590_v39 = vadd.f32 %v3194_v10, %v2596_v61  ;;  %11635 = vmatmul.mubr.msk.bf16.gmra.mrb[148].mxu0 %vm528_vm3, %v1922_v26  ;;  %11849 = vmatmul.mubr.msk.bf16.gmra.mrb[148].mxu1 %vm528_vm3, %v2811_v51  ;;  %v17733_v51 = vld [vmem:[#allocation3_spill] sm:$0xff] }
 0x342   : > { %11638 = vmatprep.mubr.msk.bf16.mxu0 %vm13158_vm2, %v17672_v57  ;;  %11852 = vmatprep.mubr.msk.bf16.mxu1 %vm13158_vm2, %v17672_v57 }
 0x344   : > { %v2307_v0 = vpop.f32.mrb[44].mxu0  ;;  %v3199_v22 = vpop.f32.mrb[44].mxu1 }
 0x345   : > { %v2597_v18 = vadd.f32 %v2307_v0, %v17732_v42  ;;  %v11532_v20 = vpop.f32.mrb[45].mxu0  ;;  %v11746_v54 = vpop.f32.mrb[45].mxu1  ;;  %v1869_v0 = vld [vmem:[%s13215_s24 + $0x322] sm:$0xff]  ;;  %v17736_v42 = vld [vmem:[#allocation4_spill] sm:$0xff] }
 0x346   : > { %v2310_v47 = vpop.f32.mrb[46].mxu0  ;;  %v3202_v26 = vpop.f32.mrb[46].mxu1 }
 0x347   : > { %v2598_v59 = vadd.f32 %v2310_v47, %v17733_v51  ;;  %v14604_v10 = vadd.f32 %v3199_v22, %v2597_v18  ;;  %v11533_v61 = vpop.f32.mrb[47].mxu0  ;;  %v11747_v25 = vpop.f32.mrb[47].mxu1  ;;  %v17737_v51 = vld [vmem:[#allocation5_spill] sm:$0xff] }
 0x349   : > { %17734 = vst [vmem:[#allocation2_spill] sm:$0xff] %v14604_v10  ;;  %v14606_v40 = vadd.f32 %v3202_v26, %v2598_v59  ;;  %11639 = vmatmul.mubr.msk.bf16.gmra.mrb[152].mxu0 %vm528_vm3, %v1923_v16  ;;  %11853 = vmatmul.mubr.msk.bf16.gmra.mrb[152].mxu1 %vm528_vm3, %v2812_v36  ;;  %v1924_v16 = vpack.c.bf16 %v1870_v48, %v1869_v0  ;;  %v1872_v0 = vld [vmem:[%s13215_s24 + $0x33a] sm:$0xff]  ;;  %v2760_v48 = vld [vmem:[%s13215_s24 + $0x34e] sm:$0xff] }
 0x34a   : > { %11642 = vmatprep.mubr.msk.bf16.mxu0 %vm13158_vm2, %v17672_v57  ;;  %11856 = vmatprep.mubr.msk.bf16.mxu1 %vm13158_vm2, %v17672_v57  ;;  %v2813_v36 = vpack.c.bf16 %v2759_v8, %v2758_v52  ;;  %v2761_v52 = vld [vmem:[%s13215_s24 + $0x356] sm:$0xff] }
 0x34b   : > { %17735 = vst [vmem:[#allocation3_spill] sm:$0xff] %v14606_v40 }
 0x34c   : > { %v2315_v5 = vpop.f32.mrb[48].mxu0  ;;  %v3207_v22 = vpop.f32.mrb[48].mxu1 }
 0x34d   : > { %v2599_v18 = vadd.f32 %v2315_v5, %v17736_v42  ;;  %v11536_v20 = vpop.f32.mrb[49].mxu0  ;;  %v11750_v54 = vpop.f32.mrb[49].mxu1  ;;  %v1871_v5 = vld [vmem:[%s13215_s24 + $0x332] sm:$0xff]  ;;  %v17740_v42 = vld [vmem:[#allocation6_spill] sm:$0xff] }
 0x34e   : > { %v2318_v47 = vpop.f32.mrb[50].mxu0  ;;  %v3210_v26 = vpop.f32.mrb[50].mxu1  ;;  %v1925_v54 = vpack.c.bf16 %v1872_v0, %v1871_v5  ;;  %v2762_v5 = vld [vmem:[%s13215_s24 + $0x35e] sm:$0x3f] }
 0x34f   : > { %v2600_v59 = vadd.f32 %v2318_v47, %v17737_v51  ;;  %v14620_v61 = vadd.f32 %v3207_v22, %v2599_v18  ;;  %v11537_v25 = vpop.f32.mrb[51].mxu0  ;;  %v11751_v40 = vpop.f32.mrb[51].mxu1 }
 0x351   : > { %17738 = vst [vmem:[#allocation4_spill] sm:$0xff] %v14620_v61  ;;  %v14622_v10 = vadd.f32 %v3210_v26, %v2600_v59  ;;  %11643 = vmatmul.mubr.msk.bf16.gmra.mrb[156].mxu0 %vm528_vm3, %v1924_v16  ;;  %11857 = vmatmul.mubr.msk.bf16.gmra.mrb[156].mxu1 %vm528_vm3, %v2813_v36  ;;  %v2814_v16 = vpack.c.bf16 %v2761_v52, %v2760_v48  ;;  %v17741_v26 = vld [vmem:[#allocation7_spill] sm:$0xff]  ;;  %v17744_v52 = vld [vmem:[#allocation8_spill] sm:$0xff] }
 0x352   : > { %11646 = vmatprep.mubr.msk.bf16.mxu0 %vm13158_vm2, %v17672_v57  ;;  %11860 = vmatprep.mubr.msk.bf16.mxu1 %vm13158_vm2, %v17672_v57 }
 0x353   : > { %17739 = vst [vmem:[#allocation5_spill] sm:$0xff] %v14622_v10 }
 0x354   : > { %v2323_v8 = vpop.f32.mrb[52].mxu0  ;;  %v3215_v22 = vpop.f32.mrb[52].mxu1 }
 0x355   : > { %v2601_v40 = vadd.f32 %v2323_v8, %v17740_v42  ;;  %v11540_v18 = vpop.f32.mrb[53].mxu0  ;;  %v11754_v20 = vpop.f32.mrb[53].mxu1  ;;  %v1873_v8 = vld [vmem:[%s13215_s24 + $0x342] sm:$0x3f] }
 0x356   : > { %v2326_v36 = vpop.f32.mrb[54].mxu0  ;;  %v3218_v47 = vpop.f32.mrb[54].mxu1  ;;  %v2815_v18 = vpack.c.bf16 %v2762_v5, %v2762_v5  ;;  %v4436_v5 = vld [vmem:[%s13215_s24 + $0x20] sm:$0xff] }
 0x357   : > { %v2602_v51 = vadd.f32 %v2326_v36, %v17741_v26  ;;  %v14636_v59 = vadd.f32 %v3215_v22, %v2601_v40  ;;  %v11541_v25 = vpop.f32.mrb[55].mxu0  ;;  %v11755_v10 = vpop.f32.mrb[55].mxu1  ;;  %v1926_v40 = vpack.c.bf16 %v1873_v8, %v1873_v8  ;;  %v3551_v8 = vld [vmem:[%s13215_s24 + $0x27] sm:$0xff] }
 0x359   : > { %17742 = vst [vmem:[#allocation6_spill] sm:$0xff] %v14636_v59  ;;  %v14638_v61 = vadd.f32 %v3218_v47, %v2602_v51  ;;  %11647 = vmatmul.mubr.msk.bf16.gmra.mrb[160].mxu0 %vm528_vm3, %v1925_v54  ;;  %11861 = vmatmul.mubr.msk.bf16.gmra.mrb[160].mxu1 %vm528_vm3, %v2814_v16  ;;  %v17745_v16 = vld [vmem:[#allocation9_spill] sm:$0xff] }
 0x35a   : > { %11650 = vmatprep.mubr.msk.bf16.mxu0 %vm13158_vm2, %v17672_v57  ;;  %11864 = vmatprep.mubr.msk.bf16.mxu1 %vm13158_vm2, %v17672_v57 }
 0x35b   : > { %17743 = vst [vmem:[#allocation7_spill] sm:$0xff] %v14638_v61 }
 0x35c   : > { %v2331_v0 = vpop.f32.mrb[56].mxu0  ;;  %v3223_v48 = vpop.f32.mrb[56].mxu1 }
 0x35d   : > { %v2603_v22 = vadd.f32 %v2331_v0, %v17744_v52  ;;  %v11544_v10 = vpop.f32.mrb[57].mxu0  ;;  %v11758_v42 = vpop.f32.mrb[57].mxu1  ;;  %v3550_v0 = vld [vmem:[%s13215_s24 + $0x1f] sm:$0xff]  ;;  %v4437_v52 = vld [vmem:[%s13215_s24 + $0x28] sm:$0xff] }
 0x35e   : > { %v2334_v20 = vpop.f32.mrb[58].mxu0  ;;  %v3226_v54 = vpop.f32.mrb[58].mxu1  ;;  %v17748_v10 = vld [vmem:[#allocation10_spill] sm:$0xff] }
 0x35f   : > { %v2604_v36 = vadd.f32 %v2334_v20, %v17745_v16  ;;  %v14650_v47 = vadd.f32 %v3223_v48, %v2603_v22  ;;  %v11545_v26 = vpop.f32.mrb[59].mxu0  ;;  %v11759_v51 = vpop.f32.mrb[59].mxu1 }
 0x360   : > { %v17749_v26 = vld [vmem:[#allocation11_spill] sm:$0xff] }
 0x361   : > { %17746 = vst [vmem:[#allocation8_spill] sm:$0xff] %v14650_v47  ;;  %v14652_v25 = vadd.f32 %v3226_v54, %v2604_v36  ;;  %11651 = vmatmul.mubr.msk.bf16.gmra.mrb[164].mxu0 %vm528_vm3, %v1926_v40  ;;  %11865 = vmatmul.mubr.msk.bf16.gmra.mrb[164].mxu1 %vm528_vm3, %v2815_v18  ;;  %v3655_v18 = vpack.c.bf16 %v3551_v8, %v3550_v0  ;;  %v3553_v0 = vld [vmem:[%s13215_s24 + $0x37] sm:$0xff] }
 0x362   : > { %11870 = vmatprep.mubr.msk.bf16.mxu0 %vm13158_vm2, %v17672_v57  ;;  %12084 = vmatprep.mubr.msk.bf16.mxu1 %vm13158_vm2, %v17672_v57  ;;  %v4541_v54 = vpack.c.bf16 %v4437_v52, %v4436_v5  ;;  %v4438_v8 = vld [vmem:[%s13215_s24 + $0x30] sm:$0xff]  ;;  %v4439_v5 = vld [vmem:[%s13215_s24 + $0x38] sm:$0xff] }
 0x363   : > { %17747 = vst [vmem:[#allocation9_spill] sm:$0xff] %v14652_v25 }
 0x364   : > { %v2339_v48 = vpop.f32.mrb[60].mxu0  ;;  %v3231_v22 = vpop.f32.mrb[60].mxu1 }
 0x365   : > { %v2605_v42 = vadd.f32 %v2339_v48, %v17748_v10  ;;  %v11548_v20 = vpop.f32.mrb[61].mxu0  ;;  %v11762_v40 = vpop.f32.mrb[61].mxu1  ;;  %v3552_v48 = vld [vmem:[%s13215_s24 + $0x2f] sm:$0xff] }
 0x366   : > { %v2342_v16 = vpop.f32.mrb[62].mxu0  ;;  %v3234_v36 = vpop.f32.mrb[62].mxu1  ;;  %v3656_v20 = vpack.c.bf16 %v3553_v0, %v3552_v48  ;;  %v4542_v40 = vpack.c.bf16 %v4439_v5, %v4438_v8  ;;  %v3555_v48 = vld [vmem:[%s13215_s24 + $0x47] sm:$0xff] }
 0x367   : > { %v2606_v51 = vadd.f32 %v2342_v16, %v17749_v26  ;;  %v14666_v25 = vadd.f32 %v3231_v22, %v2605_v42  ;;  %v11549_v47 = vpop.f32.mrb[63].mxu0  ;;  %v11763_v61 = vpop.f32.mrb[63].mxu1  ;;  %v17753_v16 = vld [vmem:[#allocation13_spill] sm:$0xff]  ;;  %v4440_v0 = vld [vmem:[%s13215_s24 + $0x40] sm:$0xff]  ;;  %v4441_v8 = vld [vmem:[%s13215_s24 + $0x48] sm:$0xff] }
 0x368   : > { %v17752_v61 = vld [vmem:[#allocation12_spill] sm:$0xff] }
 0x369   : > { %17750 = vst [vmem:[#allocation10_spill] sm:$0xff] %v14666_v25  ;;  %v14668_v59 = vadd.f32 %v3234_v36, %v2606_v51  ;;  %11871 = vmatmul.mubr.msk.bf16.vlgmr.msra.gmra.mrb[168].mxu0 %vm528_vm3, %v3655_v18  ;;  %12085 = vmatmul.mubr.msk.bf16.vlgmr.msra.gmra.mrb[168].mxu1 %vm528_vm3, %v4541_v54 }
 0x36a   : > { %11874 = vmatprep.mubr.msk.bf16.mxu0 %vm13158_vm2, %v17672_v57  ;;  %12088 = vmatprep.mubr.msk.bf16.mxu1 %vm13158_vm2, %v17672_v57 }
 0x36b   : > { %17751 = vst [vmem:[#allocation11_spill] sm:$0xff] %v14668_v59 }
 0x36c   : > { %v2347_v52 = vpop.f32.mrb[64].mxu0  ;;  %v3239_v47 = vpop.f32.mrb[64].mxu1 }
 0x36d   : > { %v2607_v22 = vadd.f32 %v2347_v52, %v17752_v61  ;;  %v11552_v10 = vpop.f32.mrb[65].mxu0  ;;  %v11766_v42 = vpop.f32.mrb[65].mxu1  ;;  %v3554_v52 = vld [vmem:[%s13215_s24 + $0x3f] sm:$0xff] }
 0x36e   : > { %v2350_v18 = vpop.f32.mrb[66].mxu0  ;;  %v3242_v54 = vpop.f32.mrb[66].mxu1  ;;  %v3657_v42 = vpack.c.bf16 %v3555_v48, %v3554_v52  ;;  %v3557_v52 = vld [vmem:[%s13215_s24 + $0x57] sm:$0xff] }
 0x36f   : > { %v2608_v36 = vadd.f32 %v2350_v18, %v17753_v16  ;;  %v14682_v26 = vadd.f32 %v3239_v47, %v2607_v22  ;;  %v11553_v51 = vpop.f32.mrb[67].mxu0  ;;  %v11767_v59 = vpop.f32.mrb[67].mxu1  ;;  %v4442_v48 = vld [vmem:[%s13215_s24 + $0x50] sm:$0xff] }
 0x370   : > { %v17756_v59 = vld [vmem:[#allocation14_spill] sm:$0xff] }
 0x371   : > { %17754 = vst [vmem:[#allocation12_spill] sm:$0xff] %v14682_v26  ;;  %v14684_v25 = vadd.f32 %v3242_v54, %v2608_v36  ;;  %11875 = vmatmul.mubr.msk.bf16.gmra.mrb[172].mxu0 %vm528_vm3, %v3656_v20  ;;  %12089 = vmatmul.mubr.msk.bf16.gmra.mrb[172].mxu1 %vm528_vm3, %v4542_v40  ;;  %v4543_v20 = vpack.c.bf16 %v4441_v8, %v4440_v0  ;;  %v17757_v54 = vld [vmem:[#allocation15_spill] sm:$0xff]  ;;  %v4443_v0 = vld [vmem:[%s13215_s24 + $0x58] sm:$0xff] }
 0x372   : > { %11878 = vmatprep.mubr.msk.bf16.mxu0 %vm13158_vm2, %v17672_v57  ;;  %12092 = vmatprep.mubr.msk.bf16.mxu1 %vm13158_vm2, %v17672_v57 }
 0x373   : > { %17755 = vst [vmem:[#allocation13_spill] sm:$0xff] %v14684_v25 }
 0x374   : > { %v2355_v5 = vpop.f32.mrb[68].mxu0  ;;  %v3247_v47 = vpop.f32.mrb[68].mxu1 }
 0x375   : > { %v2609_v61 = vadd.f32 %v2355_v5, %v17756_v59  ;;  %v11556_v22 = vpop.f32.mrb[69].mxu0  ;;  %v11770_v10 = vpop.f32.mrb[69].mxu1  ;;  %v3556_v5 = vld [vmem:[%s13215_s24 + $0x4f] sm:$0xff] }
 0x376   : > { %v2358_v40 = vpop.f32.mrb[70].mxu0  ;;  %v3250_v18 = vpop.f32.mrb[70].mxu1  ;;  %v3658_v10 = vpack.c.bf16 %v3557_v52, %v3556_v5  ;;  %v3559_v5 = vld [vmem:[%s13215_s24 + $0x67] sm:$0xff] }
 0x377   : > { %v2610_v16 = vadd.f32 %v2358_v40, %v17757_v54  ;;  %v14698_v36 = vadd.f32 %v3247_v47, %v2609_v61  ;;  %v11557_v51 = vpop.f32.mrb[71].mxu0  ;;  %v11771_v25 = vpop.f32.mrb[71].mxu1  ;;  %v4444_v52 = vld [vmem:[%s13215_s24 + $0x60] sm:$0xff] }
 0x378   : > { %v17760_v25 = vld [vmem:[#allocation16_spill] sm:$0xff] }
 0x379   : > { %17758 = vst [vmem:[#allocation14_spill] sm:$0xff] %v14698_v36  ;;  %v14700_v26 = vadd.f32 %v3250_v18, %v2610_v16  ;;  %11879 = vmatmul.mubr.msk.bf16.gmra.mrb[176].mxu0 %vm528_vm3, %v3657_v42  ;;  %12093 = vmatmul.mubr.msk.bf16.gmra.mrb[176].mxu1 %vm528_vm3, %v4543_v20  ;;  %v4544_v42 = vpack.c.bf16 %v4443_v0, %v4442_v48  ;;  %v17761_v18 = vld [vmem:[#allocation17_spill] sm:$0xff]  ;;  %v4445_v48 = vld [vmem:[%s13215_s24 + $0x68] sm:$0xff] }
 0x37a   : > { %11882 = vmatprep.mubr.msk.bf16.mxu0 %vm13158_vm2, %v17672_v57  ;;  %12096 = vmatprep.mubr.msk.bf16.mxu1 %vm13158_vm2, %v17672_v57 }
 0x37b   : > { %17759 = vst [vmem:[#allocation15_spill] sm:$0xff] %v14700_v26 }
 0x37c   : > { %v2363_v8 = vpop.f32.mrb[72].mxu0  ;;  %v3255_v47 = vpop.f32.mrb[72].mxu1 }
 0x37d   : > { %v2611_v59 = vadd.f32 %v2363_v8, %v17760_v25  ;;  %v11560_v61 = vpop.f32.mrb[73].mxu0  ;;  %v11774_v22 = vpop.f32.mrb[73].mxu1  ;;  %v3558_v8 = vld [vmem:[%s13215_s24 + $0x5f] sm:$0xff] }
 0x37e   : > { %v2366_v20 = vpop.f32.mrb[74].mxu0  ;;  %v3258_v40 = vpop.f32.mrb[74].mxu1  ;;  %v3659_v22 = vpack.c.bf16 %v3559_v5, %v3558_v8  ;;  %v3561_v8 = vld [vmem:[%s13215_s24 + $0x77] sm:$0xff] }
 0x37f   : > { %v2612_v54 = vadd.f32 %v2366_v20, %v17761_v18  ;;  %v14714_v16 = vadd.f32 %v3255_v47, %v2611_v59  ;;  %v11561_v51 = vpop.f32.mrb[75].mxu0  ;;  %v11775_v26 = vpop.f32.mrb[75].mxu1  ;;  %v4446_v5 = vld [vmem:[%s13215_s24 + $0x70] sm:$0xff] }
 0x380   : > { %v17764_v26 = vld [vmem:[#allocation18_spill] sm:$0xff] }
 0x381   : > { %17762 = vst [vmem:[#allocation16_spill] sm:$0xff] %v14714_v16  ;;  %v14716_v36 = vadd.f32 %v3258_v40, %v2612_v54  ;;  %11883 = vmatmul.mubr.msk.bf16.gmra.mrb[180].mxu0 %vm528_vm3, %v3658_v10  ;;  %12097 = vmatmul.mubr.msk.bf16.gmra.mrb[180].mxu1 %vm528_vm3, %v4544_v42  ;;  %v4545_v10 = vpack.c.bf16 %v4445_v48, %v4444_v52  ;;  %v17765_v40 = vld [vmem:[#allocation19_spill] sm:$0xff]  ;;  %v4447_v52 = vld [vmem:[%s13215_s24 + $0x78] sm:$0xff] }
 0x382   : > { %11886 = vmatprep.mubr.msk.bf16.mxu0 %vm13158_vm2, %v17672_v57  ;;  %12100 = vmatprep.mubr.msk.bf16.mxu1 %vm13158_vm2, %v17672_v57 }
 0x383   : > { %17763 = vst [vmem:[#allocation17_spill] sm:$0xff] %v14716_v36 }
 0x384   : > { %v2371_v0 = vpop.f32.mrb[76].mxu0  ;;  %v3263_v47 = vpop.f32.mrb[76].mxu1 }
 0x385   : > { %v2613_v25 = vadd.f32 %v2371_v0, %v17764_v26  ;;  %v11564_v59 = vpop.f32.mrb[77].mxu0  ;;  %v11778_v61 = vpop.f32.mrb[77].mxu1  ;;  %v3560_v0 = vld [vmem:[%s13215_s24 + $0x6f] sm:$0xff] }
 0x386   : > { %v2374_v42 = vpop.f32.mrb[78].mxu0  ;;  %v3266_v20 = vpop.f32.mrb[78].mxu1  ;;  %v3660_v61 = vpack.c.bf16 %v3561_v8, %v3560_v0  ;;  %v3563_v0 = vld [vmem:[%s13215_s24 + $0x87] sm:$0xff] }
 0x387   : > { %v2614_v18 = vadd.f32 %v2374_v42, %v17765_v40  ;;  %v14730_v54 = vadd.f32 %v3263_v47, %v2613_v25  ;;  %v11565_v51 = vpop.f32.mrb[79].mxu0  ;;  %v11779_v36 = vpop.f32.mrb[79].mxu1  ;;  %v4448_v8 = vld [vmem:[%s13215_s24 + $0x80] sm:$0xff] }
 0x388   : > { %v17768_v36 = vld [vmem:[#allocation20_spill] sm:$0xff] }
 0x389   : > { %17766 = vst [vmem:[#allocation18_spill] sm:$0xff] %v14730_v54  ;;  %v14732_v16 = vadd.f32 %v3266_v20, %v2614_v18  ;;  %11887 = vmatmul.mubr.msk.bf16.gmra.mrb[184].mxu0 %vm528_vm3, %v3659_v22  ;;  %12101 = vmatmul.mubr.msk.bf16.gmra.mrb[184].mxu1 %vm528_vm3, %v4545_v10  ;;  %v4546_v22 = vpack.c.bf16 %v4447_v52, %v4446_v5  ;;  %v17769_v20 = vld [vmem:[#allocation21_spill] sm:$0xff]  ;;  %v4449_v5 = vld [vmem:[%s13215_s24 + $0x88] sm:$0xff] }
 0x38a   : > { %11890 = vmatprep.mubr.msk.bf16.mxu0 %vm13158_vm2, %v17672_v57  ;;  %12104 = vmatprep.mubr.msk.bf16.mxu1 %vm13158_vm2, %v17672_v57 }
 0x38b   : > { %17767 = vst [vmem:[#allocation19_spill] sm:$0xff] %v14732_v16 }
 0x38c   : > { %v2379_v48 = vpop.f32.mrb[80].mxu0  ;;  %v3271_v47 = vpop.f32.mrb[80].mxu1 }
 0x38d   : > { %v2615_v26 = vadd.f32 %v2379_v48, %v17768_v36  ;;  %v11568_v25 = vpop.f32.mrb[81].mxu0  ;;  %v11782_v59 = vpop.f32.mrb[81].mxu1  ;;  %v3562_v48 = vld [vmem:[%s13215_s24 + $0x7f] sm:$0xff] }
 0x38e   : > { %v2382_v10 = vpop.f32.mrb[82].mxu0  ;;  %v3274_v42 = vpop.f32.mrb[82].mxu1  ;;  %v3661_v59 = vpack.c.bf16 %v3563_v0, %v3562_v48  ;;  %v3565_v48 = vld [vmem:[%s13215_s24 + $0x97] sm:$0xff] }
 0x38f   : > { %v2616_v40 = vadd.f32 %v2382_v10, %v17769_v20  ;;  %v14746_v18 = vadd.f32 %v3271_v47, %v2615_v26  ;;  %v11569_v51 = vpop.f32.mrb[83].mxu0  ;;  %v11783_v16 = vpop.f32.mrb[83].mxu1  ;;  %v4450_v0 = vld [vmem:[%s13215_s24 + $0x90] sm:$0xff] }
 0x390   : > { %v17772_v16 = vld [vmem:[#allocation22_spill] sm:$0xff] }
 0x391   : > { %17770 = vst [vmem:[#allocation20_spill] sm:$0xff] %v14746_v18  ;;  %v14748_v54 = vadd.f32 %v3274_v42, %v2616_v40  ;;  %11891 = vmatmul.mubr.msk.bf16.gmra.mrb[188].mxu0 %vm528_vm3, %v3660_v61  ;;  %12105 = vmatmul.mubr.msk.bf16.gmra.mrb[188].mxu1 %vm528_vm3, %v4546_v22  ;;  %v4547_v61 = vpack.c.bf16 %v4449_v5, %v4448_v8  ;;  %v17773_v42 = vld [vmem:[#allocation23_spill] sm:$0xff]  ;;  %v4451_v8 = vld [vmem:[%s13215_s24 + $0x98] sm:$0xff] }
 0x392   : > { %11894 = vmatprep.mubr.msk.bf16.mxu0 %vm13158_vm2, %v17672_v57  ;;  %12108 = vmatprep.mubr.msk.bf16.mxu1 %vm13158_vm2, %v17672_v57 }
 0x393   : > { %17771 = vst [vmem:[#allocation21_spill] sm:$0xff] %v14748_v54 }
 0x394   : > { %v2387_v52 = vpop.f32.mrb[84].mxu0  ;;  %v3279_v47 = vpop.f32.mrb[84].mxu1 }
 0x395   : > { %v2617_v36 = vadd.f32 %v2387_v52, %v17772_v16  ;;  %v11572_v26 = vpop.f32.mrb[85].mxu0  ;;  %v11786_v25 = vpop.f32.mrb[85].mxu1  ;;  %v3564_v52 = vld [vmem:[%s13215_s24 + $0x8f] sm:$0xff] }
 0x396   : > { %v2390_v22 = vpop.f32.mrb[86].mxu0  ;;  %v3282_v10 = vpop.f32.mrb[86].mxu1  ;;  %v3662_v25 = vpack.c.bf16 %v3565_v48, %v3564_v52  ;;  %v3567_v52 = vld [vmem:[%s13215_s24 + $0xa7] sm:$0xff] }
 0x397   : > { %v2618_v20 = vadd.f32 %v2390_v22, %v17773_v42  ;;  %v14762_v40 = vadd.f32 %v3279_v47, %v2617_v36  ;;  %v11573_v51 = vpop.f32.mrb[87].mxu0  ;;  %v11787_v54 = vpop.f32.mrb[87].mxu1  ;;  %v4452_v48 = vld [vmem:[%s13215_s24 + $0xa0] sm:$0xff] }
 0x398   : > { %v17776_v54 = vld [vmem:[#allocation24_spill] sm:$0xff] }
 0x399   : > { %17774 = vst [vmem:[#allocation22_spill] sm:$0xff] %v14762_v40  ;;  %v14764_v18 = vadd.f32 %v3282_v10, %v2618_v20  ;;  %11895 = vmatmul.mubr.msk.bf16.gmra.mrb[192].mxu0 %vm528_vm3, %v3661_v59  ;;  %12109 = vmatmul.mubr.msk.bf16.gmra.mrb[192].mxu1 %vm528_vm3, %v4547_v61  ;;  %v4548_v59 = vpack.c.bf16 %v4451_v8, %v4450_v0  ;;  %v17777_v10 = vld [vmem:[#allocation25_spill] sm:$0xff]  ;;  %v4453_v0 = vld [vmem:[%s13215_s24 + $0xa8] sm:$0xff] }
 0x39a   : > { %11898 = vmatprep.mubr.msk.bf16.mxu0 %vm13158_vm2, %v17672_v57  ;;  %12112 = vmatprep.mubr.msk.bf16.mxu1 %vm13158_vm2, %v17672_v57 }
 0x39b   : > { %17775 = vst [vmem:[#allocation23_spill] sm:$0xff] %v14764_v18 }
 0x39c   : > { %v2395_v5 = vpop.f32.mrb[88].mxu0  ;;  %v3287_v47 = vpop.f32.mrb[88].mxu1 }
 0x39d   : > { %v2619_v16 = vadd.f32 %v2395_v5, %v17776_v54  ;;  %v11576_v36 = vpop.f32.mrb[89].mxu0  ;;  %v11790_v26 = vpop.f32.mrb[89].mxu1  ;;  %v3566_v5 = vld [vmem:[%s13215_s24 + $0x9f] sm:$0xff] }
 0x39e   : > { %v2398_v61 = vpop.f32.mrb[90].mxu0  ;;  %v3290_v22 = vpop.f32.mrb[90].mxu1  ;;  %v3663_v26 = vpack.c.bf16 %v3567_v52, %v3566_v5  ;;  %v3569_v5 = vld [vmem:[%s13215_s24 + $0xb7] sm:$0xff] }
 0x39f   : > { %v2620_v42 = vadd.f32 %v2398_v61, %v17777_v10  ;;  %v14778_v20 = vadd.f32 %v3287_v47, %v2619_v16  ;;  %v11577_v51 = vpop.f32.mrb[91].mxu0  ;;  %v11791_v18 = vpop.f32.mrb[91].mxu1  ;;  %v4454_v52 = vld [vmem:[%s13215_s24 + $0xb0] sm:$0xff] }
 0x3a0   : > { %v17780_v18 = vld [vmem:[#allocation26_spill] sm:$0xff] }
 0x3a1   : > { %17778 = vst [vmem:[#allocation24_spill] sm:$0xff] %v14778_v20  ;;  %v14780_v40 = vadd.f32 %v3290_v22, %v2620_v42  ;;  %11899 = vmatmul.mubr.msk.bf16.gmra.mrb[196].mxu0 %vm528_vm3, %v3662_v25  ;;  %12113 = vmatmul.mubr.msk.bf16.gmra.mrb[196].mxu1 %vm528_vm3, %v4548_v59  ;;  %v4549_v25 = vpack.c.bf16 %v4453_v0, %v4452_v48  ;;  %v17781_v22 = vld [vmem:[#allocation27_spill] sm:$0xff]  ;;  %v4455_v48 = vld [vmem:[%s13215_s24 + $0xb8] sm:$0xff] }
 0x3a2   : > { %11902 = vmatprep.mubr.msk.bf16.mxu0 %vm13158_vm2, %v17672_v57  ;;  %12116 = vmatprep.mubr.msk.bf16.mxu1 %vm13158_vm2, %v17672_v57 }
 0x3a3   : > { %17779 = vst [vmem:[#allocation25_spill] sm:$0xff] %v14780_v40 }
 0x3a4   : > { %v2403_v8 = vpop.f32.mrb[92].mxu0  ;;  %v3295_v47 = vpop.f32.mrb[92].mxu1 }
 0x3a5   : > { %v2621_v54 = vadd.f32 %v2403_v8, %v17780_v18  ;;  %v11580_v16 = vpop.f32.mrb[93].mxu0  ;;  %v11794_v36 = vpop.f32.mrb[93].mxu1  ;;  %v3568_v8 = vld [vmem:[%s13215_s24 + $0xaf] sm:$0xff] }
 0x3a6   : > { %v2406_v59 = vpop.f32.mrb[94].mxu0  ;;  %v3298_v61 = vpop.f32.mrb[94].mxu1  ;;  %v3664_v36 = vpack.c.bf16 %v3569_v5, %v3568_v8  ;;  %v3571_v8 = vld [vmem:[%s13215_s24 + $0xc7] sm:$0xff] }
 0x3a7   : > { %v2622_v10 = vadd.f32 %v2406_v59, %v17781_v22  ;;  %v14794_v42 = vadd.f32 %v3295_v47, %v2621_v54  ;;  %v11581_v51 = vpop.f32.mrb[95].mxu0  ;;  %v11795_v40 = vpop.f32.mrb[95].mxu1  ;;  %v4456_v5 = vld [vmem:[%s13215_s24 + $0xc0] sm:$0xff] }
 0x3a8   : > { %v17784_v40 = vld [vmem:[#allocation28_spill] sm:$0xff] }
 0x3a9   : > { %17782 = vst [vmem:[#allocation26_spill] sm:$0xff] %v14794_v42  ;;  %v14796_v20 = vadd.f32 %v3298_v61, %v2622_v10  ;;  %11903 = vmatmul.mubr.msk.bf16.gmra.mrb[200].mxu0 %vm528_vm3, %v3663_v26  ;;  %12117 = vmatmul.mubr.msk.bf16.gmra.mrb[200].mxu1 %vm528_vm3, %v4549_v25  ;;  %v4550_v26 = vpack.c.bf16 %v4455_v48, %v4454_v52  ;;  %v17785_v61 = vld [vmem:[#allocation29_spill] sm:$0xff]  ;;  %v4457_v52 = vld [vmem:[%s13215_s24 + $0xc8] sm:$0xff] }
 0x3aa   : > { %11906 = vmatprep.mubr.msk.bf16.mxu0 %vm13158_vm2, %v17672_v57  ;;  %12120 = vmatprep.mubr.msk.bf16.mxu1 %vm13158_vm2, %v17672_v57 }
 0x3ab   : > { %17783 = vst [vmem:[#allocation27_spill] sm:$0xff] %v14796_v20 }
 0x3ac   : > { %v2411_v0 = vpop.f32.mrb[96].mxu0  ;;  %v3303_v47 = vpop.f32.mrb[96].mxu1 }
 0x3ad   : > { %v2623_v18 = vadd.f32 %v2411_v0, %v17784_v40  ;;  %v11584_v54 = vpop.f32.mrb[97].mxu0  ;;  %v11798_v16 = vpop.f32.mrb[97].mxu1  ;;  %v3570_v0 = vld [vmem:[%s13215_s24 + $0xbf] sm:$0xff] }
 0x3ae   : > { %v2414_v25 = vpop.f32.mrb[98].mxu0  ;;  %v3306_v59 = vpop.f32.mrb[98].mxu1  ;;  %v3665_v16 = vpack.c.bf16 %v3571_v8, %v3570_v0  ;;  %v3573_v0 = vld [vmem:[%s13215_s24 + $0xd7] sm:$0xff] }
 0x3af   : > { %v2624_v22 = vadd.f32 %v2414_v25, %v17785_v61  ;;  %v14810_v10 = vadd.f32 %v3303_v47, %v2623_v18  ;;  %v11585_v51 = vpop.f32.mrb[99].mxu0  ;;  %v11799_v20 = vpop.f32.mrb[99].mxu1  ;;  %v4458_v8 = vld [vmem:[%s13215_s24 + $0xd0] sm:$0xff] }
 0x3b0   : > { %v17788_v20 = vld [vmem:[#allocation30_spill] sm:$0xff] }
 0x3b1   : > { %17786 = vst [vmem:[#allocation28_spill] sm:$0xff] %v14810_v10  ;;  %v14812_v42 = vadd.f32 %v3306_v59, %v2624_v22  ;;  %11907 = vmatmul.mubr.msk.bf16.gmra.mrb[204].mxu0 %vm528_vm3, %v3664_v36  ;;  %12121 = vmatmul.mubr.msk.bf16.gmra.mrb[204].mxu1 %vm528_vm3, %v4550_v26  ;;  %v4551_v36 = vpack.c.bf16 %v4457_v52, %v4456_v5  ;;  %v17789_v59 = vld [vmem:[#allocation31_spill] sm:$0xff]  ;;  %v4459_v5 = vld [vmem:[%s13215_s24 + $0xd8] sm:$0xff] }
 0x3b2   : > { %11910 = vmatprep.mubr.msk.bf16.mxu0 %vm13158_vm2, %v17672_v57  ;;  %12124 = vmatprep.mubr.msk.bf16.mxu1 %vm13158_vm2, %v17672_v57 }
 0x3b3   : > { %17787 = vst [vmem:[#allocation29_spill] sm:$0xff] %v14812_v42 }
 0x3b4   : > { %v2419_v48 = vpop.f32.mrb[100].mxu0  ;;  %v3311_v47 = vpop.f32.mrb[100].mxu1 }
 0x3b5   : > { %v2625_v40 = vadd.f32 %v2419_v48, %v17788_v20  ;;  %v11588_v18 = vpop.f32.mrb[101].mxu0  ;;  %v11802_v54 = vpop.f32.mrb[101].mxu1  ;;  %v3572_v48 = vld [vmem:[%s13215_s24 + $0xcf] sm:$0xff] }
 0x3b6   : > { %v2422_v26 = vpop.f32.mrb[102].mxu0  ;;  %v3314_v25 = vpop.f32.mrb[102].mxu1  ;;  %v3666_v54 = vpack.c.bf16 %v3573_v0, %v3572_v48  ;;  %v3575_v48 = vld [vmem:[%s13215_s24 + $0xe7] sm:$0xff] }
 0x3b7   : > { %v2626_v61 = vadd.f32 %v2422_v26, %v17789_v59  ;;  %v14826_v22 = vadd.f32 %v3311_v47, %v2625_v40  ;;  %v11589_v51 = vpop.f32.mrb[103].mxu0  ;;  %v11803_v42 = vpop.f32.mrb[103].mxu1  ;;  %v4460_v0 = vld [vmem:[%s13215_s24 + $0xe0] sm:$0xff] }
 0x3b8   : > { %v17792_v42 = vld [vmem:[#allocation32_spill] sm:$0xff] }
 0x3b9   : > { %17790 = vst [vmem:[#allocation30_spill] sm:$0xff] %v14826_v22  ;;  %v14828_v10 = vadd.f32 %v3314_v25, %v2626_v61  ;;  %11911 = vmatmul.mubr.msk.bf16.gmra.mrb[208].mxu0 %vm528_vm3, %v3665_v16  ;;  %12125 = vmatmul.mubr.msk.bf16.gmra.mrb[208].mxu1 %vm528_vm3, %v4551_v36  ;;  %v4552_v16 = vpack.c.bf16 %v4459_v5, %v4458_v8  ;;  %v17793_v25 = vld [vmem:[#allocation33_spill] sm:$0xff]  ;;  %v4461_v8 = vld [vmem:[%s13215_s24 + $0xe8] sm:$0xff] }
 0x3ba   : > { %11914 = vmatprep.mubr.msk.bf16.mxu0 %vm13158_vm2, %v17672_v57  ;;  %12128 = vmatprep.mubr.msk.bf16.mxu1 %vm13158_vm2, %v17672_v57 }
 0x3bb   : > { %17791 = vst [vmem:[#allocation31_spill] sm:$0xff] %v14828_v10 }
 0x3bc   : > { %v2427_v52 = vpop.f32.mrb[104].mxu0  ;;  %v3319_v47 = vpop.f32.mrb[104].mxu1 }
 0x3bd   : > { %v2627_v20 = vadd.f32 %v2427_v52, %v17792_v42  ;;  %v11592_v40 = vpop.f32.mrb[105].mxu0  ;;  %v11806_v18 = vpop.f32.mrb[105].mxu1  ;;  %v3574_v52 = vld [vmem:[%s13215_s24 + $0xdf] sm:$0xff] }
 0x3be   : > { %v2430_v36 = vpop.f32.mrb[106].mxu0  ;;  %v3322_v26 = vpop.f32.mrb[106].mxu1  ;;  %v3667_v18 = vpack.c.bf16 %v3575_v48, %v3574_v52  ;;  %v3577_v52 = vld [vmem:[%s13215_s24 + $0xf7] sm:$0xff] }
 0x3bf   : > { %v2628_v59 = vadd.f32 %v2430_v36, %v17793_v25  ;;  %v14842_v61 = vadd.f32 %v3319_v47, %v2627_v20  ;;  %v11593_v51 = vpop.f32.mrb[107].mxu0  ;;  %v11807_v10 = vpop.f32.mrb[107].mxu1  ;;  %v4462_v48 = vld [vmem:[%s13215_s24 + $0xf0] sm:$0xff] }
 0x3c0   : > { %v17796_v10 = vld [vmem:[#allocation34_spill] sm:$0xff] }
 0x3c1   : > { %17794 = vst [vmem:[#allocation32_spill] sm:$0xff] %v14842_v61  ;;  %v14844_v22 = vadd.f32 %v3322_v26, %v2628_v59  ;;  %11915 = vmatmul.mubr.msk.bf16.gmra.mrb[212].mxu0 %vm528_vm3, %v3666_v54  ;;  %12129 = vmatmul.mubr.msk.bf16.gmra.mrb[212].mxu1 %vm528_vm3, %v4552_v16  ;;  %v4553_v54 = vpack.c.bf16 %v4461_v8, %v4460_v0  ;;  %v17797_v26 = vld [vmem:[#allocation35_spill] sm:$0xff]  ;;  %v4463_v0 = vld [vmem:[%s13215_s24 + $0xf8] sm:$0xff] }
 0x3c2   : > { %11918 = vmatprep.mubr.msk.bf16.mxu0 %vm13158_vm2, %v17672_v57  ;;  %12132 = vmatprep.mubr.msk.bf16.mxu1 %vm13158_vm2, %v17672_v57 }
 0x3c3   : > { %17795 = vst [vmem:[#allocation33_spill] sm:$0xff] %v14844_v22 }
 0x3c4   : > { %v2435_v5 = vpop.f32.mrb[108].mxu0  ;;  %v3327_v47 = vpop.f32.mrb[108].mxu1 }
 0x3c5   : > { %v2629_v42 = vadd.f32 %v2435_v5, %v17796_v10  ;;  %v11596_v20 = vpop.f32.mrb[109].mxu0  ;;  %v11810_v40 = vpop.f32.mrb[109].mxu1  ;;  %v3576_v5 = vld [vmem:[%s13215_s24 + $0xef] sm:$0xff] }
 0x3c6   : > { %v2438_v16 = vpop.f32.mrb[110].mxu0  ;;  %v3330_v36 = vpop.f32.mrb[110].mxu1  ;;  %v3668_v40 = vpack.c.bf16 %v3577_v52, %v3576_v5  ;;  %v3579_v5 = vld [vmem:[%s13215_s24 + $0x107] sm:$0xff] }
 0x3c7   : > { %v2630_v25 = vadd.f32 %v2438_v16, %v17797_v26  ;;  %v14858_v59 = vadd.f32 %v3327_v47, %v2629_v42  ;;  %v11597_v51 = vpop.f32.mrb[111].mxu0  ;;  %v11811_v22 = vpop.f32.mrb[111].mxu1  ;;  %v4464_v52 = vld [vmem:[%s13215_s24 + $0x100] sm:$0xff] }
 0x3c8   : > { %v17800_v22 = vld [vmem:[#allocation36_spill] sm:$0xff] }
 0x3c9   : > { %17798 = vst [vmem:[#allocation34_spill] sm:$0xff] %v14858_v59  ;;  %v14860_v61 = vadd.f32 %v3330_v36, %v2630_v25  ;;  %11919 = vmatmul.mubr.msk.bf16.gmra.mrb[216].mxu0 %vm528_vm3, %v3667_v18  ;;  %12133 = vmatmul.mubr.msk.bf16.gmra.mrb[216].mxu1 %vm528_vm3, %v4553_v54  ;;  %v4554_v18 = vpack.c.bf16 %v4463_v0, %v4462_v48  ;;  %v17801_v36 = vld [vmem:[#allocation37_spill] sm:$0xff]  ;;  %v4465_v48 = vld [vmem:[%s13215_s24 + $0x108] sm:$0xff] }
 0x3ca   : > { %11922 = vmatprep.mubr.msk.bf16.mxu0 %vm13158_vm2, %v17672_v57  ;;  %12136 = vmatprep.mubr.msk.bf16.mxu1 %vm13158_vm2, %v17672_v57 }
 0x3cb   : > { %17799 = vst [vmem:[#allocation35_spill] sm:$0xff] %v14860_v61 }
 0x3cc   : > { %v2443_v8 = vpop.f32.mrb[112].mxu0  ;;  %v3335_v47 = vpop.f32.mrb[112].mxu1 }
 0x3cd   : > { %v2631_v10 = vadd.f32 %v2443_v8, %v17800_v22  ;;  %v11600_v42 = vpop.f32.mrb[113].mxu0  ;;  %v11814_v20 = vpop.f32.mrb[113].mxu1  ;;  %v3578_v8 = vld [vmem:[%s13215_s24 + $0xff] sm:$0xff] }
 0x3ce   : > { %v2446_v54 = vpop.f32.mrb[114].mxu0  ;;  %v3338_v16 = vpop.f32.mrb[114].mxu1  ;;  %v3669_v20 = vpack.c.bf16 %v3579_v5, %v3578_v8  ;;  %v3581_v8 = vld [vmem:[%s13215_s24 + $0x117] sm:$0xff] }
 0x3cf   : > { %v2632_v26 = vadd.f32 %v2446_v54, %v17801_v36  ;;  %v14874_v25 = vadd.f32 %v3335_v47, %v2631_v10  ;;  %v11601_v51 = vpop.f32.mrb[115].mxu0  ;;  %v11815_v61 = vpop.f32.mrb[115].mxu1  ;;  %v4466_v5 = vld [vmem:[%s13215_s24 + $0x110] sm:$0xff] }
 0x3d0   : > { %v17804_v61 = vld [vmem:[#allocation38_spill] sm:$0xff] }
 0x3d1   : > { %17802 = vst [vmem:[#allocation36_spill] sm:$0xff] %v14874_v25  ;;  %v14876_v59 = vadd.f32 %v3338_v16, %v2632_v26  ;;  %11923 = vmatmul.mubr.msk.bf16.gmra.mrb[220].mxu0 %vm528_vm3, %v3668_v40  ;;  %12137 = vmatmul.mubr.msk.bf16.gmra.mrb[220].mxu1 %vm528_vm3, %v4554_v18  ;;  %v4555_v40 = vpack.c.bf16 %v4465_v48, %v4464_v52  ;;  %v17805_v16 = vld [vmem:[#allocation39_spill] sm:$0xff]  ;;  %v4467_v52 = vld [vmem:[%s13215_s24 + $0x118] sm:$0xff] }
 0x3d2   : > { %11926 = vmatprep.mubr.msk.bf16.mxu0 %vm13158_vm2, %v17672_v57  ;;  %12140 = vmatprep.mubr.msk.bf16.mxu1 %vm13158_vm2, %v17672_v57 }
 0x3d3   : > { %17803 = vst [vmem:[#allocation37_spill] sm:$0xff] %v14876_v59 }
 0x3d4   : > { %v2451_v0 = vpop.f32.mrb[116].mxu0  ;;  %v3343_v47 = vpop.f32.mrb[116].mxu1 }
 0x3d5   : > { %v2633_v22 = vadd.f32 %v2451_v0, %v17804_v61  ;;  %v11604_v10 = vpop.f32.mrb[117].mxu0  ;;  %v11818_v42 = vpop.f32.mrb[117].mxu1  ;;  %v3580_v0 = vld [vmem:[%s13215_s24 + $0x10f] sm:$0xff] }
 0x3d6   : > { %v2454_v18 = vpop.f32.mrb[118].mxu0  ;;  %v3346_v54 = vpop.f32.mrb[118].mxu1  ;;  %v3670_v42 = vpack.c.bf16 %v3581_v8, %v3580_v0  ;;  %v3583_v0 = vld [vmem:[%s13215_s24 + $0x127] sm:$0xff] }
 0x3d7   : > { %v2634_v36 = vadd.f32 %v2454_v18, %v17805_v16  ;;  %v14890_v26 = vadd.f32 %v3343_v47, %v2633_v22  ;;  %v11605_v51 = vpop.f32.mrb[119].mxu0  ;;  %v11819_v59 = vpop.f32.mrb[119].mxu1  ;;  %v4468_v8 = vld [vmem:[%s13215_s24 + $0x120] sm:$0xff] }
 0x3d8   : > { %v17808_v59 = vld [vmem:[#allocation40_spill] sm:$0xff] }
 0x3d9   : > { %17806 = vst [vmem:[#allocation38_spill] sm:$0xff] %v14890_v26  ;;  %v14892_v25 = vadd.f32 %v3346_v54, %v2634_v36  ;;  %11927 = vmatmul.mubr.msk.bf16.gmra.mrb[224].mxu0 %vm528_vm3, %v3669_v20  ;;  %12141 = vmatmul.mubr.msk.bf16.gmra.mrb[224].mxu1 %vm528_vm3, %v4555_v40  ;;  %v4556_v20 = vpack.c.bf16 %v4467_v52, %v4466_v5  ;;  %v17809_v54 = vld [vmem:[#allocation41_spill] sm:$0xff]  ;;  %v4469_v5 = vld [vmem:[%s13215_s24 + $0x128] sm:$0xff] }
 0x3da   : > { %11930 = vmatprep.mubr.msk.bf16.mxu0 %vm13158_vm2, %v17672_v57  ;;  %12144 = vmatprep.mubr.msk.bf16.mxu1 %vm13158_vm2, %v17672_v57 }
 0x3db   : > { %17807 = vst [vmem:[#allocation39_spill] sm:$0xff] %v14892_v25 }
 0x3dc   : > { %v2459_v48 = vpop.f32.mrb[120].mxu0  ;;  %v3351_v47 = vpop.f32.mrb[120].mxu1 }
 0x3dd   : > { %v2635_v61 = vadd.f32 %v2459_v48, %v17808_v59  ;;  %v11608_v22 = vpop.f32.mrb[121].mxu0  ;;  %v11822_v10 = vpop.f32.mrb[121].mxu1  ;;  %v3582_v48 = vld [vmem:[%s13215_s24 + $0x11f] sm:$0xff] }
 0x3de   : > { %v2462_v40 = vpop.f32.mrb[122].mxu0  ;;  %v3354_v18 = vpop.f32.mrb[122].mxu1  ;;  %v3671_v10 = vpack.c.bf16 %v3583_v0, %v3582_v48  ;;  %v3585_v48 = vld [vmem:[%s13215_s24 + $0x137] sm:$0xff] }
 0x3df   : > { %v2636_v16 = vadd.f32 %v2462_v40, %v17809_v54  ;;  %v14906_v36 = vadd.f32 %v3351_v47, %v2635_v61  ;;  %v11609_v51 = vpop.f32.mrb[123].mxu0  ;;  %v11823_v25 = vpop.f32.mrb[123].mxu1  ;;  %v4470_v0 = vld [vmem:[%s13215_s24 + $0x130] sm:$0xff] }
 0x3e0   : > { %v17812_v25 = vld [vmem:[#allocation42_spill] sm:$0xff] }
 0x3e1   : > { %17810 = vst [vmem:[#allocation40_spill] sm:$0xff] %v14906_v36  ;;  %v14908_v26 = vadd.f32 %v3354_v18, %v2636_v16  ;;  %11931 = vmatmul.mubr.msk.bf16.gmra.mrb[228].mxu0 %vm528_vm3, %v3670_v42  ;;  %12145 = vmatmul.mubr.msk.bf16.gmra.mrb[228].mxu1 %vm528_vm3, %v4556_v20  ;;  %v4557_v42 = vpack.c.bf16 %v4469_v5, %v4468_v8  ;;  %v17813_v18 = vld [vmem:[#allocation43_spill] sm:$0xff]  ;;  %v4471_v8 = vld [vmem:[%s13215_s24 + $0x138] sm:$0xff] }
 0x3e2   : > { %11934 = vmatprep.mubr.msk.bf16.mxu0 %vm13158_vm2, %v17672_v57  ;;  %12148 = vmatprep.mubr.msk.bf16.mxu1 %vm13158_vm2, %v17672_v57 }
 0x3e3   : > { %17811 = vst [vmem:[#allocation41_spill] sm:$0xff] %v14908_v26 }
 0x3e4   : > { %v2467_v52 = vpop.f32.mrb[124].mxu0  ;;  %v3359_v47 = vpop.f32.mrb[124].mxu1 }
 0x3e5   : > { %v2637_v59 = vadd.f32 %v2467_v52, %v17812_v25  ;;  %v11612_v61 = vpop.f32.mrb[125].mxu0  ;;  %v11826_v22 = vpop.f32.mrb[125].mxu1  ;;  %v3584_v52 = vld [vmem:[%s13215_s24 + $0x12f] sm:$0xff] }
 0x3e6   : > { %v2470_v20 = vpop.f32.mrb[126].mxu0  ;;  %v3362_v40 = vpop.f32.mrb[126].mxu1  ;;  %v3672_v22 = vpack.c.bf16 %v3585_v48, %v3584_v52  ;;  %v3587_v52 = vld [vmem:[%s13215_s24 + $0x147] sm:$0xff] }
 0x3e7   : > { %v2638_v54 = vadd.f32 %v2470_v20, %v17813_v18  ;;  %v14922_v16 = vadd.f32 %v3359_v47, %v2637_v59  ;;  %v11613_v51 = vpop.f32.mrb[127].mxu0  ;;  %v11827_v26 = vpop.f32.mrb[127].mxu1  ;;  %v4472_v48 = vld [vmem:[%s13215_s24 + $0x140] sm:$0xff] }
 0x3e8   : > { %v17816_v26 = vld [vmem:[#allocation44_spill] sm:$0xff] }
 0x3e9   : > { %17814 = vst [vmem:[#allocation42_spill] sm:$0xff] %v14922_v16  ;;  %v14924_v36 = vadd.f32 %v3362_v40, %v2638_v54  ;;  %11935 = vmatmul.mubr.msk.bf16.gmra.mrb[232].mxu0 %vm528_vm3, %v3671_v10  ;;  %12149 = vmatmul.mubr.msk.bf16.gmra.mrb[232].mxu1 %vm528_vm3, %v4557_v42  ;;  %v4558_v10 = vpack.c.bf16 %v4471_v8, %v4470_v0  ;;  %v17817_v40 = vld [vmem:[#allocation45_spill] sm:$0xff]  ;;  %v4473_v0 = vld [vmem:[%s13215_s24 + $0x148] sm:$0xff] }
 0x3ea   : > { %11938 = vmatprep.mubr.msk.bf16.mxu0 %vm13158_vm2, %v17672_v57  ;;  %12152 = vmatprep.mubr.msk.bf16.mxu1 %vm13158_vm2, %v17672_v57 }
 0x3eb   : > { %17815 = vst [vmem:[#allocation43_spill] sm:$0xff] %v14924_v36 }
 0x3ec   : > { %v2475_v5 = vpop.f32.mrb[128].mxu0  ;;  %v3367_v47 = vpop.f32.mrb[128].mxu1 }
 0x3ed   : > { %v2639_v25 = vadd.f32 %v2475_v5, %v17816_v26  ;;  %v11616_v59 = vpop.f32.mrb[129].mxu0  ;;  %v11830_v61 = vpop.f32.mrb[129].mxu1  ;;  %v3586_v5 = vld [vmem:[%s13215_s24 + $0x13f] sm:$0xff] }
 0x3ee   : > { %v2478_v42 = vpop.f32.mrb[130].mxu0  ;;  %v3370_v20 = vpop.f32.mrb[130].mxu1  ;;  %v3673_v61 = vpack.c.bf16 %v3587_v52, %v3586_v5  ;;  %v3589_v5 = vld [vmem:[%s13215_s24 + $0x157] sm:$0xff] }
 0x3ef   : > { %v2640_v18 = vadd.f32 %v2478_v42, %v17817_v40  ;;  %v14938_v54 = vadd.f32 %v3367_v47, %v2639_v25  ;;  %v11617_v51 = vpop.f32.mrb[131].mxu0  ;;  %v11831_v36 = vpop.f32.mrb[131].mxu1  ;;  %v4474_v52 = vld [vmem:[%s13215_s24 + $0x150] sm:$0xff] }
 0x3f0   : > { %v17820_v36 = vld [vmem:[#allocation46_spill] sm:$0xff] }
 0x3f1   : > { %17818 = vst [vmem:[#allocation44_spill] sm:$0xff] %v14938_v54  ;;  %v14940_v16 = vadd.f32 %v3370_v20, %v2640_v18  ;;  %11939 = vmatmul.mubr.msk.bf16.gmra.mrb[236].mxu0 %vm528_vm3, %v3672_v22  ;;  %12153 = vmatmul.mubr.msk.bf16.gmra.mrb[236].mxu1 %vm528_vm3, %v4558_v10  ;;  %v4559_v22 = vpack.c.bf16 %v4473_v0, %v4472_v48  ;;  %v17821_v20 = vld [vmem:[#allocation47_spill] sm:$0xff]  ;;  %v4475_v48 = vld [vmem:[%s13215_s24 + $0x158] sm:$0xff] }
 0x3f2   : > { %11942 = vmatprep.mubr.msk.bf16.mxu0 %vm13158_vm2, %v17672_v57  ;;  %12156 = vmatprep.mubr.msk.bf16.mxu1 %vm13158_vm2, %v17672_v57 }
 0x3f3   : > { %17819 = vst [vmem:[#allocation45_spill] sm:$0xff] %v14940_v16 }
 0x3f4   : > { %v2483_v8 = vpop.f32.mrb[132].mxu0  ;;  %v3375_v47 = vpop.f32.mrb[132].mxu1 }
 0x3f5   : > { %v2641_v26 = vadd.f32 %v2483_v8, %v17820_v36  ;;  %v11620_v25 = vpop.f32.mrb[133].mxu0  ;;  %v11834_v59 = vpop.f32.mrb[133].mxu1  ;;  %v3588_v8 = vld [vmem:[%s13215_s24 + $0x14f] sm:$0xff] }
 0x3f6   : > { %v2486_v10 = vpop.f32.mrb[134].mxu0  ;;  %v3378_v42 = vpop.f32.mrb[134].mxu1  ;;  %v3674_v59 = vpack.c.bf16 %v3589_v5, %v3588_v8  ;;  %v3591_v8 = vld [vmem:[%s13215_s24 + $0x167] sm:$0xff] }
 0x3f7   : > { %v2642_v40 = vadd.f32 %v2486_v10, %v17821_v20  ;;  %v14954_v18 = vadd.f32 %v3375_v47, %v2641_v26  ;;  %v11621_v51 = vpop.f32.mrb[135].mxu0  ;;  %v11835_v16 = vpop.f32.mrb[135].mxu1  ;;  %v4476_v5 = vld [vmem:[%s13215_s24 + $0x160] sm:$0xff] }
 0x3f8   : > { %v17824_v16 = vld [vmem:[#allocation48_spill] sm:$0xff] }
 0x3f9   : > { %17822 = vst [vmem:[#allocation46_spill] sm:$0xff] %v14954_v18  ;;  %v14956_v54 = vadd.f32 %v3378_v42, %v2642_v40  ;;  %11943 = vmatmul.mubr.msk.bf16.gmra.mrb[240].mxu0 %vm528_vm3, %v3673_v61  ;;  %12157 = vmatmul.mubr.msk.bf16.gmra.mrb[240].mxu1 %vm528_vm3, %v4559_v22  ;;  %v4560_v61 = vpack.c.bf16 %v4475_v48, %v4474_v52  ;;  %v17825_v42 = vld [vmem:[#allocation49_spill] sm:$0xff]  ;;  %v4477_v52 = vld [vmem:[%s13215_s24 + $0x168] sm:$0xff] }
 0x3fa   : > { %11946 = vmatprep.mubr.msk.bf16.mxu0 %vm13158_vm2, %v17672_v57  ;;  %12160 = vmatprep.mubr.msk.bf16.mxu1 %vm13158_vm2, %v17672_v57 }
 0x3fb   : > { %17823 = vst [vmem:[#allocation47_spill] sm:$0xff] %v14956_v54 }
 0x3fc   : > { %v2491_v0 = vpop.f32.mrb[136].mxu0  ;;  %v3383_v47 = vpop.f32.mrb[136].mxu1 }
 0x3fd   : > { %v2643_v36 = vadd.f32 %v2491_v0, %v17824_v16  ;;  %v11624_v26 = vpop.f32.mrb[137].mxu0  ;;  %v11838_v25 = vpop.f32.mrb[137].mxu1  ;;  %v3590_v0 = vld [vmem:[%s13215_s24 + $0x15f] sm:$0xff] }
 0x3fe   : > { %v2494_v22 = vpop.f32.mrb[138].mxu0  ;;  %v3386_v10 = vpop.f32.mrb[138].mxu1  ;;  %v3675_v25 = vpack.c.bf16 %v3591_v8, %v3590_v0  ;;  %v3593_v0 = vld [vmem:[%s13215_s24 + $0x177] sm:$0xff] }
 0x3ff   : > { %v2644_v20 = vadd.f32 %v2494_v22, %v17825_v42  ;;  %v14970_v40 = vadd.f32 %v3383_v47, %v2643_v36  ;;  %v11625_v51 = vpop.f32.mrb[139].mxu0  ;;  %v11839_v54 = vpop.f32.mrb[139].mxu1  ;;  %v4478_v8 = vld [vmem:[%s13215_s24 + $0x170] sm:$0xff] }
 0x400   : > { %v17828_v54 = vld [vmem:[#allocation50_spill] sm:$0xff] }
 0x401   : > { %17826 = vst [vmem:[#allocation48_spill] sm:$0xff] %v14970_v40  ;;  %v14972_v18 = vadd.f32 %v3386_v10, %v2644_v20  ;;  %11947 = vmatmul.mubr.msk.bf16.gmra.mrb[244].mxu0 %vm528_vm3, %v3674_v59  ;;  %12161 = vmatmul.mubr.msk.bf16.gmra.mrb[244].mxu1 %vm528_vm3, %v4560_v61  ;;  %v4561_v59 = vpack.c.bf16 %v4477_v52, %v4476_v5  ;;  %v17829_v10 = vld [vmem:[#allocation51_spill] sm:$0xff]  ;;  %v4479_v5 = vld [vmem:[%s13215_s24 + $0x178] sm:$0xff] }
 0x402   : > { %11950 = vmatprep.mubr.msk.bf16.mxu0 %vm13158_vm2, %v17672_v57  ;;  %12164 = vmatprep.mubr.msk.bf16.mxu1 %vm13158_vm2, %v17672_v57 }
 0x403   : > { %17827 = vst [vmem:[#allocation49_spill] sm:$0xff] %v14972_v18 }
 0x404   : > { %v2499_v48 = vpop.f32.mrb[140].mxu0  ;;  %v3391_v47 = vpop.f32.mrb[140].mxu1 }
 0x405   : > { %v2645_v16 = vadd.f32 %v2499_v48, %v17828_v54  ;;  %v11628_v36 = vpop.f32.mrb[141].mxu0  ;;  %v11842_v26 = vpop.f32.mrb[141].mxu1  ;;  %v3592_v48 = vld [vmem:[%s13215_s24 + $0x16f] sm:$0xff] }
 0x406   : > { %v2502_v61 = vpop.f32.mrb[142].mxu0  ;;  %v3394_v22 = vpop.f32.mrb[142].mxu1  ;;  %v3676_v26 = vpack.c.bf16 %v3593_v0, %v3592_v48  ;;  %v3595_v48 = vld [vmem:[%s13215_s24 + $0x187] sm:$0xff] }
 0x407   : > { %v2646_v42 = vadd.f32 %v2502_v61, %v17829_v10  ;;  %v14986_v20 = vadd.f32 %v3391_v47, %v2645_v16  ;;  %v11629_v51 = vpop.f32.mrb[143].mxu0  ;;  %v11843_v18 = vpop.f32.mrb[143].mxu1  ;;  %v4480_v0 = vld [vmem:[%s13215_s24 + $0x180] sm:$0xff] }
 0x408   : > { %v17832_v18 = vld [vmem:[#allocation52_spill] sm:$0xff] }
 0x409   : > { %17830 = vst [vmem:[#allocation50_spill] sm:$0xff] %v14986_v20  ;;  %v14988_v40 = vadd.f32 %v3394_v22, %v2646_v42  ;;  %11951 = vmatmul.mubr.msk.bf16.gmra.mrb[248].mxu0 %vm528_vm3, %v3675_v25  ;;  %12165 = vmatmul.mubr.msk.bf16.gmra.mrb[248].mxu1 %vm528_vm3, %v4561_v59  ;;  %v4562_v25 = vpack.c.bf16 %v4479_v5, %v4478_v8  ;;  %v17833_v22 = vld [vmem:[#allocation53_spill] sm:$0xff]  ;;  %v4481_v8 = vld [vmem:[%s13215_s24 + $0x188] sm:$0xff] }
 0x40a   : > { %11954 = vmatprep.mubr.msk.bf16.mxu0 %vm13158_vm2, %v17672_v57  ;;  %12168 = vmatprep.mubr.msk.bf16.mxu1 %vm13158_vm2, %v17672_v57 }
 0x40b   : > { %17831 = vst [vmem:[#allocation51_spill] sm:$0xff] %v14988_v40 }
 0x40c   : > { %v2507_v52 = vpop.f32.mrb[144].mxu0  ;;  %v3399_v47 = vpop.f32.mrb[144].mxu1 }
 0x40d   : > { %v2647_v54 = vadd.f32 %v2507_v52, %v17832_v18  ;;  %v11632_v16 = vpop.f32.mrb[145].mxu0  ;;  %v11846_v36 = vpop.f32.mrb[145].mxu1  ;;  %v3594_v52 = vld [vmem:[%s13215_s24 + $0x17f] sm:$0xff] }
 0x40e   : > { %v2510_v59 = vpop.f32.mrb[146].mxu0  ;;  %v3402_v61 = vpop.f32.mrb[146].mxu1  ;;  %v3677_v36 = vpack.c.bf16 %v3595_v48, %v3594_v52  ;;  %v3597_v52 = vld [vmem:[%s13215_s24 + $0x197] sm:$0xff] }
 0x40f   : > { %v2648_v10 = vadd.f32 %v2510_v59, %v17833_v22  ;;  %v15002_v42 = vadd.f32 %v3399_v47, %v2647_v54  ;;  %v11633_v51 = vpop.f32.mrb[147].mxu0  ;;  %v11847_v40 = vpop.f32.mrb[147].mxu1  ;;  %v4482_v48 = vld [vmem:[%s13215_s24 + $0x190] sm:$0xff] }
 0x410   : > { %v17836_v40 = vld [vmem:[#allocation54_spill] sm:$0xff] }
 0x411   : > { %17834 = vst [vmem:[#allocation52_spill] sm:$0xff] %v15002_v42  ;;  %v15004_v20 = vadd.f32 %v3402_v61, %v2648_v10  ;;  %11955 = vmatmul.mubr.msk.bf16.gmra.mrb[252].mxu0 %vm528_vm3, %v3676_v26  ;;  %12169 = vmatmul.mubr.msk.bf16.gmra.mrb[252].mxu1 %vm528_vm3, %v4562_v25  ;;  %v4563_v26 = vpack.c.bf16 %v4481_v8, %v4480_v0  ;;  %v17837_v61 = vld [vmem:[#allocation55_spill] sm:$0xff]  ;;  %v4483_v0 = vld [vmem:[%s13215_s24 + $0x198] sm:$0xff] }
 0x412   : > { %11958 = vmatprep.mubr.msk.bf16.mxu0 %vm13158_vm2, %v17672_v57  ;;  %12172 = vmatprep.mubr.msk.bf16.mxu1 %vm13158_vm2, %v17672_v57 }
 0x413   : > { %17835 = vst [vmem:[#allocation53_spill] sm:$0xff] %v15004_v20 }
 0x414   : > { %v2515_v5 = vpop.f32.mrb[148].mxu0  ;;  %v3407_v47 = vpop.f32.mrb[148].mxu1 }
 0x415   : > { %v2649_v18 = vadd.f32 %v2515_v5, %v17836_v40  ;;  %v11636_v54 = vpop.f32.mrb[149].mxu0  ;;  %v11850_v16 = vpop.f32.mrb[149].mxu1  ;;  %v3596_v5 = vld [vmem:[%s13215_s24 + $0x18f] sm:$0xff] }
 0x416   : > { %v2518_v25 = vpop.f32.mrb[150].mxu0  ;;  %v3410_v59 = vpop.f32.mrb[150].mxu1  ;;  %v3678_v16 = vpack.c.bf16 %v3597_v52, %v3596_v5  ;;  %v3599_v5 = vld [vmem:[%s13215_s24 + $0x1a7] sm:$0xff] }
 0x417   : > { %v2650_v22 = vadd.f32 %v2518_v25, %v17837_v61  ;;  %v15018_v10 = vadd.f32 %v3407_v47, %v2649_v18  ;;  %v11637_v51 = vpop.f32.mrb[151].mxu0  ;;  %v11851_v20 = vpop.f32.mrb[151].mxu1  ;;  %v4484_v52 = vld [vmem:[%s13215_s24 + $0x1a0] sm:$0xff] }
 0x418   : > { %v17840_v20 = vld [vmem:[#allocation56_spill] sm:$0xff] }
 0x419   : > { %17838 = vst [vmem:[#allocation54_spill] sm:$0xff] %v15018_v10  ;;  %v15020_v42 = vadd.f32 %v3410_v59, %v2650_v22  ;;  %11959 = vmatmul.mubr.msk.bf16.gmra.mrb[0].mxu0 %vm528_vm3, %v3677_v36  ;;  %12173 = vmatmul.mubr.msk.bf16.gmra.mrb[0].mxu1 %vm528_vm3, %v4563_v26  ;;  %v4564_v36 = vpack.c.bf16 %v4483_v0, %v4482_v48  ;;  %v17841_v59 = vld [vmem:[#allocation57_spill] sm:$0xff]  ;;  %v4485_v48 = vld [vmem:[%s13215_s24 + $0x1a8] sm:$0xff] }
 0x41a   : > { %11962 = vmatprep.mubr.msk.bf16.mxu0 %vm13158_vm2, %v17672_v57  ;;  %12176 = vmatprep.mubr.msk.bf16.mxu1 %vm13158_vm2, %v17672_v57 }
 0x41b   : > { %17839 = vst [vmem:[#allocation55_spill] sm:$0xff] %v15020_v42 }
 0x41c   : > { %v2523_v8 = vpop.f32.mrb[152].mxu0  ;;  %v3415_v47 = vpop.f32.mrb[152].mxu1 }
 0x41d   : > { %v2651_v40 = vadd.f32 %v2523_v8, %v17840_v20  ;;  %v11640_v18 = vpop.f32.mrb[153].mxu0  ;;  %v11854_v54 = vpop.f32.mrb[153].mxu1  ;;  %v3598_v8 = vld [vmem:[%s13215_s24 + $0x19f] sm:$0xff] }
 0x41e   : > { %v2526_v26 = vpop.f32.mrb[154].mxu0  ;;  %v3418_v25 = vpop.f32.mrb[154].mxu1  ;;  %v17844_v20 = vld [vmem:[#allocation58_spill] sm:$0xff]  ;;  %v3679_v54 = vpack.c.bf16 %v3599_v5, %v3598_v8  ;;  %v3600_v8 = vld [vmem:[%s13215_s24 + $0x1af] sm:$0xff] }
 0x41f   : > { %v2652_v61 = vadd.f32 %v2526_v26, %v17841_v59  ;;  %v15034_v22 = vadd.f32 %v3415_v47, %v2651_v40  ;;  %v11641_v51 = vpop.f32.mrb[155].mxu0  ;;  %v11855_v42 = vpop.f32.mrb[155].mxu1 }
 0x421   : > { %17842 = vst [vmem:[#allocation56_spill] sm:$0xff] %v15034_v22  ;;  %v15036_v10 = vadd.f32 %v3418_v25, %v2652_v61  ;;  %11963 = vmatmul.mubr.msk.bf16.gmra.mrb[4].mxu0 %vm528_vm3, %v3678_v16  ;;  %12177 = vmatmul.mubr.msk.bf16.gmra.mrb[4].mxu1 %vm528_vm3, %v4564_v36  ;;  %v4565_v16 = vpack.c.bf16 %v4485_v48, %v4484_v52  ;;  %v17845_v25 = vld [vmem:[#allocation59_spill] sm:$0xff]  ;;  %v3601_v52 = vld [vmem:[%s13215_s24 + $0x1b7] sm:$0xff] }
 0x422   : > { %11966 = vmatprep.mubr.msk.bf16.mxu0 %vm13158_vm2, %v17672_v57  ;;  %12180 = vmatprep.mubr.msk.bf16.mxu1 %vm13158_vm2, %v17672_v57  ;;  %v13018_v22 = vld [vmem:[%s17662_s1 + $0x8] ss:$0 sps:$4 sm:$0x66]   ;;  %v4487_v48 = vld [vmem:[%s13215_s24 + $0x1b8] sm:$0xff] }
 0x423   : > { %17843 = vst [vmem:[#allocation57_spill] sm:$0xff] %v15036_v10  ;;  %v5494_v5 = vrot.slane %v13018_v22, 1  ;;  %v3680_v22 = vpack.c.bf16 %v3601_v52, %v3600_v8  ;;  %v3602_v8 = vld [vmem:[%s13215_s24 + $0x1bf] sm:$0xff]  ;;  %v3603_v52 = vld [vmem:[%s13215_s24 + $0x1c7] sm:$0xff] }
 0x424   : > { %v2531_v0 = vpop.f32.mrb[156].mxu0  ;;  %v3423_v47 = vpop.f32.mrb[156].mxu1 }
 0x425   : > { %v2653_v42 = vadd.f32 %v2531_v0, %v17844_v20  ;;  %v11644_v40 = vpop.f32.mrb[157].mxu0  ;;  %v11858_v18 = vpop.f32.mrb[157].mxu1 }
 0x426   : > { %v2534_v36 = vpop.f32.mrb[158].mxu0  ;;  %v3426_v26 = vpop.f32.mrb[158].mxu1  ;;  %v17848_v40 = vld [vmem:[#allocation60_spill] sm:$0xff] }
 0x427   : > { %v2654_v59 = vadd.f32 %v2534_v36, %v17845_v25  ;;  %v15050_v61 = vadd.f32 %v3423_v47, %v2653_v42  ;;  %v11645_v51 = vpop.f32.mrb[159].mxu0  ;;  %v11859_v10 = vpop.f32.mrb[159].mxu1  ;;  %v5655_v47 = vand.u32 %v5494_v5, %v13204_v7 }
 0x428   : > { %v4486_v10 = vld [vmem:[%s13215_s24 + $0x1b0] sm:$0xff] }
 0x429   : > { %17846 = vst [vmem:[#allocation58_spill] sm:$0xff] %v15050_v61  ;;  %v15055_v0 = vadd.f32 %v3426_v26, %v2654_v59  ;;  %11967 = vmatmul.mubr.msk.bf16.gmra.mrb[8].mxu0 %vm528_vm3, %v3679_v54  ;;  %12181 = vmatmul.mubr.msk.bf16.gmra.mrb[8].mxu1 %vm528_vm3, %v4565_v16  ;;  %v4566_v36 = vpack.c.bf16 %v4487_v48, %v4486_v10  ;;  %v17849_v59 = vld [vmem:[#allocation61_spill] sm:$0xff]  ;;  %v4488_v10 = vld [vmem:[%s13215_s24 + $0x1c0] sm:$0xff]  ;;  %v4489_v48 = vld [vmem:[%s13215_s24 + $0x1c8] sm:$0xff] }
 0x42a   : > { %11970 = vmatprep.mubr.msk.bf16.mxu0 %vm13158_vm2, %v17672_v57  ;;  %12184 = vmatprep.mubr.msk.bf16.mxu1 %vm13158_vm2, %v17672_v57 }
 0x42b   : > { %17847 = vst [vmem:[#allocation59_spill] sm:$0xff] %v15055_v0  ;;  %12297 = vmatpush3.bf16.msra.mxu0 %v5655_v47 }
 0x42c   : > { %v2539_v20 = vpop.f32.mrb[160].mxu0  ;;  %v3431_v42 = vpop.f32.mrb[160].mxu1  ;;  %12724 = vmatprep.subr.bf16.mxu0 %v17672_v57 }
 0x42d   : > { %v2655_v18 = vadd.f32 %v2539_v20, %v17848_v40  ;;  %v11648_v54 = vpop.f32.mrb[161].mxu0  ;;  %v11862_v16 = vpop.f32.mrb[161].mxu1 }
 0x42e   : > { %v2542_v26 = vpop.f32.mrb[162].mxu0  ;;  %v3434_v25 = vpop.f32.mrb[162].mxu1  ;;  %v4567_v16 = vpack.c.bf16 %v4489_v48, %v4488_v10 }
 0x42f   : > { %v2656_v51 = vadd.f32 %v2542_v26, %v17849_v59  ;;  %v15071_v5 = vadd.f32 %v3431_v42, %v2655_v18  ;;  %v11649_v0 = vpop.f32.mrb[163].mxu0  ;;  %v11863_v61 = vpop.f32.mrb[163].mxu1  ;;  %v3681_v18 = vpack.c.bf16 %v3603_v52, %v3602_v8  ;;  %v4490_v8 = vld [vmem:[%s13215_s24 + $0x1d0] sm:$0xff]  ;;  %v4491_v52 = vld [vmem:[%s13215_s24 + $0x1d8] sm:$0xff] }
 0x430   : > { %v17850_v0 = vld [vmem:[#allocation62_spill] sm:$0xff] }
 0x431   : > { %v15073_v20 = vadd.f32 %v3434_v25, %v2656_v51  ;;  %11971 = vmatmul.mubr.msk.bf16.gmra.mrb[12].mxu0 %vm528_vm3, %v3680_v22  ;;  %12185 = vmatmul.mubr.msk.bf16.gmra.mrb[12].mxu1 %vm528_vm3, %v4566_v36  ;;  %v3604_v51 = vld [vmem:[%s13215_s24 + $0x1cf] sm:$0xff] }
 0x432   : > { %11974 = vmatprep.mubr.msk.bf16.mxu0 %vm13158_vm2, %v17672_v57  ;;  %12188 = vmatprep.mubr.msk.bf16.mxu1 %vm13158_vm2, %v17672_v57 }
 0x434   : > { %v2547_v47 = vpop.f32.mrb[164].mxu0  ;;  %v3439_v61 = vpop.f32.mrb[164].mxu1 }
 0x435   : > { %v2657_v42 = vadd.f32 %v2547_v47, %v17850_v0  ;;  %v11652_v40 = vpop.f32.mrb[165].mxu0  ;;  %v11866_v54 = vpop.f32.mrb[165].mxu1  ;;  %v3605_v47 = vld [vmem:[%s13215_s24 + $0x1d7] sm:$0xff] }
 0x436   : > { %v2550_v22 = vpop.f32.mrb[166].mxu0  ;;  %v3442_v36 = vpop.f32.mrb[166].mxu1  ;;  %v3682_v40 = vpack.c.bf16 %v3605_v47, %v3604_v51  ;;  %v3607_v51 = vld [vmem:[%s13215_s24 + $0x1e7] sm:$0xff] }
 0x437   : > { %v15086_v26 = vadd.f32 %v3439_v61, %v2657_v42  ;;  %v11653_v25 = vpop.f32.mrb[167].mxu0  ;;  %v11867_v59 = vpop.f32.mrb[167].mxu1  ;;  %v4492_v47 = vld [vmem:[%s13215_s24 + $0x1e0] sm:$0xff] }
 0x439   : > { %17851 = vst [vmem:[#allocation60_spill] sm:$0xff] %v15086_v26  ;;  %11975 = vmatmul.mubr.msk.bf16.gmra.mrb[16].mxu0 %vm528_vm3, %v3681_v18  ;;  %12189 = vmatmul.mubr.msk.bf16.gmra.mrb[16].mxu1 %vm528_vm3, %v4567_v16  ;;  %v4568_v18 = vpack.c.bf16 %v4491_v52, %v4490_v8 }
 0x43a   : > { %11978 = vmatprep.mubr.msk.bf16.mxu0 %vm13158_vm2, %v17672_v57  ;;  %12192 = vmatprep.mubr.msk.bf16.mxu1 %vm13158_vm2, %v17672_v57 }
 0x43c   : > { %v3909_v10 = vpop.f32.mrb[168].mxu0  ;;  %v4805_v48 = vpop.f32.mrb[168].mxu1 }
 0x43d   : > { %v4331_v61 = vadd.f32 %v3909_v10, %v14247_v3  ;;  %v11872_v0 = vpop.f32.mrb[169].mxu0  ;;  %v12086_v42 = vpop.f32.mrb[169].mxu1  ;;  %v3606_v3 = vld [vmem:[%s13215_s24 + $0x1df] sm:$0xff] }
 0x43e   : > { %v3912_v54 = vpop.f32.mrb[170].mxu0  ;;  %v4808_v16 = vpop.f32.mrb[170].mxu1  ;;  %v3683_v0 = vpack.c.bf16 %v3607_v51, %v3606_v3  ;;  %v3609_v3 = vld [vmem:[%s13215_s24 + $0x1f7] sm:$0xff] }
 0x43f   : > { %v4332_v22 = vadd.f32 %v3912_v54, %v14249_v33  ;;  %v15100_v36 = vadd.f32 %v4805_v48, %v4331_v61  ;;  %v11873_v25 = vpop.f32.mrb[171].mxu0  ;;  %v12087_v59 = vpop.f32.mrb[171].mxu1  ;;  %v4493_v33 = vld [vmem:[%s13215_s24 + $0x1e8] sm:$0xff]  ;;  %v4494_v51 = vld [vmem:[%s13215_s24 + $0x1f0] sm:$0xff] }
 0x440   : > { %v4569_v42 = vpack.c.bf16 %v4493_v33, %v4492_v47 }
 0x441   : > { %v15102_v26 = vadd.f32 %v4808_v16, %v4332_v22  ;;  %11979 = vmatmul.mubr.msk.bf16.gmra.mrb[20].mxu0 %vm528_vm3, %v3682_v40  ;;  %12193 = vmatmul.mubr.msk.bf16.gmra.mrb[20].mxu1 %vm528_vm3, %v4568_v18 }
 0x442   : > { %11982 = vmatprep.mubr.msk.bf16.mxu0 %vm13158_vm2, %v17672_v57  ;;  %12196 = vmatprep.mubr.msk.bf16.mxu1 %vm13158_vm2, %v17672_v57 }
 0x444   : > { %v3917_v8 = vpop.f32.mrb[172].mxu0  ;;  %v4813_v52 = vpop.f32.mrb[172].mxu1 }
 0x445   : > { %v4333_v10 = vadd.f32 %v3917_v8, %v14263_v31  ;;  %v11876_v48 = vpop.f32.mrb[173].mxu0  ;;  %v12090_v61 = vpop.f32.mrb[173].mxu1  ;;  %v3608_v31 = vld [vmem:[%s13215_s24 + $0x1ef] sm:$0xff] }
 0x446   : > { %v3920_v40 = vpop.f32.mrb[174].mxu0  ;;  %v4816_v18 = vpop.f32.mrb[174].mxu1  ;;  %v3684_v48 = vpack.c.bf16 %v3609_v3, %v3608_v31  ;;  %v3611_v31 = vld [vmem:[%s13215_s24 + $0x207] sm:$0xff] }
 0x447   : > { %v4334_v54 = vadd.f32 %v3920_v40, %v14265_v11  ;;  %v15116_v16 = vadd.f32 %v4813_v52, %v4333_v10  ;;  %v11877_v22 = vpop.f32.mrb[175].mxu0  ;;  %v12091_v25 = vpop.f32.mrb[175].mxu1  ;;  %v4495_v11 = vld [vmem:[%s13215_s24 + $0x1f8] sm:$0xff]  ;;  %v4496_v3 = vld [vmem:[%s13215_s24 + $0x200] sm:$0xff] }
 0x448   : > { %v4570_v61 = vpack.c.bf16 %v4495_v11, %v4494_v51 }
 0x449   : > { %v15118_v59 = vadd.f32 %v4816_v18, %v4334_v54  ;;  %11983 = vmatmul.mubr.msk.bf16.gmra.mrb[24].mxu0 %vm528_vm3, %v3683_v0  ;;  %12197 = vmatmul.mubr.msk.bf16.gmra.mrb[24].mxu1 %vm528_vm3, %v4569_v42 }
 0x44a   : > { %11986 = vmatprep.mubr.msk.bf16.mxu0 %vm13158_vm2, %v17672_v57  ;;  %12200 = vmatprep.mubr.msk.bf16.mxu1 %vm13158_vm2, %v17672_v57 }
 0x44c   : > { %v3925_v47 = vpop.f32.mrb[176].mxu0  ;;  %v4821_v33 = vpop.f32.mrb[176].mxu1 }
 0x44d   : > { %v4335_v8 = vadd.f32 %v3925_v47, %v14279_v34  ;;  %v11880_v52 = vpop.f32.mrb[177].mxu0  ;;  %v12094_v10 = vpop.f32.mrb[177].mxu1  ;;  %v3610_v34 = vld [vmem:[%s13215_s24 + $0x1ff] sm:$0xff] }
 0x44e   : > { %v3928_v0 = vpop.f32.mrb[178].mxu0  ;;  %v4824_v42 = vpop.f32.mrb[178].mxu1  ;;  %v3685_v52 = vpack.c.bf16 %v3611_v31, %v3610_v34  ;;  %v3613_v34 = vld [vmem:[%s13215_s24 + $0x217] sm:$0xff] }
 0x44f   : > { %v4336_v40 = vadd.f32 %v3928_v0, %v14281_v50  ;;  %v15132_v18 = vadd.f32 %v4821_v33, %v4335_v8  ;;  %v11881_v54 = vpop.f32.mrb[179].mxu0  ;;  %v12095_v22 = vpop.f32.mrb[179].mxu1  ;;  %v4497_v50 = vld [vmem:[%s13215_s24 + $0x208] sm:$0xff]  ;;  %v4498_v31 = vld [vmem:[%s13215_s24 + $0x210] sm:$0xff] }
 0x450   : > { %v4571_v10 = vpack.c.bf16 %v4497_v50, %v4496_v3 }
 0x451   : > { %v15134_v25 = vadd.f32 %v4824_v42, %v4336_v40  ;;  %11987 = vmatmul.mubr.msk.bf16.gmra.mrb[28].mxu0 %vm528_vm3, %v3684_v48  ;;  %12201 = vmatmul.mubr.msk.bf16.gmra.mrb[28].mxu1 %vm528_vm3, %v4570_v61 }
 0x452   : > { %11990 = vmatprep.mubr.msk.bf16.mxu0 %vm13158_vm2, %v17672_v57  ;;  %12204 = vmatprep.mubr.msk.bf16.mxu1 %vm13158_vm2, %v17672_v57 }
 0x454   : > { %v3933_v51 = vpop.f32.mrb[180].mxu0  ;;  %v4829_v11 = vpop.f32.mrb[180].mxu1 }
 0x455   : > { %v4337_v47 = vadd.f32 %v3933_v51, %v14295_v29  ;;  %v11884_v33 = vpop.f32.mrb[181].mxu0  ;;  %v12098_v8 = vpop.f32.mrb[181].mxu1  ;;  %v3612_v29 = vld [vmem:[%s13215_s24 + $0x20f] sm:$0xff] }
 0x456   : > { %v3936_v48 = vpop.f32.mrb[182].mxu0  ;;  %v4832_v61 = vpop.f32.mrb[182].mxu1  ;;  %v3686_v33 = vpack.c.bf16 %v3613_v34, %v3612_v29  ;;  %v3615_v29 = vld [vmem:[%s13215_s24 + $0x227] sm:$0xff] }
 0x457   : > { %v4338_v0 = vadd.f32 %v3936_v48, %v14297_v43  ;;  %v15148_v42 = vadd.f32 %v4829_v11, %v4337_v47  ;;  %v11885_v40 = vpop.f32.mrb[183].mxu0  ;;  %v12099_v54 = vpop.f32.mrb[183].mxu1  ;;  %v4499_v43 = vld [vmem:[%s13215_s24 + $0x218] sm:$0xff]  ;;  %v4500_v34 = vld [vmem:[%s13215_s24 + $0x220] sm:$0xff] }
 0x458   : > { %v4572_v8 = vpack.c.bf16 %v4499_v43, %v4498_v31 }
 0x459   : > { %v15150_v22 = vadd.f32 %v4832_v61, %v4338_v0  ;;  %11991 = vmatmul.mubr.msk.bf16.gmra.mrb[32].mxu0 %vm528_vm3, %v3685_v52  ;;  %12205 = vmatmul.mubr.msk.bf16.gmra.mrb[32].mxu1 %vm528_vm3, %v4571_v10 }
 0x45a   : > { %11994 = vmatprep.mubr.msk.bf16.mxu0 %vm13158_vm2, %v17672_v57  ;;  %12208 = vmatprep.mubr.msk.bf16.mxu1 %vm13158_vm2, %v17672_v57 }
 0x45c   : > { %v3941_v3 = vpop.f32.mrb[184].mxu0  ;;  %v4837_v50 = vpop.f32.mrb[184].mxu1 }
 0x45d   : > { %v4339_v51 = vadd.f32 %v3941_v3, %v14311_v58  ;;  %v11888_v11 = vpop.f32.mrb[185].mxu0  ;;  %v12102_v47 = vpop.f32.mrb[185].mxu1  ;;  %v3614_v58 = vld [vmem:[%s13215_s24 + $0x21f] sm:$0xff] }
 0x45e   : > { %v3944_v52 = vpop.f32.mrb[186].mxu0  ;;  %v4840_v10 = vpop.f32.mrb[186].mxu1  ;;  %v3687_v11 = vpack.c.bf16 %v3615_v29, %v3614_v58  ;;  %v3617_v58 = vld [vmem:[%s13215_s24 + $0x237] sm:$0xff] }
 0x45f   : > { %v4340_v48 = vadd.f32 %v3944_v52, %v14313_v41  ;;  %v15164_v61 = vadd.f32 %v4837_v50, %v4339_v51  ;;  %v11889_v0 = vpop.f32.mrb[187].mxu0  ;;  %v12103_v40 = vpop.f32.mrb[187].mxu1  ;;  %v4501_v41 = vld [vmem:[%s13215_s24 + $0x228] sm:$0xff]  ;;  %v4502_v29 = vld [vmem:[%s13215_s24 + $0x230] sm:$0xff] }
 0x460   : > { %v4573_v47 = vpack.c.bf16 %v4501_v41, %v4500_v34 }
 0x461   : > { %v15166_v54 = vadd.f32 %v4840_v10, %v4340_v48  ;;  %11995 = vmatmul.mubr.msk.bf16.gmra.mrb[36].mxu0 %vm528_vm3, %v3686_v33  ;;  %12209 = vmatmul.mubr.msk.bf16.gmra.mrb[36].mxu1 %vm528_vm3, %v4572_v8 }
 0x462   : > { %11998 = vmatprep.mubr.msk.bf16.mxu0 %vm13158_vm2, %v17672_v57  ;;  %12212 = vmatprep.mubr.msk.bf16.mxu1 %vm13158_vm2, %v17672_v57 }
 0x464   : > { %v3949_v31 = vpop.f32.mrb[188].mxu0  ;;  %v4845_v43 = vpop.f32.mrb[188].mxu1 }
 0x465   : > { %v4341_v3 = vadd.f32 %v3949_v31, %v14327_v17  ;;  %v11892_v50 = vpop.f32.mrb[189].mxu0  ;;  %v12106_v51 = vpop.f32.mrb[189].mxu1  ;;  %v3616_v17 = vld [vmem:[%s13215_s24 + $0x22f] sm:$0xff] }
 0x466   : > { %v3952_v33 = vpop.f32.mrb[190].mxu0  ;;  %v4848_v8 = vpop.f32.mrb[190].mxu1  ;;  %v3688_v50 = vpack.c.bf16 %v3617_v58, %v3616_v17  ;;  %v3619_v17 = vld [vmem:[%s13215_s24 + $0x247] sm:$0xff] }
 0x467   : > { %v4342_v52 = vadd.f32 %v3952_v33, %v14329_v55  ;;  %v15180_v10 = vadd.f32 %v4845_v43, %v4341_v3  ;;  %v11893_v48 = vpop.f32.mrb[191].mxu0  ;;  %v12107_v0 = vpop.f32.mrb[191].mxu1  ;;  %v4503_v55 = vld [vmem:[%s13215_s24 + $0x238] sm:$0xff]  ;;  %v4504_v58 = vld [vmem:[%s13215_s24 + $0x240] sm:$0xff] }
 0x468   : > { %v4574_v51 = vpack.c.bf16 %v4503_v55, %v4502_v29 }
 0x469   : > { %v15182_v40 = vadd.f32 %v4848_v8, %v4342_v52  ;;  %11999 = vmatmul.mubr.msk.bf16.gmra.mrb[40].mxu0 %vm528_vm3, %v3687_v11  ;;  %12213 = vmatmul.mubr.msk.bf16.gmra.mrb[40].mxu1 %vm528_vm3, %v4573_v47 }
 0x46a   : > { %12002 = vmatprep.mubr.msk.bf16.mxu0 %vm13158_vm2, %v17672_v57  ;;  %12216 = vmatprep.mubr.msk.bf16.mxu1 %vm13158_vm2, %v17672_v57 }
 0x46c   : > { %v3957_v34 = vpop.f32.mrb[192].mxu0  ;;  %v4853_v41 = vpop.f32.mrb[192].mxu1 }
 0x46d   : > { %v4343_v31 = vadd.f32 %v3957_v34, %v14343_v13  ;;  %v11896_v43 = vpop.f32.mrb[193].mxu0  ;;  %v12110_v3 = vpop.f32.mrb[193].mxu1  ;;  %v3618_v13 = vld [vmem:[%s13215_s24 + $0x23f] sm:$0xff] }
 0x46e   : > { %v3960_v11 = vpop.f32.mrb[194].mxu0  ;;  %v4856_v47 = vpop.f32.mrb[194].mxu1  ;;  %v3689_v43 = vpack.c.bf16 %v3619_v17, %v3618_v13  ;;  %v3621_v13 = vld [vmem:[%s13215_s24 + $0x257] sm:$0xff] }
 0x46f   : > { %v4344_v33 = vadd.f32 %v3960_v11, %v14345_v23  ;;  %v15196_v8 = vadd.f32 %v4853_v41, %v4343_v31  ;;  %v11897_v52 = vpop.f32.mrb[195].mxu0  ;;  %v12111_v48 = vpop.f32.mrb[195].mxu1  ;;  %v4505_v23 = vld [vmem:[%s13215_s24 + $0x248] sm:$0xff]  ;;  %v4506_v17 = vld [vmem:[%s13215_s24 + $0x250] sm:$0xff] }
 0x470   : > { %v4575_v3 = vpack.c.bf16 %v4505_v23, %v4504_v58 }
 0x471   : > { %v15198_v0 = vadd.f32 %v4856_v47, %v4344_v33  ;;  %12003 = vmatmul.mubr.msk.bf16.gmra.mrb[44].mxu0 %vm528_vm3, %v3688_v50  ;;  %12217 = vmatmul.mubr.msk.bf16.gmra.mrb[44].mxu1 %vm528_vm3, %v4574_v51 }
 0x472   : > { %12006 = vmatprep.mubr.msk.bf16.mxu0 %vm13158_vm2, %v17672_v57  ;;  %12220 = vmatprep.mubr.msk.bf16.mxu1 %vm13158_vm2, %v17672_v57 }
 0x474   : > { %v3965_v29 = vpop.f32.mrb[196].mxu0  ;;  %v4861_v55 = vpop.f32.mrb[196].mxu1 }
 0x475   : > { %v4345_v34 = vadd.f32 %v3965_v29, %v14359_v32  ;;  %v11900_v41 = vpop.f32.mrb[197].mxu0  ;;  %v12114_v31 = vpop.f32.mrb[197].mxu1  ;;  %v3620_v32 = vld [vmem:[%s13215_s24 + $0x24f] sm:$0xff] }
 0x476   : > { %v3968_v50 = vpop.f32.mrb[198].mxu0  ;;  %v4864_v51 = vpop.f32.mrb[198].mxu1  ;;  %v3690_v41 = vpack.c.bf16 %v3621_v13, %v3620_v32  ;;  %v3623_v32 = vld [vmem:[%s13215_s24 + $0x267] sm:$0xff] }
 0x477   : > { %v4346_v11 = vadd.f32 %v3968_v50, %v14361_v6  ;;  %v15212_v47 = vadd.f32 %v4861_v55, %v4345_v34  ;;  %v11901_v33 = vpop.f32.mrb[199].mxu0  ;;  %v12115_v52 = vpop.f32.mrb[199].mxu1  ;;  %v4507_v6 = vld [vmem:[%s13215_s24 + $0x258] sm:$0xff]  ;;  %v4508_v13 = vld [vmem:[%s13215_s24 + $0x260] sm:$0xff] }
 0x478   : > { %v4576_v31 = vpack.c.bf16 %v4507_v6, %v4506_v17 }
 0x479   : > { %v15214_v48 = vadd.f32 %v4864_v51, %v4346_v11  ;;  %12007 = vmatmul.mubr.msk.bf16.gmra.mrb[48].mxu0 %vm528_vm3, %v3689_v43  ;;  %12221 = vmatmul.mubr.msk.bf16.gmra.mrb[48].mxu1 %vm528_vm3, %v4575_v3 }
 0x47a   : > { %12010 = vmatprep.mubr.msk.bf16.mxu0 %vm13158_vm2, %v17672_v57  ;;  %12224 = vmatprep.mubr.msk.bf16.mxu1 %vm13158_vm2, %v17672_v57 }
 0x47b   : > { %17852 = vst [vmem:[#allocation61_spill] sm:$0xff] %v15214_v48 }
 0x47c   : > { %v3973_v58 = vpop.f32.mrb[200].mxu0  ;;  %v4869_v23 = vpop.f32.mrb[200].mxu1 }
 0x47d   : > { %v4347_v29 = vadd.f32 %v3973_v58, %v14375_v49  ;;  %v11904_v55 = vpop.f32.mrb[201].mxu0  ;;  %v12118_v34 = vpop.f32.mrb[201].mxu1  ;;  %v3622_v49 = vld [vmem:[%s13215_s24 + $0x25f] sm:$0xff]  ;;  %v17855_v58 = vld [vmem:[#allocation63_spill] sm:$0xff] }
 0x47e   : > { %v3976_v43 = vpop.f32.mrb[202].mxu0  ;;  %v4872_v3 = vpop.f32.mrb[202].mxu1  ;;  %v3691_v34 = vpack.c.bf16 %v3623_v32, %v3622_v49  ;;  %v3624_v49 = vld [vmem:[%s13215_s24 + $0x26f] sm:$0xff] }
 0x47f   : > { %v4348_v50 = vadd.f32 %v3976_v43, %v14377_v1  ;;  %v15228_v51 = vadd.f32 %v4869_v23, %v4347_v29  ;;  %v11905_v11 = vpop.f32.mrb[203].mxu0  ;;  %v12119_v33 = vpop.f32.mrb[203].mxu1  ;;  %v4509_v1 = vld [vmem:[%s13215_s24 + $0x268] sm:$0xff] }
 0x481   : > { %17853 = vst [vmem:[#allocation62_spill] sm:$0xff] %v15228_v51  ;;  %v15230_v52 = vadd.f32 %v4872_v3, %v4348_v50  ;;  %12011 = vmatmul.mubr.msk.bf16.gmra.mrb[52].mxu0 %vm528_vm3, %v3690_v41  ;;  %12225 = vmatmul.mubr.msk.bf16.gmra.mrb[52].mxu1 %vm528_vm3, %v4576_v31  ;;  %v4577_v41 = vpack.c.bf16 %v4509_v1, %v4508_v13  ;;  %v17856_v3 = vld [vmem:[#allocation64_spill] sm:$0xff]  ;;  %v13019_v51 = vld [vmem:[%s17662_s1 + $0x8] ss:$0 sps:$4 sm:$0xcc]  }
 0x482   : > { %12014 = vmatprep.mubr.msk.bf16.mxu0 %vm13158_vm2, %v17672_v57  ;;  %12228 = vmatprep.mubr.msk.bf16.mxu1 %vm13158_vm2, %v17672_v57  ;;  %v6381_v32 = vshrl.u32 %v13019_v51, 16  ;;  %v6384_v13 = vshll.u32 %v13019_v51, 16  ;;  %v3625_v1 = vld [vmem:[%s13215_s24 + $0x277] sm:$0xff] }
 0x483   : > { %17854 = vst [vmem:[#allocation65_spill] sm:$0xff] %v15230_v52  ;;  %v3692_v51 = vpack.c.bf16 %v3625_v1, %v3624_v49  ;;  %v3626_v49 = vld [vmem:[%s13215_s24 + $0x27f] sm:$0xff]  ;;  %v3627_v1 = vld [vmem:[%s13215_s24 + $0x287] sm:$0xff] }
 0x484   : > { %v3981_v17 = vpop.f32.mrb[204].mxu0  ;;  %v4877_v6 = vpop.f32.mrb[204].mxu1 }
 0x485   : > { %v4349_v23 = vadd.f32 %v3981_v17, %v17855_v58  ;;  %v11908_v29 = vpop.f32.mrb[205].mxu0  ;;  %v12122_v55 = vpop.f32.mrb[205].mxu1  ;;  %v6383_v58 = vrot.slane %v6381_v32, 2 }
 0x486   : > { %v3984_v31 = vpop.f32.mrb[206].mxu0  ;;  %v4880_v43 = vpop.f32.mrb[206].mxu1 }
 0x487   : > { %v4350_v50 = vadd.f32 %v3984_v31, %v17856_v3  ;;  %v15244_v11 = vadd.f32 %v4877_v6, %v4349_v23  ;;  %v11909_v33 = vpop.f32.mrb[207].mxu0  ;;  %v12123_v52 = vpop.f32.mrb[207].mxu1  ;;  %v4511_v6 = vld [vmem:[%s13215_s24 + $0x278] sm:$0xff]  ;;  %v6386_v23 = vrot.slane %v6384_v13, 3 }
 0x488   : > { %v4510_v52 = vld [vmem:[%s13215_s24 + $0x270] sm:$0xff] }
 0x489   : > { %17857 = vst [vmem:[#allocation63_spill] sm:$0xff] %v15244_v11  ;;  %v15249_v17 = vadd.f32 %v4880_v43, %v4350_v50  ;;  %12015 = vmatmul.mubr.msk.bf16.gmra.mrb[56].mxu0 %vm528_vm3, %v3691_v34  ;;  %12229 = vmatmul.mubr.msk.bf16.gmra.mrb[56].mxu1 %vm528_vm3, %v4577_v41  ;;  %v4578_v43 = vpack.c.bf16 %v4511_v6, %v4510_v52  ;;  %v4513_v52 = vld [vmem:[%s13215_s24 + $0x288] sm:$0xff] }
 0x48a   : > { %12018 = vmatprep.mubr.msk.bf16.mxu0 %vm13158_vm2, %v17672_v57  ;;  %12232 = vmatprep.mubr.msk.bf16.mxu1 %vm13158_vm2, %v17672_v57  ;;  %v6387_v3 = vor.u32 %v6386_v23, %v6383_v58 }
 0x48b   : > { %17858 = vst [vmem:[#allocation64_spill] sm:$0xff] %v15249_v17 }
 0x48c   : > { %v3989_v29 = vpop.f32.mrb[208].mxu0  ;;  %v4885_v55 = vpop.f32.mrb[208].mxu1  ;;  %v6548_v48 = vand.u32 %v6387_v3, %v13204_v7 }
 0x48d   : > { %v4351_v34 = vadd.f32 %v3989_v29, %v14411_v19  ;;  %v11912_v41 = vpop.f32.mrb[209].mxu0  ;;  %v12126_v31 = vpop.f32.mrb[209].mxu1 }
 0x48e   : > { %v3992_v50 = vpop.f32.mrb[210].mxu0  ;;  %v4888_v33 = vpop.f32.mrb[210].mxu1  ;;  %12511 = vmatpush3.bf16.msra.mxu1 %v6548_v48 }
 0x48f   : > { %v4352_v17 = vadd.f32 %v3992_v50, %v14413_v62  ;;  %v15263_v11 = vadd.f32 %v4885_v55, %v4351_v34  ;;  %v11913_v32 = vpop.f32.mrb[211].mxu0  ;;  %v12127_v13 = vpop.f32.mrb[211].mxu1  ;;  %v4512_v62 = vld [vmem:[%s13215_s24 + $0x280] sm:$0xff]  ;;  %v3693_v55 = vpack.c.bf16 %v3627_v1, %v3626_v49 }
 0x490   : > { %v4579_v34 = vpack.c.bf16 %v4513_v52, %v4512_v62  ;;  %v4514_v32 = vld [vmem:[%s13215_s24 + $0x290] sm:$0xff] }
 0x491   : > { %v15266_v19 = vadd.f32 %v4888_v33, %v4352_v17  ;;  %12019 = vmatmul.mubr.msk.bf16.gmra.mrb[60].mxu0 %vm528_vm3, %v3692_v51  ;;  %12233 = vmatmul.mubr.msk.bf16.gmra.mrb[60].mxu1 %vm528_vm3, %v4578_v43  ;;  %v3629_v33 = vld [vmem:[%s13215_s24 + $0x297] sm:$0xff] }
 0x492   : > { %12022 = vmatprep.mubr.msk.bf16.mxu0 %vm13158_vm2, %v17672_v57  ;;  %12236 = vmatprep.mubr.msk.bf16.mxu1 %vm13158_vm2, %v17672_v57 }
 0x494   : > { %v3997_v6 = vpop.f32.mrb[212].mxu0  ;;  %v4893_v58 = vpop.f32.mrb[212].mxu1 }
 0x495   : > { %v4353_v17 = vadd.f32 %v3997_v6, %v14428_v53  ;;  %v11916_v23 = vpop.f32.mrb[213].mxu0  ;;  %v12130_v29 = vpop.f32.mrb[213].mxu1  ;;  %v3628_v53 = vld [vmem:[%s13215_s24 + $0x28f] sm:$0xff] }
 0x496   : > { %v4000_v41 = vpop.f32.mrb[214].mxu0  ;;  %v4896_v31 = vpop.f32.mrb[214].mxu1  ;;  %v3694_v6 = vpack.c.bf16 %v3629_v33, %v3628_v53 }
 0x497   : > { %v4354_v51 = vadd.f32 %v4000_v41, %v14430_v35  ;;  %v15280_v43 = vadd.f32 %v4893_v58, %v4353_v17  ;;  %v11917_v3 = vpop.f32.mrb[215].mxu0  ;;  %v12131_v48 = vpop.f32.mrb[215].mxu1  ;;  %v4515_v35 = vld [vmem:[%s13215_s24 + $0x298] sm:$0xff] }
 0x498   : > { %v4580_v58 = vpack.c.bf16 %v4515_v35, %v4514_v32  ;;  %v4516_v3 = vld [vmem:[%s13215_s24 + $0x2a0] sm:$0xff] }
 0x499   : > { %v15282_v50 = vadd.f32 %v4896_v31, %v4354_v51  ;;  %12023 = vmatmul.mubr.msk.bf16.gmra.mrb[64].mxu0 %vm528_vm3, %v3693_v55  ;;  %12237 = vmatmul.mubr.msk.bf16.gmra.mrb[64].mxu1 %vm528_vm3, %v4579_v34  ;;  %v3631_v51 = vld [vmem:[%s13215_s24 + $0x2a7] sm:$0xff] }
 0x49a   : > { %12026 = vmatprep.mubr.msk.bf16.mxu0 %vm13158_vm2, %v17672_v57  ;;  %12240 = vmatprep.mubr.msk.bf16.mxu1 %vm13158_vm2, %v17672_v57 }
 0x49c   : > { %v4005_v13 = vpop.f32.mrb[216].mxu0  ;;  %v4901_v49 = vpop.f32.mrb[216].mxu1 }
 0x49d   : > { %v4355_v1 = vadd.f32 %v4005_v13, %v14444_v9  ;;  %v11920_v62 = vpop.f32.mrb[217].mxu0  ;;  %v12134_v52 = vpop.f32.mrb[217].mxu1  ;;  %v3630_v9 = vld [vmem:[%s13215_s24 + $0x29f] sm:$0xff] }
 0x49e   : > { %v4008_v17 = vpop.f32.mrb[218].mxu0  ;;  %v4904_v23 = vpop.f32.mrb[218].mxu1  ;;  %v3695_v13 = vpack.c.bf16 %v3631_v51, %v3630_v9 }
 0x49f   : > { %v4356_v29 = vadd.f32 %v4008_v17, %v14446_v30  ;;  %v15296_v55 = vadd.f32 %v4901_v49, %v4355_v1  ;;  %v11921_v34 = vpop.f32.mrb[219].mxu0  ;;  %v12135_v41 = vpop.f32.mrb[219].mxu1  ;;  %v4517_v30 = vld [vmem:[%s13215_s24 + $0x2a8] sm:$0xff] }
 0x4a0   : > { %v4581_v49 = vpack.c.bf16 %v4517_v30, %v4516_v3  ;;  %v4518_v34 = vld [vmem:[%s13215_s24 + $0x2b0] sm:$0xff] }
 0x4a1   : > { %v15298_v31 = vadd.f32 %v4904_v23, %v4356_v29  ;;  %12027 = vmatmul.mubr.msk.bf16.gmra.mrb[68].mxu0 %vm528_vm3, %v3694_v6  ;;  %12241 = vmatmul.mubr.msk.bf16.gmra.mrb[68].mxu1 %vm528_vm3, %v4580_v58  ;;  %v3633_v29 = vld [vmem:[%s13215_s24 + $0x2b7] sm:$0xff] }
 0x4a2   : > { %12030 = vmatprep.mubr.msk.bf16.mxu0 %vm13158_vm2, %v17672_v57  ;;  %12244 = vmatprep.mubr.msk.bf16.mxu1 %vm13158_vm2, %v17672_v57 }
 0x4a4   : > { %v4013_v48 = vpop.f32.mrb[220].mxu0  ;;  %v4909_v53 = vpop.f32.mrb[220].mxu1 }
 0x4a5   : > { %v4357_v33 = vadd.f32 %v4013_v48, %v14460_v38  ;;  %v11924_v32 = vpop.f32.mrb[221].mxu0  ;;  %v12138_v35 = vpop.f32.mrb[221].mxu1  ;;  %v3632_v38 = vld [vmem:[%s13215_s24 + $0x2af] sm:$0xff] }
 0x4a6   : > { %v4016_v1 = vpop.f32.mrb[222].mxu0  ;;  %v4912_v62 = vpop.f32.mrb[222].mxu1  ;;  %v3696_v48 = vpack.c.bf16 %v3633_v29, %v3632_v38 }
 0x4a7   : > { %v4358_v52 = vadd.f32 %v4016_v1, %v14462_v46  ;;  %v15312_v6 = vadd.f32 %v4909_v53, %v4357_v33  ;;  %v11925_v58 = vpop.f32.mrb[223].mxu0  ;;  %v12139_v17 = vpop.f32.mrb[223].mxu1  ;;  %v4519_v46 = vld [vmem:[%s13215_s24 + $0x2b8] sm:$0xff] }
 0x4a8   : > { %v4582_v53 = vpack.c.bf16 %v4519_v46, %v4518_v34  ;;  %v4520_v58 = vld [vmem:[%s13215_s24 + $0x2c0] sm:$0xff] }
 0x4a9   : > { %v15314_v23 = vadd.f32 %v4912_v62, %v4358_v52  ;;  %12031 = vmatmul.mubr.msk.bf16.gmra.mrb[72].mxu0 %vm528_vm3, %v3695_v13  ;;  %12245 = vmatmul.mubr.msk.bf16.gmra.mrb[72].mxu1 %vm528_vm3, %v4581_v49  ;;  %v3635_v52 = vld [vmem:[%s13215_s24 + $0x2c7] sm:$0xff] }
 0x4aa   : > { %12034 = vmatprep.mubr.msk.bf16.mxu0 %vm13158_vm2, %v17672_v57  ;;  %12248 = vmatprep.mubr.msk.bf16.mxu1 %vm13158_vm2, %v17672_v57 }
 0x4ac   : > { %v4021_v41 = vpop.f32.mrb[224].mxu0  ;;  %v4917_v9 = vpop.f32.mrb[224].mxu1 }
 0x4ad   : > { %v4359_v51 = vadd.f32 %v4021_v41, %v14476_v12  ;;  %v11928_v3 = vpop.f32.mrb[225].mxu0  ;;  %v12142_v30 = vpop.f32.mrb[225].mxu1  ;;  %v3634_v12 = vld [vmem:[%s13215_s24 + $0x2bf] sm:$0xff] }
 0x4ae   : > { %v4024_v33 = vpop.f32.mrb[226].mxu0  ;;  %v4920_v32 = vpop.f32.mrb[226].mxu1  ;;  %v3697_v41 = vpack.c.bf16 %v3635_v52, %v3634_v12 }
 0x4af   : > { %v4360_v35 = vadd.f32 %v4024_v33, %v14478_v45  ;;  %v15328_v13 = vadd.f32 %v4917_v9, %v4359_v51  ;;  %v11929_v49 = vpop.f32.mrb[227].mxu0  ;;  %v12143_v1 = vpop.f32.mrb[227].mxu1  ;;  %v4521_v45 = vld [vmem:[%s13215_s24 + $0x2c8] sm:$0xff] }
 0x4b0   : > { %v4583_v9 = vpack.c.bf16 %v4521_v45, %v4520_v58  ;;  %v4522_v49 = vld [vmem:[%s13215_s24 + $0x2d0] sm:$0xff] }
 0x4b1   : > { %v15330_v62 = vadd.f32 %v4920_v32, %v4360_v35  ;;  %12035 = vmatmul.mubr.msk.bf16.gmra.mrb[76].mxu0 %vm528_vm3, %v3696_v48  ;;  %12249 = vmatmul.mubr.msk.bf16.gmra.mrb[76].mxu1 %vm528_vm3, %v4582_v53  ;;  %v3637_v35 = vld [vmem:[%s13215_s24 + $0x2d7] sm:$0xff] }
 0x4b2   : > { %12038 = vmatprep.mubr.msk.bf16.mxu0 %vm13158_vm2, %v17672_v57  ;;  %12252 = vmatprep.mubr.msk.bf16.mxu1 %vm13158_vm2, %v17672_v57 }
 0x4b4   : > { %v4029_v17 = vpop.f32.mrb[228].mxu0  ;;  %v4925_v38 = vpop.f32.mrb[228].mxu1 }
 0x4b5   : > { %v4361_v29 = vadd.f32 %v4029_v17, %v14492_v24  ;;  %v11932_v34 = vpop.f32.mrb[229].mxu0  ;;  %v12146_v46 = vpop.f32.mrb[229].mxu1  ;;  %v3636_v24 = vld [vmem:[%s13215_s24 + $0x2cf] sm:$0xff] }
 0x4b6   : > { %v4032_v51 = vpop.f32.mrb[230].mxu0  ;;  %v4928_v3 = vpop.f32.mrb[230].mxu1  ;;  %v3698_v17 = vpack.c.bf16 %v3637_v35, %v3636_v24 }
 0x4b7   : > { %v4362_v30 = vadd.f32 %v4032_v51, %v14494_v56  ;;  %v15344_v48 = vadd.f32 %v4925_v38, %v4361_v29  ;;  %v11933_v53 = vpop.f32.mrb[231].mxu0  ;;  %v12147_v33 = vpop.f32.mrb[231].mxu1  ;;  %v4523_v56 = vld [vmem:[%s13215_s24 + $0x2d8] sm:$0xff] }
 0x4b8   : > { %v4584_v38 = vpack.c.bf16 %v4523_v56, %v4522_v49  ;;  %v4524_v53 = vld [vmem:[%s13215_s24 + $0x2e0] sm:$0xff] }
 0x4b9   : > { %v15346_v32 = vadd.f32 %v4928_v3, %v4362_v30  ;;  %12039 = vmatmul.mubr.msk.bf16.gmra.mrb[80].mxu0 %vm528_vm3, %v3697_v41  ;;  %12253 = vmatmul.mubr.msk.bf16.gmra.mrb[80].mxu1 %vm528_vm3, %v4583_v9  ;;  %v3639_v30 = vld [vmem:[%s13215_s24 + $0x2e7] sm:$0xff] }
 0x4ba   : > { %12042 = vmatprep.mubr.msk.bf16.mxu0 %vm13158_vm2, %v17672_v57  ;;  %12256 = vmatprep.mubr.msk.bf16.mxu1 %vm13158_vm2, %v17672_v57 }
 0x4bc   : > { %v4037_v1 = vpop.f32.mrb[232].mxu0  ;;  %v4933_v12 = vpop.f32.mrb[232].mxu1 }
 0x4bd   : > { %v4363_v52 = vadd.f32 %v4037_v1, %v14508_v21  ;;  %v11936_v58 = vpop.f32.mrb[233].mxu0  ;;  %v12150_v45 = vpop.f32.mrb[233].mxu1  ;;  %v3638_v21 = vld [vmem:[%s13215_s24 + $0x2df] sm:$0xff] }
 0x4be   : > { %v4040_v29 = vpop.f32.mrb[234].mxu0  ;;  %v4936_v34 = vpop.f32.mrb[234].mxu1  ;;  %v3699_v1 = vpack.c.bf16 %v3639_v30, %v3638_v21 }
 0x4bf   : > { %v4364_v46 = vadd.f32 %v4040_v29, %v14510_v4  ;;  %v15360_v41 = vadd.f32 %v4933_v12, %v4363_v52  ;;  %v11937_v9 = vpop.f32.mrb[235].mxu0  ;;  %v12151_v51 = vpop.f32.mrb[235].mxu1  ;;  %v4525_v4 = vld [vmem:[%s13215_s24 + $0x2e8] sm:$0xff] }
 0x4c0   : > { %v4585_v12 = vpack.c.bf16 %v4525_v4, %v4524_v53  ;;  %v4526_v9 = vld [vmem:[%s13215_s24 + $0x2f0] sm:$0xff] }
 0x4c1   : > { %v15362_v3 = vadd.f32 %v4936_v34, %v4364_v46  ;;  %12043 = vmatmul.mubr.msk.bf16.gmra.mrb[84].mxu0 %vm528_vm3, %v3698_v17  ;;  %12257 = vmatmul.mubr.msk.bf16.gmra.mrb[84].mxu1 %vm528_vm3, %v4584_v38  ;;  %v3641_v46 = vld [vmem:[%s13215_s24 + $0x2f7] sm:$0xff] }
 0x4c2   : > { %12046 = vmatprep.mubr.msk.bf16.mxu0 %vm13158_vm2, %v17672_v57  ;;  %12260 = vmatprep.mubr.msk.bf16.mxu1 %vm13158_vm2, %v17672_v57 }
 0x4c4   : > { %v4045_v33 = vpop.f32.mrb[236].mxu0  ;;  %v4941_v24 = vpop.f32.mrb[236].mxu1 }
 0x4c5   : > { %v4365_v35 = vadd.f32 %v4045_v33, %v14524_v27  ;;  %v11940_v49 = vpop.f32.mrb[237].mxu0  ;;  %v12154_v56 = vpop.f32.mrb[237].mxu1  ;;  %v3640_v27 = vld [vmem:[%s13215_s24 + $0x2ef] sm:$0xff] }
 0x4c6   : > { %v4048_v52 = vpop.f32.mrb[238].mxu0  ;;  %v4944_v58 = vpop.f32.mrb[238].mxu1  ;;  %v3700_v33 = vpack.c.bf16 %v3641_v46, %v3640_v27 }
 0x4c7   : > { %v4366_v45 = vadd.f32 %v4048_v52, %v14526_v60  ;;  %v15376_v17 = vadd.f32 %v4941_v24, %v4365_v35  ;;  %v11941_v38 = vpop.f32.mrb[239].mxu0  ;;  %v12155_v29 = vpop.f32.mrb[239].mxu1  ;;  %v4527_v60 = vld [vmem:[%s13215_s24 + $0x2f8] sm:$0xff] }
 0x4c8   : > { %v4586_v24 = vpack.c.bf16 %v4527_v60, %v4526_v9  ;;  %v4528_v38 = vld [vmem:[%s13215_s24 + $0x300] sm:$0xff] }
 0x4c9   : > { %v15378_v34 = vadd.f32 %v4944_v58, %v4366_v45  ;;  %12047 = vmatmul.mubr.msk.bf16.gmra.mrb[88].mxu0 %vm528_vm3, %v3699_v1  ;;  %12261 = vmatmul.mubr.msk.bf16.gmra.mrb[88].mxu1 %vm528_vm3, %v4585_v12  ;;  %v3643_v45 = vld [vmem:[%s13215_s24 + $0x307] sm:$0xff] }
 0x4ca   : > { %12050 = vmatprep.mubr.msk.bf16.mxu0 %vm13158_vm2, %v17672_v57  ;;  %12264 = vmatprep.mubr.msk.bf16.mxu1 %vm13158_vm2, %v17672_v57 }
 0x4cc   : > { %v4053_v51 = vpop.f32.mrb[240].mxu0  ;;  %v4949_v21 = vpop.f32.mrb[240].mxu1 }
 0x4cd   : > { %v4367_v30 = vadd.f32 %v4053_v51, %v14540_v63  ;;  %v11944_v53 = vpop.f32.mrb[241].mxu0  ;;  %v12158_v4 = vpop.f32.mrb[241].mxu1  ;;  %v3642_v63 = vld [vmem:[%s13215_s24 + $0x2ff] sm:$0xff] }
 0x4ce   : > { %v4056_v35 = vpop.f32.mrb[242].mxu0  ;;  %v4952_v49 = vpop.f32.mrb[242].mxu1  ;;  %v3701_v51 = vpack.c.bf16 %v3643_v45, %v3642_v63 }
 0x4cf   : > { %v4368_v56 = vadd.f32 %v4056_v35, %v14542_v14  ;;  %v15392_v1 = vadd.f32 %v4949_v21, %v4367_v30  ;;  %v11945_v12 = vpop.f32.mrb[243].mxu0  ;;  %v12159_v52 = vpop.f32.mrb[243].mxu1  ;;  %v4529_v14 = vld [vmem:[%s13215_s24 + $0x308] sm:$0xff] }
 0x4d0   : > { %v4587_v21 = vpack.c.bf16 %v4529_v14, %v4528_v38  ;;  %v4530_v12 = vld [vmem:[%s13215_s24 + $0x310] sm:$0xff] }
 0x4d1   : > { %v15394_v58 = vadd.f32 %v4952_v49, %v4368_v56  ;;  %12051 = vmatmul.mubr.msk.bf16.gmra.mrb[92].mxu0 %vm528_vm3, %v3700_v33  ;;  %12265 = vmatmul.mubr.msk.bf16.gmra.mrb[92].mxu1 %vm528_vm3, %v4586_v24  ;;  %v3645_v56 = vld [vmem:[%s13215_s24 + $0x317] sm:$0xff] }
 0x4d2   : > { %12054 = vmatprep.mubr.msk.bf16.mxu0 %vm13158_vm2, %v17672_v57  ;;  %12268 = vmatprep.mubr.msk.bf16.mxu1 %vm13158_vm2, %v17672_v57 }
 0x4d4   : > { %v4061_v29 = vpop.f32.mrb[244].mxu0  ;;  %v4957_v27 = vpop.f32.mrb[244].mxu1 }
 0x4d5   : > { %v4369_v46 = vadd.f32 %v4061_v29, %v14556_v37  ;;  %v11948_v9 = vpop.f32.mrb[245].mxu0  ;;  %v12162_v60 = vpop.f32.mrb[245].mxu1  ;;  %v3644_v37 = vld [vmem:[%s13215_s24 + $0x30f] sm:$0xff] }
 0x4d6   : > { %v4064_v30 = vpop.f32.mrb[246].mxu0  ;;  %v4960_v53 = vpop.f32.mrb[246].mxu1  ;;  %v3702_v29 = vpack.c.bf16 %v3645_v56, %v3644_v37 }
 0x4d7   : > { %v4370_v4 = vadd.f32 %v4064_v30, %v14558_v2  ;;  %v15408_v33 = vadd.f32 %v4957_v27, %v4369_v46  ;;  %v11949_v24 = vpop.f32.mrb[247].mxu0  ;;  %v12163_v35 = vpop.f32.mrb[247].mxu1  ;;  %v4531_v2 = vld [vmem:[%s13215_s24 + $0x318] sm:$0xff] }
 0x4d8   : > { %v4588_v27 = vpack.c.bf16 %v4531_v2, %v4530_v12  ;;  %v4532_v24 = vld [vmem:[%s13215_s24 + $0x320] sm:$0xff] }
 0x4d9   : > { %v15410_v49 = vadd.f32 %v4960_v53, %v4370_v4  ;;  %12055 = vmatmul.mubr.msk.bf16.gmra.mrb[96].mxu0 %vm528_vm3, %v3701_v51  ;;  %12269 = vmatmul.mubr.msk.bf16.gmra.mrb[96].mxu1 %vm528_vm3, %v4587_v21  ;;  %v3647_v4 = vld [vmem:[%s13215_s24 + $0x327] sm:$0xff] }
 0x4da   : > { %12058 = vmatprep.mubr.msk.bf16.mxu0 %vm13158_vm2, %v17672_v57  ;;  %12272 = vmatprep.mubr.msk.bf16.mxu1 %vm13158_vm2, %v17672_v57 }
 0x4dc   : > { %v4069_v52 = vpop.f32.mrb[248].mxu0  ;;  %v4965_v63 = vpop.f32.mrb[248].mxu1 }
 0x4dd   : > { %v4371_v45 = vadd.f32 %v4069_v52, %v14572_v15  ;;  %v11952_v38 = vpop.f32.mrb[249].mxu0  ;;  %v12166_v14 = vpop.f32.mrb[249].mxu1  ;;  %v3646_v15 = vld [vmem:[%s13215_s24 + $0x31f] sm:$0xff] }
 0x4de   : > { %v4072_v46 = vpop.f32.mrb[250].mxu0  ;;  %v4968_v9 = vpop.f32.mrb[250].mxu1  ;;  %v3703_v52 = vpack.c.bf16 %v3647_v4, %v3646_v15  ;;  %v17859_v4 = vld [vmem:[#allocation2_spill] sm:$0xff] }
 0x4df   : > { %v4372_v60 = vadd.f32 %v4072_v46, %v14574_v44  ;;  %v15424_v51 = vadd.f32 %v4965_v63, %v4371_v45  ;;  %v11953_v21 = vpop.f32.mrb[251].mxu0  ;;  %v12167_v30 = vpop.f32.mrb[251].mxu1  ;;  %v4533_v44 = vld [vmem:[%s13215_s24 + $0x328] sm:$0xff] }
 0x4e0   : > { %v4589_v63 = vpack.c.bf16 %v4533_v44, %v4532_v24  ;;  %v4534_v21 = vld [vmem:[%s13215_s24 + $0x330] sm:$0xff] }
 0x4e1   : > { %v15426_v53 = vadd.f32 %v4968_v9, %v4372_v60  ;;  %12059 = vmatmul.mubr.msk.bf16.gmra.mrb[100].mxu0 %vm528_vm3, %v3702_v29  ;;  %12273 = vmatmul.mubr.msk.bf16.gmra.mrb[100].mxu1 %vm528_vm3, %v4588_v27  ;;  %v3649_v60 = vld [vmem:[%s13215_s24 + $0x337] sm:$0xff] }
 0x4e2   : > { %12062 = vmatprep.mubr.msk.bf16.mxu0 %vm13158_vm2, %v17672_v57  ;;  %12276 = vmatprep.mubr.msk.bf16.mxu1 %vm13158_vm2, %v17672_v57 }
 0x4e4   : > { %v4077_v35 = vpop.f32.mrb[252].mxu0  ;;  %v4973_v37 = vpop.f32.mrb[252].mxu1 }
 0x4e5   : > { %v4373_v56 = vadd.f32 %v4077_v35, %v14588_v28  ;;  %v11956_v12 = vpop.f32.mrb[253].mxu0  ;;  %v12170_v2 = vpop.f32.mrb[253].mxu1  ;;  %v3648_v28 = vld [vmem:[%s13215_s24 + $0x32f] sm:$0xff] }
 0x4e6   : > { %v4080_v45 = vpop.f32.mrb[254].mxu0  ;;  %v4976_v38 = vpop.f32.mrb[254].mxu1 }
 0x4e7   : > { %v4374_v14 = vadd.f32 %v4080_v45, %v14590_v39  ;;  %v15440_v29 = vadd.f32 %v4973_v37, %v4373_v56  ;;  %v11957_v27 = vpop.f32.mrb[255].mxu0  ;;  %v12171_v46 = vpop.f32.mrb[255].mxu1  ;;  %v4535_v39 = vld [vmem:[%s13215_s24 + $0x338] sm:$0xff]  ;;  %v3704_v37 = vpack.c.bf16 %v3649_v60, %v3648_v28  ;;  %v3651_v28 = vld [vmem:[%s13215_s24 + $0x347] sm:$0xff] }
 0x4e8   : > { %v4590_v56 = vpack.c.bf16 %v4535_v39, %v4534_v21  ;;  %v3650_v46 = vld [vmem:[%s13215_s24 + $0x33f] sm:$0xff]  ;;  %v4537_v21 = vld [vmem:[%s13215_s24 + $0x348] sm:$0xff] }
 0x4e9   : > { %v15442_v9 = vadd.f32 %v4976_v38, %v4374_v14  ;;  %12063 = vmatmul.mubr.msk.bf16.gmra.mrb[104].mxu0 %vm528_vm3, %v3703_v52  ;;  %12277 = vmatmul.mubr.msk.bf16.gmra.mrb[104].mxu1 %vm528_vm3, %v4589_v63  ;;  %v17860_v52 = vld [vmem:[#allocation3_spill] sm:$0xff]  ;;  %v4536_v60 = vld [vmem:[%s13215_s24 + $0x340] sm:$0xff] }
 0x4ea   : > { %12066 = vmatprep.mubr.msk.bf16.mxu0 %vm13158_vm2, %v17672_v57  ;;  %12280 = vmatprep.mubr.msk.bf16.mxu1 %vm13158_vm2, %v17672_v57 }
 0x4ec   : > { %v4085_v30 = vpop.f32.mrb[0].mxu0  ;;  %v4981_v15 = vpop.f32.mrb[0].mxu1 }
 0x4ed   : > { %v4375_v24 = vadd.f32 %v4085_v30, %v17859_v4  ;;  %v11960_v44 = vpop.f32.mrb[1].mxu0  ;;  %v12174_v35 = vpop.f32.mrb[1].mxu1 }
 0x4ee   : > { %v4088_v12 = vpop.f32.mrb[2].mxu0  ;;  %v4984_v2 = vpop.f32.mrb[2].mxu1  ;;  %v3705_v35 = vpack.c.bf16 %v3651_v28, %v3650_v46  ;;  %v3653_v46 = vld [vmem:[%s13215_s24 + $0x357] sm:$0xff] }
 0x4ef   : > { %v4376_v63 = vadd.f32 %v4088_v12, %v17860_v52  ;;  %v15456_v45 = vadd.f32 %v4981_v15, %v4375_v24  ;;  %v11961_v38 = vpop.f32.mrb[3].mxu0  ;;  %v12175_v14 = vpop.f32.mrb[3].mxu1  ;;  %v17862_v15 = vld [vmem:[#allocation4_spill] sm:$0xff] }
 0x4f0   : > { %v4538_v28 = vld [vmem:[%s13215_s24 + $0x350] sm:$0xff] }
 0x4f1   : > { %v15458_v27 = vadd.f32 %v4984_v2, %v4376_v63  ;;  %12067 = vmatmul.mubr.msk.bf16.gmra.mrb[108].mxu0 %vm528_vm3, %v3704_v37  ;;  %12281 = vmatmul.mubr.msk.bf16.gmra.mrb[108].mxu1 %vm528_vm3, %v4590_v56  ;;  %v4591_v37 = vpack.c.bf16 %v4537_v21, %v4536_v60  ;;  %v17863_v2 = vld [vmem:[#allocation5_spill] sm:$0xff] }
 0x4f2   : > { %12070 = vmatprep.mubr.msk.bf16.mxu0 %vm13158_vm2, %v17672_v57  ;;  %12284 = vmatprep.mubr.msk.bf16.mxu1 %vm13158_vm2, %v17672_v57  ;;  %v4539_v60 = vld [vmem:[%s13215_s24 + $0x358] sm:$0xff] }
 0x4f3   : > { %17861 = vst [vmem:[#allocation2_spill] sm:$0xff] %v15458_v27 }
 0x4f4   : > { %v4093_v39 = vpop.f32.mrb[4].mxu0  ;;  %v4989_v30 = vpop.f32.mrb[4].mxu1 }
 0x4f5   : > { %v4377_v4 = vadd.f32 %v4093_v39, %v17862_v15  ;;  %v11964_v24 = vpop.f32.mrb[5].mxu0  ;;  %v12178_v44 = vpop.f32.mrb[5].mxu1  ;;  %v3652_v39 = vld [vmem:[%s13215_s24 + $0x34f] sm:$0xff]  ;;  %v17866_v15 = vld [vmem:[#allocation6_spill] sm:$0xff] }
 0x4f6   : > { %v4096_v56 = vpop.f32.mrb[6].mxu0  ;;  %v4992_v12 = vpop.f32.mrb[6].mxu1 }
 0x4f7   : > { %v4378_v52 = vadd.f32 %v4096_v56, %v17863_v2  ;;  %v15472_v63 = vadd.f32 %v4989_v30, %v4377_v4  ;;  %v11965_v38 = vpop.f32.mrb[7].mxu0  ;;  %v12179_v14 = vpop.f32.mrb[7].mxu1  ;;  %v17867_v2 = vld [vmem:[#allocation7_spill] sm:$0xff] }
 0x4f9   : > { %17864 = vst [vmem:[#allocation3_spill] sm:$0xff] %v15472_v63  ;;  %v15474_v27 = vadd.f32 %v4992_v12, %v4378_v52  ;;  %12071 = vmatmul.mubr.msk.bf16.gmra.mrb[112].mxu0 %vm528_vm3, %v3705_v35  ;;  %12285 = vmatmul.mubr.msk.bf16.gmra.mrb[112].mxu1 %vm528_vm3, %v4591_v37  ;;  %v3706_v35 = vpack.c.bf16 %v3653_v46, %v3652_v39  ;;  %v4540_v39 = vld [vmem:[%s13215_s24 + $0x360] sm:$0x3f] }
 0x4fa   : > { %12074 = vmatprep.mubr.msk.bf16.mxu0 %vm13158_vm2, %v17672_v57  ;;  %12288 = vmatprep.mubr.msk.bf16.mxu1 %vm13158_vm2, %v17672_v57  ;;  %v4592_v37 = vpack.c.bf16 %v4539_v60, %v4538_v28  ;;  %v17870_v60 = vld [vmem:[#allocation8_spill] sm:$0xff] }
 0x4fb   : > { %17865 = vst [vmem:[#allocation4_spill] sm:$0xff] %v15474_v27 }
 0x4fc   : > { %v4101_v21 = vpop.f32.mrb[8].mxu0  ;;  %v4997_v30 = vpop.f32.mrb[8].mxu1 }
 0x4fd   : > { %v4379_v4 = vadd.f32 %v4101_v21, %v17866_v15  ;;  %v11968_v24 = vpop.f32.mrb[9].mxu0  ;;  %v12182_v44 = vpop.f32.mrb[9].mxu1  ;;  %v3654_v21 = vld [vmem:[%s13215_s24 + $0x35f] sm:$0x3f] }
 0x4fe   : > { %v4104_v56 = vpop.f32.mrb[10].mxu0  ;;  %v5000_v12 = vpop.f32.mrb[10].mxu1  ;;  %v4593_v24 = vpack.c.bf16 %v4540_v39, %v4540_v39  ;;  %v6218_v39 = vld [vmem:[%s13215_s24 + $0x3d] sm:$0xff] }
 0x4ff   : > { %v4380_v52 = vadd.f32 %v4104_v56, %v17867_v2  ;;  %v15488_v38 = vadd.f32 %v4997_v30, %v4379_v4  ;;  %v11969_v14 = vpop.f32.mrb[11].mxu0  ;;  %v12183_v27 = vpop.f32.mrb[11].mxu1  ;;  %v3707_v4 = vpack.c.bf16 %v3654_v21, %v3654_v21  ;;  %v5333_v21 = vld [vmem:[%s13215_s24 + $0x44] sm:$0xff] }
 0x501   : > { %17868 = vst [vmem:[#allocation5_spill] sm:$0xff] %v15488_v38  ;;  %v15490_v63 = vadd.f32 %v5000_v12, %v4380_v52  ;;  %12075 = vmatmul.mubr.msk.bf16.gmra.mrb[116].mxu0 %vm528_vm3, %v3706_v35  ;;  %12289 = vmatmul.mubr.msk.bf16.gmra.mrb[116].mxu1 %vm528_vm3, %v4592_v37  ;;  %v17871_v37 = vld [vmem:[#allocation9_spill] sm:$0xff] }
 0x502   : > { %12078 = vmatprep.mubr.msk.bf16.mxu0 %vm13158_vm2, %v17672_v57  ;;  %12292 = vmatprep.mubr.msk.bf16.mxu1 %vm13158_vm2, %v17672_v57 }
 0x503   : > { %17869 = vst [vmem:[#allocation6_spill] sm:$0xff] %v15490_v63 }
 0x504   : > { %v4109_v46 = vpop.f32.mrb[12].mxu0  ;;  %v5005_v28 = vpop.f32.mrb[12].mxu1 }
 0x505   : > { %v4381_v30 = vadd.f32 %v4109_v46, %v17870_v60  ;;  %v11972_v27 = vpop.f32.mrb[13].mxu0  ;;  %v12186_v15 = vpop.f32.mrb[13].mxu1  ;;  %v5332_v46 = vld [vmem:[%s13215_s24 + $0x3c] sm:$0xff]  ;;  %v6219_v60 = vld [vmem:[%s13215_s24 + $0x45] sm:$0xff] }
 0x506   : > { %v4112_v44 = vpop.f32.mrb[14].mxu0  ;;  %v5008_v35 = vpop.f32.mrb[14].mxu1  ;;  %v17874_v27 = vld [vmem:[#allocation10_spill] sm:$0xff] }
 0x507   : > { %v4382_v56 = vadd.f32 %v4112_v44, %v17871_v37  ;;  %v15502_v12 = vadd.f32 %v5005_v28, %v4381_v30  ;;  %v11973_v2 = vpop.f32.mrb[15].mxu0  ;;  %v12187_v52 = vpop.f32.mrb[15].mxu1 }
 0x508   : > { %v17875_v2 = vld [vmem:[#allocation11_spill] sm:$0xff] }
 0x509   : > { %17872 = vst [vmem:[#allocation7_spill] sm:$0xff] %v15502_v12  ;;  %v15504_v14 = vadd.f32 %v5008_v35, %v4382_v56  ;;  %12079 = vmatmul.mubr.msk.bf16.gmra.mrb[120].mxu0 %vm528_vm3, %v3707_v4  ;;  %12293 = vmatmul.mubr.msk.bf16.gmra.mrb[120].mxu1 %vm528_vm3, %v4593_v24  ;;  %v5437_v24 = vpack.c.bf16 %v5333_v21, %v5332_v46  ;;  %v5335_v46 = vld [vmem:[%s13215_s24 + $0x54] sm:$0xff] }
 0x50a   : > { %12298 = vmatprep.mubr.msk.bf16.mxu0 %vm13158_vm2, %v17672_v57  ;;  %12512 = vmatprep.mubr.msk.bf16.mxu1 %vm13158_vm2, %v17672_v57  ;;  %v6323_v35 = vpack.c.bf16 %v6219_v60, %v6218_v39  ;;  %v6220_v21 = vld [vmem:[%s13215_s24 + $0x4d] sm:$0xff]  ;;  %v6221_v39 = vld [vmem:[%s13215_s24 + $0x55] sm:$0xff] }
 0x50b   : > { %17873 = vst [vmem:[#allocation8_spill] sm:$0xff] %v15504_v14 }
 0x50c   : > { %v4117_v28 = vpop.f32.mrb[16].mxu0  ;;  %v5013_v30 = vpop.f32.mrb[16].mxu1 }
 0x50d   : > { %v4383_v15 = vadd.f32 %v4117_v28, %v17874_v27  ;;  %v11976_v44 = vpop.f32.mrb[17].mxu0  ;;  %v12190_v4 = vpop.f32.mrb[17].mxu1  ;;  %v5334_v28 = vld [vmem:[%s13215_s24 + $0x4c] sm:$0xff] }
 0x50e   : > { %v4120_v37 = vpop.f32.mrb[18].mxu0  ;;  %v5016_v56 = vpop.f32.mrb[18].mxu1  ;;  %v5438_v44 = vpack.c.bf16 %v5335_v46, %v5334_v28  ;;  %v6324_v4 = vpack.c.bf16 %v6221_v39, %v6220_v21  ;;  %v5337_v28 = vld [vmem:[%s13215_s24 + $0x64] sm:$0xff] }
 0x50f   : > { %v4384_v52 = vadd.f32 %v4120_v37, %v17875_v2  ;;  %v15518_v14 = vadd.f32 %v5013_v30, %v4383_v15  ;;  %v11977_v12 = vpop.f32.mrb[19].mxu0  ;;  %v12191_v63 = vpop.f32.mrb[19].mxu1  ;;  %v17879_v37 = vld [vmem:[#allocation13_spill] sm:$0xff]  ;;  %v6223_v21 = vld [vmem:[%s13215_s24 + $0x65] sm:$0xff] }
 0x510   : > { %v17878_v63 = vld [vmem:[#allocation12_spill] sm:$0xff]  ;;  %v6222_v46 = vld [vmem:[%s13215_s24 + $0x5d] sm:$0xff] }
 0x511   : > { %17876 = vst [vmem:[#allocation9_spill] sm:$0xff] %v15518_v14  ;;  %v15520_v38 = vadd.f32 %v5016_v56, %v4384_v52  ;;  %12299 = vmatmul.mubr.msk.bf16.vlgmr.msra.gmra.mrb[124].mxu0 %vm528_vm3, %v5437_v24  ;;  %12513 = vmatmul.mubr.msk.bf16.vlgmr.msra.gmra.mrb[124].mxu1 %vm528_vm3, %v6323_v35 }
 0x512   : > { %12302 = vmatprep.mubr.msk.bf16.mxu0 %vm13158_vm2, %v17672_v57  ;;  %12516 = vmatprep.mubr.msk.bf16.mxu1 %vm13158_vm2, %v17672_v57 }
 0x513   : > { %17877 = vst [vmem:[#allocation10_spill] sm:$0xff] %v15520_v38 }
 0x514   : > { %v4125_v60 = vpop.f32.mrb[20].mxu0  ;;  %v5021_v12 = vpop.f32.mrb[20].mxu1 }
 0x515   : > { %v4385_v30 = vadd.f32 %v4125_v60, %v17878_v63  ;;  %v11980_v27 = vpop.f32.mrb[21].mxu0  ;;  %v12194_v15 = vpop.f32.mrb[21].mxu1  ;;  %v5336_v60 = vld [vmem:[%s13215_s24 + $0x5c] sm:$0xff] }
 0x516   : > { %v4128_v24 = vpop.f32.mrb[22].mxu0  ;;  %v5024_v35 = vpop.f32.mrb[22].mxu1  ;;  %v5439_v15 = vpack.c.bf16 %v5337_v28, %v5336_v60  ;;  %v5339_v60 = vld [vmem:[%s13215_s24 + $0x74] sm:$0xff] }
 0x517   : > { %v4386_v56 = vadd.f32 %v4128_v24, %v17879_v37  ;;  %v15534_v2 = vadd.f32 %v5021_v12, %v4385_v30  ;;  %v11981_v52 = vpop.f32.mrb[23].mxu0  ;;  %v12195_v38 = vpop.f32.mrb[23].mxu1  ;;  %v6224_v28 = vld [vmem:[%s13215_s24 + $0x6d] sm:$0xff] }
 0x518   : > { %v17882_v38 = vld [vmem:[#allocation14_spill] sm:$0xff] }
 0x519   : > { %17880 = vst [vmem:[#allocation11_spill] sm:$0xff] %v15534_v2  ;;  %v15536_v14 = vadd.f32 %v5024_v35, %v4386_v56  ;;  %12303 = vmatmul.mubr.msk.bf16.gmra.mrb[128].mxu0 %vm528_vm3, %v5438_v44  ;;  %12517 = vmatmul.mubr.msk.bf16.gmra.mrb[128].mxu1 %vm528_vm3, %v6324_v4  ;;  %v6325_v44 = vpack.c.bf16 %v6223_v21, %v6222_v46  ;;  %v17883_v35 = vld [vmem:[#allocation15_spill] sm:$0xff]  ;;  %v6225_v46 = vld [vmem:[%s13215_s24 + $0x75] sm:$0xff] }
 0x51a   : > { %12306 = vmatprep.mubr.msk.bf16.mxu0 %vm13158_vm2, %v17672_v57  ;;  %12520 = vmatprep.mubr.msk.bf16.mxu1 %vm13158_vm2, %v17672_v57 }
 0x51b   : > { %17881 = vst [vmem:[#allocation12_spill] sm:$0xff] %v15536_v14 }
 0x51c   : > { %v4133_v39 = vpop.f32.mrb[24].mxu0  ;;  %v5029_v12 = vpop.f32.mrb[24].mxu1 }
 0x51d   : > { %v4387_v63 = vadd.f32 %v4133_v39, %v17882_v38  ;;  %v11984_v30 = vpop.f32.mrb[25].mxu0  ;;  %v12198_v27 = vpop.f32.mrb[25].mxu1  ;;  %v5338_v39 = vld [vmem:[%s13215_s24 + $0x6c] sm:$0xff] }
 0x51e   : > { %v4136_v4 = vpop.f32.mrb[26].mxu0  ;;  %v5032_v24 = vpop.f32.mrb[26].mxu1  ;;  %v5440_v27 = vpack.c.bf16 %v5339_v60, %v5338_v39  ;;  %v5341_v39 = vld [vmem:[%s13215_s24 + $0x84] sm:$0xff] }
 0x51f   : > { %v4388_v37 = vadd.f32 %v4136_v4, %v17883_v35  ;;  %v15550_v56 = vadd.f32 %v5029_v12, %v4387_v63  ;;  %v11985_v52 = vpop.f32.mrb[27].mxu0  ;;  %v12199_v14 = vpop.f32.mrb[27].mxu1  ;;  %v6226_v60 = vld [vmem:[%s13215_s24 + $0x7d] sm:$0xff] }
 0x520   : > { %v17886_v14 = vld [vmem:[#allocation16_spill] sm:$0xff] }
 0x521   : > { %17884 = vst [vmem:[#allocation13_spill] sm:$0xff] %v15550_v56  ;;  %v15552_v2 = vadd.f32 %v5032_v24, %v4388_v37  ;;  %12307 = vmatmul.mubr.msk.bf16.gmra.mrb[132].mxu0 %vm528_vm3, %v5439_v15  ;;  %12521 = vmatmul.mubr.msk.bf16.gmra.mrb[132].mxu1 %vm528_vm3, %v6325_v44  ;;  %v6326_v15 = vpack.c.bf16 %v6225_v46, %v6224_v28  ;;  %v17887_v24 = vld [vmem:[#allocation17_spill] sm:$0xff]  ;;  %v6227_v28 = vld [vmem:[%s13215_s24 + $0x85] sm:$0xff] }
 0x522   : > { %12310 = vmatprep.mubr.msk.bf16.mxu0 %vm13158_vm2, %v17672_v57  ;;  %12524 = vmatprep.mubr.msk.bf16.mxu1 %vm13158_vm2, %v17672_v57 }
 0x523   : > { %17885 = vst [vmem:[#allocation14_spill] sm:$0xff] %v15552_v2 }
 0x524   : > { %v4141_v21 = vpop.f32.mrb[28].mxu0  ;;  %v5037_v12 = vpop.f32.mrb[28].mxu1 }
 0x525   : > { %v4389_v38 = vadd.f32 %v4141_v21, %v17886_v14  ;;  %v11988_v63 = vpop.f32.mrb[29].mxu0  ;;  %v12202_v30 = vpop.f32.mrb[29].mxu1  ;;  %v5340_v21 = vld [vmem:[%s13215_s24 + $0x7c] sm:$0xff] }
 0x526   : > { %v4144_v44 = vpop.f32.mrb[30].mxu0  ;;  %v5040_v4 = vpop.f32.mrb[30].mxu1  ;;  %v5441_v30 = vpack.c.bf16 %v5341_v39, %v5340_v21  ;;  %v5343_v21 = vld [vmem:[%s13215_s24 + $0x94] sm:$0xff] }
 0x527   : > { %v4390_v35 = vadd.f32 %v4144_v44, %v17887_v24  ;;  %v15566_v37 = vadd.f32 %v5037_v12, %v4389_v38  ;;  %v11989_v52 = vpop.f32.mrb[31].mxu0  ;;  %v12203_v2 = vpop.f32.mrb[31].mxu1  ;;  %v6228_v39 = vld [vmem:[%s13215_s24 + $0x8d] sm:$0xff] }
 0x528   : > { %v17890_v2 = vld [vmem:[#allocation18_spill] sm:$0xff] }
 0x529   : > { %17888 = vst [vmem:[#allocation15_spill] sm:$0xff] %v15566_v37  ;;  %v15568_v56 = vadd.f32 %v5040_v4, %v4390_v35  ;;  %12311 = vmatmul.mubr.msk.bf16.gmra.mrb[136].mxu0 %vm528_vm3, %v5440_v27  ;;  %12525 = vmatmul.mubr.msk.bf16.gmra.mrb[136].mxu1 %vm528_vm3, %v6326_v15  ;;  %v6327_v27 = vpack.c.bf16 %v6227_v28, %v6226_v60  ;;  %v17891_v4 = vld [vmem:[#allocation19_spill] sm:$0xff]  ;;  %v6229_v60 = vld [vmem:[%s13215_s24 + $0x95] sm:$0xff] }
 0x52a   : > { %12314 = vmatprep.mubr.msk.bf16.mxu0 %vm13158_vm2, %v17672_v57  ;;  %12528 = vmatprep.mubr.msk.bf16.mxu1 %vm13158_vm2, %v17672_v57 }
 0x52b   : > { %17889 = vst [vmem:[#allocation16_spill] sm:$0xff] %v15568_v56 }
 0x52c   : > { %v4149_v46 = vpop.f32.mrb[32].mxu0  ;;  %v5045_v12 = vpop.f32.mrb[32].mxu1 }
 0x52d   : > { %v4391_v14 = vadd.f32 %v4149_v46, %v17890_v2  ;;  %v11992_v38 = vpop.f32.mrb[33].mxu0  ;;  %v12206_v63 = vpop.f32.mrb[33].mxu1  ;;  %v5342_v46 = vld [vmem:[%s13215_s24 + $0x8c] sm:$0xff] }
 0x52e   : > { %v4152_v15 = vpop.f32.mrb[34].mxu0  ;;  %v5048_v44 = vpop.f32.mrb[34].mxu1  ;;  %v5442_v63 = vpack.c.bf16 %v5343_v21, %v5342_v46  ;;  %v5345_v46 = vld [vmem:[%s13215_s24 + $0xa4] sm:$0xff] }
 0x52f   : > { %v4392_v24 = vadd.f32 %v4152_v15, %v17891_v4  ;;  %v15582_v35 = vadd.f32 %v5045_v12, %v4391_v14  ;;  %v11993_v52 = vpop.f32.mrb[35].mxu0  ;;  %v12207_v56 = vpop.f32.mrb[35].mxu1  ;;  %v6230_v21 = vld [vmem:[%s13215_s24 + $0x9d] sm:$0xff] }
 0x530   : > { %v17894_v56 = vld [vmem:[#allocation20_spill] sm:$0xff] }
 0x531   : > { %17892 = vst [vmem:[#allocation17_spill] sm:$0xff] %v15582_v35  ;;  %v15584_v37 = vadd.f32 %v5048_v44, %v4392_v24  ;;  %12315 = vmatmul.mubr.msk.bf16.gmra.mrb[140].mxu0 %vm528_vm3, %v5441_v30  ;;  %12529 = vmatmul.mubr.msk.bf16.gmra.mrb[140].mxu1 %vm528_vm3, %v6327_v27  ;;  %v6328_v30 = vpack.c.bf16 %v6229_v60, %v6228_v39  ;;  %v17895_v44 = vld [vmem:[#allocation21_spill] sm:$0xff]  ;;  %v6231_v39 = vld [vmem:[%s13215_s24 + $0xa5] sm:$0xff] }
 0x532   : > { %12318 = vmatprep.mubr.msk.bf16.mxu0 %vm13158_vm2, %v17672_v57  ;;  %12532 = vmatprep.mubr.msk.bf16.mxu1 %vm13158_vm2, %v17672_v57 }
 0x533   : > { %17893 = vst [vmem:[#allocation18_spill] sm:$0xff] %v15584_v37 }
 0x534   : > { %v4157_v28 = vpop.f32.mrb[36].mxu0  ;;  %v5053_v12 = vpop.f32.mrb[36].mxu1 }
 0x535   : > { %v4393_v2 = vadd.f32 %v4157_v28, %v17894_v56  ;;  %v11996_v14 = vpop.f32.mrb[37].mxu0  ;;  %v12210_v38 = vpop.f32.mrb[37].mxu1  ;;  %v5344_v28 = vld [vmem:[%s13215_s24 + $0x9c] sm:$0xff] }
 0x536   : > { %v4160_v27 = vpop.f32.mrb[38].mxu0  ;;  %v5056_v15 = vpop.f32.mrb[38].mxu1  ;;  %v5443_v38 = vpack.c.bf16 %v5345_v46, %v5344_v28  ;;  %v5347_v28 = vld [vmem:[%s13215_s24 + $0xb4] sm:$0xff] }
 0x537   : > { %v4394_v4 = vadd.f32 %v4160_v27, %v17895_v44  ;;  %v15598_v24 = vadd.f32 %v5053_v12, %v4393_v2  ;;  %v11997_v52 = vpop.f32.mrb[39].mxu0  ;;  %v12211_v37 = vpop.f32.mrb[39].mxu1  ;;  %v6232_v46 = vld [vmem:[%s13215_s24 + $0xad] sm:$0xff] }
 0x538   : > { %v17898_v37 = vld [vmem:[#allocation22_spill] sm:$0xff] }
 0x539   : > { %17896 = vst [vmem:[#allocation19_spill] sm:$0xff] %v15598_v24  ;;  %v15600_v35 = vadd.f32 %v5056_v15, %v4394_v4  ;;  %12319 = vmatmul.mubr.msk.bf16.gmra.mrb[144].mxu0 %vm528_vm3, %v5442_v63  ;;  %12533 = vmatmul.mubr.msk.bf16.gmra.mrb[144].mxu1 %vm528_vm3, %v6328_v30  ;;  %v6329_v63 = vpack.c.bf16 %v6231_v39, %v6230_v21  ;;  %v17899_v15 = vld [vmem:[#allocation23_spill] sm:$0xff]  ;;  %v6233_v21 = vld [vmem:[%s13215_s24 + $0xb5] sm:$0xff] }
 0x53a   : > { %12322 = vmatprep.mubr.msk.bf16.mxu0 %vm13158_vm2, %v17672_v57  ;;  %12536 = vmatprep.mubr.msk.bf16.mxu1 %vm13158_vm2, %v17672_v57 }
 0x53b   : > { %17897 = vst [vmem:[#allocation20_spill] sm:$0xff] %v15600_v35 }
 0x53c   : > { %v4165_v60 = vpop.f32.mrb[40].mxu0  ;;  %v5061_v12 = vpop.f32.mrb[40].mxu1 }
 0x53d   : > { %v4395_v56 = vadd.f32 %v4165_v60, %v17898_v37  ;;  %v12000_v2 = vpop.f32.mrb[41].mxu0  ;;  %v12214_v14 = vpop.f32.mrb[41].mxu1  ;;  %v5346_v60 = vld [vmem:[%s13215_s24 + $0xac] sm:$0xff] }
 0x53e   : > { %v4168_v30 = vpop.f32.mrb[42].mxu0  ;;  %v5064_v27 = vpop.f32.mrb[42].mxu1  ;;  %v5444_v14 = vpack.c.bf16 %v5347_v28, %v5346_v60  ;;  %v5349_v60 = vld [vmem:[%s13215_s24 + $0xc4] sm:$0xff] }
 0x53f   : > { %v4396_v44 = vadd.f32 %v4168_v30, %v17899_v15  ;;  %v15614_v4 = vadd.f32 %v5061_v12, %v4395_v56  ;;  %v12001_v52 = vpop.f32.mrb[43].mxu0  ;;  %v12215_v35 = vpop.f32.mrb[43].mxu1  ;;  %v6234_v28 = vld [vmem:[%s13215_s24 + $0xbd] sm:$0xff] }
 0x540   : > { %v17902_v35 = vld [vmem:[#allocation24_spill] sm:$0xff] }
 0x541   : > { %17900 = vst [vmem:[#allocation21_spill] sm:$0xff] %v15614_v4  ;;  %v15616_v24 = vadd.f32 %v5064_v27, %v4396_v44  ;;  %12323 = vmatmul.mubr.msk.bf16.gmra.mrb[148].mxu0 %vm528_vm3, %v5443_v38  ;;  %12537 = vmatmul.mubr.msk.bf16.gmra.mrb[148].mxu1 %vm528_vm3, %v6329_v63  ;;  %v6330_v38 = vpack.c.bf16 %v6233_v21, %v6232_v46  ;;  %v17903_v27 = vld [vmem:[#allocation25_spill] sm:$0xff]  ;;  %v6235_v46 = vld [vmem:[%s13215_s24 + $0xc5] sm:$0xff] }
 0x542   : > { %12326 = vmatprep.mubr.msk.bf16.mxu0 %vm13158_vm2, %v17672_v57  ;;  %12540 = vmatprep.mubr.msk.bf16.mxu1 %vm13158_vm2, %v17672_v57 }
 0x543   : > { %17901 = vst [vmem:[#allocation22_spill] sm:$0xff] %v15616_v24 }
 0x544   : > { %v4173_v39 = vpop.f32.mrb[44].mxu0  ;;  %v5069_v12 = vpop.f32.mrb[44].mxu1 }
 0x545   : > { %v4397_v37 = vadd.f32 %v4173_v39, %v17902_v35  ;;  %v12004_v56 = vpop.f32.mrb[45].mxu0  ;;  %v12218_v2 = vpop.f32.mrb[45].mxu1  ;;  %v5348_v39 = vld [vmem:[%s13215_s24 + $0xbc] sm:$0xff] }
 0x546   : > { %v4176_v63 = vpop.f32.mrb[46].mxu0  ;;  %v5072_v30 = vpop.f32.mrb[46].mxu1  ;;  %v5445_v2 = vpack.c.bf16 %v5349_v60, %v5348_v39  ;;  %v5351_v39 = vld [vmem:[%s13215_s24 + $0xd4] sm:$0xff] }
 0x547   : > { %v4398_v15 = vadd.f32 %v4176_v63, %v17903_v27  ;;  %v15630_v44 = vadd.f32 %v5069_v12, %v4397_v37  ;;  %v12005_v52 = vpop.f32.mrb[47].mxu0  ;;  %v12219_v24 = vpop.f32.mrb[47].mxu1  ;;  %v6236_v60 = vld [vmem:[%s13215_s24 + $0xcd] sm:$0xff] }
 0x548   : > { %v17906_v24 = vld [vmem:[#allocation26_spill] sm:$0xff] }
 0x549   : > { %17904 = vst [vmem:[#allocation23_spill] sm:$0xff] %v15630_v44  ;;  %v15632_v4 = vadd.f32 %v5072_v30, %v4398_v15  ;;  %12327 = vmatmul.mubr.msk.bf16.gmra.mrb[152].mxu0 %vm528_vm3, %v5444_v14  ;;  %12541 = vmatmul.mubr.msk.bf16.gmra.mrb[152].mxu1 %vm528_vm3, %v6330_v38  ;;  %v6331_v14 = vpack.c.bf16 %v6235_v46, %v6234_v28  ;;  %v17907_v30 = vld [vmem:[#allocation27_spill] sm:$0xff]  ;;  %v6237_v28 = vld [vmem:[%s13215_s24 + $0xd5] sm:$0xff] }
 0x54a   : > { %12330 = vmatprep.mubr.msk.bf16.mxu0 %vm13158_vm2, %v17672_v57  ;;  %12544 = vmatprep.mubr.msk.bf16.mxu1 %vm13158_vm2, %v17672_v57 }
 0x54b   : > { %17905 = vst [vmem:[#allocation24_spill] sm:$0xff] %v15632_v4 }
 0x54c   : > { %v4181_v21 = vpop.f32.mrb[48].mxu0  ;;  %v5077_v12 = vpop.f32.mrb[48].mxu1 }
 0x54d   : > { %v4399_v35 = vadd.f32 %v4181_v21, %v17906_v24  ;;  %v12008_v37 = vpop.f32.mrb[49].mxu0  ;;  %v12222_v56 = vpop.f32.mrb[49].mxu1  ;;  %v5350_v21 = vld [vmem:[%s13215_s24 + $0xcc] sm:$0xff] }
 0x54e   : > { %v4184_v38 = vpop.f32.mrb[50].mxu0  ;;  %v5080_v63 = vpop.f32.mrb[50].mxu1  ;;  %v5446_v56 = vpack.c.bf16 %v5351_v39, %v5350_v21  ;;  %v5353_v21 = vld [vmem:[%s13215_s24 + $0xe4] sm:$0xff] }
 0x54f   : > { %v4400_v27 = vadd.f32 %v4184_v38, %v17907_v30  ;;  %v15646_v15 = vadd.f32 %v5077_v12, %v4399_v35  ;;  %v12009_v52 = vpop.f32.mrb[51].mxu0  ;;  %v12223_v4 = vpop.f32.mrb[51].mxu1  ;;  %v6238_v39 = vld [vmem:[%s13215_s24 + $0xdd] sm:$0xff] }
 0x550   : > { %v17910_v4 = vld [vmem:[#allocation28_spill] sm:$0xff] }
 0x551   : > { %17908 = vst [vmem:[#allocation25_spill] sm:$0xff] %v15646_v15  ;;  %v15648_v44 = vadd.f32 %v5080_v63, %v4400_v27  ;;  %12331 = vmatmul.mubr.msk.bf16.gmra.mrb[156].mxu0 %vm528_vm3, %v5445_v2  ;;  %12545 = vmatmul.mubr.msk.bf16.gmra.mrb[156].mxu1 %vm528_vm3, %v6331_v14  ;;  %v6332_v2 = vpack.c.bf16 %v6237_v28, %v6236_v60  ;;  %v17911_v63 = vld [vmem:[#allocation29_spill] sm:$0xff]  ;;  %v6239_v60 = vld [vmem:[%s13215_s24 + $0xe5] sm:$0xff] }
 0x552   : > { %12334 = vmatprep.mubr.msk.bf16.mxu0 %vm13158_vm2, %v17672_v57  ;;  %12548 = vmatprep.mubr.msk.bf16.mxu1 %vm13158_vm2, %v17672_v57 }
 0x553   : > { %17909 = vst [vmem:[#allocation26_spill] sm:$0xff] %v15648_v44 }
 0x554   : > { %v4189_v46 = vpop.f32.mrb[52].mxu0  ;;  %v5085_v12 = vpop.f32.mrb[52].mxu1 }
 0x555   : > { %v4401_v24 = vadd.f32 %v4189_v46, %v17910_v4  ;;  %v12012_v35 = vpop.f32.mrb[53].mxu0  ;;  %v12226_v37 = vpop.f32.mrb[53].mxu1  ;;  %v5352_v46 = vld [vmem:[%s13215_s24 + $0xdc] sm:$0xff] }
 0x556   : > { %v4192_v14 = vpop.f32.mrb[54].mxu0  ;;  %v5088_v38 = vpop.f32.mrb[54].mxu1  ;;  %v5447_v37 = vpack.c.bf16 %v5353_v21, %v5352_v46  ;;  %v5355_v46 = vld [vmem:[%s13215_s24 + $0xf4] sm:$0xff] }
 0x557   : > { %v4402_v30 = vadd.f32 %v4192_v14, %v17911_v63  ;;  %v15662_v27 = vadd.f32 %v5085_v12, %v4401_v24  ;;  %v12013_v52 = vpop.f32.mrb[55].mxu0  ;;  %v12227_v44 = vpop.f32.mrb[55].mxu1  ;;  %v6240_v21 = vld [vmem:[%s13215_s24 + $0xed] sm:$0xff] }
 0x558   : > { %v17914_v44 = vld [vmem:[#allocation30_spill] sm:$0xff] }
 0x559   : > { %17912 = vst [vmem:[#allocation27_spill] sm:$0xff] %v15662_v27  ;;  %v15664_v15 = vadd.f32 %v5088_v38, %v4402_v30  ;;  %12335 = vmatmul.mubr.msk.bf16.gmra.mrb[160].mxu0 %vm528_vm3, %v5446_v56  ;;  %12549 = vmatmul.mubr.msk.bf16.gmra.mrb[160].mxu1 %vm528_vm3, %v6332_v2  ;;  %v6333_v56 = vpack.c.bf16 %v6239_v60, %v6238_v39  ;;  %v17915_v38 = vld [vmem:[#allocation31_spill] sm:$0xff]  ;;  %v6241_v39 = vld [vmem:[%s13215_s24 + $0xf5] sm:$0xff] }
 0x55a   : > { %12338 = vmatprep.mubr.msk.bf16.mxu0 %vm13158_vm2, %v17672_v57  ;;  %12552 = vmatprep.mubr.msk.bf16.mxu1 %vm13158_vm2, %v17672_v57 }
 0x55b   : > { %17913 = vst [vmem:[#allocation28_spill] sm:$0xff] %v15664_v15 }
 0x55c   : > { %v4197_v28 = vpop.f32.mrb[56].mxu0  ;;  %v5093_v12 = vpop.f32.mrb[56].mxu1 }
 0x55d   : > { %v4403_v4 = vadd.f32 %v4197_v28, %v17914_v44  ;;  %v12016_v24 = vpop.f32.mrb[57].mxu0  ;;  %v12230_v35 = vpop.f32.mrb[57].mxu1  ;;  %v5354_v28 = vld [vmem:[%s13215_s24 + $0xec] sm:$0xff] }
 0x55e   : > { %v4200_v2 = vpop.f32.mrb[58].mxu0  ;;  %v5096_v14 = vpop.f32.mrb[58].mxu1  ;;  %v5448_v35 = vpack.c.bf16 %v5355_v46, %v5354_v28  ;;  %v5357_v28 = vld [vmem:[%s13215_s24 + $0x104] sm:$0xff] }
 0x55f   : > { %v4404_v63 = vadd.f32 %v4200_v2, %v17915_v38  ;;  %v15678_v30 = vadd.f32 %v5093_v12, %v4403_v4  ;;  %v12017_v52 = vpop.f32.mrb[59].mxu0  ;;  %v12231_v15 = vpop.f32.mrb[59].mxu1  ;;  %v6242_v46 = vld [vmem:[%s13215_s24 + $0xfd] sm:$0xff] }
 0x560   : > { %v17918_v15 = vld [vmem:[#allocation32_spill] sm:$0xff] }
 0x561   : > { %17916 = vst [vmem:[#allocation29_spill] sm:$0xff] %v15678_v30  ;;  %v15680_v27 = vadd.f32 %v5096_v14, %v4404_v63  ;;  %12339 = vmatmul.mubr.msk.bf16.gmra.mrb[164].mxu0 %vm528_vm3, %v5447_v37  ;;  %12553 = vmatmul.mubr.msk.bf16.gmra.mrb[164].mxu1 %vm528_vm3, %v6333_v56  ;;  %v6334_v37 = vpack.c.bf16 %v6241_v39, %v6240_v21  ;;  %v17919_v14 = vld [vmem:[#allocation33_spill] sm:$0xff]  ;;  %v6243_v21 = vld [vmem:[%s13215_s24 + $0x105] sm:$0xff] }
 0x562   : > { %12342 = vmatprep.mubr.msk.bf16.mxu0 %vm13158_vm2, %v17672_v57  ;;  %12556 = vmatprep.mubr.msk.bf16.mxu1 %vm13158_vm2, %v17672_v57 }
 0x563   : > { %17917 = vst [vmem:[#allocation30_spill] sm:$0xff] %v15680_v27 }
 0x564   : > { %v4205_v60 = vpop.f32.mrb[60].mxu0  ;;  %v5101_v12 = vpop.f32.mrb[60].mxu1 }
 0x565   : > { %v4405_v44 = vadd.f32 %v4205_v60, %v17918_v15  ;;  %v12020_v4 = vpop.f32.mrb[61].mxu0  ;;  %v12234_v24 = vpop.f32.mrb[61].mxu1  ;;  %v5356_v60 = vld [vmem:[%s13215_s24 + $0xfc] sm:$0xff] }
 0x566   : > { %v4208_v56 = vpop.f32.mrb[62].mxu0  ;;  %v5104_v2 = vpop.f32.mrb[62].mxu1  ;;  %v5449_v24 = vpack.c.bf16 %v5357_v28, %v5356_v60  ;;  %v5359_v60 = vld [vmem:[%s13215_s24 + $0x114] sm:$0xff] }
 0x567   : > { %v4406_v38 = vadd.f32 %v4208_v56, %v17919_v14  ;;  %v15694_v63 = vadd.f32 %v5101_v12, %v4405_v44  ;;  %v12021_v52 = vpop.f32.mrb[63].mxu0  ;;  %v12235_v27 = vpop.f32.mrb[63].mxu1  ;;  %v6244_v28 = vld [vmem:[%s13215_s24 + $0x10d] sm:$0xff] }
 0x568   : > { %v17922_v27 = vld [vmem:[#allocation34_spill] sm:$0xff] }
 0x569   : > { %17920 = vst [vmem:[#allocation31_spill] sm:$0xff] %v15694_v63  ;;  %v15696_v30 = vadd.f32 %v5104_v2, %v4406_v38  ;;  %12343 = vmatmul.mubr.msk.bf16.gmra.mrb[168].mxu0 %vm528_vm3, %v5448_v35  ;;  %12557 = vmatmul.mubr.msk.bf16.gmra.mrb[168].mxu1 %vm528_vm3, %v6334_v37  ;;  %v6335_v35 = vpack.c.bf16 %v6243_v21, %v6242_v46  ;;  %v17923_v2 = vld [vmem:[#allocation35_spill] sm:$0xff]  ;;  %v6245_v46 = vld [vmem:[%s13215_s24 + $0x115] sm:$0xff] }
 0x56a   : > { %12346 = vmatprep.mubr.msk.bf16.mxu0 %vm13158_vm2, %v17672_v57  ;;  %12560 = vmatprep.mubr.msk.bf16.mxu1 %vm13158_vm2, %v17672_v57 }
 0x56b   : > { %17921 = vst [vmem:[#allocation32_spill] sm:$0xff] %v15696_v30 }
 0x56c   : > { %v4213_v39 = vpop.f32.mrb[64].mxu0  ;;  %v5109_v12 = vpop.f32.mrb[64].mxu1 }
 0x56d   : > { %v4407_v15 = vadd.f32 %v4213_v39, %v17922_v27  ;;  %v12024_v44 = vpop.f32.mrb[65].mxu0  ;;  %v12238_v4 = vpop.f32.mrb[65].mxu1  ;;  %v5358_v39 = vld [vmem:[%s13215_s24 + $0x10c] sm:$0xff] }
 0x56e   : > { %v4216_v37 = vpop.f32.mrb[66].mxu0  ;;  %v5112_v56 = vpop.f32.mrb[66].mxu1  ;;  %v5450_v4 = vpack.c.bf16 %v5359_v60, %v5358_v39  ;;  %v5361_v39 = vld [vmem:[%s13215_s24 + $0x124] sm:$0xff] }
 0x56f   : > { %v4408_v14 = vadd.f32 %v4216_v37, %v17923_v2  ;;  %v15710_v38 = vadd.f32 %v5109_v12, %v4407_v15  ;;  %v12025_v52 = vpop.f32.mrb[67].mxu0  ;;  %v12239_v30 = vpop.f32.mrb[67].mxu1  ;;  %v6246_v60 = vld [vmem:[%s13215_s24 + $0x11d] sm:$0xff] }
 0x570   : > { %v17926_v30 = vld [vmem:[#allocation36_spill] sm:$0xff] }
 0x571   : > { %17924 = vst [vmem:[#allocation33_spill] sm:$0xff] %v15710_v38  ;;  %v15712_v63 = vadd.f32 %v5112_v56, %v4408_v14  ;;  %12347 = vmatmul.mubr.msk.bf16.gmra.mrb[172].mxu0 %vm528_vm3, %v5449_v24  ;;  %12561 = vmatmul.mubr.msk.bf16.gmra.mrb[172].mxu1 %vm528_vm3, %v6335_v35  ;;  %v6336_v24 = vpack.c.bf16 %v6245_v46, %v6244_v28  ;;  %v17927_v56 = vld [vmem:[#allocation37_spill] sm:$0xff]  ;;  %v6247_v28 = vld [vmem:[%s13215_s24 + $0x125] sm:$0xff] }
 0x572   : > { %12350 = vmatprep.mubr.msk.bf16.mxu0 %vm13158_vm2, %v17672_v57  ;;  %12564 = vmatprep.mubr.msk.bf16.mxu1 %vm13158_vm2, %v17672_v57 }
 0x573   : > { %17925 = vst [vmem:[#allocation34_spill] sm:$0xff] %v15712_v63 }
 0x574   : > { %v4221_v21 = vpop.f32.mrb[68].mxu0  ;;  %v5117_v12 = vpop.f32.mrb[68].mxu1 }
 0x575   : > { %v4409_v27 = vadd.f32 %v4221_v21, %v17926_v30  ;;  %v12028_v15 = vpop.f32.mrb[69].mxu0  ;;  %v12242_v44 = vpop.f32.mrb[69].mxu1  ;;  %v5360_v21 = vld [vmem:[%s13215_s24 + $0x11c] sm:$0xff] }
 0x576   : > { %v4224_v35 = vpop.f32.mrb[70].mxu0  ;;  %v5120_v37 = vpop.f32.mrb[70].mxu1  ;;  %v5451_v44 = vpack.c.bf16 %v5361_v39, %v5360_v21  ;;  %v5363_v21 = vld [vmem:[%s13215_s24 + $0x134] sm:$0xff] }
 0x577   : > { %v4410_v2 = vadd.f32 %v4224_v35, %v17927_v56  ;;  %v15726_v14 = vadd.f32 %v5117_v12, %v4409_v27  ;;  %v12029_v52 = vpop.f32.mrb[71].mxu0  ;;  %v12243_v63 = vpop.f32.mrb[71].mxu1  ;;  %v6248_v39 = vld [vmem:[%s13215_s24 + $0x12d] sm:$0xff] }
 0x578   : > { %v17930_v63 = vld [vmem:[#allocation38_spill] sm:$0xff] }
 0x579   : > { %17928 = vst [vmem:[#allocation35_spill] sm:$0xff] %v15726_v14  ;;  %v15728_v38 = vadd.f32 %v5120_v37, %v4410_v2  ;;  %12351 = vmatmul.mubr.msk.bf16.gmra.mrb[176].mxu0 %vm528_vm3, %v5450_v4  ;;  %12565 = vmatmul.mubr.msk.bf16.gmra.mrb[176].mxu1 %vm528_vm3, %v6336_v24  ;;  %v6337_v4 = vpack.c.bf16 %v6247_v28, %v6246_v60  ;;  %v17931_v37 = vld [vmem:[#allocation39_spill] sm:$0xff]  ;;  %v6249_v60 = vld [vmem:[%s13215_s24 + $0x135] sm:$0xff] }
 0x57a   : > { %12354 = vmatprep.mubr.msk.bf16.mxu0 %vm13158_vm2, %v17672_v57  ;;  %12568 = vmatprep.mubr.msk.bf16.mxu1 %vm13158_vm2, %v17672_v57 }
 0x57b   : > { %17929 = vst [vmem:[#allocation36_spill] sm:$0xff] %v15728_v38 }
 0x57c   : > { %v4229_v46 = vpop.f32.mrb[72].mxu0  ;;  %v5125_v12 = vpop.f32.mrb[72].mxu1 }
 0x57d   : > { %v4411_v30 = vadd.f32 %v4229_v46, %v17930_v63  ;;  %v12032_v27 = vpop.f32.mrb[73].mxu0  ;;  %v12246_v15 = vpop.f32.mrb[73].mxu1  ;;  %v5362_v46 = vld [vmem:[%s13215_s24 + $0x12c] sm:$0xff] }
 0x57e   : > { %v4232_v24 = vpop.f32.mrb[74].mxu0  ;;  %v5128_v35 = vpop.f32.mrb[74].mxu1  ;;  %v5452_v15 = vpack.c.bf16 %v5363_v21, %v5362_v46  ;;  %v5365_v46 = vld [vmem:[%s13215_s24 + $0x144] sm:$0xff] }
 0x57f   : > { %v4412_v56 = vadd.f32 %v4232_v24, %v17931_v37  ;;  %v15742_v2 = vadd.f32 %v5125_v12, %v4411_v30  ;;  %v12033_v52 = vpop.f32.mrb[75].mxu0  ;;  %v12247_v38 = vpop.f32.mrb[75].mxu1  ;;  %v6250_v21 = vld [vmem:[%s13215_s24 + $0x13d] sm:$0xff] }
 0x580   : > { %v17934_v38 = vld [vmem:[#allocation40_spill] sm:$0xff] }
 0x581   : > { %17932 = vst [vmem:[#allocation37_spill] sm:$0xff] %v15742_v2  ;;  %v15744_v14 = vadd.f32 %v5128_v35, %v4412_v56  ;;  %12355 = vmatmul.mubr.msk.bf16.gmra.mrb[180].mxu0 %vm528_vm3, %v5451_v44  ;;  %12569 = vmatmul.mubr.msk.bf16.gmra.mrb[180].mxu1 %vm528_vm3, %v6337_v4  ;;  %v6338_v44 = vpack.c.bf16 %v6249_v60, %v6248_v39  ;;  %v17935_v35 = vld [vmem:[#allocation41_spill] sm:$0xff]  ;;  %v6251_v39 = vld [vmem:[%s13215_s24 + $0x145] sm:$0xff] }
 0x582   : > { %12358 = vmatprep.mubr.msk.bf16.mxu0 %vm13158_vm2, %v17672_v57  ;;  %12572 = vmatprep.mubr.msk.bf16.mxu1 %vm13158_vm2, %v17672_v57 }
 0x583   : > { %17933 = vst [vmem:[#allocation38_spill] sm:$0xff] %v15744_v14 }
 0x584   : > { %v4237_v28 = vpop.f32.mrb[76].mxu0  ;;  %v5133_v12 = vpop.f32.mrb[76].mxu1 }
 0x585   : > { %v4413_v63 = vadd.f32 %v4237_v28, %v17934_v38  ;;  %v12036_v30 = vpop.f32.mrb[77].mxu0  ;;  %v12250_v27 = vpop.f32.mrb[77].mxu1  ;;  %v5364_v28 = vld [vmem:[%s13215_s24 + $0x13c] sm:$0xff] }
 0x586   : > { %v4240_v4 = vpop.f32.mrb[78].mxu0  ;;  %v5136_v24 = vpop.f32.mrb[78].mxu1  ;;  %v5453_v27 = vpack.c.bf16 %v5365_v46, %v5364_v28  ;;  %v5367_v28 = vld [vmem:[%s13215_s24 + $0x154] sm:$0xff] }
 0x587   : > { %v4414_v37 = vadd.f32 %v4240_v4, %v17935_v35  ;;  %v15758_v56 = vadd.f32 %v5133_v12, %v4413_v63  ;;  %v12037_v52 = vpop.f32.mrb[79].mxu0  ;;  %v12251_v14 = vpop.f32.mrb[79].mxu1  ;;  %v6252_v46 = vld [vmem:[%s13215_s24 + $0x14d] sm:$0xff] }
 0x588   : > { %v17938_v14 = vld [vmem:[#allocation42_spill] sm:$0xff] }
 0x589   : > { %17936 = vst [vmem:[#allocation39_spill] sm:$0xff] %v15758_v56  ;;  %v15760_v2 = vadd.f32 %v5136_v24, %v4414_v37  ;;  %12359 = vmatmul.mubr.msk.bf16.gmra.mrb[184].mxu0 %vm528_vm3, %v5452_v15  ;;  %12573 = vmatmul.mubr.msk.bf16.gmra.mrb[184].mxu1 %vm528_vm3, %v6338_v44  ;;  %v6339_v15 = vpack.c.bf16 %v6251_v39, %v6250_v21  ;;  %v17939_v24 = vld [vmem:[#allocation43_spill] sm:$0xff]  ;;  %v6253_v21 = vld [vmem:[%s13215_s24 + $0x155] sm:$0xff] }
 0x58a   : > { %12362 = vmatprep.mubr.msk.bf16.mxu0 %vm13158_vm2, %v17672_v57  ;;  %12576 = vmatprep.mubr.msk.bf16.mxu1 %vm13158_vm2, %v17672_v57 }
 0x58b   : > { %17937 = vst [vmem:[#allocation40_spill] sm:$0xff] %v15760_v2 }
 0x58c   : > { %v4245_v60 = vpop.f32.mrb[80].mxu0  ;;  %v5141_v12 = vpop.f32.mrb[80].mxu1 }
 0x58d   : > { %v4415_v38 = vadd.f32 %v4245_v60, %v17938_v14  ;;  %v12040_v63 = vpop.f32.mrb[81].mxu0  ;;  %v12254_v30 = vpop.f32.mrb[81].mxu1  ;;  %v5366_v60 = vld [vmem:[%s13215_s24 + $0x14c] sm:$0xff] }
 0x58e   : > { %v4248_v44 = vpop.f32.mrb[82].mxu0  ;;  %v5144_v4 = vpop.f32.mrb[82].mxu1 }
 0x58f   : > { %v4416_v35 = vadd.f32 %v4248_v44, %v17939_v24  ;;  %v12041_v37 = vpop.f32.mrb[83].mxu0  ;;  %v12255_v52 = vpop.f32.mrb[83].mxu1  ;;  %v15774_v2 = vadd.f32 %v5141_v12, %v4415_v38  ;;  %v17942_v38 = vld [vmem:[#allocation44_spill] sm:$0xff]  ;;  %v6340_v44 = vpack.c.bf16 %v6253_v21, %v6252_v46  ;;  %v6255_v46 = vld [vmem:[%s13215_s24 + $0x165] sm:$0xff] }
 0x591   : > { %17940 = vst [vmem:[#allocation41_spill] sm:$0xff] %v15774_v2  ;;  %12363 = vmatmul.mubr.msk.bf16.gmra.mrb[188].mxu0 %vm528_vm3, %v5453_v27  ;;  %12577 = vmatmul.mubr.msk.bf16.gmra.mrb[188].mxu1 %vm528_vm3, %v6339_v15  ;;  %v15779_v14 = vadd.f32 %v5144_v4, %v4416_v35  ;;  %v5454_v15 = vpack.c.bf16 %v5367_v28, %v5366_v60  ;;  %v17943_v35 = vld [vmem:[#allocation45_spill] sm:$0xff]  ;;  %v5369_v60 = vld [vmem:[%s13215_s24 + $0x164] sm:$0xff] }
 0x592   : > { %12366 = vmatprep.mubr.msk.bf16.mxu0 %vm13158_vm2, %v17672_v57  ;;  %12580 = vmatprep.mubr.msk.bf16.mxu1 %vm13158_vm2, %v17672_v57  ;;  %v6254_v28 = vld [vmem:[%s13215_s24 + $0x15d] sm:$0xff] }
 0x593   : > { %17941 = vst [vmem:[#allocation42_spill] sm:$0xff] %v15779_v14 }
 0x594   : > { %v4253_v39 = vpop.f32.mrb[84].mxu0  ;;  %v5149_v12 = vpop.f32.mrb[84].mxu1 }
 0x595   : > { %v4417_v63 = vadd.f32 %v4253_v39, %v17942_v38  ;;  %v12044_v30 = vpop.f32.mrb[85].mxu0  ;;  %v12258_v27 = vpop.f32.mrb[85].mxu1  ;;  %v5368_v39 = vld [vmem:[%s13215_s24 + $0x15c] sm:$0xff] }
 0x596   : > { %v4256_v4 = vpop.f32.mrb[86].mxu0  ;;  %v5152_v24 = vpop.f32.mrb[86].mxu1 }
 0x597   : > { %v4418_v37 = vadd.f32 %v4256_v4, %v17943_v35  ;;  %v12045_v52 = vpop.f32.mrb[87].mxu0  ;;  %v12259_v14 = vpop.f32.mrb[87].mxu1  ;;  %v15790_v2 = vadd.f32 %v5149_v12, %v4417_v63  ;;  %v17946_v12 = vld [vmem:[#allocation46_spill] sm:$0xff]  ;;  %v17947_v35 = vld [vmem:[#allocation47_spill] sm:$0xff] }
 0x599   : > { %17944 = vst [vmem:[#allocation43_spill] sm:$0xff] %v15790_v2  ;;  %12367 = vmatmul.mubr.msk.bf16.gmra.mrb[192].mxu0 %vm528_vm3, %v5454_v15  ;;  %12581 = vmatmul.mubr.msk.bf16.gmra.mrb[192].mxu1 %vm528_vm3, %v6340_v44  ;;  %v15795_v38 = vadd.f32 %v5152_v24, %v4418_v37  ;;  %v5455_v15 = vpack.c.bf16 %v5369_v60, %v5368_v39  ;;  %v5371_v39 = vld [vmem:[%s13215_s24 + $0x174] sm:$0xff] }
 0x59a   : > { %12370 = vmatprep.mubr.msk.bf16.mxu0 %vm13158_vm2, %v17672_v57  ;;  %12584 = vmatprep.mubr.msk.bf16.mxu1 %vm13158_vm2, %v17672_v57  ;;  %v6341_v44 = vpack.c.bf16 %v6255_v46, %v6254_v28  ;;  %v6256_v60 = vld [vmem:[%s13215_s24 + $0x16d] sm:$0xff]  ;;  %v6257_v28 = vld [vmem:[%s13215_s24 + $0x175] sm:$0xff] }
 0x59b   : > { %17945 = vst [vmem:[#allocation44_spill] sm:$0xff] %v15795_v38 }
 0x59c   : > { %v4261_v14 = vpop.f32.mrb[88].mxu0  ;;  %v5157_v21 = vpop.f32.mrb[88].mxu1 }
 0x59d   : > { %v4419_v63 = vadd.f32 %v4261_v14, %v17946_v12  ;;  %v12048_v30 = vpop.f32.mrb[89].mxu0  ;;  %v12262_v27 = vpop.f32.mrb[89].mxu1  ;;  %v5370_v14 = vld [vmem:[%s13215_s24 + $0x16c] sm:$0xff] }
 0x59e   : > { %v4264_v4 = vpop.f32.mrb[90].mxu0  ;;  %v5160_v24 = vpop.f32.mrb[90].mxu1 }
 0x59f   : > { %v4420_v37 = vadd.f32 %v4264_v4, %v17947_v35  ;;  %v12049_v52 = vpop.f32.mrb[91].mxu0  ;;  %v12263_v38 = vpop.f32.mrb[91].mxu1  ;;  %v15806_v2 = vadd.f32 %v5157_v21, %v4419_v63  ;;  %v17950_v21 = vld [vmem:[#allocation48_spill] sm:$0xff]  ;;  %v17951_v35 = vld [vmem:[#allocation49_spill] sm:$0xff] }
 0x5a1   : > { %17948 = vst [vmem:[#allocation45_spill] sm:$0xff] %v15806_v2  ;;  %12371 = vmatmul.mubr.msk.bf16.gmra.mrb[196].mxu0 %vm528_vm3, %v5455_v15  ;;  %12585 = vmatmul.mubr.msk.bf16.gmra.mrb[196].mxu1 %vm528_vm3, %v6341_v44  ;;  %v15811_v12 = vadd.f32 %v5160_v24, %v4420_v37  ;;  %v5456_v15 = vpack.c.bf16 %v5371_v39, %v5370_v14  ;;  %v5373_v14 = vld [vmem:[%s13215_s24 + $0x184] sm:$0xff] }
 0x5a2   : > { %12374 = vmatprep.mubr.msk.bf16.mxu0 %vm13158_vm2, %v17672_v57  ;;  %12588 = vmatprep.mubr.msk.bf16.mxu1 %vm13158_vm2, %v17672_v57  ;;  %v6342_v44 = vpack.c.bf16 %v6257_v28, %v6256_v60  ;;  %v6258_v39 = vld [vmem:[%s13215_s24 + $0x17d] sm:$0xff]  ;;  %v6259_v60 = vld [vmem:[%s13215_s24 + $0x185] sm:$0xff] }
 0x5a3   : > { %17949 = vst [vmem:[#allocation46_spill] sm:$0xff] %v15811_v12 }
 0x5a4   : > { %v4269_v38 = vpop.f32.mrb[92].mxu0  ;;  %v5165_v46 = vpop.f32.mrb[92].mxu1 }
 0x5a5   : > { %v4421_v63 = vadd.f32 %v4269_v38, %v17950_v21  ;;  %v12052_v30 = vpop.f32.mrb[93].mxu0  ;;  %v12266_v27 = vpop.f32.mrb[93].mxu1  ;;  %v5372_v38 = vld [vmem:[%s13215_s24 + $0x17c] sm:$0xff] }
 0x5a6   : > { %v4272_v4 = vpop.f32.mrb[94].mxu0  ;;  %v5168_v24 = vpop.f32.mrb[94].mxu1 }
 0x5a7   : > { %v4422_v37 = vadd.f32 %v4272_v4, %v17951_v35  ;;  %v12053_v52 = vpop.f32.mrb[95].mxu0  ;;  %v12267_v12 = vpop.f32.mrb[95].mxu1  ;;  %v15822_v2 = vadd.f32 %v5165_v46, %v4421_v63  ;;  %v17954_v46 = vld [vmem:[#allocation50_spill] sm:$0xff]  ;;  %v17955_v35 = vld [vmem:[#allocation51_spill] sm:$0xff] }
 0x5a9   : > { %17952 = vst [vmem:[#allocation47_spill] sm:$0xff] %v15822_v2  ;;  %12375 = vmatmul.mubr.msk.bf16.gmra.mrb[200].mxu0 %vm528_vm3, %v5456_v15  ;;  %12589 = vmatmul.mubr.msk.bf16.gmra.mrb[200].mxu1 %vm528_vm3, %v6342_v44  ;;  %v15827_v21 = vadd.f32 %v5168_v24, %v4422_v37  ;;  %v5457_v15 = vpack.c.bf16 %v5373_v14, %v5372_v38  ;;  %v5375_v38 = vld [vmem:[%s13215_s24 + $0x194] sm:$0xff] }
 0x5aa   : > { %12378 = vmatprep.mubr.msk.bf16.mxu0 %vm13158_vm2, %v17672_v57  ;;  %12592 = vmatprep.mubr.msk.bf16.mxu1 %vm13158_vm2, %v17672_v57  ;;  %v6343_v44 = vpack.c.bf16 %v6259_v60, %v6258_v39  ;;  %v6260_v14 = vld [vmem:[%s13215_s24 + $0x18d] sm:$0xff]  ;;  %v6261_v39 = vld [vmem:[%s13215_s24 + $0x195] sm:$0xff] }
 0x5ab   : > { %17953 = vst [vmem:[#allocation48_spill] sm:$0xff] %v15827_v21 }
 0x5ac   : > { %v4277_v12 = vpop.f32.mrb[96].mxu0  ;;  %v5173_v28 = vpop.f32.mrb[96].mxu1 }
 0x5ad   : > { %v4423_v63 = vadd.f32 %v4277_v12, %v17954_v46  ;;  %v12056_v30 = vpop.f32.mrb[97].mxu0  ;;  %v12270_v27 = vpop.f32.mrb[97].mxu1  ;;  %v5374_v12 = vld [vmem:[%s13215_s24 + $0x18c] sm:$0xff] }
 0x5ae   : > { %v4280_v4 = vpop.f32.mrb[98].mxu0  ;;  %v5176_v24 = vpop.f32.mrb[98].mxu1 }
 0x5af   : > { %v4424_v37 = vadd.f32 %v4280_v4, %v17955_v35  ;;  %v12057_v52 = vpop.f32.mrb[99].mxu0  ;;  %v12271_v21 = vpop.f32.mrb[99].mxu1  ;;  %v15838_v2 = vadd.f32 %v5173_v28, %v4423_v63  ;;  %v17958_v28 = vld [vmem:[#allocation52_spill] sm:$0xff]  ;;  %v17959_v35 = vld [vmem:[#allocation53_spill] sm:$0xff] }
 0x5b1   : > { %17956 = vst [vmem:[#allocation49_spill] sm:$0xff] %v15838_v2  ;;  %12379 = vmatmul.mubr.msk.bf16.gmra.mrb[204].mxu0 %vm528_vm3, %v5457_v15  ;;  %12593 = vmatmul.mubr.msk.bf16.gmra.mrb[204].mxu1 %vm528_vm3, %v6343_v44  ;;  %v15843_v46 = vadd.f32 %v5176_v24, %v4424_v37  ;;  %v5458_v15 = vpack.c.bf16 %v5375_v38, %v5374_v12  ;;  %v5377_v12 = vld [vmem:[%s13215_s24 + $0x1a4] sm:$0xff] }
 0x5b2   : > { %12382 = vmatprep.mubr.msk.bf16.mxu0 %vm13158_vm2, %v17672_v57  ;;  %12596 = vmatprep.mubr.msk.bf16.mxu1 %vm13158_vm2, %v17672_v57  ;;  %v6344_v44 = vpack.c.bf16 %v6261_v39, %v6260_v14  ;;  %v6262_v38 = vld [vmem:[%s13215_s24 + $0x19d] sm:$0xff]  ;;  %v6263_v14 = vld [vmem:[%s13215_s24 + $0x1a5] sm:$0xff] }
 0x5b3   : > { %17957 = vst [vmem:[#allocation50_spill] sm:$0xff] %v15843_v46 }
 0x5b4   : > { %v4285_v21 = vpop.f32.mrb[100].mxu0  ;;  %v5181_v60 = vpop.f32.mrb[100].mxu1 }
 0x5b5   : > { %v4425_v63 = vadd.f32 %v4285_v21, %v17958_v28  ;;  %v12060_v30 = vpop.f32.mrb[101].mxu0  ;;  %v12274_v27 = vpop.f32.mrb[101].mxu1  ;;  %v5376_v21 = vld [vmem:[%s13215_s24 + $0x19c] sm:$0xff] }
 0x5b6   : > { %v4288_v4 = vpop.f32.mrb[102].mxu0  ;;  %v5184_v24 = vpop.f32.mrb[102].mxu1 }
 0x5b7   : > { %v4426_v37 = vadd.f32 %v4288_v4, %v17959_v35  ;;  %v12061_v52 = vpop.f32.mrb[103].mxu0  ;;  %v12275_v46 = vpop.f32.mrb[103].mxu1  ;;  %v15854_v2 = vadd.f32 %v5181_v60, %v4425_v63  ;;  %v17962_v60 = vld [vmem:[#allocation54_spill] sm:$0xff]  ;;  %v17963_v35 = vld [vmem:[#allocation55_spill] sm:$0xff] }
 0x5b9   : > { %17960 = vst [vmem:[#allocation51_spill] sm:$0xff] %v15854_v2  ;;  %12383 = vmatmul.mubr.msk.bf16.gmra.mrb[208].mxu0 %vm528_vm3, %v5458_v15  ;;  %12597 = vmatmul.mubr.msk.bf16.gmra.mrb[208].mxu1 %vm528_vm3, %v6344_v44  ;;  %v15859_v28 = vadd.f32 %v5184_v24, %v4426_v37  ;;  %v5459_v15 = vpack.c.bf16 %v5377_v12, %v5376_v21  ;;  %v5379_v21 = vld [vmem:[%s13215_s24 + $0x1b4] sm:$0xff] }
 0x5ba   : > { %12386 = vmatprep.mubr.msk.bf16.mxu0 %vm13158_vm2, %v17672_v57  ;;  %12600 = vmatprep.mubr.msk.bf16.mxu1 %vm13158_vm2, %v17672_v57  ;;  %v6345_v44 = vpack.c.bf16 %v6263_v14, %v6262_v38  ;;  %v6264_v12 = vld [vmem:[%s13215_s24 + $0x1ad] sm:$0xff]  ;;  %v6265_v38 = vld [vmem:[%s13215_s24 + $0x1b5] sm:$0xff] }
 0x5bb   : > { %17961 = vst [vmem:[#allocation52_spill] sm:$0xff] %v15859_v28 }
 0x5bc   : > { %v4293_v46 = vpop.f32.mrb[104].mxu0  ;;  %v5189_v39 = vpop.f32.mrb[104].mxu1 }
 0x5bd   : > { %v4427_v63 = vadd.f32 %v4293_v46, %v17962_v60  ;;  %v12064_v30 = vpop.f32.mrb[105].mxu0  ;;  %v12278_v27 = vpop.f32.mrb[105].mxu1  ;;  %v5378_v46 = vld [vmem:[%s13215_s24 + $0x1ac] sm:$0xff] }
 0x5be   : > { %v4296_v4 = vpop.f32.mrb[106].mxu0  ;;  %v5192_v24 = vpop.f32.mrb[106].mxu1 }
 0x5bf   : > { %v4428_v37 = vadd.f32 %v4296_v4, %v17963_v35  ;;  %v12065_v52 = vpop.f32.mrb[107].mxu0  ;;  %v12279_v28 = vpop.f32.mrb[107].mxu1  ;;  %v15870_v2 = vadd.f32 %v5189_v39, %v4427_v63  ;;  %v17966_v39 = vld [vmem:[#allocation56_spill] sm:$0xff]  ;;  %v17967_v35 = vld [vmem:[#allocation57_spill] sm:$0xff] }
 0x5c1   : > { %17964 = vst [vmem:[#allocation53_spill] sm:$0xff] %v15870_v2  ;;  %12387 = vmatmul.mubr.msk.bf16.gmra.mrb[212].mxu0 %vm528_vm3, %v5459_v15  ;;  %12601 = vmatmul.mubr.msk.bf16.gmra.mrb[212].mxu1 %vm528_vm3, %v6345_v44  ;;  %v15875_v60 = vadd.f32 %v5192_v24, %v4428_v37  ;;  %v5460_v15 = vpack.c.bf16 %v5379_v21, %v5378_v46  ;;  %v5381_v46 = vld [vmem:[%s13215_s24 + $0x1c4] sm:$0xff] }
 0x5c2   : > { %12390 = vmatprep.mubr.msk.bf16.mxu0 %vm13158_vm2, %v17672_v57  ;;  %12604 = vmatprep.mubr.msk.bf16.mxu1 %vm13158_vm2, %v17672_v57  ;;  %v6346_v44 = vpack.c.bf16 %v6265_v38, %v6264_v12  ;;  %v6266_v21 = vld [vmem:[%s13215_s24 + $0x1bd] sm:$0xff]  ;;  %v6267_v12 = vld [vmem:[%s13215_s24 + $0x1c5] sm:$0xff] }
 0x5c3   : > { %17965 = vst [vmem:[#allocation54_spill] sm:$0xff] %v15875_v60 }
 0x5c4   : > { %v4301_v28 = vpop.f32.mrb[108].mxu0  ;;  %v5197_v14 = vpop.f32.mrb[108].mxu1 }
 0x5c5   : > { %v4429_v63 = vadd.f32 %v4301_v28, %v17966_v39  ;;  %v12068_v30 = vpop.f32.mrb[109].mxu0  ;;  %v12282_v27 = vpop.f32.mrb[109].mxu1  ;;  %v5380_v28 = vld [vmem:[%s13215_s24 + $0x1bc] sm:$0xff] }
 0x5c6   : > { %v4304_v4 = vpop.f32.mrb[110].mxu0  ;;  %v5200_v24 = vpop.f32.mrb[110].mxu1 }
 0x5c7   : > { %v4430_v37 = vadd.f32 %v4304_v4, %v17967_v35  ;;  %v12069_v52 = vpop.f32.mrb[111].mxu0  ;;  %v12283_v60 = vpop.f32.mrb[111].mxu1  ;;  %v15886_v2 = vadd.f32 %v5197_v14, %v4429_v63  ;;  %v17970_v14 = vld [vmem:[#allocation58_spill] sm:$0xff]  ;;  %v17971_v35 = vld [vmem:[#allocation59_spill] sm:$0xff] }
 0x5c9   : > { %17968 = vst [vmem:[#allocation55_spill] sm:$0xff] %v15886_v2  ;;  %12391 = vmatmul.mubr.msk.bf16.gmra.mrb[216].mxu0 %vm528_vm3, %v5460_v15  ;;  %12605 = vmatmul.mubr.msk.bf16.gmra.mrb[216].mxu1 %vm528_vm3, %v6346_v44  ;;  %v15891_v39 = vadd.f32 %v5200_v24, %v4430_v37  ;;  %v5461_v15 = vpack.c.bf16 %v5381_v46, %v5380_v28  ;;  %v7269_v2 = vld [vmem:[%s17662_s1 + $0xc] sm:$0x3] }
 0x5ca   : > { %12394 = vmatprep.mubr.msk.bf16.mxu0 %vm13158_vm2, %v17672_v57  ;;  %12608 = vmatprep.mubr.msk.bf16.mxu1 %vm13158_vm2, %v17672_v57  ;;  %v6347_v44 = vpack.c.bf16 %v6267_v12, %v6266_v21  ;;  %v5382_v28 = vld [vmem:[%s13215_s24 + $0x1cc] sm:$0xff]  ;;  %v5383_v21 = vld [vmem:[%s13215_s24 + $0x1d4] sm:$0xff] }
 0x5cb   : > { %17969 = vst [vmem:[#allocation56_spill] sm:$0xff] %v15891_v39  ;;  %v6269_v12 = vld [vmem:[%s13215_s24 + $0x1d5] sm:$0xff] }
 0x5cc   : > { %v4309_v38 = vpop.f32.mrb[112].mxu0  ;;  %v5205_v60 = vpop.f32.mrb[112].mxu1 }
 0x5cd   : > { %v4431_v63 = vadd.f32 %v4309_v38, %v17970_v14  ;;  %v12072_v30 = vpop.f32.mrb[113].mxu0  ;;  %v12286_v27 = vpop.f32.mrb[113].mxu1  ;;  %v7430_v38 = vand.u32 %v7269_v2, %v13204_v7 }
 0x5ce   : > { %v4312_v4 = vpop.f32.mrb[114].mxu0  ;;  %v5208_v24 = vpop.f32.mrb[114].mxu1  ;;  %v5462_v30 = vpack.c.bf16 %v5383_v21, %v5382_v28  ;;  %v6270_v28 = vld [vmem:[%s13215_s24 + $0x1dd] sm:$0xff] }
 0x5cf   : > { %v4432_v37 = vadd.f32 %v4312_v4, %v17971_v35  ;;  %v12073_v52 = vpop.f32.mrb[115].mxu0  ;;  %v12287_v39 = vpop.f32.mrb[115].mxu1  ;;  %v15905_v56 = vadd.f32 %v5205_v60, %v4431_v63  ;;  %12725 = vmatpush3.bf16.msra.mxu0 %v7430_v38  ;;  %v5385_v38 = vld [vmem:[%s13215_s24 + $0x1e4] sm:$0xff] }
 0x5d0   : > { %v6268_v39 = vld [vmem:[%s13215_s24 + $0x1cd] sm:$0xff] }
 0x5d1   : > { %12395 = vmatmul.mubr.msk.bf16.gmra.mrb[220].mxu0 %vm528_vm3, %v5461_v15  ;;  %12609 = vmatmul.mubr.msk.bf16.gmra.mrb[220].mxu1 %vm528_vm3, %v6347_v44  ;;  %v15911_v46 = vadd.f32 %v5208_v24, %v4432_v37  ;;  %v6348_v27 = vpack.c.bf16 %v6269_v12, %v6268_v39  ;;  %v17972_v12 = vld [vmem:[#allocation60_spill] sm:$0xff] }
 0x5d2   : > { %12398 = vmatprep.mubr.msk.bf16.mxu0 %vm13158_vm2, %v17672_v57  ;;  %12612 = vmatprep.mubr.msk.bf16.mxu1 %vm13158_vm2, %v17672_v57 }
 0x5d4   : > { %v4317_v60 = vpop.f32.mrb[116].mxu0  ;;  %v5213_v7 = vpop.f32.mrb[116].mxu1 }
 0x5d5   : > { %v4433_v2 = vadd.f32 %v4317_v60, %v15071_v5  ;;  %v12076_v14 = vpop.f32.mrb[117].mxu0  ;;  %v12290_v63 = vpop.f32.mrb[117].mxu1  ;;  %v5384_v5 = vld [vmem:[%s13215_s24 + $0x1dc] sm:$0xff] }
 0x5d6   : > { %v4320_v15 = vpop.f32.mrb[118].mxu0  ;;  %v5216_v44 = vpop.f32.mrb[118].mxu1 }
 0x5d7   : > { %v4434_v4 = vadd.f32 %v4320_v15, %v15073_v20  ;;  %v12077_v24 = vpop.f32.mrb[119].mxu0  ;;  %v12291_v35 = vpop.f32.mrb[119].mxu1  ;;  %v15922_v37 = vadd.f32 %v5213_v7, %v4433_v2  ;;  %v6271_v20 = vld [vmem:[%s13215_s24 + $0x1e5] sm:$0xff]  ;;  %v5463_v2 = vpack.c.bf16 %v5385_v38, %v5384_v5  ;;  %v6272_v5 = vld [vmem:[%s13215_s24 + $0x1ed] sm:$0xff]  ;;  %v6273_v38 = vld [vmem:[%s13215_s24 + $0x1f5] sm:$0xff] }
 0x5d8   : > { %v6349_v63 = vpack.c.bf16 %v6271_v20, %v6270_v28  ;;  %v5386_v24 = vld [vmem:[%s13215_s24 + $0x1ec] sm:$0xff]  ;;  %v5387_v35 = vld [vmem:[%s13215_s24 + $0x1f4] sm:$0xff] }
 0x5d9   : > { %12399 = vmatmul.mubr.msk.bf16.gmra.mrb[224].mxu0 %vm528_vm3, %v5462_v30  ;;  %12613 = vmatmul.mubr.msk.bf16.gmra.mrb[224].mxu1 %vm528_vm3, %v6348_v27  ;;  %v15927_v52 = vadd.f32 %v5216_v44, %v4434_v4 }
 0x5da   : > { %12402 = vmatprep.mubr.msk.bf16.mxu0 %vm13158_vm2, %v17672_v57  ;;  %12616 = vmatprep.mubr.msk.bf16.mxu1 %vm13158_vm2, %v17672_v57 }
 0x5dc   : > { %v4325_v21 = vpop.f32.mrb[120].mxu0  ;;  %v5221_v39 = vpop.f32.mrb[120].mxu1 }
 0x5dd   : > { %v4435_v60 = vadd.f32 %v4325_v21, %v17972_v12  ;;  %v12080_v7 = vpop.f32.mrb[121].mxu0  ;;  %v12294_v14 = vpop.f32.mrb[121].mxu1 }
 0x5de   : > { %v4328_v30 = vpop.f32.mrb[122].mxu0  ;;  %v5224_v27 = vpop.f32.mrb[122].mxu1  ;;  %v6350_v7 = vpack.c.bf16 %v6273_v38, %v6272_v5 }
 0x5df   : > { %v12081_v15 = vpop.f32.mrb[123].mxu0  ;;  %v12295_v44 = vpop.f32.mrb[123].mxu1  ;;  %v15937_v4 = vadd.f32 %v5221_v39, %v4435_v60  ;;  %v5464_v60 = vpack.c.bf16 %v5387_v35, %v5386_v24  ;;  %v5389_v24 = vld [vmem:[%s13215_s24 + $0x204] sm:$0xff] }
 0x5e0   : > { %v6274_v35 = vld [vmem:[%s13215_s24 + $0x1fd] sm:$0xff] }
 0x5e1   : > { %12403 = vmatmul.mubr.msk.bf16.gmra.mrb[228].mxu0 %vm528_vm3, %v5463_v2  ;;  %12617 = vmatmul.mubr.msk.bf16.gmra.mrb[228].mxu1 %vm528_vm3, %v6349_v63 }
 0x5e2   : > { %12406 = vmatprep.mubr.msk.bf16.mxu0 %vm13158_vm2, %v17672_v57  ;;  %12620 = vmatprep.mubr.msk.bf16.mxu1 %vm13158_vm2, %v17672_v57 }
 0x5e4   : > { %v5691_v28 = vpop.f32.mrb[124].mxu0  ;;  %v6584_v20 = vpop.f32.mrb[124].mxu1 }
 0x5e5   : > { %v6113_v21 = vadd.f32 %v5691_v28, %v15100_v36  ;;  %v12300_v39 = vpop.f32.mrb[125].mxu0  ;;  %v12514_v12 = vpop.f32.mrb[125].mxu1  ;;  %v5388_v36 = vld [vmem:[%s13215_s24 + $0x1fc] sm:$0xff] }
 0x5e6   : > { %v5694_v2 = vpop.f32.mrb[126].mxu0  ;;  %v6587_v14 = vpop.f32.mrb[126].mxu1  ;;  %v5465_v39 = vpack.c.bf16 %v5389_v24, %v5388_v36  ;;  %v5391_v36 = vld [vmem:[%s13215_s24 + $0x214] sm:$0xff] }
 0x5e7   : > { %v6114_v63 = vadd.f32 %v5694_v2, %v15102_v26  ;;  %v12301_v30 = vpop.f32.mrb[127].mxu0  ;;  %v12515_v27 = vpop.f32.mrb[127].mxu1  ;;  %v15951_v15 = vadd.f32 %v6584_v20, %v6113_v21  ;;  %v6275_v26 = vld [vmem:[%s13215_s24 + $0x205] sm:$0xff]  ;;  %v6276_v24 = vld [vmem:[%s13215_s24 + $0x20d] sm:$0xff] }
 0x5e8   : > { %v6351_v12 = vpack.c.bf16 %v6275_v26, %v6274_v35 }
 0x5e9   : > { %12407 = vmatmul.mubr.msk.bf16.gmra.mrb[232].mxu0 %vm528_vm3, %v5464_v60  ;;  %12621 = vmatmul.mubr.msk.bf16.gmra.mrb[232].mxu1 %vm528_vm3, %v6350_v7  ;;  %v15956_v44 = vadd.f32 %v6587_v14, %v6114_v63 }
 0x5ea   : > { %12410 = vmatprep.mubr.msk.bf16.mxu0 %vm13158_vm2, %v17672_v57  ;;  %12624 = vmatprep.mubr.msk.bf16.mxu1 %vm13158_vm2, %v17672_v57 }
 0x5ec   : > { %v5699_v5 = vpop.f32.mrb[128].mxu0  ;;  %v6592_v38 = vpop.f32.mrb[128].mxu1 }
 0x5ed   : > { %v6115_v28 = vadd.f32 %v5699_v5, %v15116_v16  ;;  %v12304_v20 = vpop.f32.mrb[129].mxu0  ;;  %v12518_v21 = vpop.f32.mrb[129].mxu1  ;;  %v5390_v16 = vld [vmem:[%s13215_s24 + $0x20c] sm:$0xff] }
 0x5ee   : > { %v5702_v60 = vpop.f32.mrb[130].mxu0  ;;  %v6595_v7 = vpop.f32.mrb[130].mxu1  ;;  %v5466_v20 = vpack.c.bf16 %v5391_v36, %v5390_v16  ;;  %v5393_v16 = vld [vmem:[%s13215_s24 + $0x224] sm:$0xff] }
 0x5ef   : > { %v6116_v2 = vadd.f32 %v5702_v60, %v15118_v59  ;;  %v12305_v14 = vpop.f32.mrb[131].mxu0  ;;  %v12519_v63 = vpop.f32.mrb[131].mxu1  ;;  %v15967_v30 = vadd.f32 %v6592_v38, %v6115_v28  ;;  %v6277_v59 = vld [vmem:[%s13215_s24 + $0x215] sm:$0xff]  ;;  %v6278_v36 = vld [vmem:[%s13215_s24 + $0x21d] sm:$0xff] }
 0x5f0   : > { %v6352_v21 = vpack.c.bf16 %v6277_v59, %v6276_v24 }
 0x5f1   : > { %12411 = vmatmul.mubr.msk.bf16.gmra.mrb[236].mxu0 %vm528_vm3, %v5465_v39  ;;  %12625 = vmatmul.mubr.msk.bf16.gmra.mrb[236].mxu1 %vm528_vm3, %v6351_v12  ;;  %v15972_v27 = vadd.f32 %v6595_v7, %v6116_v2 }
 0x5f2   : > { %12414 = vmatprep.mubr.msk.bf16.mxu0 %vm13158_vm2, %v17672_v57  ;;  %12628 = vmatprep.mubr.msk.bf16.mxu1 %vm13158_vm2, %v17672_v57 }
 0x5f4   : > { %v5707_v35 = vpop.f32.mrb[132].mxu0  ;;  %v6600_v26 = vpop.f32.mrb[132].mxu1 }
 0x5f5   : > { %v6117_v5 = vadd.f32 %v5707_v35, %v15132_v18  ;;  %v12308_v38 = vpop.f32.mrb[133].mxu0  ;;  %v12522_v28 = vpop.f32.mrb[133].mxu1  ;;  %v5392_v18 = vld [vmem:[%s13215_s24 + $0x21c] sm:$0xff] }
 0x5f6   : > { %v5710_v39 = vpop.f32.mrb[134].mxu0  ;;  %v6603_v12 = vpop.f32.mrb[134].mxu1  ;;  %v5467_v38 = vpack.c.bf16 %v5393_v16, %v5392_v18  ;;  %v5395_v18 = vld [vmem:[%s13215_s24 + $0x234] sm:$0xff] }
 0x5f7   : > { %v6118_v60 = vadd.f32 %v5710_v39, %v15134_v25  ;;  %v12309_v7 = vpop.f32.mrb[135].mxu0  ;;  %v12523_v2 = vpop.f32.mrb[135].mxu1  ;;  %v15983_v14 = vadd.f32 %v6600_v26, %v6117_v5  ;;  %v6279_v25 = vld [vmem:[%s13215_s24 + $0x225] sm:$0xff]  ;;  %v6280_v16 = vld [vmem:[%s13215_s24 + $0x22d] sm:$0xff] }
 0x5f8   : > { %v6353_v28 = vpack.c.bf16 %v6279_v25, %v6278_v36 }
 0x5f9   : > { %12415 = vmatmul.mubr.msk.bf16.gmra.mrb[240].mxu0 %vm528_vm3, %v5466_v20  ;;  %12629 = vmatmul.mubr.msk.bf16.gmra.mrb[240].mxu1 %vm528_vm3, %v6352_v21  ;;  %v15988_v63 = vadd.f32 %v6603_v12, %v6118_v60 }
 0x5fa   : > { %12418 = vmatprep.mubr.msk.bf16.mxu0 %vm13158_vm2, %v17672_v57  ;;  %12632 = vmatprep.mubr.msk.bf16.mxu1 %vm13158_vm2, %v17672_v57 }
 0x5fc   : > { %v5715_v24 = vpop.f32.mrb[136].mxu0  ;;  %v6608_v59 = vpop.f32.mrb[136].mxu1 }
 0x5fd   : > { %v6119_v35 = vadd.f32 %v5715_v24, %v15148_v42  ;;  %v12312_v26 = vpop.f32.mrb[137].mxu0  ;;  %v12526_v5 = vpop.f32.mrb[137].mxu1  ;;  %v5394_v42 = vld [vmem:[%s13215_s24 + $0x22c] sm:$0xff] }
 0x5fe   : > { %v5718_v20 = vpop.f32.mrb[138].mxu0  ;;  %v6611_v21 = vpop.f32.mrb[138].mxu1  ;;  %v5468_v26 = vpack.c.bf16 %v5395_v18, %v5394_v42  ;;  %v5397_v42 = vld [vmem:[%s13215_s24 + $0x244] sm:$0xff] }
 0x5ff   : > { %v6120_v39 = vadd.f32 %v5718_v20, %v15150_v22  ;;  %v12313_v12 = vpop.f32.mrb[139].mxu0  ;;  %v12527_v60 = vpop.f32.mrb[139].mxu1  ;;  %v15999_v7 = vadd.f32 %v6608_v59, %v6119_v35  ;;  %v6281_v22 = vld [vmem:[%s13215_s24 + $0x235] sm:$0xff]  ;;  %v6282_v18 = vld [vmem:[%s13215_s24 + $0x23d] sm:$0xff] }
 0x600   : > { %v6354_v5 = vpack.c.bf16 %v6281_v22, %v6280_v16 }
 0x601   : > { %12419 = vmatmul.mubr.msk.bf16.gmra.mrb[244].mxu0 %vm528_vm3, %v5467_v38  ;;  %12633 = vmatmul.mubr.msk.bf16.gmra.mrb[244].mxu1 %vm528_vm3, %v6353_v28  ;;  %v16004_v2 = vadd.f32 %v6611_v21, %v6120_v39 }
 0x602   : > { %12422 = vmatprep.mubr.msk.bf16.mxu0 %vm13158_vm2, %v17672_v57  ;;  %12636 = vmatprep.mubr.msk.bf16.mxu1 %vm13158_vm2, %v17672_v57 }
 0x604   : > { %v5723_v36 = vpop.f32.mrb[140].mxu0  ;;  %v6616_v25 = vpop.f32.mrb[140].mxu1 }
 0x605   : > { %v6121_v24 = vadd.f32 %v5723_v36, %v15164_v61  ;;  %v12316_v59 = vpop.f32.mrb[141].mxu0  ;;  %v12530_v35 = vpop.f32.mrb[141].mxu1  ;;  %v5396_v61 = vld [vmem:[%s13215_s24 + $0x23c] sm:$0xff] }
 0x606   : > { %v5726_v38 = vpop.f32.mrb[142].mxu0  ;;  %v6619_v28 = vpop.f32.mrb[142].mxu1  ;;  %v5469_v59 = vpack.c.bf16 %v5397_v42, %v5396_v61  ;;  %v5399_v61 = vld [vmem:[%s13215_s24 + $0x254] sm:$0xff] }
 0x607   : > { %v6122_v20 = vadd.f32 %v5726_v38, %v15166_v54  ;;  %v12317_v21 = vpop.f32.mrb[143].mxu0  ;;  %v12531_v39 = vpop.f32.mrb[143].mxu1  ;;  %v16015_v12 = vadd.f32 %v6616_v25, %v6121_v24  ;;  %v6283_v54 = vld [vmem:[%s13215_s24 + $0x245] sm:$0xff]  ;;  %v6284_v42 = vld [vmem:[%s13215_s24 + $0x24d] sm:$0xff] }
 0x608   : > { %v6355_v35 = vpack.c.bf16 %v6283_v54, %v6282_v18 }
 0x609   : > { %12423 = vmatmul.mubr.msk.bf16.gmra.mrb[248].mxu0 %vm528_vm3, %v5468_v26  ;;  %12637 = vmatmul.mubr.msk.bf16.gmra.mrb[248].mxu1 %vm528_vm3, %v6354_v5  ;;  %v16020_v60 = vadd.f32 %v6619_v28, %v6122_v20 }
 0x60a   : > { %12426 = vmatprep.mubr.msk.bf16.mxu0 %vm13158_vm2, %v17672_v57  ;;  %12640 = vmatprep.mubr.msk.bf16.mxu1 %vm13158_vm2, %v17672_v57 }
 0x60c   : > { %v5731_v16 = vpop.f32.mrb[144].mxu0  ;;  %v6624_v22 = vpop.f32.mrb[144].mxu1 }
 0x60d   : > { %v6123_v36 = vadd.f32 %v5731_v16, %v15180_v10  ;;  %v12320_v25 = vpop.f32.mrb[145].mxu0  ;;  %v12534_v24 = vpop.f32.mrb[145].mxu1  ;;  %v5398_v10 = vld [vmem:[%s13215_s24 + $0x24c] sm:$0xff] }
 0x60e   : > { %v5734_v26 = vpop.f32.mrb[146].mxu0  ;;  %v6627_v5 = vpop.f32.mrb[146].mxu1  ;;  %v5470_v25 = vpack.c.bf16 %v5399_v61, %v5398_v10  ;;  %v5401_v10 = vld [vmem:[%s13215_s24 + $0x264] sm:$0xff] }
 0x60f   : > { %v6124_v38 = vadd.f32 %v5734_v26, %v15182_v40  ;;  %v12321_v28 = vpop.f32.mrb[147].mxu0  ;;  %v12535_v20 = vpop.f32.mrb[147].mxu1  ;;  %v16031_v21 = vadd.f32 %v6624_v22, %v6123_v36  ;;  %v6285_v40 = vld [vmem:[%s13215_s24 + $0x255] sm:$0xff]  ;;  %v6286_v61 = vld [vmem:[%s13215_s24 + $0x25d] sm:$0xff] }
 0x610   : > { %v6356_v24 = vpack.c.bf16 %v6285_v40, %v6284_v42 }
 0x611   : > { %12427 = vmatmul.mubr.msk.bf16.gmra.mrb[252].mxu0 %vm528_vm3, %v5469_v59  ;;  %12641 = vmatmul.mubr.msk.bf16.gmra.mrb[252].mxu1 %vm528_vm3, %v6355_v35  ;;  %v16036_v39 = vadd.f32 %v6627_v5, %v6124_v38 }
 0x612   : > { %12430 = vmatprep.mubr.msk.bf16.mxu0 %vm13158_vm2, %v17672_v57  ;;  %12644 = vmatprep.mubr.msk.bf16.mxu1 %vm13158_vm2, %v17672_v57 }
 0x614   : > { %v5739_v18 = vpop.f32.mrb[148].mxu0  ;;  %v6632_v54 = vpop.f32.mrb[148].mxu1 }
 0x615   : > { %v6125_v16 = vadd.f32 %v5739_v18, %v15196_v8  ;;  %v12324_v22 = vpop.f32.mrb[149].mxu0  ;;  %v12538_v36 = vpop.f32.mrb[149].mxu1  ;;  %v5400_v8 = vld [vmem:[%s13215_s24 + $0x25c] sm:$0xff] }
 0x616   : > { %v5742_v59 = vpop.f32.mrb[150].mxu0  ;;  %v6635_v35 = vpop.f32.mrb[150].mxu1  ;;  %v5471_v22 = vpack.c.bf16 %v5401_v10, %v5400_v8  ;;  %v5403_v8 = vld [vmem:[%s13215_s24 + $0x274] sm:$0xff] }
 0x617   : > { %v6126_v26 = vadd.f32 %v5742_v59, %v15198_v0  ;;  %v12325_v5 = vpop.f32.mrb[151].mxu0  ;;  %v12539_v38 = vpop.f32.mrb[151].mxu1  ;;  %v16047_v28 = vadd.f32 %v6632_v54, %v6125_v16  ;;  %v6287_v0 = vld [vmem:[%s13215_s24 + $0x265] sm:$0xff]  ;;  %v17973_v59 = vld [vmem:[#allocation61_spill] sm:$0xff]  ;;  %v6288_v10 = vld [vmem:[%s13215_s24 + $0x26d] sm:$0xff] }
 0x618   : > { %v6357_v36 = vpack.c.bf16 %v6287_v0, %v6286_v61  ;;  %v6289_v61 = vld [vmem:[%s13215_s24 + $0x275] sm:$0xff] }
 0x619   : > { %12431 = vmatmul.mubr.msk.bf16.gmra.mrb[0].mxu0 %vm528_vm3, %v5470_v25  ;;  %12645 = vmatmul.mubr.msk.bf16.gmra.mrb[0].mxu1 %vm528_vm3, %v6356_v24  ;;  %v16052_v20 = vadd.f32 %v6635_v35, %v6126_v26 }
 0x61a   : > { %12434 = vmatprep.mubr.msk.bf16.mxu0 %vm13158_vm2, %v17672_v57  ;;  %12648 = vmatprep.mubr.msk.bf16.mxu1 %vm13158_vm2, %v17672_v57 }
 0x61c   : > { %v5747_v42 = vpop.f32.mrb[152].mxu0  ;;  %v6640_v40 = vpop.f32.mrb[152].mxu1 }
 0x61d   : > { %v6127_v18 = vadd.f32 %v5747_v42, %v15212_v47  ;;  %v12328_v54 = vpop.f32.mrb[153].mxu0  ;;  %v12542_v16 = vpop.f32.mrb[153].mxu1  ;;  %v5402_v47 = vld [vmem:[%s13215_s24 + $0x26c] sm:$0xff] }
 0x61e   : > { %v5750_v25 = vpop.f32.mrb[154].mxu0  ;;  %v6643_v24 = vpop.f32.mrb[154].mxu1 }
 0x61f   : > { %v6128_v35 = vadd.f32 %v5750_v25, %v17973_v59  ;;  %v12329_v26 = vpop.f32.mrb[155].mxu0  ;;  %v12543_v5 = vpop.f32.mrb[155].mxu1  ;;  %v16063_v38 = vadd.f32 %v6640_v40, %v6127_v18  ;;  %v17976_v18 = vld [vmem:[#allocation62_spill] sm:$0xff]  ;;  %v6358_v25 = vpack.c.bf16 %v6289_v61, %v6288_v10 }
 0x620   : > { %v6291_v10 = vld [vmem:[%s13215_s24 + $0x285] sm:$0xff] }
 0x621   : > { %17974 = vst [vmem:[#allocation57_spill] sm:$0xff] %v16063_v38  ;;  %12435 = vmatmul.mubr.msk.bf16.gmra.mrb[4].mxu0 %vm528_vm3, %v5471_v22  ;;  %12649 = vmatmul.mubr.msk.bf16.gmra.mrb[4].mxu1 %vm528_vm3, %v6357_v36  ;;  %v16068_v42 = vadd.f32 %v6643_v24, %v6128_v35  ;;  %v5472_v36 = vpack.c.bf16 %v5403_v8, %v5402_v47  ;;  %v17977_v35 = vld [vmem:[#allocation65_spill] sm:$0xff]  ;;  %v5405_v47 = vld [vmem:[%s13215_s24 + $0x284] sm:$0xff] }
 0x622   : > { %12438 = vmatprep.mubr.msk.bf16.mxu0 %vm13158_vm2, %v17672_v57  ;;  %12652 = vmatprep.mubr.msk.bf16.mxu1 %vm13158_vm2, %v17672_v57  ;;  %v6290_v8 = vld [vmem:[%s13215_s24 + $0x27d] sm:$0xff] }
 0x623   : > { %17975 = vst [vmem:[#allocation58_spill] sm:$0xff] %v16068_v42 }
 0x624   : > { %v5755_v0 = vpop.f32.mrb[156].mxu0  ;;  %v6648_v40 = vpop.f32.mrb[156].mxu1 }
 0x625   : > { %v6129_v54 = vadd.f32 %v5755_v0, %v17976_v18  ;;  %v12332_v16 = vpop.f32.mrb[157].mxu0  ;;  %v12546_v22 = vpop.f32.mrb[157].mxu1  ;;  %v5404_v0 = vld [vmem:[%s13215_s24 + $0x27c] sm:$0xff] }
 0x626   : > { %v5758_v24 = vpop.f32.mrb[158].mxu0  ;;  %v6651_v59 = vpop.f32.mrb[158].mxu1 }
 0x627   : > { %v6130_v26 = vadd.f32 %v5758_v24, %v17977_v35  ;;  %v12333_v5 = vpop.f32.mrb[159].mxu0  ;;  %v12547_v42 = vpop.f32.mrb[159].mxu1  ;;  %v16079_v38 = vadd.f32 %v6648_v40, %v6129_v54  ;;  %v17980_v40 = vld [vmem:[#allocation63_spill] sm:$0xff]  ;;  %v17981_v35 = vld [vmem:[#allocation64_spill] sm:$0xff] }
 0x629   : > { %17978 = vst [vmem:[#allocation59_spill] sm:$0xff] %v16079_v38  ;;  %12439 = vmatmul.mubr.msk.bf16.gmra.mrb[8].mxu0 %vm528_vm3, %v5472_v36  ;;  %12653 = vmatmul.mubr.msk.bf16.gmra.mrb[8].mxu1 %vm528_vm3, %v6358_v25  ;;  %v16084_v18 = vadd.f32 %v6651_v59, %v6130_v26  ;;  %v5473_v36 = vpack.c.bf16 %v5405_v47, %v5404_v0  ;;  %v5407_v0 = vld [vmem:[%s13215_s24 + $0x294] sm:$0xff] }
 0x62a   : > { %12442 = vmatprep.mubr.msk.bf16.mxu0 %vm13158_vm2, %v17672_v57  ;;  %12656 = vmatprep.mubr.msk.bf16.mxu1 %vm13158_vm2, %v17672_v57  ;;  %v6359_v25 = vpack.c.bf16 %v6291_v10, %v6290_v8  ;;  %v6292_v47 = vld [vmem:[%s13215_s24 + $0x28d] sm:$0xff]  ;;  %v6293_v8 = vld [vmem:[%s13215_s24 + $0x295] sm:$0xff] }
 0x62b   : > { %17979 = vst [vmem:[#allocation60_spill] sm:$0xff] %v16084_v18 }
 0x62c   : > { %v5763_v42 = vpop.f32.mrb[160].mxu0  ;;  %v6656_v61 = vpop.f32.mrb[160].mxu1 }
 0x62d   : > { %v6131_v54 = vadd.f32 %v5763_v42, %v17980_v40  ;;  %v12336_v16 = vpop.f32.mrb[161].mxu0  ;;  %v12550_v22 = vpop.f32.mrb[161].mxu1  ;;  %v5406_v42 = vld [vmem:[%s13215_s24 + $0x28c] sm:$0xff] }
 0x62e   : > { %v5766_v24 = vpop.f32.mrb[162].mxu0  ;;  %v6659_v59 = vpop.f32.mrb[162].mxu1  ;;  %v5474_v22 = vpack.c.bf16 %v5407_v0, %v5406_v42  ;;  %v5409_v42 = vld [vmem:[%s13215_s24 + $0x2a4] sm:$0xff] }
 0x62f   : > { %v6132_v26 = vadd.f32 %v5766_v24, %v17981_v35  ;;  %v12337_v5 = vpop.f32.mrb[163].mxu0  ;;  %v12551_v18 = vpop.f32.mrb[163].mxu1  ;;  %v16095_v38 = vadd.f32 %v6656_v61, %v6131_v54  ;;  %v6294_v0 = vld [vmem:[%s13215_s24 + $0x29d] sm:$0xff] }
 0x631   : > { %12443 = vmatmul.mubr.msk.bf16.gmra.mrb[12].mxu0 %vm528_vm3, %v5473_v36  ;;  %12657 = vmatmul.mubr.msk.bf16.gmra.mrb[12].mxu1 %vm528_vm3, %v6359_v25  ;;  %v16100_v40 = vadd.f32 %v6659_v59, %v6132_v26  ;;  %v6360_v36 = vpack.c.bf16 %v6293_v8, %v6292_v47 }
 0x632   : > { %12446 = vmatprep.mubr.msk.bf16.mxu0 %vm13158_vm2, %v17672_v57  ;;  %12660 = vmatprep.mubr.msk.bf16.mxu1 %vm13158_vm2, %v17672_v57 }
 0x634   : > { %v5771_v18 = vpop.f32.mrb[164].mxu0  ;;  %v6664_v10 = vpop.f32.mrb[164].mxu1 }
 0x635   : > { %v6133_v61 = vadd.f32 %v5771_v18, %v15263_v11  ;;  %v12340_v54 = vpop.f32.mrb[165].mxu0  ;;  %v12554_v16 = vpop.f32.mrb[165].mxu1  ;;  %v5408_v11 = vld [vmem:[%s13215_s24 + $0x29c] sm:$0xff] }
 0x636   : > { %v5774_v25 = vpop.f32.mrb[166].mxu0  ;;  %v6667_v24 = vpop.f32.mrb[166].mxu1  ;;  %v5475_v16 = vpack.c.bf16 %v5409_v42, %v5408_v11  ;;  %v5411_v11 = vld [vmem:[%s13215_s24 + $0x2b4] sm:$0xff] }
 0x637   : > { %v6134_v59 = vadd.f32 %v5774_v25, %v15266_v19  ;;  %v12341_v35 = vpop.f32.mrb[167].mxu0  ;;  %v12555_v26 = vpop.f32.mrb[167].mxu1  ;;  %v16111_v5 = vadd.f32 %v6664_v10, %v6133_v61  ;;  %v6295_v19 = vld [vmem:[%s13215_s24 + $0x2a5] sm:$0xff]  ;;  %v6296_v42 = vld [vmem:[%s13215_s24 + $0x2ad] sm:$0xff] }
 0x639   : > { %12447 = vmatmul.mubr.msk.bf16.gmra.mrb[16].mxu0 %vm528_vm3, %v5474_v22  ;;  %12661 = vmatmul.mubr.msk.bf16.gmra.mrb[16].mxu1 %vm528_vm3, %v6360_v36  ;;  %v16116_v18 = vadd.f32 %v6667_v24, %v6134_v59  ;;  %v6361_v22 = vpack.c.bf16 %v6295_v19, %v6294_v0 }
 0x63a   : > { %12450 = vmatprep.mubr.msk.bf16.mxu0 %vm13158_vm2, %v17672_v57  ;;  %12664 = vmatprep.mubr.msk.bf16.mxu1 %vm13158_vm2, %v17672_v57 }
 0x63c   : > { %v5779_v47 = vpop.f32.mrb[168].mxu0  ;;  %v6672_v8 = vpop.f32.mrb[168].mxu1 }
 0x63d   : > { %v6135_v10 = vadd.f32 %v5779_v47, %v15280_v43  ;;  %v12344_v61 = vpop.f32.mrb[169].mxu0  ;;  %v12558_v54 = vpop.f32.mrb[169].mxu1  ;;  %v5410_v43 = vld [vmem:[%s13215_s24 + $0x2ac] sm:$0xff] }
 0x63e   : > { %v5782_v36 = vpop.f32.mrb[170].mxu0  ;;  %v6675_v25 = vpop.f32.mrb[170].mxu1  ;;  %v5476_v54 = vpack.c.bf16 %v5411_v11, %v5410_v43  ;;  %v5413_v43 = vld [vmem:[%s13215_s24 + $0x2c4] sm:$0xff] }
 0x63f   : > { %v6136_v24 = vadd.f32 %v5782_v36, %v15282_v50  ;;  %v12345_v59 = vpop.f32.mrb[171].mxu0  ;;  %v12559_v35 = vpop.f32.mrb[171].mxu1  ;;  %v16127_v26 = vadd.f32 %v6672_v8, %v6135_v10  ;;  %v6297_v50 = vld [vmem:[%s13215_s24 + $0x2b5] sm:$0xff]  ;;  %v6298_v11 = vld [vmem:[%s13215_s24 + $0x2bd] sm:$0xff] }
 0x641   : > { %12451 = vmatmul.mubr.msk.bf16.gmra.mrb[20].mxu0 %vm528_vm3, %v5475_v16  ;;  %12665 = vmatmul.mubr.msk.bf16.gmra.mrb[20].mxu1 %vm528_vm3, %v6361_v22  ;;  %v16132_v47 = vadd.f32 %v6675_v25, %v6136_v24  ;;  %v6362_v16 = vpack.c.bf16 %v6297_v50, %v6296_v42 }
 0x642   : > { %12454 = vmatprep.mubr.msk.bf16.mxu0 %vm13158_vm2, %v17672_v57  ;;  %12668 = vmatprep.mubr.msk.bf16.mxu1 %vm13158_vm2, %v17672_v57 }
 0x644   : > { %v5787_v0 = vpop.f32.mrb[172].mxu0  ;;  %v6680_v19 = vpop.f32.mrb[172].mxu1 }
 0x645   : > { %v6137_v8 = vadd.f32 %v5787_v0, %v15296_v55  ;;  %v12348_v10 = vpop.f32.mrb[173].mxu0  ;;  %v12562_v61 = vpop.f32.mrb[173].mxu1  ;;  %v5412_v55 = vld [vmem:[%s13215_s24 + $0x2bc] sm:$0xff] }
 0x646   : > { %v5790_v22 = vpop.f32.mrb[174].mxu0  ;;  %v6683_v36 = vpop.f32.mrb[174].mxu1  ;;  %v5477_v61 = vpack.c.bf16 %v5413_v43, %v5412_v55  ;;  %v5415_v55 = vld [vmem:[%s13215_s24 + $0x2d4] sm:$0xff] }
 0x647   : > { %v6138_v25 = vadd.f32 %v5790_v22, %v15298_v31  ;;  %v12349_v24 = vpop.f32.mrb[175].mxu0  ;;  %v12563_v59 = vpop.f32.mrb[175].mxu1  ;;  %v16143_v35 = vadd.f32 %v6680_v19, %v6137_v8  ;;  %v6299_v31 = vld [vmem:[%s13215_s24 + $0x2c5] sm:$0xff]  ;;  %v6300_v43 = vld [vmem:[%s13215_s24 + $0x2cd] sm:$0xff] }
 0x649   : > { %12455 = vmatmul.mubr.msk.bf16.gmra.mrb[24].mxu0 %vm528_vm3, %v5476_v54  ;;  %12669 = vmatmul.mubr.msk.bf16.gmra.mrb[24].mxu1 %vm528_vm3, %v6362_v16  ;;  %v16148_v0 = vadd.f32 %v6683_v36, %v6138_v25  ;;  %v6363_v54 = vpack.c.bf16 %v6299_v31, %v6298_v11 }
 0x64a   : > { %12458 = vmatprep.mubr.msk.bf16.mxu0 %vm13158_vm2, %v17672_v57  ;;  %12672 = vmatprep.mubr.msk.bf16.mxu1 %vm13158_vm2, %v17672_v57 }
 0x64c   : > { %v5795_v42 = vpop.f32.mrb[176].mxu0  ;;  %v6688_v50 = vpop.f32.mrb[176].mxu1 }
 0x64d   : > { %v6139_v19 = vadd.f32 %v5795_v42, %v15312_v6  ;;  %v12352_v8 = vpop.f32.mrb[177].mxu0  ;;  %v12566_v10 = vpop.f32.mrb[177].mxu1  ;;  %v5414_v6 = vld [vmem:[%s13215_s24 + $0x2cc] sm:$0xff] }
 0x64e   : > { %v5798_v16 = vpop.f32.mrb[178].mxu0  ;;  %v6691_v22 = vpop.f32.mrb[178].mxu1  ;;  %v5478_v10 = vpack.c.bf16 %v5415_v55, %v5414_v6  ;;  %v5417_v6 = vld [vmem:[%s13215_s24 + $0x2e4] sm:$0xff] }
 0x64f   : > { %v6140_v36 = vadd.f32 %v5798_v16, %v15314_v23  ;;  %v12353_v25 = vpop.f32.mrb[179].mxu0  ;;  %v12567_v24 = vpop.f32.mrb[179].mxu1  ;;  %v16159_v59 = vadd.f32 %v6688_v50, %v6139_v19  ;;  %v6301_v23 = vld [vmem:[%s13215_s24 + $0x2d5] sm:$0xff]  ;;  %v6302_v55 = vld [vmem:[%s13215_s24 + $0x2dd] sm:$0xff] }
 0x651   : > { %12459 = vmatmul.mubr.msk.bf16.gmra.mrb[28].mxu0 %vm528_vm3, %v5477_v61  ;;  %12673 = vmatmul.mubr.msk.bf16.gmra.mrb[28].mxu1 %vm528_vm3, %v6363_v54  ;;  %v16164_v42 = vadd.f32 %v6691_v22, %v6140_v36  ;;  %v6364_v61 = vpack.c.bf16 %v6301_v23, %v6300_v43 }
 0x652   : > { %12462 = vmatprep.mubr.msk.bf16.mxu0 %vm13158_vm2, %v17672_v57  ;;  %12676 = vmatprep.mubr.msk.bf16.mxu1 %vm13158_vm2, %v17672_v57 }
 0x654   : > { %v5803_v11 = vpop.f32.mrb[180].mxu0  ;;  %v6696_v31 = vpop.f32.mrb[180].mxu1 }
 0x655   : > { %v6141_v50 = vadd.f32 %v5803_v11, %v15328_v13  ;;  %v12356_v19 = vpop.f32.mrb[181].mxu0  ;;  %v12570_v8 = vpop.f32.mrb[181].mxu1  ;;  %v5416_v13 = vld [vmem:[%s13215_s24 + $0x2dc] sm:$0xff] }
 0x656   : > { %v5806_v54 = vpop.f32.mrb[182].mxu0  ;;  %v6699_v16 = vpop.f32.mrb[182].mxu1  ;;  %v5479_v8 = vpack.c.bf16 %v5417_v6, %v5416_v13  ;;  %v5419_v13 = vld [vmem:[%s13215_s24 + $0x2f4] sm:$0xff] }
 0x657   : > { %v6142_v22 = vadd.f32 %v5806_v54, %v15330_v62  ;;  %v12357_v36 = vpop.f32.mrb[183].mxu0  ;;  %v12571_v25 = vpop.f32.mrb[183].mxu1  ;;  %v16175_v24 = vadd.f32 %v6696_v31, %v6141_v50  ;;  %v6303_v62 = vld [vmem:[%s13215_s24 + $0x2e5] sm:$0xff]  ;;  %v6304_v6 = vld [vmem:[%s13215_s24 + $0x2ed] sm:$0xff] }
 0x659   : > { %12463 = vmatmul.mubr.msk.bf16.gmra.mrb[32].mxu0 %vm528_vm3, %v5478_v10  ;;  %12677 = vmatmul.mubr.msk.bf16.gmra.mrb[32].mxu1 %vm528_vm3, %v6364_v61  ;;  %v16180_v11 = vadd.f32 %v6699_v16, %v6142_v22  ;;  %v6365_v10 = vpack.c.bf16 %v6303_v62, %v6302_v55 }
 0x65a   : > { %12466 = vmatprep.mubr.msk.bf16.mxu0 %vm13158_vm2, %v17672_v57  ;;  %12680 = vmatprep.mubr.msk.bf16.mxu1 %vm13158_vm2, %v17672_v57 }
 0x65c   : > { %v5811_v43 = vpop.f32.mrb[184].mxu0  ;;  %v6704_v23 = vpop.f32.mrb[184].mxu1 }
 0x65d   : > { %v6143_v31 = vadd.f32 %v5811_v43, %v15344_v48  ;;  %v12360_v50 = vpop.f32.mrb[185].mxu0  ;;  %v12574_v19 = vpop.f32.mrb[185].mxu1  ;;  %v5418_v48 = vld [vmem:[%s13215_s24 + $0x2ec] sm:$0xff] }
 0x65e   : > { %v5814_v61 = vpop.f32.mrb[186].mxu0  ;;  %v6707_v54 = vpop.f32.mrb[186].mxu1  ;;  %v5480_v19 = vpack.c.bf16 %v5419_v13, %v5418_v48  ;;  %v5421_v48 = vld [vmem:[%s13215_s24 + $0x304] sm:$0xff] }
 0x65f   : > { %v6144_v16 = vadd.f32 %v5814_v61, %v15346_v32  ;;  %v12361_v22 = vpop.f32.mrb[187].mxu0  ;;  %v12575_v36 = vpop.f32.mrb[187].mxu1  ;;  %v16191_v25 = vadd.f32 %v6704_v23, %v6143_v31  ;;  %v6305_v32 = vld [vmem:[%s13215_s24 + $0x2f5] sm:$0xff]  ;;  %v6306_v13 = vld [vmem:[%s13215_s24 + $0x2fd] sm:$0xff] }
 0x661   : > { %12467 = vmatmul.mubr.msk.bf16.gmra.mrb[36].mxu0 %vm528_vm3, %v5479_v8  ;;  %12681 = vmatmul.mubr.msk.bf16.gmra.mrb[36].mxu1 %vm528_vm3, %v6365_v10  ;;  %v16196_v43 = vadd.f32 %v6707_v54, %v6144_v16  ;;  %v6366_v8 = vpack.c.bf16 %v6305_v32, %v6304_v6 }
 0x662   : > { %12470 = vmatprep.mubr.msk.bf16.mxu0 %vm13158_vm2, %v17672_v57  ;;  %12684 = vmatprep.mubr.msk.bf16.mxu1 %vm13158_vm2, %v17672_v57 }
 0x664   : > { %v5819_v55 = vpop.f32.mrb[188].mxu0  ;;  %v6712_v62 = vpop.f32.mrb[188].mxu1 }
 0x665   : > { %v6145_v23 = vadd.f32 %v5819_v55, %v15360_v41  ;;  %v12364_v31 = vpop.f32.mrb[189].mxu0  ;;  %v12578_v50 = vpop.f32.mrb[189].mxu1  ;;  %v5420_v41 = vld [vmem:[%s13215_s24 + $0x2fc] sm:$0xff] }
 0x666   : > { %v5822_v10 = vpop.f32.mrb[190].mxu0  ;;  %v6715_v61 = vpop.f32.mrb[190].mxu1  ;;  %v5481_v50 = vpack.c.bf16 %v5421_v48, %v5420_v41  ;;  %v5423_v41 = vld [vmem:[%s13215_s24 + $0x314] sm:$0xff] }
 0x667   : > { %v6146_v54 = vadd.f32 %v5822_v10, %v15362_v3  ;;  %v12365_v16 = vpop.f32.mrb[191].mxu0  ;;  %v12579_v22 = vpop.f32.mrb[191].mxu1  ;;  %v16207_v36 = vadd.f32 %v6712_v62, %v6145_v23  ;;  %v6307_v3 = vld [vmem:[%s13215_s24 + $0x305] sm:$0xff]  ;;  %v6308_v48 = vld [vmem:[%s13215_s24 + $0x30d] sm:$0xff] }
 0x669   : > { %12471 = vmatmul.mubr.msk.bf16.gmra.mrb[40].mxu0 %vm528_vm3, %v5480_v19  ;;  %12685 = vmatmul.mubr.msk.bf16.gmra.mrb[40].mxu1 %vm528_vm3, %v6366_v8  ;;  %v16212_v55 = vadd.f32 %v6715_v61, %v6146_v54  ;;  %v6367_v19 = vpack.c.bf16 %v6307_v3, %v6306_v13 }
 0x66a   : > { %12474 = vmatprep.mubr.msk.bf16.mxu0 %vm13158_vm2, %v17672_v57  ;;  %12688 = vmatprep.mubr.msk.bf16.mxu1 %vm13158_vm2, %v17672_v57 }
 0x66c   : > { %v5827_v6 = vpop.f32.mrb[192].mxu0  ;;  %v6720_v32 = vpop.f32.mrb[192].mxu1 }
 0x66d   : > { %v6147_v62 = vadd.f32 %v5827_v6, %v15376_v17  ;;  %v12368_v23 = vpop.f32.mrb[193].mxu0  ;;  %v12582_v31 = vpop.f32.mrb[193].mxu1  ;;  %v5422_v17 = vld [vmem:[%s13215_s24 + $0x30c] sm:$0xff] }
 0x66e   : > { %v5830_v8 = vpop.f32.mrb[194].mxu0  ;;  %v6723_v10 = vpop.f32.mrb[194].mxu1  ;;  %v5482_v31 = vpack.c.bf16 %v5423_v41, %v5422_v17  ;;  %v5425_v17 = vld [vmem:[%s13215_s24 + $0x324] sm:$0xff] }
 0x66f   : > { %v6148_v61 = vadd.f32 %v5830_v8, %v15378_v34  ;;  %v12369_v54 = vpop.f32.mrb[195].mxu0  ;;  %v12583_v16 = vpop.f32.mrb[195].mxu1  ;;  %v16223_v22 = vadd.f32 %v6720_v32, %v6147_v62  ;;  %v6309_v34 = vld [vmem:[%s13215_s24 + $0x315] sm:$0xff]  ;;  %v6310_v41 = vld [vmem:[%s13215_s24 + $0x31d] sm:$0xff] }
 0x671   : > { %12475 = vmatmul.mubr.msk.bf16.gmra.mrb[44].mxu0 %vm528_vm3, %v5481_v50  ;;  %12689 = vmatmul.mubr.msk.bf16.gmra.mrb[44].mxu1 %vm528_vm3, %v6367_v19  ;;  %v16228_v6 = vadd.f32 %v6723_v10, %v6148_v61  ;;  %v6368_v50 = vpack.c.bf16 %v6309_v34, %v6308_v48 }
 0x672   : > { %12478 = vmatprep.mubr.msk.bf16.mxu0 %vm13158_vm2, %v17672_v57  ;;  %12692 = vmatprep.mubr.msk.bf16.mxu1 %vm13158_vm2, %v17672_v57 }
 0x674   : > { %v5835_v13 = vpop.f32.mrb[196].mxu0  ;;  %v6728_v3 = vpop.f32.mrb[196].mxu1 }
 0x675   : > { %v6149_v32 = vadd.f32 %v5835_v13, %v15392_v1  ;;  %v12372_v62 = vpop.f32.mrb[197].mxu0  ;;  %v12586_v23 = vpop.f32.mrb[197].mxu1  ;;  %v5424_v1 = vld [vmem:[%s13215_s24 + $0x31c] sm:$0xff] }
 0x676   : > { %v5838_v19 = vpop.f32.mrb[198].mxu0  ;;  %v6731_v8 = vpop.f32.mrb[198].mxu1  ;;  %v5483_v23 = vpack.c.bf16 %v5425_v17, %v5424_v1  ;;  %v5427_v1 = vld [vmem:[%s13215_s24 + $0x334] sm:$0xff] }
 0x677   : > { %v6150_v10 = vadd.f32 %v5838_v19, %v15394_v58  ;;  %v12373_v61 = vpop.f32.mrb[199].mxu0  ;;  %v12587_v54 = vpop.f32.mrb[199].mxu1  ;;  %v16239_v16 = vadd.f32 %v6728_v3, %v6149_v32  ;;  %v6311_v58 = vld [vmem:[%s13215_s24 + $0x325] sm:$0xff]  ;;  %v6312_v17 = vld [vmem:[%s13215_s24 + $0x32d] sm:$0xff] }
 0x679   : > { %12479 = vmatmul.mubr.msk.bf16.gmra.mrb[48].mxu0 %vm528_vm3, %v5482_v31  ;;  %12693 = vmatmul.mubr.msk.bf16.gmra.mrb[48].mxu1 %vm528_vm3, %v6368_v50  ;;  %v16244_v13 = vadd.f32 %v6731_v8, %v6150_v10  ;;  %v6369_v31 = vpack.c.bf16 %v6311_v58, %v6310_v41 }
 0x67a   : > { %12482 = vmatprep.mubr.msk.bf16.mxu0 %vm13158_vm2, %v17672_v57  ;;  %12696 = vmatprep.mubr.msk.bf16.mxu1 %vm13158_vm2, %v17672_v57 }
 0x67c   : > { %v5843_v48 = vpop.f32.mrb[200].mxu0  ;;  %v6736_v34 = vpop.f32.mrb[200].mxu1 }
 0x67d   : > { %v6151_v3 = vadd.f32 %v5843_v48, %v15408_v33  ;;  %v12376_v32 = vpop.f32.mrb[201].mxu0  ;;  %v12590_v62 = vpop.f32.mrb[201].mxu1  ;;  %v5426_v33 = vld [vmem:[%s13215_s24 + $0x32c] sm:$0xff] }
 0x67e   : > { %v5846_v50 = vpop.f32.mrb[202].mxu0  ;;  %v6739_v19 = vpop.f32.mrb[202].mxu1  ;;  %v5484_v62 = vpack.c.bf16 %v5427_v1, %v5426_v33  ;;  %v5429_v33 = vld [vmem:[%s13215_s24 + $0x344] sm:$0xff] }
 0x67f   : > { %v6152_v8 = vadd.f32 %v5846_v50, %v15410_v49  ;;  %v12377_v10 = vpop.f32.mrb[203].mxu0  ;;  %v12591_v61 = vpop.f32.mrb[203].mxu1  ;;  %v16255_v54 = vadd.f32 %v6736_v34, %v6151_v3  ;;  %v6313_v49 = vld [vmem:[%s13215_s24 + $0x335] sm:$0xff]  ;;  %v6314_v1 = vld [vmem:[%s13215_s24 + $0x33d] sm:$0xff] }
 0x681   : > { %12483 = vmatmul.mubr.msk.bf16.gmra.mrb[52].mxu0 %vm528_vm3, %v5483_v23  ;;  %12697 = vmatmul.mubr.msk.bf16.gmra.mrb[52].mxu1 %vm528_vm3, %v6369_v31  ;;  %v16260_v48 = vadd.f32 %v6739_v19, %v6152_v8  ;;  %v6370_v23 = vpack.c.bf16 %v6313_v49, %v6312_v17 }
 0x682   : > { %12486 = vmatprep.mubr.msk.bf16.mxu0 %vm13158_vm2, %v17672_v57  ;;  %12700 = vmatprep.mubr.msk.bf16.mxu1 %vm13158_vm2, %v17672_v57 }
 0x684   : > { %v5851_v41 = vpop.f32.mrb[204].mxu0  ;;  %v6744_v58 = vpop.f32.mrb[204].mxu1 }
 0x685   : > { %v6153_v34 = vadd.f32 %v5851_v41, %v15424_v51  ;;  %v12380_v3 = vpop.f32.mrb[205].mxu0  ;;  %v12594_v32 = vpop.f32.mrb[205].mxu1  ;;  %v5428_v51 = vld [vmem:[%s13215_s24 + $0x33c] sm:$0xff] }
 0x686   : > { %v5854_v31 = vpop.f32.mrb[206].mxu0  ;;  %v6747_v50 = vpop.f32.mrb[206].mxu1  ;;  %v5485_v32 = vpack.c.bf16 %v5429_v33, %v5428_v51  ;;  %v5431_v51 = vld [vmem:[%s13215_s24 + $0x354] sm:$0xff] }
 0x687   : > { %v6154_v19 = vadd.f32 %v5854_v31, %v15426_v53  ;;  %v12381_v8 = vpop.f32.mrb[207].mxu0  ;;  %v12595_v10 = vpop.f32.mrb[207].mxu1  ;;  %v16271_v61 = vadd.f32 %v6744_v58, %v6153_v34  ;;  %v6315_v53 = vld [vmem:[%s13215_s24 + $0x345] sm:$0xff]  ;;  %v6316_v33 = vld [vmem:[%s13215_s24 + $0x34d] sm:$0xff] }
 0x689   : > { %12487 = vmatmul.mubr.msk.bf16.gmra.mrb[56].mxu0 %vm528_vm3, %v5484_v62  ;;  %12701 = vmatmul.mubr.msk.bf16.gmra.mrb[56].mxu1 %vm528_vm3, %v6370_v23  ;;  %v16276_v41 = vadd.f32 %v6747_v50, %v6154_v19  ;;  %v6371_v62 = vpack.c.bf16 %v6315_v53, %v6314_v1 }
 0x68a   : > { %12490 = vmatprep.mubr.msk.bf16.mxu0 %vm13158_vm2, %v17672_v57  ;;  %12704 = vmatprep.mubr.msk.bf16.mxu1 %vm13158_vm2, %v17672_v57 }
 0x68c   : > { %v5859_v17 = vpop.f32.mrb[208].mxu0  ;;  %v6752_v49 = vpop.f32.mrb[208].mxu1 }
 0x68d   : > { %v6155_v58 = vadd.f32 %v5859_v17, %v15440_v29  ;;  %v12384_v34 = vpop.f32.mrb[209].mxu0  ;;  %v12598_v3 = vpop.f32.mrb[209].mxu1  ;;  %v5430_v29 = vld [vmem:[%s13215_s24 + $0x34c] sm:$0xff] }
 0x68e   : > { %v5862_v23 = vpop.f32.mrb[210].mxu0  ;;  %v6755_v31 = vpop.f32.mrb[210].mxu1  ;;  %v5486_v3 = vpack.c.bf16 %v5431_v51, %v5430_v29  ;;  %v5433_v29 = vld [vmem:[%s13215_s24 + $0x364] sm:$0xff] }
 0x68f   : > { %v6156_v50 = vadd.f32 %v5862_v23, %v15442_v9  ;;  %v12385_v19 = vpop.f32.mrb[211].mxu0  ;;  %v12599_v8 = vpop.f32.mrb[211].mxu1  ;;  %v16287_v10 = vadd.f32 %v6752_v49, %v6155_v58  ;;  %v6317_v9 = vld [vmem:[%s13215_s24 + $0x355] sm:$0xff]  ;;  %v6318_v51 = vld [vmem:[%s13215_s24 + $0x35d] sm:$0xff] }
 0x691   : > { %17982 = vst [vmem:[#allocation61_spill] sm:$0xff] %v16287_v10  ;;  %12491 = vmatmul.mubr.msk.bf16.gmra.mrb[60].mxu0 %vm528_vm3, %v5485_v32  ;;  %12705 = vmatmul.mubr.msk.bf16.gmra.mrb[60].mxu1 %vm528_vm3, %v6371_v62  ;;  %v16292_v17 = vadd.f32 %v6755_v31, %v6156_v50  ;;  %v6372_v32 = vpack.c.bf16 %v6317_v9, %v6316_v33  ;;  %v17984_v31 = vld [vmem:[#allocation2_spill] sm:$0xff] }
 0x692   : > { %12494 = vmatprep.mubr.msk.bf16.mxu0 %vm13158_vm2, %v17672_v57  ;;  %12708 = vmatprep.mubr.msk.bf16.mxu1 %vm13158_vm2, %v17672_v57  ;;  %v6319_v33 = vld [vmem:[%s13215_s24 + $0x365] sm:$0xff] }
 0x693   : > { %17983 = vst [vmem:[#allocation62_spill] sm:$0xff] %v16292_v17 }
 0x694   : > { %v5867_v1 = vpop.f32.mrb[212].mxu0  ;;  %v6760_v53 = vpop.f32.mrb[212].mxu1 }
 0x695   : > { %v6157_v49 = vadd.f32 %v5867_v1, %v15456_v45  ;;  %v12388_v58 = vpop.f32.mrb[213].mxu0  ;;  %v12602_v34 = vpop.f32.mrb[213].mxu1  ;;  %v5432_v45 = vld [vmem:[%s13215_s24 + $0x35c] sm:$0xff] }
 0x696   : > { %v5870_v62 = vpop.f32.mrb[214].mxu0  ;;  %v6763_v23 = vpop.f32.mrb[214].mxu1 }
 0x697   : > { %v6158_v50 = vadd.f32 %v5870_v62, %v17984_v31  ;;  %v12389_v19 = vpop.f32.mrb[215].mxu0  ;;  %v12603_v8 = vpop.f32.mrb[215].mxu1  ;;  %v16303_v17 = vadd.f32 %v6760_v53, %v6157_v49  ;;  %v17987_v49 = vld [vmem:[#allocation3_spill] sm:$0xff]  ;;  %v6373_v62 = vpack.c.bf16 %v6319_v33, %v6318_v51  ;;  %v6321_v51 = vld [vmem:[%s13215_s24 + $0x375] sm:$0xff] }
 0x699   : > { %17985 = vst [vmem:[#allocation65_spill] sm:$0xff] %v16303_v17  ;;  %12495 = vmatmul.mubr.msk.bf16.gmra.mrb[64].mxu0 %vm528_vm3, %v5486_v3  ;;  %12709 = vmatmul.mubr.msk.bf16.gmra.mrb[64].mxu1 %vm528_vm3, %v6372_v32  ;;  %v16308_v1 = vadd.f32 %v6763_v23, %v6158_v50  ;;  %v5487_v32 = vpack.c.bf16 %v5433_v29, %v5432_v45  ;;  %v17988_v50 = vld [vmem:[#allocation4_spill] sm:$0xff] }
 0x69a   : > { %12498 = vmatprep.mubr.msk.bf16.mxu0 %vm13158_vm2, %v17672_v57  ;;  %12712 = vmatprep.mubr.msk.bf16.mxu1 %vm13158_vm2, %v17672_v57  ;;  %v5435_v45 = vld [vmem:[%s13215_s24 + $0x374] sm:$0xff] }
 0x69b   : > { %17986 = vst [vmem:[#allocation63_spill] sm:$0xff] %v16308_v1  ;;  %v6320_v29 = vld [vmem:[%s13215_s24 + $0x36d] sm:$0xff] }
 0x69c   : > { %v5875_v9 = vpop.f32.mrb[216].mxu0  ;;  %v6768_v53 = vpop.f32.mrb[216].mxu1 }
 0x69d   : > { %v6159_v58 = vadd.f32 %v5875_v9, %v17987_v49  ;;  %v12392_v34 = vpop.f32.mrb[217].mxu0  ;;  %v12606_v3 = vpop.f32.mrb[217].mxu1  ;;  %v5434_v9 = vld [vmem:[%s13215_s24 + $0x36c] sm:$0xff] }
 0x69e   : > { %v5878_v23 = vpop.f32.mrb[218].mxu0  ;;  %v6771_v31 = vpop.f32.mrb[218].mxu1 }
 0x69f   : > { %v6160_v19 = vadd.f32 %v5878_v23, %v17988_v50  ;;  %v12393_v8 = vpop.f32.mrb[219].mxu0  ;;  %v12607_v1 = vpop.f32.mrb[219].mxu1  ;;  %v16319_v17 = vadd.f32 %v6768_v53, %v6159_v58  ;;  %v17991_v53 = vld [vmem:[#allocation5_spill] sm:$0xff]  ;;  %v17992_v50 = vld [vmem:[#allocation6_spill] sm:$0xff] }
 0x6a1   : > { %17989 = vst [vmem:[#allocation64_spill] sm:$0xff] %v16319_v17  ;;  %12499 = vmatmul.mubr.msk.bf16.gmra.mrb[68].mxu0 %vm528_vm3, %v5487_v32  ;;  %12713 = vmatmul.mubr.msk.bf16.gmra.mrb[68].mxu1 %vm528_vm3, %v6373_v62  ;;  %v16324_v49 = vadd.f32 %v6771_v31, %v6160_v19  ;;  %v5488_v32 = vpack.c.bf16 %v5435_v45, %v5434_v9  ;;  %v6322_v9 = vld [vmem:[%s13215_s24 + $0x37d] sm:$0x3f] }
 0x6a2   : > { %12502 = vmatprep.mubr.msk.bf16.mxu0 %vm13158_vm2, %v17672_v57  ;;  %12716 = vmatprep.mubr.msk.bf16.mxu1 %vm13158_vm2, %v17672_v57  ;;  %v6374_v62 = vpack.c.bf16 %v6321_v51, %v6320_v29  ;;  %v17993_v51 = vld [vmem:[#allocation7_spill] sm:$0xff] }
 0x6a3   : > { %17990 = vst [vmem:[#allocation2_spill] sm:$0xff] %v16324_v49 }
 0x6a4   : > { %v5883_v33 = vpop.f32.mrb[220].mxu0  ;;  %v6776_v1 = vpop.f32.mrb[220].mxu1 }
 0x6a5   : > { %v6161_v58 = vadd.f32 %v5883_v33, %v17991_v53  ;;  %v12396_v34 = vpop.f32.mrb[221].mxu0  ;;  %v12610_v3 = vpop.f32.mrb[221].mxu1  ;;  %v5436_v33 = vld [vmem:[%s13215_s24 + $0x37c] sm:$0x3f] }
 0x6a6   : > { %v5886_v23 = vpop.f32.mrb[222].mxu0  ;;  %v6779_v31 = vpop.f32.mrb[222].mxu1  ;;  %v6375_v34 = vpack.c.bf16 %v6322_v9, %v6322_v9 }
 0x6a7   : > { %v6162_v19 = vadd.f32 %v5886_v23, %v17992_v50  ;;  %v12397_v8 = vpop.f32.mrb[223].mxu0  ;;  %v12611_v49 = vpop.f32.mrb[223].mxu1  ;;  %v16335_v17 = vadd.f32 %v6776_v1, %v6161_v58  ;;  %v5489_v58 = vpack.c.bf16 %v5436_v33, %v5436_v33  ;;  %v7112_v33 = vld [vmem:[%s13215_s24 + $0x46] sm:$0xff] }
 0x6a9   : > { %12503 = vmatmul.mubr.msk.bf16.gmra.mrb[72].mxu0 %vm528_vm3, %v5488_v32  ;;  %12717 = vmatmul.mubr.msk.bf16.gmra.mrb[72].mxu1 %vm528_vm3, %v6374_v62  ;;  %v16339_v10 = vadd.f32 %v6779_v31, %v6162_v19  ;;  %v17994_v62 = vld [vmem:[#allocation8_spill] sm:$0xff] }
 0x6aa   : > { %12506 = vmatprep.mubr.msk.bf16.mxu0 %vm13158_vm2, %v17672_v57  ;;  %12720 = vmatprep.mubr.msk.bf16.mxu1 %vm13158_vm2, %v17672_v57 }
 0x6ac   : > { %v5891_v45 = vpop.f32.mrb[224].mxu0  ;;  %v6784_v29 = vpop.f32.mrb[224].mxu1 }
 0x6ad   : > { %v6163_v49 = vadd.f32 %v5891_v45, %v17993_v51  ;;  %v12400_v1 = vpop.f32.mrb[225].mxu0  ;;  %v12614_v53 = vpop.f32.mrb[225].mxu1  ;;  %v7111_v45 = vld [vmem:[%s13215_s24 + $0x3e] sm:$0xff] }
 0x6ae   : > { %v5894_v3 = vpop.f32.mrb[226].mxu0  ;;  %v6787_v32 = vpop.f32.mrb[226].mxu1  ;;  %v17997_v1 = vld [vmem:[#allocation9_spill] sm:$0xff] }
 0x6af   : > { %v6164_v23 = vadd.f32 %v5894_v3, %v17994_v62  ;;  %v12401_v31 = vpop.f32.mrb[227].mxu0  ;;  %v12615_v50 = vpop.f32.mrb[227].mxu1  ;;  %v16349_v19 = vadd.f32 %v6784_v29, %v6163_v49  ;;  %v7216_v49 = vpack.c.bf16 %v7112_v33, %v7111_v45  ;;  %v18001_v33 = vld [vmem:[#allocation11_spill] sm:$0xff] }
 0x6b0   : > { %v17998_v31 = vld [vmem:[#allocation10_spill] sm:$0xff] }
 0x6b1   : > { %17995 = vst [vmem:[#allocation3_spill] sm:$0xff] %v16349_v19  ;;  %12507 = vmatmul.mubr.msk.bf16.gmra.mrb[76].mxu0 %vm528_vm3, %v5489_v58  ;;  %12721 = vmatmul.mubr.msk.bf16.gmra.mrb[76].mxu1 %vm528_vm3, %v6375_v34  ;;  %v16353_v8 = vadd.f32 %v6787_v32, %v6164_v23  ;;  %v7113_v19 = vld [vmem:[%s13215_s24 + $0x4e] sm:$0xff] }
 0x6b2   : > { %12726 = vmatprep.mubr.msk.bf16.mxu0 %vm13158_vm2, %v17672_v57 }
 0x6b3   : > { %17996 = vst [vmem:[#allocation4_spill] sm:$0xff] %v16353_v8 }
 0x6b4   : > { %v5899_v9 = vpop.f32.mrb[228].mxu0  ;;  %v6792_v51 = vpop.f32.mrb[228].mxu1 }
 0x6b5   : > { %v6165_v53 = vadd.f32 %v5899_v9, %v17997_v1  ;;  %v12404_v3 = vpop.f32.mrb[229].mxu0  ;;  %v12618_v29 = vpop.f32.mrb[229].mxu1  ;;  %v7114_v9 = vld [vmem:[%s13215_s24 + $0x56] sm:$0xff] }
 0x6b6   : > { %v5902_v62 = vpop.f32.mrb[230].mxu0  ;;  %v6795_v58 = vpop.f32.mrb[230].mxu1 }
 0x6b7   : > { %v6166_v34 = vadd.f32 %v5902_v62, %v17998_v31  ;;  %v12405_v32 = vpop.f32.mrb[231].mxu0  ;;  %v12619_v23 = vpop.f32.mrb[231].mxu1  ;;  %v16361_v50 = vadd.f32 %v6792_v51, %v6165_v53  ;;  %v7217_v31 = vpack.c.bf16 %v7114_v9, %v7113_v19  ;;  %v18005_v9 = vld [vmem:[#allocation13_spill] sm:$0xff] }
 0x6b8   : > { %v18002_v32 = vld [vmem:[#allocation12_spill] sm:$0xff] }
 0x6b9   : > { %17999 = vst [vmem:[#allocation5_spill] sm:$0xff] %v16361_v50  ;;  %12727 = vmatmul.mubr.msk.bf16.vlgmr.msra.gmra.mrb[80].mxu0 %vm528_vm3, %v7216_v49  ;;  %v16364_v8 = vadd.f32 %v6795_v58, %v6166_v34  ;;  %v7115_v50 = vld [vmem:[%s13215_s24 + $0x5e] sm:$0xff] }
 0x6ba   : > { %12730 = vmatprep.mubr.msk.bf16.mxu0 %vm13158_vm2, %v17672_v57 }
 0x6bb   : > { %18000 = vst [vmem:[#allocation6_spill] sm:$0xff] %v16364_v8 }
 0x6bc   : > { %v5907_v1 = vpop.f32.mrb[232].mxu0  ;;  %v6800_v45 = vpop.f32.mrb[232].mxu1 }
 0x6bd   : > { %v6167_v3 = vadd.f32 %v5907_v1, %v18001_v33  ;;  %v12408_v29 = vpop.f32.mrb[233].mxu0  ;;  %v12622_v62 = vpop.f32.mrb[233].mxu1  ;;  %v7116_v1 = vld [vmem:[%s13215_s24 + $0x66] sm:$0xff] }
 0x6be   : > { %v5910_v51 = vpop.f32.mrb[234].mxu0  ;;  %v6803_v53 = vpop.f32.mrb[234].mxu1 }
 0x6bf   : > { %v6168_v49 = vadd.f32 %v5910_v51, %v18002_v32  ;;  %v12409_v58 = vpop.f32.mrb[235].mxu0  ;;  %v12623_v34 = vpop.f32.mrb[235].mxu1  ;;  %v16372_v23 = vadd.f32 %v6800_v45, %v6167_v3  ;;  %v7218_v32 = vpack.c.bf16 %v7116_v1, %v7115_v50  ;;  %v18009_v1 = vld [vmem:[#allocation15_spill] sm:$0xff] }
 0x6c0   : > { %v18006_v58 = vld [vmem:[#allocation14_spill] sm:$0xff] }
 0x6c1   : > { %18003 = vst [vmem:[#allocation7_spill] sm:$0xff] %v16372_v23  ;;  %12731 = vmatmul.mubr.msk.bf16.gmra.mrb[84].mxu0 %vm528_vm3, %v7217_v31  ;;  %v16375_v8 = vadd.f32 %v6803_v53, %v6168_v49  ;;  %v7117_v23 = vld [vmem:[%s13215_s24 + $0x6e] sm:$0xff] }
 0x6c2   : > { %12734 = vmatprep.mubr.msk.bf16.mxu0 %vm13158_vm2, %v17672_v57 }
 0x6c3   : > { %18004 = vst [vmem:[#allocation8_spill] sm:$0xff] %v16375_v8 }
 0x6c4   : > { %v5915_v33 = vpop.f32.mrb[236].mxu0  ;;  %v6808_v19 = vpop.f32.mrb[236].mxu1 }
 0x6c5   : > { %v6169_v29 = vadd.f32 %v5915_v33, %v18005_v9  ;;  %v12412_v62 = vpop.f32.mrb[237].mxu0  ;;  %v12626_v51 = vpop.f32.mrb[237].mxu1  ;;  %v7118_v33 = vld [vmem:[%s13215_s24 + $0x76] sm:$0xff] }
 0x6c6   : > { %v5918_v45 = vpop.f32.mrb[238].mxu0  ;;  %v6811_v3 = vpop.f32.mrb[238].mxu1 }
 0x6c7   : > { %v6170_v31 = vadd.f32 %v5918_v45, %v18006_v58  ;;  %v12413_v53 = vpop.f32.mrb[239].mxu0  ;;  %v12627_v49 = vpop.f32.mrb[239].mxu1  ;;  %v16383_v34 = vadd.f32 %v6808_v19, %v6169_v29  ;;  %v7219_v58 = vpack.c.bf16 %v7118_v33, %v7117_v23  ;;  %v18013_v33 = vld [vmem:[#allocation17_spill] sm:$0xff] }
 0x6c8   : > { %v18010_v53 = vld [vmem:[#allocation16_spill] sm:$0xff] }
 0x6c9   : > { %18007 = vst [vmem:[#allocation9_spill] sm:$0xff] %v16383_v34  ;;  %12735 = vmatmul.mubr.msk.bf16.gmra.mrb[88].mxu0 %vm528_vm3, %v7218_v32  ;;  %v16386_v8 = vadd.f32 %v6811_v3, %v6170_v31  ;;  %v7119_v34 = vld [vmem:[%s13215_s24 + $0x7e] sm:$0xff] }
 0x6ca   : > { %12738 = vmatprep.mubr.msk.bf16.mxu0 %vm13158_vm2, %v17672_v57 }
 0x6cb   : > { %18008 = vst [vmem:[#allocation10_spill] sm:$0xff] %v16386_v8 }
 0x6cc   : > { %v5923_v9 = vpop.f32.mrb[240].mxu0  ;;  %v6816_v50 = vpop.f32.mrb[240].mxu1 }
 0x6cd   : > { %v6171_v62 = vadd.f32 %v5923_v9, %v18009_v1  ;;  %v12416_v51 = vpop.f32.mrb[241].mxu0  ;;  %v12630_v45 = vpop.f32.mrb[241].mxu1  ;;  %v7120_v9 = vld [vmem:[%s13215_s24 + $0x86] sm:$0xff] }
 0x6ce   : > { %v5926_v19 = vpop.f32.mrb[242].mxu0  ;;  %v6819_v29 = vpop.f32.mrb[242].mxu1 }
 0x6cf   : > { %v6172_v32 = vadd.f32 %v5926_v19, %v18010_v53  ;;  %v12417_v3 = vpop.f32.mrb[243].mxu0  ;;  %v12631_v31 = vpop.f32.mrb[243].mxu1  ;;  %v16394_v49 = vadd.f32 %v6816_v50, %v6171_v62  ;;  %v7220_v53 = vpack.c.bf16 %v7120_v9, %v7119_v34  ;;  %v18017_v9 = vld [vmem:[#allocation19_spill] sm:$0xff] }
 0x6d0   : > { %v18014_v3 = vld [vmem:[#allocation18_spill] sm:$0xff] }
 0x6d1   : > { %18011 = vst [vmem:[#allocation11_spill] sm:$0xff] %v16394_v49  ;;  %12739 = vmatmul.mubr.msk.bf16.gmra.mrb[92].mxu0 %vm528_vm3, %v7219_v58  ;;  %v16397_v8 = vadd.f32 %v6819_v29, %v6172_v32  ;;  %v7121_v49 = vld [vmem:[%s13215_s24 + $0x8e] sm:$0xff] }
 0x6d2   : > { %12742 = vmatprep.mubr.msk.bf16.mxu0 %vm13158_vm2, %v17672_v57 }
 0x6d3   : > { %18012 = vst [vmem:[#allocation12_spill] sm:$0xff] %v16397_v8 }
 0x6d4   : > { %v5931_v1 = vpop.f32.mrb[244].mxu0  ;;  %v6824_v23 = vpop.f32.mrb[244].mxu1 }
 0x6d5   : > { %v6173_v51 = vadd.f32 %v5931_v1, %v18013_v33  ;;  %v12420_v45 = vpop.f32.mrb[245].mxu0  ;;  %v12634_v19 = vpop.f32.mrb[245].mxu1  ;;  %v7122_v1 = vld [vmem:[%s13215_s24 + $0x96] sm:$0xff] }
 0x6d6   : > { %v5934_v50 = vpop.f32.mrb[246].mxu0  ;;  %v6827_v62 = vpop.f32.mrb[246].mxu1 }
 0x6d7   : > { %v6174_v58 = vadd.f32 %v5934_v50, %v18014_v3  ;;  %v12421_v29 = vpop.f32.mrb[247].mxu0  ;;  %v12635_v32 = vpop.f32.mrb[247].mxu1  ;;  %v16405_v31 = vadd.f32 %v6824_v23, %v6173_v51  ;;  %v7221_v3 = vpack.c.bf16 %v7122_v1, %v7121_v49  ;;  %v18021_v1 = vld [vmem:[#allocation21_spill] sm:$0xff] }
 0x6d8   : > { %v18018_v29 = vld [vmem:[#allocation20_spill] sm:$0xff] }
 0x6d9   : > { %18015 = vst [vmem:[#allocation13_spill] sm:$0xff] %v16405_v31  ;;  %12743 = vmatmul.mubr.msk.bf16.gmra.mrb[96].mxu0 %vm528_vm3, %v7220_v53  ;;  %v16408_v8 = vadd.f32 %v6827_v62, %v6174_v58  ;;  %v7123_v31 = vld [vmem:[%s13215_s24 + $0x9e] sm:$0xff] }
 0x6da   : > { %12746 = vmatprep.mubr.msk.bf16.mxu0 %vm13158_vm2, %v17672_v57 }
 0x6db   : > { %18016 = vst [vmem:[#allocation14_spill] sm:$0xff] %v16408_v8 }
 0x6dc   : > { %v5939_v33 = vpop.f32.mrb[248].mxu0  ;;  %v6832_v34 = vpop.f32.mrb[248].mxu1 }
 0x6dd   : > { %v6175_v45 = vadd.f32 %v5939_v33, %v18017_v9  ;;  %v12424_v19 = vpop.f32.mrb[249].mxu0  ;;  %v12638_v50 = vpop.f32.mrb[249].mxu1  ;;  %v7124_v33 = vld [vmem:[%s13215_s24 + $0xa6] sm:$0xff] }
 0x6de   : > { %v5942_v23 = vpop.f32.mrb[250].mxu0  ;;  %v6835_v51 = vpop.f32.mrb[250].mxu1 }
 0x6df   : > { %v6176_v53 = vadd.f32 %v5942_v23, %v18018_v29  ;;  %v12425_v62 = vpop.f32.mrb[251].mxu0  ;;  %v12639_v58 = vpop.f32.mrb[251].mxu1  ;;  %v16416_v32 = vadd.f32 %v6832_v34, %v6175_v45  ;;  %v7222_v29 = vpack.c.bf16 %v7124_v33, %v7123_v31  ;;  %v18025_v33 = vld [vmem:[#allocation23_spill] sm:$0xff] }
 0x6e0   : > { %v18022_v62 = vld [vmem:[#allocation22_spill] sm:$0xff] }
 0x6e1   : > { %18019 = vst [vmem:[#allocation15_spill] sm:$0xff] %v16416_v32  ;;  %12747 = vmatmul.mubr.msk.bf16.gmra.mrb[100].mxu0 %vm528_vm3, %v7221_v3  ;;  %v16419_v8 = vadd.f32 %v6835_v51, %v6176_v53  ;;  %v7125_v32 = vld [vmem:[%s13215_s24 + $0xae] sm:$0xff] }
 0x6e2   : > { %12750 = vmatprep.mubr.msk.bf16.mxu0 %vm13158_vm2, %v17672_v57 }
 0x6e3   : > { %18020 = vst [vmem:[#allocation16_spill] sm:$0xff] %v16419_v8 }
 0x6e4   : > { %v5947_v9 = vpop.f32.mrb[252].mxu0  ;;  %v6840_v49 = vpop.f32.mrb[252].mxu1 }
 0x6e5   : > { %v6177_v19 = vadd.f32 %v5947_v9, %v18021_v1  ;;  %v12428_v50 = vpop.f32.mrb[253].mxu0  ;;  %v12642_v23 = vpop.f32.mrb[253].mxu1  ;;  %v7126_v9 = vld [vmem:[%s13215_s24 + $0xb6] sm:$0xff] }
 0x6e6   : > { %v5950_v34 = vpop.f32.mrb[254].mxu0  ;;  %v6843_v45 = vpop.f32.mrb[254].mxu1 }
 0x6e7   : > { %v6178_v3 = vadd.f32 %v5950_v34, %v18022_v62  ;;  %v12429_v51 = vpop.f32.mrb[255].mxu0  ;;  %v12643_v53 = vpop.f32.mrb[255].mxu1  ;;  %v16427_v58 = vadd.f32 %v6840_v49, %v6177_v19  ;;  %v7223_v62 = vpack.c.bf16 %v7126_v9, %v7125_v32  ;;  %v18029_v9 = vld [vmem:[#allocation25_spill] sm:$0xff] }
 0x6e8   : > { %v18026_v51 = vld [vmem:[#allocation24_spill] sm:$0xff] }
 0x6e9   : > { %18023 = vst [vmem:[#allocation17_spill] sm:$0xff] %v16427_v58  ;;  %12751 = vmatmul.mubr.msk.bf16.gmra.mrb[104].mxu0 %vm528_vm3, %v7222_v29  ;;  %v16430_v8 = vadd.f32 %v6843_v45, %v6178_v3  ;;  %v7127_v58 = vld [vmem:[%s13215_s24 + $0xbe] sm:$0xff] }
 0x6ea   : > { %12754 = vmatprep.mubr.msk.bf16.mxu0 %vm13158_vm2, %v17672_v57 }
 0x6eb   : > { %18024 = vst [vmem:[#allocation18_spill] sm:$0xff] %v16430_v8 }
 0x6ec   : > { %v5955_v1 = vpop.f32.mrb[0].mxu0  ;;  %v6848_v31 = vpop.f32.mrb[0].mxu1 }
 0x6ed   : > { %v6179_v50 = vadd.f32 %v5955_v1, %v18025_v33  ;;  %v12432_v23 = vpop.f32.mrb[1].mxu0  ;;  %v12646_v34 = vpop.f32.mrb[1].mxu1  ;;  %v7128_v1 = vld [vmem:[%s13215_s24 + $0xc6] sm:$0xff] }
 0x6ee   : > { %v5958_v49 = vpop.f32.mrb[2].mxu0  ;;  %v6851_v19 = vpop.f32.mrb[2].mxu1 }
 0x6ef   : > { %v6180_v29 = vadd.f32 %v5958_v49, %v18026_v51  ;;  %v12433_v45 = vpop.f32.mrb[3].mxu0  ;;  %v12647_v3 = vpop.f32.mrb[3].mxu1  ;;  %v16438_v53 = vadd.f32 %v6848_v31, %v6179_v50  ;;  %v7224_v51 = vpack.c.bf16 %v7128_v1, %v7127_v58  ;;  %v18033_v1 = vld [vmem:[#allocation27_spill] sm:$0xff] }
 0x6f0   : > { %v18030_v45 = vld [vmem:[#allocation26_spill] sm:$0xff] }
 0x6f1   : > { %18027 = vst [vmem:[#allocation19_spill] sm:$0xff] %v16438_v53  ;;  %12755 = vmatmul.mubr.msk.bf16.gmra.mrb[108].mxu0 %vm528_vm3, %v7223_v62  ;;  %v16441_v8 = vadd.f32 %v6851_v19, %v6180_v29  ;;  %v7129_v53 = vld [vmem:[%s13215_s24 + $0xce] sm:$0xff] }
 0x6f2   : > { %12758 = vmatprep.mubr.msk.bf16.mxu0 %vm13158_vm2, %v17672_v57 }
 0x6f3   : > { %18028 = vst [vmem:[#allocation20_spill] sm:$0xff] %v16441_v8 }
 0x6f4   : > { %v5963_v33 = vpop.f32.mrb[4].mxu0  ;;  %v6856_v32 = vpop.f32.mrb[4].mxu1 }
 0x6f5   : > { %v6181_v23 = vadd.f32 %v5963_v33, %v18029_v9  ;;  %v12436_v34 = vpop.f32.mrb[5].mxu0  ;;  %v12650_v49 = vpop.f32.mrb[5].mxu1  ;;  %v7130_v33 = vld [vmem:[%s13215_s24 + $0xd6] sm:$0xff] }
 0x6f6   : > { %v5966_v31 = vpop.f32.mrb[6].mxu0  ;;  %v6859_v50 = vpop.f32.mrb[6].mxu1 }
 0x6f7   : > { %v6182_v62 = vadd.f32 %v5966_v31, %v18030_v45  ;;  %v12437_v19 = vpop.f32.mrb[7].mxu0  ;;  %v12651_v29 = vpop.f32.mrb[7].mxu1  ;;  %v16449_v3 = vadd.f32 %v6856_v32, %v6181_v23  ;;  %v7225_v45 = vpack.c.bf16 %v7130_v33, %v7129_v53  ;;  %v18037_v33 = vld [vmem:[#allocation29_spill] sm:$0xff] }
 0x6f8   : > { %v18034_v19 = vld [vmem:[#allocation28_spill] sm:$0xff] }
 0x6f9   : > { %18031 = vst [vmem:[#allocation21_spill] sm:$0xff] %v16449_v3  ;;  %12759 = vmatmul.mubr.msk.bf16.gmra.mrb[112].mxu0 %vm528_vm3, %v7224_v51  ;;  %v16452_v8 = vadd.f32 %v6859_v50, %v6182_v62  ;;  %v7131_v3 = vld [vmem:[%s13215_s24 + $0xde] sm:$0xff] }
 0x6fa   : > { %12762 = vmatprep.mubr.msk.bf16.mxu0 %vm13158_vm2, %v17672_v57 }
 0x6fb   : > { %18032 = vst [vmem:[#allocation22_spill] sm:$0xff] %v16452_v8 }
 0x6fc   : > { %v5971_v9 = vpop.f32.mrb[8].mxu0  ;;  %v6864_v58 = vpop.f32.mrb[8].mxu1 }
 0x6fd   : > { %v6183_v34 = vadd.f32 %v5971_v9, %v18033_v1  ;;  %v12440_v49 = vpop.f32.mrb[9].mxu0  ;;  %v12654_v31 = vpop.f32.mrb[9].mxu1  ;;  %v7132_v9 = vld [vmem:[%s13215_s24 + $0xe6] sm:$0xff] }
 0x6fe   : > { %v5974_v32 = vpop.f32.mrb[10].mxu0  ;;  %v6867_v23 = vpop.f32.mrb[10].mxu1 }
 0x6ff   : > { %v6184_v51 = vadd.f32 %v5974_v32, %v18034_v19  ;;  %v12441_v50 = vpop.f32.mrb[11].mxu0  ;;  %v12655_v62 = vpop.f32.mrb[11].mxu1  ;;  %v16460_v29 = vadd.f32 %v6864_v58, %v6183_v34  ;;  %v7226_v19 = vpack.c.bf16 %v7132_v9, %v7131_v3  ;;  %v18041_v9 = vld [vmem:[#allocation31_spill] sm:$0xff] }
 0x700   : > { %v18038_v50 = vld [vmem:[#allocation30_spill] sm:$0xff] }
 0x701   : > { %18035 = vst [vmem:[#allocation23_spill] sm:$0xff] %v16460_v29  ;;  %12763 = vmatmul.mubr.msk.bf16.gmra.mrb[116].mxu0 %vm528_vm3, %v7225_v45  ;;  %v16463_v8 = vadd.f32 %v6867_v23, %v6184_v51  ;;  %v7133_v29 = vld [vmem:[%s13215_s24 + $0xee] sm:$0xff] }
 0x702   : > { %12766 = vmatprep.mubr.msk.bf16.mxu0 %vm13158_vm2, %v17672_v57 }
 0x703   : > { %18036 = vst [vmem:[#allocation24_spill] sm:$0xff] %v16463_v8 }
 0x704   : > { %v5979_v1 = vpop.f32.mrb[12].mxu0  ;;  %v6872_v53 = vpop.f32.mrb[12].mxu1 }
 0x705   : > { %v6185_v49 = vadd.f32 %v5979_v1, %v18037_v33  ;;  %v12444_v31 = vpop.f32.mrb[13].mxu0  ;;  %v12658_v32 = vpop.f32.mrb[13].mxu1  ;;  %v7134_v1 = vld [vmem:[%s13215_s24 + $0xf6] sm:$0xff] }
 0x706   : > { %v5982_v58 = vpop.f32.mrb[14].mxu0  ;;  %v6875_v34 = vpop.f32.mrb[14].mxu1 }
 0x707   : > { %v6186_v45 = vadd.f32 %v5982_v58, %v18038_v50  ;;  %v12445_v23 = vpop.f32.mrb[15].mxu0  ;;  %v12659_v51 = vpop.f32.mrb[15].mxu1  ;;  %v16471_v62 = vadd.f32 %v6872_v53, %v6185_v49  ;;  %v7227_v50 = vpack.c.bf16 %v7134_v1, %v7133_v29  ;;  %v18045_v1 = vld [vmem:[#allocation33_spill] sm:$0xff] }
 0x708   : > { %v18042_v23 = vld [vmem:[#allocation32_spill] sm:$0xff] }
 0x709   : > { %18039 = vst [vmem:[#allocation25_spill] sm:$0xff] %v16471_v62  ;;  %12767 = vmatmul.mubr.msk.bf16.gmra.mrb[120].mxu0 %vm528_vm3, %v7226_v19  ;;  %v16474_v8 = vadd.f32 %v6875_v34, %v6186_v45  ;;  %v7135_v62 = vld [vmem:[%s13215_s24 + $0xfe] sm:$0xff] }
 0x70a   : > { %12770 = vmatprep.mubr.msk.bf16.mxu0 %vm13158_vm2, %v17672_v57 }
 0x70b   : > { %18040 = vst [vmem:[#allocation26_spill] sm:$0xff] %v16474_v8 }
 0x70c   : > { %v5987_v33 = vpop.f32.mrb[16].mxu0  ;;  %v6880_v3 = vpop.f32.mrb[16].mxu1 }
 0x70d   : > { %v6187_v31 = vadd.f32 %v5987_v33, %v18041_v9  ;;  %v12448_v32 = vpop.f32.mrb[17].mxu0  ;;  %v12662_v58 = vpop.f32.mrb[17].mxu1  ;;  %v7136_v33 = vld [vmem:[%s13215_s24 + $0x106] sm:$0xff] }
 0x70e   : > { %v5990_v53 = vpop.f32.mrb[18].mxu0  ;;  %v6883_v49 = vpop.f32.mrb[18].mxu1 }
 0x70f   : > { %v6188_v19 = vadd.f32 %v5990_v53, %v18042_v23  ;;  %v12449_v34 = vpop.f32.mrb[19].mxu0  ;;  %v12663_v45 = vpop.f32.mrb[19].mxu1  ;;  %v16482_v51 = vadd.f32 %v6880_v3, %v6187_v31  ;;  %v7228_v23 = vpack.c.bf16 %v7136_v33, %v7135_v62  ;;  %v18049_v33 = vld [vmem:[#allocation35_spill] sm:$0xff] }
 0x710   : > { %v18046_v34 = vld [vmem:[#allocation34_spill] sm:$0xff] }
 0x711   : > { %18043 = vst [vmem:[#allocation27_spill] sm:$0xff] %v16482_v51  ;;  %12771 = vmatmul.mubr.msk.bf16.gmra.mrb[124].mxu0 %vm528_vm3, %v7227_v50  ;;  %v16485_v8 = vadd.f32 %v6883_v49, %v6188_v19  ;;  %v7137_v51 = vld [vmem:[%s13215_s24 + $0x10e] sm:$0xff] }
 0x712   : > { %12774 = vmatprep.mubr.msk.bf16.mxu0 %vm13158_vm2, %v17672_v57 }
 0x713   : > { %18044 = vst [vmem:[#allocation28_spill] sm:$0xff] %v16485_v8 }
 0x714   : > { %v5995_v9 = vpop.f32.mrb[20].mxu0  ;;  %v6888_v29 = vpop.f32.mrb[20].mxu1 }
 0x715   : > { %v6189_v32 = vadd.f32 %v5995_v9, %v18045_v1  ;;  %v12452_v58 = vpop.f32.mrb[21].mxu0  ;;  %v12666_v53 = vpop.f32.mrb[21].mxu1  ;;  %v7138_v9 = vld [vmem:[%s13215_s24 + $0x116] sm:$0xff] }
 0x716   : > { %v5998_v3 = vpop.f32.mrb[22].mxu0  ;;  %v6891_v31 = vpop.f32.mrb[22].mxu1 }
 0x717   : > { %v6190_v50 = vadd.f32 %v5998_v3, %v18046_v34  ;;  %v12453_v49 = vpop.f32.mrb[23].mxu0  ;;  %v12667_v19 = vpop.f32.mrb[23].mxu1  ;;  %v16493_v45 = vadd.f32 %v6888_v29, %v6189_v32  ;;  %v7229_v34 = vpack.c.bf16 %v7138_v9, %v7137_v51  ;;  %v18053_v9 = vld [vmem:[#allocation37_spill] sm:$0xff] }
 0x718   : > { %v18050_v49 = vld [vmem:[#allocation36_spill] sm:$0xff] }
 0x719   : > { %18047 = vst [vmem:[#allocation29_spill] sm:$0xff] %v16493_v45  ;;  %12775 = vmatmul.mubr.msk.bf16.gmra.mrb[128].mxu0 %vm528_vm3, %v7228_v23  ;;  %v16496_v8 = vadd.f32 %v6891_v31, %v6190_v50  ;;  %v7139_v45 = vld [vmem:[%s13215_s24 + $0x11e] sm:$0xff] }
 0x71a   : > { %12778 = vmatprep.mubr.msk.bf16.mxu0 %vm13158_vm2, %v17672_v57 }
 0x71b   : > { %18048 = vst [vmem:[#allocation30_spill] sm:$0xff] %v16496_v8 }
 0x71c   : > { %v6003_v1 = vpop.f32.mrb[24].mxu0  ;;  %v6896_v62 = vpop.f32.mrb[24].mxu1 }
 0x71d   : > { %v6191_v58 = vadd.f32 %v6003_v1, %v18049_v33  ;;  %v12456_v53 = vpop.f32.mrb[25].mxu0  ;;  %v12670_v3 = vpop.f32.mrb[25].mxu1  ;;  %v7140_v1 = vld [vmem:[%s13215_s24 + $0x126] sm:$0xff] }
 0x71e   : > { %v6006_v29 = vpop.f32.mrb[26].mxu0  ;;  %v6899_v32 = vpop.f32.mrb[26].mxu1 }
 0x71f   : > { %v6192_v23 = vadd.f32 %v6006_v29, %v18050_v49  ;;  %v12457_v31 = vpop.f32.mrb[27].mxu0  ;;  %v12671_v50 = vpop.f32.mrb[27].mxu1  ;;  %v16504_v19 = vadd.f32 %v6896_v62, %v6191_v58  ;;  %v7230_v49 = vpack.c.bf16 %v7140_v1, %v7139_v45 }
 0x720   : > { %v18054_v31 = vld [vmem:[#allocation38_spill] sm:$0xff] }
 0x721   : > { %18051 = vst [vmem:[#allocation31_spill] sm:$0xff] %v16504_v19  ;;  %12779 = vmatmul.mubr.msk.bf16.gmra.mrb[132].mxu0 %vm528_vm3, %v7229_v34  ;;  %v16507_v8 = vadd.f32 %v6899_v32, %v6192_v23  ;;  %v7141_v19 = vld [vmem:[%s13215_s24 + $0x12e] sm:$0xff] }
 0x722   : > { %12782 = vmatprep.mubr.msk.bf16.mxu0 %vm13158_vm2, %v17672_v57 }
 0x723   : > { %18052 = vst [vmem:[#allocation32_spill] sm:$0xff] %v16507_v8 }
 0x724   : > { %v6011_v33 = vpop.f32.mrb[28].mxu0  ;;  %v6904_v51 = vpop.f32.mrb[28].mxu1 }
 0x725   : > { %v6193_v53 = vadd.f32 %v6011_v33, %v18053_v9  ;;  %v12460_v3 = vpop.f32.mrb[29].mxu0  ;;  %v12674_v29 = vpop.f32.mrb[29].mxu1  ;;  %v7142_v33 = vld [vmem:[%s13215_s24 + $0x136] sm:$0xff] }
 0x726   : > { %v6014_v62 = vpop.f32.mrb[30].mxu0  ;;  %v6907_v58 = vpop.f32.mrb[30].mxu1  ;;  %v18057_v3 = vld [vmem:[#allocation39_spill] sm:$0xff] }
 0x727   : > { %v6194_v34 = vadd.f32 %v6014_v62, %v18054_v31  ;;  %v12461_v32 = vpop.f32.mrb[31].mxu0  ;;  %v12675_v23 = vpop.f32.mrb[31].mxu1  ;;  %v16515_v50 = vadd.f32 %v6904_v51, %v6193_v53  ;;  %v7231_v31 = vpack.c.bf16 %v7142_v33, %v7141_v19  ;;  %v18061_v33 = vld [vmem:[#allocation41_spill] sm:$0xff] }
 0x729   : > { %18055 = vst [vmem:[#allocation33_spill] sm:$0xff] %v16515_v50  ;;  %12783 = vmatmul.mubr.msk.bf16.gmra.mrb[136].mxu0 %vm528_vm3, %v7230_v49  ;;  %v16518_v8 = vadd.f32 %v6907_v58, %v6194_v34  ;;  %v18059_v58 = vld [vmem:[#allocation40_spill] sm:$0xff]  ;;  %v7144_v50 = vld [vmem:[%s13215_s24 + $0x146] sm:$0xff] }
 0x72a   : > { %12786 = vmatprep.mubr.msk.bf16.mxu0 %vm13158_vm2, %v17672_v57 }
 0x72b   : > { %18056 = vst [vmem:[#allocation34_spill] sm:$0xff] %v16518_v8 }
 0x72c   : > { %v6019_v9 = vpop.f32.mrb[32].mxu0  ;;  %v6912_v45 = vpop.f32.mrb[32].mxu1 }
 0x72d   : > { %v12464_v1 = vpop.f32.mrb[33].mxu0  ;;  %v6195_v29 = vadd.f32 %v6019_v9, %v18057_v3  ;;  %v12678_v62 = vpop.f32.mrb[33].mxu1 }
 0x72e   : > { %v6022_v51 = vpop.f32.mrb[34].mxu0  ;;  %v6915_v53 = vpop.f32.mrb[34].mxu1  ;;  %v7143_v1 = vld [vmem:[%s13215_s24 + $0x13e] sm:$0xff] }
 0x72f   : > { %v16525_v32 = vadd.f32 %v6912_v45, %v6195_v29  ;;  %v12465_v49 = vpop.f32.mrb[35].mxu0  ;;  %v6196_v34 = vadd.f32 %v6022_v51, %v18059_v58  ;;  %v12679_v23 = vpop.f32.mrb[35].mxu1  ;;  %v7232_v62 = vpack.c.bf16 %v7144_v50, %v7143_v1  ;;  %v18065_v1 = vld [vmem:[#allocation43_spill] sm:$0xff] }
 0x731   : > { %18058 = vst [vmem:[#allocation35_spill] sm:$0xff] %v16525_v32  ;;  %v16528_v8 = vadd.f32 %v6915_v53, %v6196_v34  ;;  %12787 = vmatmul.mubr.msk.bf16.gmra.mrb[140].mxu0 %vm528_vm3, %v7231_v31  ;;  %v18062_v53 = vld [vmem:[#allocation42_spill] sm:$0xff]  ;;  %v7145_v32 = vld [vmem:[%s13215_s24 + $0x14e] sm:$0xff] }
 0x732   : > { %12790 = vmatprep.mubr.msk.bf16.mxu0 %vm13158_vm2, %v17672_v57 }
 0x733   : > { %18060 = vst [vmem:[#allocation36_spill] sm:$0xff] %v16528_v8 }
 0x734   : > { %v6027_v9 = vpop.f32.mrb[36].mxu0  ;;  %v6920_v19 = vpop.f32.mrb[36].mxu1 }
 0x735   : > { %v6197_v45 = vadd.f32 %v6027_v9, %v18061_v33  ;;  %v12468_v3 = vpop.f32.mrb[37].mxu0  ;;  %v12682_v29 = vpop.f32.mrb[37].mxu1  ;;  %v7146_v9 = vld [vmem:[%s13215_s24 + $0x156] sm:$0xff] }
 0x736   : > { %v6030_v51 = vpop.f32.mrb[38].mxu0  ;;  %v6923_v49 = vpop.f32.mrb[38].mxu1 }
 0x737   : > { %v6198_v58 = vadd.f32 %v6030_v51, %v18062_v53  ;;  %v16537_v34 = vadd.f32 %v6920_v19, %v6197_v45  ;;  %v12469_v31 = vpop.f32.mrb[39].mxu0  ;;  %v12683_v23 = vpop.f32.mrb[39].mxu1  ;;  %v7233_v45 = vpack.c.bf16 %v7146_v9, %v7145_v32  ;;  %v18069_v9 = vld [vmem:[#allocation45_spill] sm:$0xff] }
 0x739   : > { %18063 = vst [vmem:[#allocation37_spill] sm:$0xff] %v16537_v34  ;;  %v16539_v8 = vadd.f32 %v6923_v49, %v6198_v58  ;;  %12791 = vmatmul.mubr.msk.bf16.gmra.mrb[144].mxu0 %vm528_vm3, %v7232_v62  ;;  %v18066_v49 = vld [vmem:[#allocation44_spill] sm:$0xff]  ;;  %v7147_v34 = vld [vmem:[%s13215_s24 + $0x15e] sm:$0xff] }
 0x73a   : > { %12794 = vmatprep.mubr.msk.bf16.mxu0 %vm13158_vm2, %v17672_v57 }
 0x73b   : > { %18064 = vst [vmem:[#allocation38_spill] sm:$0xff] %v16539_v8 }
 0x73c   : > { %v6035_v33 = vpop.f32.mrb[40].mxu0  ;;  %v6928_v50 = vpop.f32.mrb[40].mxu1 }
 0x73d   : > { %v6199_v3 = vadd.f32 %v6035_v33, %v18065_v1  ;;  %v12472_v29 = vpop.f32.mrb[41].mxu0  ;;  %v12686_v19 = vpop.f32.mrb[41].mxu1  ;;  %v7148_v33 = vld [vmem:[%s13215_s24 + $0x166] sm:$0xff] }
 0x73e   : > { %v6038_v51 = vpop.f32.mrb[42].mxu0  ;;  %v6931_v53 = vpop.f32.mrb[42].mxu1 }
 0x73f   : > { %v6200_v58 = vadd.f32 %v6038_v51, %v18066_v49  ;;  %v16548_v31 = vadd.f32 %v6928_v50, %v6199_v3  ;;  %v12473_v62 = vpop.f32.mrb[43].mxu0  ;;  %v12687_v23 = vpop.f32.mrb[43].mxu1  ;;  %v7234_v3 = vpack.c.bf16 %v7148_v33, %v7147_v34  ;;  %v18073_v33 = vld [vmem:[#allocation47_spill] sm:$0xff] }
 0x741   : > { %18067 = vst [vmem:[#allocation39_spill] sm:$0xff] %v16548_v31  ;;  %v16550_v8 = vadd.f32 %v6931_v53, %v6200_v58  ;;  %12795 = vmatmul.mubr.msk.bf16.gmra.mrb[148].mxu0 %vm528_vm3, %v7233_v45  ;;  %v18070_v53 = vld [vmem:[#allocation46_spill] sm:$0xff]  ;;  %v7149_v31 = vld [vmem:[%s13215_s24 + $0x16e] sm:$0xff] }
 0x742   : > { %12798 = vmatprep.mubr.msk.bf16.mxu0 %vm13158_vm2, %v17672_v57 }
 0x743   : > { %18068 = vst [vmem:[#allocation40_spill] sm:$0xff] %v16550_v8 }
 0x744   : > { %v6043_v1 = vpop.f32.mrb[44].mxu0  ;;  %v6936_v32 = vpop.f32.mrb[44].mxu1 }
 0x745   : > { %v6201_v29 = vadd.f32 %v6043_v1, %v18069_v9  ;;  %v12476_v19 = vpop.f32.mrb[45].mxu0  ;;  %v12690_v50 = vpop.f32.mrb[45].mxu1  ;;  %v7150_v1 = vld [vmem:[%s13215_s24 + $0x176] sm:$0xff] }
 0x746   : > { %v6046_v51 = vpop.f32.mrb[46].mxu0  ;;  %v6939_v49 = vpop.f32.mrb[46].mxu1 }
 0x747   : > { %v6202_v58 = vadd.f32 %v6046_v51, %v18070_v53  ;;  %v16559_v62 = vadd.f32 %v6936_v32, %v6201_v29  ;;  %v12477_v45 = vpop.f32.mrb[47].mxu0  ;;  %v12691_v23 = vpop.f32.mrb[47].mxu1  ;;  %v7235_v29 = vpack.c.bf16 %v7150_v1, %v7149_v31  ;;  %v18077_v1 = vld [vmem:[#allocation49_spill] sm:$0xff] }
 0x749   : > { %18071 = vst [vmem:[#allocation41_spill] sm:$0xff] %v16559_v62  ;;  %v16561_v8 = vadd.f32 %v6939_v49, %v6202_v58  ;;  %12799 = vmatmul.mubr.msk.bf16.gmra.mrb[152].mxu0 %vm528_vm3, %v7234_v3  ;;  %v18074_v49 = vld [vmem:[#allocation48_spill] sm:$0xff]  ;;  %v7151_v62 = vld [vmem:[%s13215_s24 + $0x17e] sm:$0xff] }
 0x74a   : > { %12802 = vmatprep.mubr.msk.bf16.mxu0 %vm13158_vm2, %v17672_v57 }
 0x74b   : > { %18072 = vst [vmem:[#allocation42_spill] sm:$0xff] %v16561_v8 }
 0x74c   : > { %v6051_v9 = vpop.f32.mrb[48].mxu0  ;;  %v6944_v34 = vpop.f32.mrb[48].mxu1 }
 0x74d   : > { %v6203_v19 = vadd.f32 %v6051_v9, %v18073_v33  ;;  %v12480_v50 = vpop.f32.mrb[49].mxu0  ;;  %v12694_v32 = vpop.f32.mrb[49].mxu1  ;;  %v7152_v9 = vld [vmem:[%s13215_s24 + $0x186] sm:$0xff] }
 0x74e   : > { %v6054_v51 = vpop.f32.mrb[50].mxu0  ;;  %v6947_v53 = vpop.f32.mrb[50].mxu1 }
 0x74f   : > { %v6204_v58 = vadd.f32 %v6054_v51, %v18074_v49  ;;  %v16570_v45 = vadd.f32 %v6944_v34, %v6203_v19  ;;  %v12481_v3 = vpop.f32.mrb[51].mxu0  ;;  %v12695_v23 = vpop.f32.mrb[51].mxu1  ;;  %v7236_v19 = vpack.c.bf16 %v7152_v9, %v7151_v62  ;;  %v18081_v9 = vld [vmem:[#allocation51_spill] sm:$0xff] }
 0x751   : > { %18075 = vst [vmem:[#allocation43_spill] sm:$0xff] %v16570_v45  ;;  %v16572_v8 = vadd.f32 %v6947_v53, %v6204_v58  ;;  %12803 = vmatmul.mubr.msk.bf16.gmra.mrb[156].mxu0 %vm528_vm3, %v7235_v29  ;;  %v18078_v53 = vld [vmem:[#allocation50_spill] sm:$0xff]  ;;  %v7153_v45 = vld [vmem:[%s13215_s24 + $0x18e] sm:$0xff] }
 0x752   : > { %12806 = vmatprep.mubr.msk.bf16.mxu0 %vm13158_vm2, %v17672_v57 }
 0x753   : > { %18076 = vst [vmem:[#allocation44_spill] sm:$0xff] %v16572_v8 }
 0x754   : > { %v6059_v33 = vpop.f32.mrb[52].mxu0  ;;  %v6952_v31 = vpop.f32.mrb[52].mxu1 }
 0x755   : > { %v6205_v50 = vadd.f32 %v6059_v33, %v18077_v1  ;;  %v12484_v32 = vpop.f32.mrb[53].mxu0  ;;  %v12698_v34 = vpop.f32.mrb[53].mxu1  ;;  %v7154_v33 = vld [vmem:[%s13215_s24 + $0x196] sm:$0xff] }
 0x756   : > { %v6062_v51 = vpop.f32.mrb[54].mxu0  ;;  %v6955_v49 = vpop.f32.mrb[54].mxu1 }
 0x757   : > { %v6206_v58 = vadd.f32 %v6062_v51, %v18078_v53  ;;  %v16581_v3 = vadd.f32 %v6952_v31, %v6205_v50  ;;  %v12485_v29 = vpop.f32.mrb[55].mxu0  ;;  %v12699_v23 = vpop.f32.mrb[55].mxu1  ;;  %v7237_v50 = vpack.c.bf16 %v7154_v33, %v7153_v45  ;;  %v18085_v33 = vld [vmem:[#allocation53_spill] sm:$0xff] }
 0x759   : > { %18079 = vst [vmem:[#allocation45_spill] sm:$0xff] %v16581_v3  ;;  %v16583_v8 = vadd.f32 %v6955_v49, %v6206_v58  ;;  %12807 = vmatmul.mubr.msk.bf16.gmra.mrb[160].mxu0 %vm528_vm3, %v7236_v19  ;;  %v18082_v49 = vld [vmem:[#allocation52_spill] sm:$0xff]  ;;  %v7155_v3 = vld [vmem:[%s13215_s24 + $0x19e] sm:$0xff] }
 0x75a   : > { %12810 = vmatprep.mubr.msk.bf16.mxu0 %vm13158_vm2, %v17672_v57 }
 0x75b   : > { %18080 = vst [vmem:[#allocation46_spill] sm:$0xff] %v16583_v8 }
 0x75c   : > { %v6067_v1 = vpop.f32.mrb[56].mxu0  ;;  %v6960_v62 = vpop.f32.mrb[56].mxu1 }
 0x75d   : > { %v6207_v32 = vadd.f32 %v6067_v1, %v18081_v9  ;;  %v12488_v34 = vpop.f32.mrb[57].mxu0  ;;  %v12702_v31 = vpop.f32.mrb[57].mxu1  ;;  %v7156_v1 = vld [vmem:[%s13215_s24 + $0x1a6] sm:$0xff] }
 0x75e   : > { %v6070_v51 = vpop.f32.mrb[58].mxu0  ;;  %v6963_v53 = vpop.f32.mrb[58].mxu1 }
 0x75f   : > { %v6208_v58 = vadd.f32 %v6070_v51, %v18082_v49  ;;  %v16592_v29 = vadd.f32 %v6960_v62, %v6207_v32  ;;  %v12489_v19 = vpop.f32.mrb[59].mxu0  ;;  %v12703_v23 = vpop.f32.mrb[59].mxu1  ;;  %v7238_v32 = vpack.c.bf16 %v7156_v1, %v7155_v3  ;;  %v18089_v1 = vld [vmem:[#allocation55_spill] sm:$0xff] }
 0x761   : > { %18083 = vst [vmem:[#allocation47_spill] sm:$0xff] %v16592_v29  ;;  %v16594_v8 = vadd.f32 %v6963_v53, %v6208_v58  ;;  %12811 = vmatmul.mubr.msk.bf16.gmra.mrb[164].mxu0 %vm528_vm3, %v7237_v50  ;;  %v18086_v53 = vld [vmem:[#allocation54_spill] sm:$0xff]  ;;  %v7157_v29 = vld [vmem:[%s13215_s24 + $0x1ae] sm:$0xff] }
 0x762   : > { %12814 = vmatprep.mubr.msk.bf16.mxu0 %vm13158_vm2, %v17672_v57 }
 0x763   : > { %18084 = vst [vmem:[#allocation48_spill] sm:$0xff] %v16594_v8 }
 0x764   : > { %v6075_v9 = vpop.f32.mrb[60].mxu0  ;;  %v6968_v45 = vpop.f32.mrb[60].mxu1 }
 0x765   : > { %v6209_v34 = vadd.f32 %v6075_v9, %v18085_v33  ;;  %v12492_v31 = vpop.f32.mrb[61].mxu0  ;;  %v12706_v62 = vpop.f32.mrb[61].mxu1  ;;  %v7158_v9 = vld [vmem:[%s13215_s24 + $0x1b6] sm:$0xff] }
 0x766   : > { %v6078_v51 = vpop.f32.mrb[62].mxu0  ;;  %v6971_v49 = vpop.f32.mrb[62].mxu1 }
 0x767   : > { %v6210_v58 = vadd.f32 %v6078_v51, %v18086_v53  ;;  %v16603_v19 = vadd.f32 %v6968_v45, %v6209_v34  ;;  %v12493_v50 = vpop.f32.mrb[63].mxu0  ;;  %v12707_v23 = vpop.f32.mrb[63].mxu1  ;;  %v7239_v34 = vpack.c.bf16 %v7158_v9, %v7157_v29 }
 0x769   : > { %18087 = vst [vmem:[#allocation49_spill] sm:$0xff] %v16603_v19  ;;  %v16605_v8 = vadd.f32 %v6971_v49, %v6210_v58  ;;  %12815 = vmatmul.mubr.msk.bf16.gmra.mrb[168].mxu0 %vm528_vm3, %v7238_v32  ;;  %v18090_v49 = vld [vmem:[#allocation56_spill] sm:$0xff]  ;;  %v7159_v19 = vld [vmem:[%s13215_s24 + $0x1be] sm:$0xff] }
 0x76a   : > { %12818 = vmatprep.mubr.msk.bf16.mxu0 %vm13158_vm2, %v17672_v57 }
 0x76b   : > { %18088 = vst [vmem:[#allocation50_spill] sm:$0xff] %v16605_v8 }
 0x76c   : > { %v6083_v33 = vpop.f32.mrb[64].mxu0  ;;  %v6976_v3 = vpop.f32.mrb[64].mxu1 }
 0x76d   : > { %v6211_v31 = vadd.f32 %v6083_v33, %v18089_v1  ;;  %v12496_v62 = vpop.f32.mrb[65].mxu0  ;;  %v12710_v45 = vpop.f32.mrb[65].mxu1  ;;  %v7160_v33 = vld [vmem:[%s13215_s24 + $0x1c6] sm:$0xff] }
 0x76e   : > { %v6086_v51 = vpop.f32.mrb[66].mxu0  ;;  %v6979_v53 = vpop.f32.mrb[66].mxu1 }
 0x76f   : > { %v6212_v58 = vadd.f32 %v6086_v51, %v18090_v49  ;;  %v16614_v50 = vadd.f32 %v6976_v3, %v6211_v31  ;;  %v12497_v32 = vpop.f32.mrb[67].mxu0  ;;  %v12711_v23 = vpop.f32.mrb[67].mxu1  ;;  %v7240_v31 = vpack.c.bf16 %v7160_v33, %v7159_v19 }
 0x770   : > { %v7161_v23 = vld [vmem:[%s13215_s24 + $0x1ce] sm:$0xff] }
 0x771   : > { %v16616_v8 = vadd.f32 %v6979_v53, %v6212_v58  ;;  %12819 = vmatmul.mubr.msk.bf16.gmra.mrb[172].mxu0 %vm528_vm3, %v7239_v34 }
 0x772   : > { %12822 = vmatprep.mubr.msk.bf16.mxu0 %vm13158_vm2, %v17672_v57 }
 0x774   : > { %v6091_v1 = vpop.f32.mrb[68].mxu0  ;;  %v6984_v29 = vpop.f32.mrb[68].mxu1 }
 0x775   : > { %v6213_v9 = vadd.f32 %v6091_v1, %v15905_v56  ;;  %v12500_v62 = vpop.f32.mrb[69].mxu0  ;;  %v12714_v3 = vpop.f32.mrb[69].mxu1  ;;  %v7162_v56 = vld [vmem:[%s13215_s24 + $0x1d6] sm:$0xff] }
 0x776   : > { %v6094_v45 = vpop.f32.mrb[70].mxu0  ;;  %v6987_v51 = vpop.f32.mrb[70].mxu1 }
 0x777   : > { %v6214_v53 = vadd.f32 %v6094_v45, %v15911_v46  ;;  %v16625_v49 = vadd.f32 %v6984_v29, %v6213_v9  ;;  %v12501_v34 = vpop.f32.mrb[71].mxu0  ;;  %v12715_v58 = vpop.f32.mrb[71].mxu1  ;;  %v7241_v9 = vpack.c.bf16 %v7162_v56, %v7161_v23 }
 0x778   : > { %v7164_v58 = vld [vmem:[%s13215_s24 + $0x1e6] sm:$0xff] }
 0x779   : > { %v16627_v32 = vadd.f32 %v6987_v51, %v6214_v53  ;;  %12823 = vmatmul.mubr.msk.bf16.gmra.mrb[176].mxu0 %vm528_vm3, %v7240_v31 }
 0x77a   : > { %12826 = vmatprep.mubr.msk.bf16.mxu0 %vm13158_vm2, %v17672_v57 }
 0x77c   : > { %v6099_v1 = vpop.f32.mrb[72].mxu0  ;;  %v6992_v19 = vpop.f32.mrb[72].mxu1 }
 0x77d   : > { %v6215_v33 = vadd.f32 %v6099_v1, %v15922_v37  ;;  %v12504_v46 = vpop.f32.mrb[73].mxu0  ;;  %v12718_v29 = vpop.f32.mrb[73].mxu1  ;;  %v7163_v37 = vld [vmem:[%s13215_s24 + $0x1de] sm:$0xff] }
 0x77e   : > { %v6102_v62 = vpop.f32.mrb[74].mxu0  ;;  %v6995_v3 = vpop.f32.mrb[74].mxu1 }
 0x77f   : > { %v6216_v45 = vadd.f32 %v6102_v62, %v15927_v52  ;;  %v16636_v51 = vadd.f32 %v6992_v19, %v6215_v33  ;;  %v12505_v31 = vpop.f32.mrb[75].mxu0  ;;  %v12719_v53 = vpop.f32.mrb[75].mxu1  ;;  %v7242_v19 = vpack.c.bf16 %v7164_v58, %v7163_v37 }
 0x780   : > { %v7166_v31 = vld [vmem:[%s13215_s24 + $0x1f6] sm:$0xff] }
 0x781   : > { %v16638_v34 = vadd.f32 %v6995_v3, %v6216_v45  ;;  %12827 = vmatmul.mubr.msk.bf16.gmra.mrb[180].mxu0 %vm528_vm3, %v7241_v9  ;;  %v7165_v45 = vld [vmem:[%s13215_s24 + $0x1ee] sm:$0xff] }
 0x782   : > { %12830 = vmatprep.mubr.msk.bf16.mxu0 %vm13158_vm2, %v17672_v57 }
 0x784   : > { %v6107_v23 = vpop.f32.mrb[76].mxu0  ;;  %v7000_v56 = vpop.f32.mrb[76].mxu1 }
 0x785   : > { %v6217_v1 = vadd.f32 %v6107_v23, %v15937_v4  ;;  %v12508_v52 = vpop.f32.mrb[77].mxu0  ;;  %v12722_v33 = vpop.f32.mrb[77].mxu1  ;;  %v16656_v4 = vld [vmem:[%s17663_s2] ss:$0 sm:$0xff]  ;;  %v7243_v23 = vpack.c.bf16 %v7166_v31, %v7165_v45 }
 0x786   : > { %v6110_v46 = vpop.f32.mrb[78].mxu0  ;;  %v7003_v29 = vpop.f32.mrb[78].mxu1 }
 0x787   : > { %v16646_v62 = vadd.f32 %v7000_v56, %v6217_v1  ;;  %v12509_v3 = vpop.f32.mrb[79].mxu0  ;;  %v12723_v9 = vpop.f32.mrb[79].mxu1  ;;  %v7167_v46 = vld [vmem:[%s13215_s24 + $0x1fe] sm:$0xff]  ;;  %v7168_v29 = vld [vmem:[%s13215_s24 + $0x206] sm:$0xff] }
 0x789   : > { %12831 = vmatmul.mubr.msk.bf16.gmra.mrb[184].mxu0 %vm528_vm3, %v7242_v19 }
 0x78a   : > { %12834 = vmatprep.mubr.msk.bf16.mxu0 %vm13158_vm2, %v17672_v57 }
 0x78c   : > { %v7466_v53 = vpop.f32.mrb[80].mxu0 }
 0x78d   : > { %v7888_v37 = vadd.f32 %v7466_v53, %v15951_v15  ;;  %v12728_v58 = vpop.f32.mrb[81].mxu0  ;;  %v7244_v53 = vpack.c.bf16 %v7168_v29, %v7167_v46 }
 0x78e   : > { %v7469_v56 = vpop.f32.mrb[82].mxu0 }
 0x78f   : > { %v8000_v1 = vadd.f32 %v16656_v4, %v7888_v37  ;;  %v7889_v52 = vadd.f32 %v7469_v56, %v15956_v44  ;;  %v12729_v19 = vpop.f32.mrb[83].mxu0 }
 0x790   : > { %v7170_v19 = vld [vmem:[%s13215_s24 + $0x216] sm:$0xff] }
 0x791   : > { %v8001_v33 = vadd.f32 %v16656_v4, %v7889_v52  ;;  %12835 = vmatmul.mubr.msk.bf16.gmra.mrb[188].mxu0 %vm528_vm3, %v7243_v23  ;;  %v8105_v15 = vmax.f32 %v8000_v1, 0.0  ;;  %v7169_v1 = vld [vmem:[%s13215_s24 + $0x20e] sm:$0xff] }
 0x792   : > { %12838 = vmatprep.mubr.msk.bf16.mxu0 %vm13158_vm2, %v17672_v57 }
 0x793   : > { %v8106_v3 = vmax.f32 %v8001_v33, 0.0 }
 0x794   : > { %v7474_v9 = vpop.f32.mrb[84].mxu0 }
 0x795   : > { %v16667_v45 = vpack.c.bf16 %v8106_v3, %v8105_v15  ;;  %v7890_v31 = vadd.f32 %v7474_v9, %v15967_v30  ;;  %v12732_v44 = vpop.f32.mrb[85].mxu0  ;;  %v7245_v3 = vpack.c.bf16 %v7170_v19, %v7169_v1 }
 0x796   : > { %v7477_v37 = vpop.f32.mrb[86].mxu0 }
 0x797   : > { %v8002_v58 = vadd.f32 %v16656_v4, %v7890_v31  ;;  %v7891_v23 = vadd.f32 %v7477_v37, %v15972_v27  ;;  %v12733_v56 = vpop.f32.mrb[87].mxu0 }
 0x799   : > { %v8003_v52 = vadd.f32 %v16656_v4, %v7891_v23  ;;  %12839 = vmatmul.mubr.msk.bf16.gmra.mrb[192].mxu0 %vm528_vm3, %v7244_v53  ;;  %v8107_v30 = vmax.f32 %v8002_v58, 0.0  ;;  %v7171_v58 = vld [vmem:[%s13215_s24 + $0x21e] sm:$0xff]  ;;  %v7172_v23 = vld [vmem:[%s13215_s24 + $0x226] sm:$0xff] }
 0x79a   : > { %12842 = vmatprep.mubr.msk.bf16.mxu0 %vm13158_vm2, %v17672_v57 }
 0x79b   : > { %v8108_v33 = vmax.f32 %v8003_v52, 0.0 }
 0x79c   : > { %v7482_v46 = vpop.f32.mrb[88].mxu0 }
 0x79d   : > { %v16678_v29 = vpack.c.bf16 %v8108_v33, %v8107_v30  ;;  %v7892_v15 = vadd.f32 %v7482_v46, %v15983_v14  ;;  %v12736_v27 = vpop.f32.mrb[89].mxu0  ;;  %v7246_v30 = vpack.c.bf16 %v7172_v23, %v7171_v58 }
 0x79e   : > { %v7485_v9 = vpop.f32.mrb[90].mxu0 }
 0x79f   : > { %v8004_v31 = vadd.f32 %v16656_v4, %v7892_v15  ;;  %v7893_v44 = vadd.f32 %v7485_v9, %v15988_v63  ;;  %v12737_v53 = vpop.f32.mrb[91].mxu0 }
 0x7a1   : > { %v8005_v37 = vadd.f32 %v16656_v4, %v7893_v44  ;;  %12843 = vmatmul.mubr.msk.bf16.gmra.mrb[196].mxu0 %vm528_vm3, %v7245_v3  ;;  %v8109_v56 = vmax.f32 %v8004_v31, 0.0  ;;  %v13022_v3 = vld [vmem:[%s17664_s3 + $0x4] ss:$28 sps:$4 sm:$0xff]   ;;  %v7174_v31 = vld [vmem:[%s13215_s24 + $0x236] sm:$0xff] }
 0x7a2   : > { %12846 = vmatprep.mubr.msk.bf16.mxu0 %vm13158_vm2, %v17672_v57  ;;  %8883 = vmatprep.mubr.bf16.mxu1 %v13022_v3 }
 0x7a3   : > { %v8110_v14 = vmax.f32 %v8005_v37, 0.0 }
 0x7a4   : > { %v7490_v52 = vpop.f32.mrb[92].mxu0 }
 0x7a5   : > { %v16689_v1 = vpack.c.bf16 %v8110_v14, %v8109_v56  ;;  %v7894_v19 = vadd.f32 %v7490_v52, %v15999_v7  ;;  %v12740_v63 = vpop.f32.mrb[93].mxu0  ;;  %v7173_v7 = vld [vmem:[%s13215_s24 + $0x22e] sm:$0xff] }
 0x7a6   : > { %v7493_v33 = vpop.f32.mrb[94].mxu0  ;;  %v7247_v56 = vpack.c.bf16 %v7174_v31, %v7173_v7 }
 0x7a7   : > { %v8006_v46 = vadd.f32 %v16656_v4, %v7894_v19  ;;  %v7895_v15 = vadd.f32 %v7493_v33, %v16004_v2  ;;  %v12741_v27 = vpop.f32.mrb[95].mxu0  ;;  %v7175_v33 = vld [vmem:[%s13215_s24 + $0x23e] sm:$0xff] }
 0x7a9   : > { %v8007_v9 = vadd.f32 %v16656_v4, %v7895_v15  ;;  %12847 = vmatmul.mubr.msk.bf16.gmra.mrb[200].mxu0 %vm528_vm3, %v7246_v30  ;;  %v8111_v44 = vmax.f32 %v8006_v46, 0.0  ;;  %v7176_v46 = vld [vmem:[%s13215_s24 + $0x246] sm:$0xff] }
 0x7aa   : > { %12850 = vmatprep.mubr.msk.bf16.mxu0 %vm13158_vm2, %v17672_v57  ;;  %v7248_v7 = vpack.c.bf16 %v7176_v46, %v7175_v33 }
 0x7ab   : > { %v8112_v53 = vmax.f32 %v8007_v9, 0.0 }
 0x7ac   : > { %v7498_v2 = vpop.f32.mrb[96].mxu0 }
 0x7ad   : > { %v16703_v37 = vpack.c.bf16 %v8112_v53, %v8111_v44  ;;  %v7896_v58 = vadd.f32 %v7498_v2, %v16015_v12  ;;  %v12744_v23 = vpop.f32.mrb[97].mxu0 }
 0x7ae   : > { %v7501_v14 = vpop.f32.mrb[98].mxu0  ;;  %v7177_v23 = vld [vmem:[%s13215_s24 + $0x24e] sm:$0xff] }
 0x7af   : > { %v8008_v52 = vadd.f32 %v16656_v4, %v7896_v58  ;;  %v7897_v19 = vadd.f32 %v7501_v14, %v16020_v60  ;;  %v12745_v63 = vpop.f32.mrb[99].mxu0 }
 0x7b1   : > { %v8009_v30 = vadd.f32 %v16656_v4, %v7897_v19  ;;  %12851 = vmatmul.mubr.msk.bf16.gmra.mrb[204].mxu0 %vm528_vm3, %v7247_v56  ;;  %v8113_v12 = vmax.f32 %v8008_v52, 0.0  ;;  %v7178_v56 = vld [vmem:[%s13215_s24 + $0x256] sm:$0xff] }
 0x7b2   : > { %12854 = vmatprep.mubr.msk.bf16.mxu0 %vm13158_vm2, %v17672_v57 }
 0x7b3   : > { %v8114_v15 = vmax.f32 %v8009_v30, 0.0  ;;  %v7249_v30 = vpack.c.bf16 %v7178_v56, %v7177_v23 }
 0x7b4   : > { %v7506_v27 = vpop.f32.mrb[100].mxu0 }
 0x7b5   : > { %v16714_v3 = vpack.c.bf16 %v8114_v15, %v8113_v12  ;;  %v7898_v9 = vadd.f32 %v7506_v27, %v16031_v21  ;;  %v12748_v60 = vpop.f32.mrb[101].mxu0 }
 0x7b6   : > { %v7509_v31 = vpop.f32.mrb[102].mxu0  ;;  %v7180_v60 = vld [vmem:[%s13215_s24 + $0x266] sm:$0xff] }
 0x7b7   : > { %v8010_v44 = vadd.f32 %v16656_v4, %v7898_v9  ;;  %v7899_v53 = vadd.f32 %v7509_v31, %v16036_v39  ;;  %v12749_v2 = vpop.f32.mrb[103].mxu0  ;;  %v7179_v9 = vld [vmem:[%s13215_s24 + $0x25e] sm:$0xff] }
 0x7b9   : > { %v8011_v58 = vadd.f32 %v16656_v4, %v7899_v53  ;;  %12855 = vmatmul.mubr.msk.bf16.gmra.mrb[208].mxu0 %vm528_vm3, %v7248_v7  ;;  %v8115_v21 = vmax.f32 %v8010_v44, 0.0  ;;  %v18091_v53 = vld [vmem:[#allocation57_spill] sm:$0xff] }
 0x7ba   : > { %12858 = vmatprep.mubr.msk.bf16.mxu0 %vm13158_vm2, %v17672_v57 }
 0x7bb   : > { %v8116_v14 = vmax.f32 %v8011_v58, 0.0  ;;  %v7250_v58 = vpack.c.bf16 %v7180_v60, %v7179_v9 }
 0x7bc   : > { %v7514_v52 = vpop.f32.mrb[104].mxu0 }
 0x7bd   : > { %v16725_v19 = vpack.c.bf16 %v8116_v14, %v8115_v21  ;;  %v7900_v63 = vadd.f32 %v7514_v52, %v16047_v28  ;;  %v12752_v39 = vpop.f32.mrb[105].mxu0  ;;  %v18092_v21 = vld [vmem:[#allocation58_spill] sm:$0xff] }
 0x7be   : > { %v7517_v33 = vpop.f32.mrb[106].mxu0  ;;  %v7181_v39 = vld [vmem:[%s13215_s24 + $0x26e] sm:$0xff] }
 0x7bf   : > { %v8012_v46 = vadd.f32 %v16656_v4, %v7900_v63  ;;  %v7901_v12 = vadd.f32 %v7517_v33, %v16052_v20  ;;  %v12753_v15 = vpop.f32.mrb[107].mxu0 }
 0x7c1   : > { %v8013_v27 = vadd.f32 %v16656_v4, %v7901_v12  ;;  %12859 = vmatmul.mubr.msk.bf16.gmra.mrb[212].mxu0 %vm528_vm3, %v7249_v30  ;;  %v8117_v28 = vmax.f32 %v8012_v46, 0.0  ;;  %v7182_v30 = vld [vmem:[%s13215_s24 + $0x276] sm:$0xff] }
 0x7c2   : > { %12862 = vmatprep.mubr.msk.bf16.mxu0 %vm13158_vm2, %v17672_v57 }
 0x7c3   : > { %v8118_v7 = vmax.f32 %v8013_v27, 0.0  ;;  %v18093_v27 = vld [vmem:[#allocation59_spill] sm:$0xff] }
 0x7c4   : > { %v7522_v31 = vpop.f32.mrb[108].mxu0 }
 0x7c5   : > { %v16736_v44 = vpack.c.bf16 %v8118_v7, %v8117_v28  ;;  %v7902_v2 = vadd.f32 %v7522_v31, %v18091_v53  ;;  %v12756_v20 = vpop.f32.mrb[109].mxu0  ;;  %v7251_v28 = vpack.c.bf16 %v7182_v30, %v7181_v39  ;;  %v18094_v53 = vld [vmem:[#allocation60_spill] sm:$0xff] }
 0x7c6   : > { %v7525_v23 = vpop.f32.mrb[110].mxu0 }
 0x7c7   : > { %v8014_v56 = vadd.f32 %v16656_v4, %v7902_v2  ;;  %v7903_v14 = vadd.f32 %v7525_v23, %v18092_v21  ;;  %v12757_v52 = vpop.f32.mrb[111].mxu0  ;;  %v7183_v23 = vld [vmem:[%s13215_s24 + $0x27e] sm:$0xff] }
 0x7c9   : > { %v8015_v63 = vadd.f32 %v16656_v4, %v7903_v14  ;;  %12863 = vmatmul.mubr.msk.bf16.gmra.mrb[216].mxu0 %vm528_vm3, %v7250_v58  ;;  %v8119_v33 = vmax.f32 %v8014_v56, 0.0  ;;  %v7184_v56 = vld [vmem:[%s13215_s24 + $0x286] sm:$0xff] }
 0x7ca   : > { %12866 = vmatprep.mubr.msk.bf16.mxu0 %vm13158_vm2, %v17672_v57 }
 0x7cb   : > { %v8120_v46 = vmax.f32 %v8015_v63, 0.0 }
 0x7cc   : > { %v7530_v12 = vpop.f32.mrb[112].mxu0 }
 0x7cd   : > { %v16747_v15 = vpack.c.bf16 %v8120_v46, %v8119_v33  ;;  %v7904_v9 = vadd.f32 %v7530_v12, %v18093_v27  ;;  %v12760_v60 = vpop.f32.mrb[113].mxu0  ;;  %v7252_v33 = vpack.c.bf16 %v7184_v56, %v7183_v23 }
 0x7ce   : > { %v7533_v7 = vpop.f32.mrb[114].mxu0 }
 0x7cf   : > { %v8016_v31 = vadd.f32 %v16656_v4, %v7904_v9  ;;  %v7905_v2 = vadd.f32 %v7533_v7, %v18094_v53  ;;  %v12761_v20 = vpop.f32.mrb[115].mxu0 }
 0x7d1   : > { %v8017_v58 = vadd.f32 %v16656_v4, %v7905_v2  ;;  %12867 = vmatmul.mubr.msk.bf16.gmra.mrb[220].mxu0 %vm528_vm3, %v7251_v28  ;;  %v8121_v21 = vmax.f32 %v8016_v31, 0.0  ;;  %v7186_v28 = vld [vmem:[%s13215_s24 + $0x296] sm:$0xff] }
 0x7d2   : > { %12870 = vmatprep.mubr.msk.bf16.mxu0 %vm13158_vm2, %v17672_v57 }
 0x7d3   : > { %v8122_v14 = vmax.f32 %v8017_v58, 0.0 }
 0x7d4   : > { %v7538_v52 = vpop.f32.mrb[116].mxu0 }
 0x7d5   : > { %v7906_v63 = vadd.f32 %v7538_v52, %v16095_v38  ;;  %v12764_v39 = vpop.f32.mrb[117].mxu0  ;;  %v8218_v30 = vpack.c.bf16 %v8122_v14, %v8121_v21  ;;  %v7185_v38 = vld [vmem:[%s13215_s24 + $0x28e] sm:$0xff]  ;;  %v7188_v52 = vld [vmem:[%s13215_s24 + $0x2a6] sm:$0xff] }
 0x7d6   : > { %v7541_v46 = vpop.f32.mrb[118].mxu0  ;;  %v7253_v58 = vpack.c.bf16 %v7186_v28, %v7185_v38  ;;  %v7190_v28 = vld [vmem:[%s13215_s24 + $0x2b6] sm:$0xff] }
 0x7d7   : > { %v8018_v12 = vadd.f32 %v16656_v4, %v7906_v63  ;;  %v7907_v27 = vadd.f32 %v7541_v46, %v16100_v40  ;;  %10712 = vmatprep.subr.bf16.mxu1 %v8218_v30  ;;  %v12765_v9 = vpop.f32.mrb[119].mxu0 }
 0x7d8   : > { %10713 = vmatpush3.bf16.msra.mxu1 %v16667_v45 }
 0x7d9   : > { %v8019_v60 = vadd.f32 %v16656_v4, %v7907_v27  ;;  %12871 = vmatmul.mubr.msk.bf16.gmra.mrb[224].mxu0 %vm528_vm3, %v7252_v33  ;;  %v8123_v7 = vmax.f32 %v8018_v12, 0.0 }
 0x7da   : > { %12874 = vmatprep.mubr.msk.bf16.mxu0 %vm13158_vm2, %v17672_v57 }
 0x7db   : > { %v8124_v31 = vmax.f32 %v8019_v60, 0.0 }
 0x7dc   : > { %v7546_v53 = vpop.f32.mrb[120].mxu0 }
 0x7dd   : > { %v7908_v40 = vadd.f32 %v7546_v53, %v16111_v5  ;;  %v12768_v2 = vpop.f32.mrb[121].mxu0  ;;  %v8219_v20 = vpack.c.bf16 %v8124_v31, %v8123_v7  ;;  %v7187_v5 = vld [vmem:[%s13215_s24 + $0x29e] sm:$0xff] }
 0x7de   : > { %v7549_v45 = vpop.f32.mrb[122].mxu0  ;;  %v7254_v12 = vpack.c.bf16 %v7188_v52, %v7187_v5 }
 0x7df   : > { %v8020_v23 = vadd.f32 %v16656_v4, %v7908_v40  ;;  %v7909_v56 = vadd.f32 %v7549_v45, %v16116_v18  ;;  %10714 = vmatprep.subr.bf16.mxu1 %v8219_v20  ;;  %v12769_v21 = vpop.f32.mrb[123].mxu0 }
 0x7e0   : > { %10715 = vmatpush3.bf16.msra.mxu1 %v16678_v29  ;;  %v7192_v21 = vld [vmem:[%s13215_s24 + $0x2c6] sm:$0xff] }
 0x7e1   : > { %v8021_v14 = vadd.f32 %v16656_v4, %v7909_v56  ;;  %12875 = vmatmul.mubr.msk.bf16.gmra.mrb[228].mxu0 %vm528_vm3, %v7253_v58  ;;  %v8125_v63 = vmax.f32 %v8020_v23, 0.0 }
 0x7e2   : > { %12878 = vmatprep.mubr.msk.bf16.mxu0 %vm13158_vm2, %v17672_v57 }
 0x7e3   : > { %v8126_v39 = vmax.f32 %v8021_v14, 0.0 }
 0x7e4   : > { %v7554_v30 = vpop.f32.mrb[124].mxu0 }
 0x7e5   : > { %v7910_v18 = vadd.f32 %v7554_v30, %v16127_v26  ;;  %v12772_v33 = vpop.f32.mrb[125].mxu0  ;;  %v8220_v46 = vpack.c.bf16 %v8126_v39, %v8125_v63  ;;  %v7189_v26 = vld [vmem:[%s13215_s24 + $0x2ae] sm:$0xff] }
 0x7e6   : > { %v7557_v29 = vpop.f32.mrb[126].mxu0  ;;  %v7255_v20 = vpack.c.bf16 %v7190_v28, %v7189_v26 }
 0x7e7   : > { %v8022_v27 = vadd.f32 %v16656_v4, %v7910_v18  ;;  %v7911_v9 = vadd.f32 %v7557_v29, %v16132_v47  ;;  %10716 = vmatprep.subr.bf16.mxu1 %v8220_v46  ;;  %v12773_v60 = vpop.f32.mrb[127].mxu0  ;;  %v7194_v29 = vld [vmem:[%s13215_s24 + $0x2d6] sm:$0xff] }
 0x7e8   : > { %10717 = vmatpush3.bf16.msra.mxu1 %v16689_v1 }
 0x7e9   : > { %v8023_v38 = vadd.f32 %v16656_v4, %v7911_v9  ;;  %12879 = vmatmul.mubr.msk.bf16.gmra.mrb[232].mxu0 %vm528_vm3, %v7254_v12  ;;  %v8127_v7 = vmax.f32 %v8022_v27, 0.0 }
 0x7ea   : > { %12882 = vmatprep.mubr.msk.bf16.mxu0 %vm13158_vm2, %v17672_v57 }
 0x7eb   : > { %v8128_v31 = vmax.f32 %v8023_v38, 0.0 }
 0x7ec   : > { %v7562_v53 = vpop.f32.mrb[128].mxu0 }
 0x7ed   : > { %v7912_v47 = vadd.f32 %v7562_v53, %v16143_v35  ;;  %v12776_v40 = vpop.f32.mrb[129].mxu0  ;;  %v8221_v2 = vpack.c.bf16 %v8128_v31, %v8127_v7  ;;  %v7191_v35 = vld [vmem:[%s13215_s24 + $0x2be] sm:$0xff] }
 0x7ee   : > { %v7565_v1 = vpop.f32.mrb[130].mxu0  ;;  %v7256_v30 = vpack.c.bf16 %v7192_v21, %v7191_v35  ;;  %v7196_v40 = vld [vmem:[%s13215_s24 + $0x2e6] sm:$0xff] }
 0x7ef   : > { %v8024_v58 = vadd.f32 %v16656_v4, %v7912_v47  ;;  %v7913_v45 = vadd.f32 %v7565_v1, %v16148_v0  ;;  %10718 = vmatprep.subr.bf16.mxu1 %v8221_v2  ;;  %v12777_v23 = vpop.f32.mrb[131].mxu0 }
 0x7f0   : > { %10719 = vmatpush3.bf16.msra.mxu1 %v16703_v37 }
 0x7f1   : > { %v8025_v56 = vadd.f32 %v16656_v4, %v7913_v45  ;;  %12883 = vmatmul.mubr.msk.bf16.gmra.mrb[236].mxu0 %vm528_vm3, %v7255_v20  ;;  %v8129_v14 = vmax.f32 %v8024_v58, 0.0 }
 0x7f2   : > { %12886 = vmatprep.mubr.msk.bf16.mxu0 %vm13158_vm2, %v17672_v57 }
 0x7f3   : > { %v8130_v5 = vmax.f32 %v8025_v56, 0.0 }
 0x7f4   : > { %v7570_v52 = vpop.f32.mrb[132].mxu0 }
 0x7f5   : > { %v7914_v0 = vadd.f32 %v7570_v52, %v16159_v59  ;;  %v12780_v63 = vpop.f32.mrb[133].mxu0  ;;  %v8222_v39 = vpack.c.bf16 %v8130_v5, %v8129_v14  ;;  %v7193_v59 = vld [vmem:[%s13215_s24 + $0x2ce] sm:$0xff]  ;;  %v7198_v5 = vld [vmem:[%s13215_s24 + $0x2f6] sm:$0xff] }
 0x7f6   : > { %v7573_v37 = vpop.f32.mrb[134].mxu0  ;;  %v7257_v28 = vpack.c.bf16 %v7194_v29, %v7193_v59  ;;  %v7200_v29 = vld [vmem:[%s13215_s24 + $0x306] sm:$0xff] }
 0x7f7   : > { %v8026_v18 = vadd.f32 %v16656_v4, %v7914_v0  ;;  %v7915_v33 = vadd.f32 %v7573_v37, %v16164_v42  ;;  %10720 = vmatprep.subr.bf16.mxu1 %v8222_v39  ;;  %v12781_v46 = vpop.f32.mrb[135].mxu0 }
 0x7f8   : > { %10721 = vmatpush3.bf16.msra.mxu1 %v16714_v3 }
 0x7f9   : > { %v8027_v12 = vadd.f32 %v16656_v4, %v7915_v33  ;;  %12887 = vmatmul.mubr.msk.bf16.gmra.mrb[240].mxu0 %vm528_vm3, %v7256_v30  ;;  %v8131_v27 = vmax.f32 %v8026_v18, 0.0 }
 0x7fa   : > { %12890 = vmatprep.mubr.msk.bf16.mxu0 %vm13158_vm2, %v17672_v57 }
 0x7fb   : > { %v8132_v9 = vmax.f32 %v8027_v12, 0.0  ;;  %v13020_v12 = vld [vmem:[%s17664_s3] ss:$28 sps:$4 sm:$0xff]  }
 0x7fc   : > { %v7578_v60 = vpop.f32.mrb[136].mxu0 }
 0x7fd   : > { %v7916_v42 = vadd.f32 %v7578_v60, %v16175_v24  ;;  %v12784_v38 = vpop.f32.mrb[137].mxu0  ;;  %v8223_v26 = vpack.c.bf16 %v8132_v9, %v8131_v27  ;;  %v7195_v24 = vld [vmem:[%s13215_s24 + $0x2de] sm:$0xff] }
 0x7fe   : > { %v7581_v3 = vpop.f32.mrb[138].mxu0  ;;  %v7258_v23 = vpack.c.bf16 %v7196_v40, %v7195_v24  ;;  %v7202_v40 = vld [vmem:[%s13215_s24 + $0x316] sm:$0xff] }
 0x7ff   : > { %v8028_v7 = vadd.f32 %v16656_v4, %v7916_v42  ;;  %v7917_v31 = vadd.f32 %v7581_v3, %v16180_v11  ;;  %10722 = vmatprep.subr.bf16.mxu1 %v8223_v26  ;;  %v12785_v53 = vpop.f32.mrb[139].mxu0 }
 0x800   : > { %10723 = vmatpush3.bf16.msra.mxu1 %v16725_v19  ;;  %v13023_v53 = vld [vmem:[%s17664_s3 + $0x38] ss:$28 sps:$4 sm:$0xff]  }
 0x801   : > { %v8029_v47 = vadd.f32 %v16656_v4, %v7917_v31  ;;  %12891 = vmatmul.mubr.msk.bf16.gmra.mrb[244].mxu0 %vm528_vm3, %v7257_v28  ;;  %v8133_v2 = vmax.f32 %v8028_v7, 0.0 }
 0x802   : > { %12894 = vmatprep.mubr.msk.bf16.mxu0 %vm13158_vm2, %v17672_v57 }
 0x803   : > { %v8134_v20 = vmax.f32 %v8029_v47, 0.0  ;;  %v13028_v47 = vld [vmem:[%s17664_s3 + $0x74] ss:$28 sps:$4 sm:$0xff]  }
 0x804   : > { %v7586_v1 = vpop.f32.mrb[140].mxu0 }
 0x805   : > { %v7918_v11 = vadd.f32 %v7586_v1, %v16191_v25  ;;  %v12788_v58 = vpop.f32.mrb[141].mxu0  ;;  %v8224_v45 = vpack.c.bf16 %v8134_v20, %v8133_v2  ;;  %v7197_v25 = vld [vmem:[%s13215_s24 + $0x2ee] sm:$0xff] }
 0x806   : > { %v7589_v19 = vpop.f32.mrb[142].mxu0  ;;  %v7259_v37 = vpack.c.bf16 %v7198_v5, %v7197_v25  ;;  %v7204_v5 = vld [vmem:[%s13215_s24 + $0x326] sm:$0xff] }
 0x807   : > { %v8030_v56 = vadd.f32 %v16656_v4, %v7918_v11  ;;  %v7919_v35 = vadd.f32 %v7589_v19, %v16196_v43  ;;  %10724 = vmatprep.subr.bf16.mxu1 %v8224_v45  ;;  %v12789_v21 = vpop.f32.mrb[143].mxu0 }
 0x808   : > { %10725 = vmatpush3.bf16.msra.mxu1 %v16736_v44  ;;  %v13026_v21 = vld [vmem:[%s17664_s3 + $0x70] ss:$28 sps:$4 sm:$0xff]  }
 0x809   : > { %v8031_v14 = vadd.f32 %v16656_v4, %v7919_v35  ;;  %12895 = vmatmul.mubr.msk.bf16.gmra.mrb[248].mxu0 %vm528_vm3, %v7258_v23  ;;  %v8135_v52 = vmax.f32 %v8030_v56, 0.0 }
 0x80a   : > { %12898 = vmatprep.mubr.msk.bf16.mxu0 %vm13158_vm2, %v17672_v57 }
 0x80b   : > { %v8136_v0 = vmax.f32 %v8031_v14, 0.0  ;;  %v13031_v14 = vld [vmem:[%s17664_s3 + $0xac] ss:$28 sps:$4 sm:$0xff]  }
 0x80c   : > { %v7594_v63 = vpop.f32.mrb[144].mxu0 }
 0x80d   : > { %v7920_v39 = vadd.f32 %v7594_v63, %v16207_v36  ;;  %v12792_v43 = vpop.f32.mrb[145].mxu0  ;;  %v8225_v30 = vpack.c.bf16 %v8136_v0, %v8135_v52  ;;  %v13025_v36 = vld [vmem:[%s17664_s3 + $0x3c] ss:$28 sps:$4 sm:$0xff]  }
 0x80e   : > { %v7597_v44 = vpop.f32.mrb[146].mxu0 }
 0x80f   : > { %v8032_v18 = vadd.f32 %v16656_v4, %v7920_v39  ;;  %v7921_v33 = vadd.f32 %v7597_v44, %v16212_v55  ;;  %10726 = vmatprep.subr.bf16.mxu1 %v8225_v30  ;;  %v12793_v46 = vpop.f32.mrb[147].mxu0  ;;  %v7199_v55 = vld [vmem:[%s13215_s24 + $0x2fe] sm:$0xff] }
 0x810   : > { %10727 = vmatpush3.bf16.msra.mxu1 %v16747_v15  ;;  %v7260_v26 = vpack.c.bf16 %v7200_v29, %v7199_v55  ;;  %v13029_v46 = vld [vmem:[%s17664_s3 + $0xa8] ss:$28 sps:$4 sm:$0xff]  }
 0x811   : > { %v8033_v59 = vadd.f32 %v16656_v4, %v7921_v33  ;;  %12899 = vmatmul.mubr.msk.bf16.gmra.mrb[252].mxu0 %vm528_vm3, %v7259_v37  ;;  %v8137_v27 = vmax.f32 %v8032_v18, 0.0 }
 0x812   : > { %12902 = vmatprep.mubr.msk.bf16.mxu0 %vm13158_vm2, %v17672_v57 }
 0x813   : > { %v8138_v9 = vmax.f32 %v8033_v59, 0.0  ;;  %8884 = vmatmul.mubr.bf16.vlgmr.msra.gmra.mrb[80].mxu1 %v13020_v12  ;;  %v13034_v12 = vld [vmem:[%s17664_s3 + $0xe4] ss:$28 sps:$4 sm:$0xff]   ;;  %v7206_v59 = vld [vmem:[%s13215_s24 + $0x336] sm:$0xff] }
 0x814   : > { %v7602_v60 = vpop.f32.mrb[148].mxu0  ;;  %8891 = vmatprep.mubr.bf16.mxu1 %v13025_v36 }
 0x815   : > { %v16844_v15 = vpack.c.bf16 %v8138_v9, %v8137_v27  ;;  %v7922_v42 = vadd.f32 %v7602_v60, %v16223_v22  ;;  %v12796_v38 = vpop.f32.mrb[149].mxu0  ;;  %v7201_v22 = vld [vmem:[%s13215_s24 + $0x30e] sm:$0xff] }
 0x816   : > { %v7605_v28 = vpop.f32.mrb[150].mxu0  ;;  %v7261_v45 = vpack.c.bf16 %v7202_v40, %v7201_v22 }
 0x817   : > { %v8034_v3 = vadd.f32 %v16656_v4, %v7922_v42  ;;  %v7923_v7 = vadd.f32 %v7605_v28, %v16228_v6  ;;  %v12797_v31 = vpop.f32.mrb[151].mxu0 }
 0x818   : > { %v13037_v31 = vld [vmem:[%s17664_s3 + $0x11c] ss:$28 sps:$4 sm:$0xff]  }
 0x819   : > { %v8035_v24 = vadd.f32 %v16656_v4, %v7923_v7  ;;  %12903 = vmatmul.mubr.msk.bf16.gmra.mrb[0].mxu0 %vm528_vm3, %v7260_v26  ;;  %v8139_v2 = vmax.f32 %v8034_v3, 0.0  ;;  %v13032_v7 = vld [vmem:[%s17664_s3 + $0xe0] ss:$28 sps:$4 sm:$0xff]  }
 0x81a   : > { %12906 = vmatprep.mubr.msk.bf16.mxu0 %vm13158_vm2, %v17672_v57 }
 0x81b   : > { %v8140_v6 = vmax.f32 %v8035_v24, 0.0  ;;  %8892 = vmatmul.mubr.bf16.gmra.mrb[84].mxu1 %v13023_v53 }
 0x81c   : > { %v7610_v20 = vpop.f32.mrb[152].mxu0  ;;  %8899 = vmatprep.mubr.bf16.mxu1 %v13028_v47  ;;  %v7208_v47 = vld [vmem:[%s13215_s24 + $0x346] sm:$0xff] }
 0x81d   : > { %v16861_v1 = vpack.c.bf16 %v8140_v6, %v8139_v2  ;;  %v7924_v11 = vadd.f32 %v7610_v20, %v16239_v16  ;;  %v12800_v58 = vpop.f32.mrb[153].mxu0  ;;  %v7203_v16 = vld [vmem:[%s13215_s24 + $0x31e] sm:$0xff] }
 0x81e   : > { %v7613_v23 = vpop.f32.mrb[154].mxu0  ;;  %v7262_v30 = vpack.c.bf16 %v7204_v5, %v7203_v16  ;;  %v18095_v2 = vld [vmem:[#allocation61_spill] sm:$0xff] }
 0x81f   : > { %v8036_v19 = vadd.f32 %v16656_v4, %v7924_v11  ;;  %v7925_v56 = vadd.f32 %v7613_v23, %v16244_v13  ;;  %v12801_v35 = vpop.f32.mrb[155].mxu0  ;;  %v18096_v23 = vld [vmem:[#allocation62_spill] sm:$0xff]  ;;  %v7210_v16 = vld [vmem:[%s13215_s24 + $0x356] sm:$0xff] }
 0x820   : > { %v13035_v35 = vld [vmem:[%s17664_s3 + $0x118] ss:$28 sps:$4 sm:$0xff]  }
 0x821   : > { %v8037_v25 = vadd.f32 %v16656_v4, %v7925_v56  ;;  %12907 = vmatmul.mubr.msk.bf16.gmra.mrb[4].mxu0 %vm528_vm3, %v7261_v45  ;;  %v8141_v52 = vmax.f32 %v8036_v19, 0.0 }
 0x822   : > { %12910 = vmatprep.mubr.msk.bf16.mxu0 %vm13158_vm2, %v17672_v57 }
 0x823   : > { %v8142_v13 = vmax.f32 %v8037_v25, 0.0  ;;  %8900 = vmatmul.mubr.bf16.gmra.mrb[88].mxu1 %v13026_v21  ;;  %v13040_v21 = vld [vmem:[%s17664_s3 + $0x154] ss:$28 sps:$4 sm:$0xff]  }
 0x824   : > { %v7618_v0 = vpop.f32.mrb[156].mxu0  ;;  %8907 = vmatprep.mubr.bf16.mxu1 %v13031_v14  ;;  %v7209_v25 = vld [vmem:[%s13215_s24 + $0x34e] sm:$0xff] }
 0x825   : > { %v16878_v63 = vpack.c.bf16 %v8142_v13, %v8141_v52  ;;  %v7926_v39 = vadd.f32 %v7618_v0, %v16255_v54  ;;  %v12804_v43 = vpop.f32.mrb[157].mxu0  ;;  %v7205_v54 = vld [vmem:[%s13215_s24 + $0x32e] sm:$0xff] }
 0x826   : > { %v7621_v37 = vpop.f32.mrb[158].mxu0  ;;  %v7263_v42 = vpack.c.bf16 %v7206_v59, %v7205_v54  ;;  %v13043_v54 = vld [vmem:[%s17664_s3 + $0x18c] ss:$28 sps:$4 sm:$0xff]  }
 0x827   : > { %v8038_v44 = vadd.f32 %v16656_v4, %v7926_v39  ;;  %v7927_v18 = vadd.f32 %v7621_v37, %v16260_v48  ;;  %v12805_v33 = vpop.f32.mrb[159].mxu0  ;;  %v18097_v39 = vld [vmem:[#allocation65_spill] sm:$0xff]  ;;  %v7265_v37 = vpack.c.bf16 %v7210_v16, %v7209_v25 }
 0x828   : > { %v18098_v33 = vld [vmem:[#allocation63_spill] sm:$0xff]  ;;  %v13044_v16 = vld [vmem:[%s17664_s3 + $0x1c0] ss:$28 sps:$4 sm:$0xff]  }
 0x829   : > { %v8039_v36 = vadd.f32 %v16656_v4, %v7927_v18  ;;  %12911 = vmatmul.mubr.msk.bf16.gmra.mrb[8].mxu0 %vm528_vm3, %v7262_v30  ;;  %v8143_v55 = vmax.f32 %v8038_v44, 0.0 }
 0x82a   : > { %12914 = vmatprep.mubr.msk.bf16.mxu0 %vm13158_vm2, %v17672_v57 }
 0x82b   : > { %v8144_v48 = vmax.f32 %v8039_v36, 0.0  ;;  %8908 = vmatmul.mubr.bf16.gmra.mrb[92].mxu1 %v13029_v46  ;;  %v13038_v36 = vld [vmem:[%s17664_s3 + $0x150] ss:$28 sps:$4 sm:$0xff]  }
 0x82c   : > { %v7626_v29 = vpop.f32.mrb[160].mxu0  ;;  %8915 = vmatprep.mubr.bf16.mxu1 %v13034_v12 }
 0x82d   : > { %v16895_v27 = vpack.c.bf16 %v8144_v48, %v8143_v55  ;;  %v7928_v9 = vadd.f32 %v7626_v29, %v16271_v61  ;;  %v12808_v60 = vpop.f32.mrb[161].mxu0  ;;  %v7207_v61 = vld [vmem:[%s13215_s24 + $0x33e] sm:$0xff]  ;;  %v7212_v48 = vld [vmem:[%s13215_s24 + $0x366] sm:$0xff] }
 0x82e   : > { %v7629_v38 = vpop.f32.mrb[162].mxu0  ;;  %v7264_v11 = vpack.c.bf16 %v7208_v47, %v7207_v61  ;;  %v7211_v55 = vld [vmem:[%s13215_s24 + $0x35e] sm:$0xff] }
 0x82f   : > { %v8040_v26 = vadd.f32 %v16656_v4, %v7928_v9  ;;  %v7929_v28 = vadd.f32 %v7629_v38, %v16276_v41  ;;  %v12809_v3 = vpop.f32.mrb[163].mxu0  ;;  %v18099_v38 = vld [vmem:[#allocation64_spill] sm:$0xff] }
 0x830   : > { %v7266_v3 = vpack.c.bf16 %v7212_v48, %v7211_v55  ;;  %v13052_v55 = vld [vmem:[%s17664_s3 + $0x234] ss:$28 sps:$4 sm:$0xff]  }
 0x831   : > { %v8041_v53 = vadd.f32 %v16656_v4, %v7929_v28  ;;  %12915 = vmatmul.mubr.msk.bf16.gmra.mrb[12].mxu0 %vm528_vm3, %v7263_v42  ;;  %v8145_v24 = vmax.f32 %v8040_v26, 0.0 }
 0x832   : > { %12918 = vmatprep.mubr.msk.bf16.mxu0 %vm13158_vm2, %v17672_v57 }
 0x833   : > { %v8146_v41 = vmax.f32 %v8041_v53, 0.0  ;;  %8916 = vmatmul.mubr.bf16.gmra.mrb[96].mxu1 %v13032_v7  ;;  %v18100_v53 = vld [vmem:[#allocation2_spill] sm:$0xff] }
 0x834   : > { %v7634_v22 = vpop.f32.mrb[164].mxu0  ;;  %8923 = vmatprep.mubr.bf16.mxu1 %v13037_v31 }
 0x835   : > { %v16912_v40 = vpack.c.bf16 %v8146_v41, %v8145_v24  ;;  %v7930_v6 = vadd.f32 %v7634_v22, %v18095_v2  ;;  %v12812_v20 = vpop.f32.mrb[165].mxu0  ;;  %v13041_v24 = vld [vmem:[%s17664_s3 + $0x188] ss:$28 sps:$4 sm:$0xff]   ;;  %v7213_v2 = vld [vmem:[%s13215_s24 + $0x36e] sm:$0xff] }
 0x836   : > { %v7637_v58 = vpop.f32.mrb[166].mxu0  ;;  %v13046_v41 = vld [vmem:[%s17664_s3 + $0x1c4] ss:$28 sps:$4 sm:$0xff]  }
 0x837   : > { %v8042_v45 = vadd.f32 %v16656_v4, %v7930_v6  ;;  %v7931_v19 = vadd.f32 %v7637_v58, %v18096_v23  ;;  %v12813_v56 = vpop.f32.mrb[167].mxu0  ;;  %v7214_v6 = vld [vmem:[%s13215_s24 + $0x376] sm:$0xff] }
 0x838   : > { %v7267_v56 = vpack.c.bf16 %v7214_v6, %v7213_v2 }
 0x839   : > { %v8043_v14 = vadd.f32 %v16656_v4, %v7931_v19  ;;  %12919 = vmatmul.mubr.msk.bf16.gmra.mrb[16].mxu0 %vm528_vm3, %v7264_v11  ;;  %v8147_v5 = vmax.f32 %v8042_v45, 0.0 }
 0x83a   : > { %12922 = vmatprep.mubr.msk.bf16.mxu0 %vm13158_vm2, %v17672_v57 }
 0x83b   : > { %v8148_v52 = vmax.f32 %v8043_v14, 0.0  ;;  %8924 = vmatmul.mubr.bf16.gmra.mrb[100].mxu1 %v13035_v35 }
 0x83c   : > { %v7642_v13 = vpop.f32.mrb[168].mxu0  ;;  %8931 = vmatprep.mubr.bf16.mxu1 %v13040_v21 }
 0x83d   : > { %v16929_v0 = vpack.c.bf16 %v8148_v52, %v8147_v5  ;;  %v7932_v43 = vadd.f32 %v7642_v13, %v18097_v39  ;;  %v12816_v30 = vpop.f32.mrb[169].mxu0  ;;  %v13049_v5 = vld [vmem:[%s17664_s3 + $0x1fc] ss:$28 sps:$4 sm:$0xff]  }
 0x83e   : > { %v7645_v44 = vpop.f32.mrb[170].mxu0 }
 0x83f   : > { %v8044_v18 = vadd.f32 %v16656_v4, %v7932_v43  ;;  %v7933_v46 = vadd.f32 %v7645_v44, %v18098_v33  ;;  %v12817_v12 = vpop.f32.mrb[171].mxu0  ;;  %v18101_v43 = vld [vmem:[#allocation3_spill] sm:$0xff] }
 0x840   : > { %v18102_v12 = vld [vmem:[#allocation4_spill] sm:$0xff] }
 0x841   : > { %v8045_v59 = vadd.f32 %v16656_v4, %v7933_v46  ;;  %12923 = vmatmul.mubr.msk.bf16.gmra.mrb[20].mxu0 %vm528_vm3, %v7265_v37  ;;  %v8149_v29 = vmax.f32 %v8044_v18, 0.0 }
 0x842   : > { %12926 = vmatprep.mubr.msk.bf16.mxu0 %vm13158_vm2, %v17672_v57 }
 0x843   : > { %v8150_v9 = vmax.f32 %v8045_v59, 0.0  ;;  %8932 = vmatmul.mubr.bf16.gmra.mrb[104].mxu1 %v13038_v36  ;;  %v13047_v59 = vld [vmem:[%s17664_s3 + $0x1f8] ss:$28 sps:$4 sm:$0xff]  }
 0x844   : > { %v7650_v60 = vpop.f32.mrb[172].mxu0  ;;  %8939 = vmatprep.mubr.bf16.mxu1 %v13043_v54 }
 0x845   : > { %v16946_v42 = vpack.c.bf16 %v8150_v9, %v8149_v29  ;;  %v7934_v26 = vadd.f32 %v7650_v60, %v18099_v38  ;;  %v12820_v28 = vpop.f32.mrb[173].mxu0  ;;  %v18103_v38 = vld [vmem:[#allocation5_spill] sm:$0xff] }
 0x846   : > { %v7653_v7 = vpop.f32.mrb[174].mxu0 }
 0x847   : > { %v8046_v31 = vadd.f32 %v16656_v4, %v7934_v26  ;;  %v7935_v61 = vadd.f32 %v7653_v7, %v18100_v53  ;;  %v12821_v47 = vpop.f32.mrb[175].mxu0 }
 0x848   : > { %v13050_v47 = vld [vmem:[%s17664_s3 + $0x230] ss:$28 sps:$4 sm:$0xff]  }
 0x849   : > { %v8047_v22 = vadd.f32 %v16656_v4, %v7935_v61  ;;  %12927 = vmatmul.mubr.msk.bf16.gmra.mrb[24].mxu0 %vm528_vm3, %v7266_v3  ;;  %v8151_v20 = vmax.f32 %v8046_v31, 0.0  ;;  %v18104_v31 = vld [vmem:[#allocation6_spill] sm:$0xff] }
 0x84a   : > { %12930 = vmatprep.mubr.msk.bf16.mxu0 %vm13158_vm2, %v17672_v57 }
 0x84b   : > { %v8152_v11 = vmax.f32 %v8047_v22, 0.0  ;;  %8940 = vmatmul.mubr.bf16.gmra.mrb[108].mxu1 %v13041_v24  ;;  %v13055_v24 = vld [vmem:[%s17664_s3 + $0x26c] ss:$28 sps:$4 sm:$0xff]  }
 0x84c   : > { %v7658_v58 = vpop.f32.mrb[176].mxu0  ;;  %8947 = vmatprep.mubr.bf16.mxu1 %v13046_v41 }
 0x84d   : > { %v16963_v45 = vpack.c.bf16 %v8152_v11, %v8151_v20  ;;  %v7936_v23 = vadd.f32 %v7658_v58, %v16335_v17  ;;  %v12824_v19 = vpop.f32.mrb[177].mxu0  ;;  %v7215_v17 = vld [vmem:[%s13215_s24 + $0x37e] sm:$0x3f]  ;;  %v18105_v20 = vld [vmem:[#allocation7_spill] sm:$0xff] }
 0x84e   : > { %v7661_v35 = vpop.f32.mrb[178].mxu0  ;;  %v7268_v18 = vpack.c.bf16 %v7215_v17, %v7215_v17  ;;  %v8359_v19 = vld [vmem:[%s17664_s3 + $0x2a0] sm:$0x33] }
 0x84f   : > { %v8048_v21 = vadd.f32 %v16656_v4, %v7936_v23  ;;  %v7937_v14 = vadd.f32 %v7661_v35, %v16339_v10  ;;  %v12825_v25 = vpop.f32.mrb[179].mxu0  ;;  %v18106_v35 = vld [vmem:[#allocation8_spill] sm:$0xff] }
 0x850   : > { %v13053_v25 = vld [vmem:[%s17664_s3 + $0x268] ss:$28 sps:$4 sm:$0xff]  }
 0x851   : > { %v8049_v52 = vadd.f32 %v16656_v4, %v7937_v14  ;;  %12931 = vmatmul.mubr.msk.bf16.gmra.mrb[28].mxu0 %vm528_vm3, %v7267_v56  ;;  %v8153_v13 = vmax.f32 %v8048_v21, 0.0 }
 0x852   : > { %12934 = vmatprep.mubr.msk.bf16.mxu0 %vm13158_vm2, %v17672_v57 }
 0x853   : > { %v8154_v39 = vmax.f32 %v8049_v52, 0.0  ;;  %8948 = vmatmul.mubr.bf16.gmra.mrb[112].mxu1 %v13044_v16  ;;  %v10155_v16 = vcombine.high %v8359_v19, %v8359_v19 }
 0x854   : > { %v7666_v10 = vpop.f32.mrb[180].mxu0  ;;  %8955 = vmatprep.mubr.bf16.mxu1 %v13049_v5 }
 0x855   : > { %v7938_v30 = vadd.f32 %v7666_v10, %v18101_v43  ;;  %v12828_v37 = vpop.f32.mrb[181].mxu0  ;;  %v8234_v44 = vpack.c.bf16 %v8154_v39, %v8153_v13  ;;  %v18107_v39 = vld [vmem:[#allocation9_spill] sm:$0xff] }
 0x856   : > { %v7669_v33 = vpop.f32.mrb[182].mxu0 }
 0x857   : > { %v8050_v46 = vadd.f32 %v16656_v4, %v7938_v30  ;;  %v7939_v36 = vadd.f32 %v7669_v33, %v18102_v12  ;;  %10806 = vmatprep.subr.bf16.mxu1 %v8234_v44  ;;  %v12829_v54 = vpop.f32.mrb[183].mxu0  ;;  %v13060_v12 = vld [vmem:[%s17664_s3 + $0xc] ss:$28 sps:$4 sm:$0xff]  }
 0x858   : > { %10807 = vmatpush3.bf16.msra.mxu1 %v16844_v15 }
 0x859   : > { %v8051_v48 = vadd.f32 %v16656_v4, %v7939_v36  ;;  %12935 = vmatmul.mubr.msk.bf16.gmra.mrb[32].mxu0 %vm528_vm3, %v7268_v18  ;;  %v8155_v29 = vmax.f32 %v8050_v46, 0.0  ;;  %v18108_v18 = vld [vmem:[#allocation10_spill] sm:$0xff] }
 0x85a   : > { %v17023_v36 = vld [vmem:[%s17663_s2] ss:$0 sm:$0xff] }
 0x85b   : > { %v8156_v9 = vmax.f32 %v8051_v48, 0.0  ;;  %8956 = vmatmul.mubr.bf16.gmra.mrb[116].mxu1 %v13047_v59  ;;  %v18109_v48 = vld [vmem:[#allocation11_spill] sm:$0xff] }
 0x85c   : > { %v7674_v60 = vpop.f32.mrb[184].mxu0  ;;  %8963 = vmatprep.mubr.bf16.mxu1 %v13052_v55 }
 0x85d   : > { %v7940_v26 = vadd.f32 %v7674_v60, %v18103_v38  ;;  %v12832_v28 = vpop.f32.mrb[185].mxu0  ;;  %v8235_v3 = vpack.c.bf16 %v8156_v9, %v8155_v29 }
 0x85e   : > { %v7677_v7 = vpop.f32.mrb[186].mxu0 }
 0x85f   : > { %v8052_v15 = vadd.f32 %v16656_v4, %v7940_v26  ;;  %v7941_v53 = vadd.f32 %v7677_v7, %v18104_v31  ;;  %10808 = vmatprep.subr.bf16.mxu1 %v8235_v3  ;;  %v12833_v61 = vpop.f32.mrb[187].mxu0  ;;  %v18110_v26 = vld [vmem:[#allocation12_spill] sm:$0xff] }
 0x860   : > { %10809 = vmatpush3.bf16.msra.mxu1 %v16861_v1  ;;  %v18111_v61 = vld [vmem:[#allocation13_spill] sm:$0xff] }
 0x861   : > { %v8053_v41 = vadd.f32 %v16656_v4, %v7941_v53  ;;  %v8157_v22 = vmax.f32 %v8052_v15, 0.0 }
 0x863   : > { %v8158_v2 = vmax.f32 %v8053_v41, 0.0  ;;  %8964 = vmatmul.mubr.bf16.gmra.mrb[120].mxu1 %v13050_v47 }
 0x864   : > { %v7682_v6 = vpop.f32.mrb[188].mxu0  ;;  %8971 = vmatprep.mubr.bf16.mxu1 %v13055_v24 }
 0x865   : > { %v7942_v11 = vadd.f32 %v7682_v6, %v18105_v20  ;;  %v12836_v58 = vpop.f32.mrb[189].mxu0  ;;  %v8236_v23 = vpack.c.bf16 %v8158_v2, %v8157_v22  ;;  %v18112_v6 = vld [vmem:[#allocation14_spill] sm:$0xff] }
 0x866   : > { %v7685_v1 = vpop.f32.mrb[190].mxu0 }
 0x867   : > { %v8054_v56 = vadd.f32 %v16656_v4, %v7942_v11  ;;  %v7943_v21 = vadd.f32 %v7685_v1, %v18106_v35  ;;  %10810 = vmatprep.subr.bf16.mxu1 %v8236_v23  ;;  %v12837_v14 = vpop.f32.mrb[191].mxu0  ;;  %v18113_v1 = vld [vmem:[#allocation15_spill] sm:$0xff] }
 0x868   : > { %10811 = vmatpush3.bf16.msra.mxu1 %v16878_v63  ;;  %v10154_v63 = vcombine.low %v8359_v19, %v8359_v19 }
 0x869   : > { %v8055_v5 = vadd.f32 %v16656_v4, %v7943_v21  ;;  %v8159_v52 = vmax.f32 %v8054_v56, 0.0 }
 0x86b   : > { %v8160_v17 = vmax.f32 %v8055_v5, 0.0  ;;  %8972 = vmatmul.mubr.bf16.gmra.mrb[124].mxu1 %v13053_v25 }
 0x86c   : > { %v7690_v13 = vpop.f32.mrb[192].mxu0  ;;  %8979 = vmatprep.mubr.bf16.mxu1 %v10155_v16  ;;  %v18114_v16 = vld [vmem:[#allocation16_spill] sm:$0xff] }
 0x86d   : > { %v7944_v10 = vadd.f32 %v7690_v13, %v18107_v39  ;;  %v12840_v43 = vpop.f32.mrb[193].mxu0  ;;  %v8237_v30 = vpack.c.bf16 %v8160_v17, %v8159_v52 }
 0x86e   : > { %v7693_v37 = vpop.f32.mrb[194].mxu0 }
 0x86f   : > { %v8056_v44 = vadd.f32 %v16656_v4, %v7944_v10  ;;  %v7945_v33 = vadd.f32 %v7693_v37, %v18108_v18  ;;  %10812 = vmatprep.subr.bf16.mxu1 %v8237_v30  ;;  %v12841_v46 = vpop.f32.mrb[195].mxu0  ;;  %v18115_v10 = vld [vmem:[#allocation17_spill] sm:$0xff] }
 0x870   : > { %10813 = vmatpush3.bf16.msra.mxu1 %v16895_v27 }
 0x871   : > { %v8057_v54 = vadd.f32 %v17023_v36, %v7945_v33  ;;  %v8161_v59 = vmax.f32 %v8056_v44, 0.0  ;;  %v18116_v33 = vld [vmem:[#allocation18_spill] sm:$0xff] }
 0x873   : > { %v8162_v4 = vmax.f32 %v8057_v54, 0.0  ;;  %8980 = vmatmul.mubr.bf16.gmra.mrb[128].mxu1 %v10154_v63 }
 0x874   : > { %v7698_v55 = vpop.f32.mrb[196].mxu0  ;;  %9019 = vmatprep.mubr.bf16.mxu1 %v13060_v12  ;;  %v13063_v12 = vld [vmem:[%s17664_s3 + $0x44] ss:$28 sps:$4 sm:$0xff]  }
 0x875   : > { %v7946_v29 = vadd.f32 %v7698_v55, %v18109_v48  ;;  %v12844_v9 = vpop.f32.mrb[197].mxu0  ;;  %v8238_v27 = vpack.c.bf16 %v8162_v4, %v8161_v59 }
 0x876   : > { %v7701_v60 = vpop.f32.mrb[198].mxu0 }
 0x877   : > { %v8058_v38 = vadd.f32 %v17023_v36, %v7946_v29  ;;  %v7947_v28 = vadd.f32 %v7701_v60, %v18110_v26  ;;  %10814 = vmatprep.subr.bf16.mxu1 %v8238_v27  ;;  %v12845_v3 = vpop.f32.mrb[199].mxu0  ;;  %v18117_v29 = vld [vmem:[#allocation19_spill] sm:$0xff] }
 0x878   : > { %10815 = vmatpush3.bf16.msra.mxu1 %v16912_v40  ;;  %v13061_v3 = vld [vmem:[%s17664_s3 + $0x40] ss:$28 sps:$4 sm:$0xff]  }
 0x879   : > { %v8059_v7 = vadd.f32 %v17023_v36, %v7947_v28  ;;  %v8163_v15 = vmax.f32 %v8058_v38, 0.0 }
 0x87b   : > { %v8164_v31 = vmax.f32 %v8059_v7, 0.0  ;;  %v13066_v7 = vld [vmem:[%s17664_s3 + $0x7c] ss:$28 sps:$4 sm:$0xff]  }
 0x87c   : > { %v7706_v53 = vpop.f32.mrb[200].mxu0 }
 0x87d   : > { %v7948_v47 = vadd.f32 %v7706_v53, %v18111_v61  ;;  %v12848_v24 = vpop.f32.mrb[201].mxu0  ;;  %v8239_v41 = vpack.c.bf16 %v8164_v31, %v8163_v15 }
 0x87e   : > { %v7709_v22 = vpop.f32.mrb[202].mxu0  ;;  %v18119_v24 = vld [vmem:[#allocation21_spill] sm:$0xff] }
 0x87f   : > { %v8060_v2 = vadd.f32 %v17023_v36, %v7948_v47  ;;  %v7949_v20 = vadd.f32 %v7709_v22, %v18112_v6  ;;  %10816 = vmatprep.subr.bf16.mxu1 %v8239_v41  ;;  %v12849_v11 = vpop.f32.mrb[203].mxu0 }
 0x880   : > { %10817 = vmatpush3.bf16.msra.mxu1 %v16929_v0 }
 0x881   : > { %v8061_v40 = vadd.f32 %v17023_v36, %v7949_v20  ;;  %v8165_v58 = vmax.f32 %v8060_v2, 0.0  ;;  %v18120_v20 = vld [vmem:[#allocation22_spill] sm:$0xff] }
 0x883   : > { %v8166_v23 = vmax.f32 %v8061_v40, 0.0 }
 0x884   : > { %v7714_v19 = vpop.f32.mrb[204].mxu0 }
 0x885   : > { %v7950_v56 = vadd.f32 %v7714_v19, %v18113_v1  ;;  %v12852_v35 = vpop.f32.mrb[205].mxu0  ;;  %v8240_v21 = vpack.c.bf16 %v8166_v23, %v8165_v58  ;;  %v13064_v58 = vld [vmem:[%s17664_s3 + $0x78] ss:$28 sps:$4 sm:$0xff]  }
 0x886   : > { %v7717_v14 = vpop.f32.mrb[206].mxu0  ;;  %v13069_v23 = vld [vmem:[%s17664_s3 + $0xb4] ss:$28 sps:$4 sm:$0xff]  }
 0x887   : > { %v8062_v25 = vadd.f32 %v17023_v36, %v7950_v56  ;;  %v7951_v5 = vadd.f32 %v7717_v14, %v18114_v16  ;;  %10818 = vmatprep.subr.bf16.mxu1 %v8240_v21  ;;  %v12853_v52 = vpop.f32.mrb[207].mxu0  ;;  %v18121_v14 = vld [vmem:[#allocation23_spill] sm:$0xff] }
 0x888   : > { %10819 = vmatpush3.bf16.msra.mxu1 %v16946_v42  ;;  %v13058_v42 = vld [vmem:[%s17664_s3 + $0x8] ss:$28 sps:$4 sm:$0xff]  }
 0x889   : > { %v8063_v0 = vadd.f32 %v17023_v36, %v7951_v5  ;;  %v8167_v17 = vmax.f32 %v8062_v25, 0.0 }
 0x88b   : > { %v8168_v13 = vmax.f32 %v8063_v0, 0.0  ;;  %v18122_v0 = vld [vmem:[#allocation24_spill] sm:$0xff] }
 0x88c   : > { %v7722_v39 = vpop.f32.mrb[208].mxu0 }
 0x88d   : > { %v7952_v43 = vadd.f32 %v7722_v39, %v18115_v10  ;;  %v12856_v30 = vpop.f32.mrb[209].mxu0  ;;  %v8241_v37 = vpack.c.bf16 %v8168_v13, %v8167_v17  ;;  %v13067_v39 = vld [vmem:[%s17664_s3 + $0xb0] ss:$28 sps:$4 sm:$0xff]  }
 0x88e   : > { %v7725_v44 = vpop.f32.mrb[210].mxu0  ;;  %v13072_v10 = vld [vmem:[%s17664_s3 + $0xec] ss:$28 sps:$4 sm:$0xff]  }
 0x88f   : > { %v8064_v18 = vadd.f32 %v17023_v36, %v7952_v43  ;;  %v7953_v46 = vadd.f32 %v7725_v44, %v18116_v33  ;;  %10820 = vmatprep.subr.bf16.mxu1 %v8241_v37  ;;  %v12857_v63 = vpop.f32.mrb[211].mxu0  ;;  %v18123_v33 = vld [vmem:[#allocation25_spill] sm:$0xff] }
 0x890   : > { %10821 = vmatpush3.bf16.msra.mxu1 %v16963_v45  ;;  %v18118_v45 = vld [vmem:[#allocation20_spill] sm:$0xff] }
 0x891   : > { %v8065_v54 = vadd.f32 %v17023_v36, %v7953_v46  ;;  %v8169_v59 = vmax.f32 %v8064_v18, 0.0 }
 0x893   : > { %v8170_v4 = vmax.f32 %v8065_v54, 0.0  ;;  %9020 = vmatmul.mubr.bf16.vlgmr.msra.gmra.mrb[132].mxu1 %v13058_v42  ;;  %v18124_v54 = vld [vmem:[#allocation26_spill] sm:$0xff] }
 0x894   : > { %v7730_v55 = vpop.f32.mrb[212].mxu0  ;;  %9027 = vmatprep.mubr.bf16.mxu1 %v13063_v12 }
 0x895   : > { %v17052_v48 = vpack.c.bf16 %v8170_v4, %v8169_v59  ;;  %v7954_v9 = vadd.f32 %v7730_v55, %v18117_v29  ;;  %v12860_v27 = vpop.f32.mrb[213].mxu0  ;;  %v13070_v55 = vld [vmem:[%s17664_s3 + $0xe8] ss:$28 sps:$4 sm:$0xff]  }
 0x896   : > { %v7733_v60 = vpop.f32.mrb[214].mxu0  ;;  %v13075_v29 = vld [vmem:[%s17664_s3 + $0x124] ss:$28 sps:$4 sm:$0xff]  }
 0x897   : > { %v8066_v38 = vadd.f32 %v17023_v36, %v7954_v9  ;;  %v7955_v26 = vadd.f32 %v7733_v60, %v18118_v45  ;;  %v12861_v28 = vpop.f32.mrb[215].mxu0 }
 0x899   : > { %v8067_v15 = vadd.f32 %v17023_v36, %v7955_v26  ;;  %v8171_v31 = vmax.f32 %v8066_v38, 0.0  ;;  %v18125_v26 = vld [vmem:[#allocation27_spill] sm:$0xff] }
 0x89b   : > { %v8172_v53 = vmax.f32 %v8067_v15, 0.0  ;;  %9028 = vmatmul.mubr.bf16.gmra.mrb[136].mxu1 %v13061_v3 }
 0x89c   : > { %v7738_v61 = vpop.f32.mrb[216].mxu0  ;;  %9035 = vmatprep.mubr.bf16.mxu1 %v13066_v7 }
 0x89d   : > { %v17064_v47 = vpack.c.bf16 %v8172_v53, %v8171_v31  ;;  %v7956_v41 = vadd.f32 %v7738_v61, %v18119_v24  ;;  %v12864_v22 = vpop.f32.mrb[217].mxu0  ;;  %v18126_v31 = vld [vmem:[#allocation28_spill] sm:$0xff]  ;;  %v13073_v24 = vld [vmem:[%s17664_s3 + $0x120] ss:$28 sps:$4 sm:$0xff]  }
 0x89e   : > { %v7741_v2 = vpop.f32.mrb[218].mxu0 }
 0x89f   : > { %v8068_v6 = vadd.f32 %v17023_v36, %v7956_v41  ;;  %v7957_v11 = vadd.f32 %v7741_v2, %v18120_v20  ;;  %v12865_v40 = vpop.f32.mrb[219].mxu0  ;;  %v13078_v41 = vld [vmem:[%s17664_s3 + $0x15c] ss:$28 sps:$4 sm:$0xff]  }
 0x8a0   : > { %v18127_v40 = vld [vmem:[#allocation29_spill] sm:$0xff] }
 0x8a1   : > { %v8069_v19 = vadd.f32 %v17023_v36, %v7957_v11  ;;  %v8173_v1 = vmax.f32 %v8068_v6, 0.0 }
 0x8a3   : > { %v8174_v56 = vmax.f32 %v8069_v19, 0.0  ;;  %9036 = vmatmul.mubr.bf16.gmra.mrb[140].mxu1 %v13064_v58 }
 0x8a4   : > { %v7746_v35 = vpop.f32.mrb[220].mxu0  ;;  %9043 = vmatprep.mubr.bf16.mxu1 %v13069_v23 }
 0x8a5   : > { %v17076_v21 = vpack.c.bf16 %v8174_v56, %v8173_v1  ;;  %v7958_v25 = vadd.f32 %v7746_v35, %v18121_v14  ;;  %v12868_v16 = vpop.f32.mrb[221].mxu0  ;;  %v18128_v56 = vld [vmem:[#allocation30_spill] sm:$0xff] }
 0x8a6   : > { %v7749_v5 = vpop.f32.mrb[222].mxu0  ;;  %v13081_v16 = vld [vmem:[%s17664_s3 + $0x194] ss:$28 sps:$4 sm:$0xff]  }
 0x8a7   : > { %v8070_v52 = vadd.f32 %v17023_v36, %v7958_v25  ;;  %v7959_v17 = vadd.f32 %v7749_v5, %v18122_v0  ;;  %v12869_v13 = vpop.f32.mrb[223].mxu0  ;;  %v13076_v25 = vld [vmem:[%s17664_s3 + $0x158] ss:$28 sps:$4 sm:$0xff]  }
 0x8a9   : > { %v8071_v43 = vadd.f32 %v17023_v36, %v7959_v17  ;;  %v8175_v30 = vmax.f32 %v8070_v52, 0.0 }
 0x8ab   : > { %v8176_v37 = vmax.f32 %v8071_v43, 0.0  ;;  %9044 = vmatmul.mubr.bf16.gmra.mrb[144].mxu1 %v13067_v39  ;;  %v18129_v39 = vld [vmem:[#allocation31_spill] sm:$0xff] }
 0x8ac   : > { %v7754_v44 = vpop.f32.mrb[224].mxu0  ;;  %9051 = vmatprep.mubr.bf16.mxu1 %v13072_v10 }
 0x8ad   : > { %v17088_v18 = vpack.c.bf16 %v8176_v37, %v8175_v30  ;;  %v7960_v46 = vadd.f32 %v7754_v44, %v18123_v33  ;;  %v12872_v63 = vpop.f32.mrb[225].mxu0  ;;  %v18130_v44 = vld [vmem:[#allocation32_spill] sm:$0xff] }
 0x8ae   : > { %v7757_v42 = vpop.f32.mrb[226].mxu0  ;;  %v13079_v63 = vld [vmem:[%s17664_s3 + $0x190] ss:$28 sps:$4 sm:$0xff]  }
 0x8af   : > { %v8072_v12 = vadd.f32 %v17023_v36, %v7960_v46  ;;  %v7961_v59 = vadd.f32 %v7757_v42, %v18124_v54  ;;  %v12873_v4 = vpop.f32.mrb[227].mxu0  ;;  %v13084_v42 = vld [vmem:[%s17664_s3 + $0x1cc] ss:$28 sps:$4 sm:$0xff]  }
 0x8b1   : > { %v8073_v9 = vadd.f32 %v17023_v36, %v7961_v59  ;;  %v8177_v27 = vmax.f32 %v8072_v12, 0.0 }
 0x8b3   : > { %v8178_v60 = vmax.f32 %v8073_v9, 0.0  ;;  %9052 = vmatmul.mubr.bf16.gmra.mrb[148].mxu1 %v13070_v55 }
 0x8b4   : > { %v7762_v38 = vpop.f32.mrb[228].mxu0  ;;  %9059 = vmatprep.mubr.bf16.mxu1 %v13075_v29  ;;  %v18131_v29 = vld [vmem:[#allocation33_spill] sm:$0xff] }
 0x8b5   : > { %v17100_v45 = vpack.c.bf16 %v8178_v60, %v8177_v27  ;;  %v7962_v28 = vadd.f32 %v7762_v38, %v18125_v26  ;;  %v12876_v3 = vpop.f32.mrb[229].mxu0  ;;  %v18132_v26 = vld [vmem:[#allocation34_spill] sm:$0xff] }
 0x8b6   : > { %v7765_v7 = vpop.f32.mrb[230].mxu0 }
 0x8b7   : > { %v8074_v15 = vadd.f32 %v17023_v36, %v7962_v28  ;;  %v7963_v53 = vadd.f32 %v7765_v7, %v18126_v31  ;;  %v12877_v61 = vpop.f32.mrb[231].mxu0  ;;  %v13082_v7 = vld [vmem:[%s17664_s3 + $0x1c8] ss:$28 sps:$4 sm:$0xff]  }
 0x8b9   : > { %v8075_v22 = vadd.f32 %v17023_v36, %v7963_v53  ;;  %v8179_v2 = vmax.f32 %v8074_v15, 0.0  ;;  %v13087_v15 = vld [vmem:[%s17664_s3 + $0x204] ss:$28 sps:$4 sm:$0xff]  }
 0x8bb   : > { %v8180_v6 = vmax.f32 %v8075_v22, 0.0  ;;  %9060 = vmatmul.mubr.bf16.gmra.mrb[152].mxu1 %v13073_v24 }
 0x8bc   : > { %v7770_v20 = vpop.f32.mrb[232].mxu0  ;;  %9067 = vmatprep.mubr.bf16.mxu1 %v13078_v41  ;;  %v18133_v41 = vld [vmem:[#allocation35_spill] sm:$0xff] }
 0x8bd   : > { %v17112_v11 = vpack.c.bf16 %v8180_v6, %v8179_v2  ;;  %v7964_v58 = vadd.f32 %v7770_v20, %v18127_v40  ;;  %v12880_v23 = vpop.f32.mrb[233].mxu0 }
 0x8be   : > { %v7773_v19 = vpop.f32.mrb[234].mxu0 }
 0x8bf   : > { %v8076_v1 = vadd.f32 %v17023_v36, %v7964_v58  ;;  %v7965_v35 = vadd.f32 %v7773_v19, %v18128_v56  ;;  %v12881_v14 = vpop.f32.mrb[235].mxu0  ;;  %v18134_v58 = vld [vmem:[#allocation36_spill] sm:$0xff]  ;;  %v13090_v56 = vld [vmem:[%s17664_s3 + $0x23c] ss:$28 sps:$4 sm:$0xff]  }
 0x8c1   : > { %v8077_v5 = vadd.f32 %v17023_v36, %v7965_v35  ;;  %v8181_v52 = vmax.f32 %v8076_v1, 0.0  ;;  %v13085_v1 = vld [vmem:[%s17664_s3 + $0x200] ss:$28 sps:$4 sm:$0xff]  }
 0x8c3   : > { %v8182_v0 = vmax.f32 %v8077_v5, 0.0  ;;  %9068 = vmatmul.mubr.bf16.gmra.mrb[156].mxu1 %v13076_v25  ;;  %v18135_v5 = vld [vmem:[#allocation37_spill] sm:$0xff] }
 0x8c4   : > { %v7778_v17 = vpop.f32.mrb[236].mxu0  ;;  %9075 = vmatprep.mubr.bf16.mxu1 %v13081_v16 }
 0x8c5   : > { %v17124_v13 = vpack.c.bf16 %v8182_v0, %v8181_v52  ;;  %v7966_v10 = vadd.f32 %v7778_v17, %v18129_v39  ;;  %v12884_v43 = vpop.f32.mrb[237].mxu0 }
 0x8c6   : > { %v7781_v30 = vpop.f32.mrb[238].mxu0  ;;  %v18136_v43 = vld [vmem:[#allocation38_spill] sm:$0xff] }
 0x8c7   : > { %v8078_v37 = vadd.f32 %v17023_v36, %v7966_v10  ;;  %v7967_v33 = vadd.f32 %v7781_v30, %v18130_v44  ;;  %v12885_v46 = vpop.f32.mrb[239].mxu0  ;;  %v13093_v44 = vld [vmem:[%s17664_s3 + $0x274] ss:$28 sps:$4 sm:$0xff]  }
 0x8c9   : > { %v8079_v12 = vadd.f32 %v17023_v36, %v7967_v33  ;;  %v8183_v54 = vmax.f32 %v8078_v37, 0.0  ;;  %v13088_v37 = vld [vmem:[%s17664_s3 + $0x238] ss:$28 sps:$4 sm:$0xff]  }
 0x8cb   : > { %v8184_v59 = vmax.f32 %v8079_v12, 0.0  ;;  %9076 = vmatmul.mubr.bf16.gmra.mrb[160].mxu1 %v13079_v63  ;;  %v18137_v12 = vld [vmem:[#allocation39_spill] sm:$0xff] }
 0x8cc   : > { %v7786_v4 = vpop.f32.mrb[240].mxu0  ;;  %9083 = vmatprep.mubr.bf16.mxu1 %v13084_v42 }
 0x8cd   : > { %v17136_v55 = vpack.c.bf16 %v8184_v59, %v8183_v54  ;;  %v7968_v9 = vadd.f32 %v7786_v4, %v18131_v29  ;;  %v12888_v27 = vpop.f32.mrb[241].mxu0  ;;  %v8360_v29 = vld [vmem:[%s17664_s3 + $0x2a8] sm:$0x33] }
 0x8ce   : > { %v7789_v60 = vpop.f32.mrb[242].mxu0 }
 0x8cf   : > { %v8080_v38 = vadd.f32 %v17023_v36, %v7968_v9  ;;  %v7969_v28 = vadd.f32 %v7789_v60, %v18132_v26  ;;  %v12889_v3 = vpop.f32.mrb[243].mxu0  ;;  %v18138_v60 = vld [vmem:[#allocation40_spill] sm:$0xff] }
 0x8d1   : > { %v8081_v31 = vadd.f32 %v17023_v36, %v7969_v28  ;;  %v8185_v53 = vmax.f32 %v8080_v38, 0.0  ;;  %v13091_v28 = vld [vmem:[%s17664_s3 + $0x270] ss:$28 sps:$4 sm:$0xff]  }
 0x8d3   : > { %v8186_v61 = vmax.f32 %v8081_v31, 0.0  ;;  %9084 = vmatmul.mubr.bf16.gmra.mrb[164].mxu1 %v13082_v7  ;;  %v10157_v7 = vcombine.high %v8360_v29, %v8360_v29 }
 0x8d4   : > { %v7794_v24 = vpop.f32.mrb[244].mxu0  ;;  %9091 = vmatprep.mubr.bf16.mxu1 %v13087_v15 }
 0x8d5   : > { %v7970_v22 = vadd.f32 %v7794_v24, %v18133_v41  ;;  %v12892_v2 = vpop.f32.mrb[245].mxu0  ;;  %v8250_v6 = vpack.c.bf16 %v8186_v61, %v8185_v53 }
 0x8d6   : > { %v7797_v20 = vpop.f32.mrb[246].mxu0 }
 0x8d7   : > { %v8082_v40 = vadd.f32 %v17023_v36, %v7970_v22  ;;  %v7971_v23 = vadd.f32 %v7797_v20, %v18134_v58  ;;  %10900 = vmatprep.subr.bf16.mxu1 %v8250_v6  ;;  %v12893_v19 = vpop.f32.mrb[247].mxu0  ;;  %v18139_v6 = vld [vmem:[#allocation41_spill] sm:$0xff] }
 0x8d8   : > { %10901 = vmatpush3.bf16.msra.mxu1 %v17052_v48 }
 0x8d9   : > { %v8083_v35 = vadd.f32 %v17023_v36, %v7971_v23  ;;  %v8187_v14 = vmax.f32 %v8082_v40, 0.0 }
 0x8db   : > { %v8188_v25 = vmax.f32 %v8083_v35, 0.0  ;;  %9092 = vmatmul.mubr.bf16.gmra.mrb[168].mxu1 %v13085_v1  ;;  %v18140_v1 = vld [vmem:[#allocation42_spill] sm:$0xff] }
 0x8dc   : > { %v7802_v16 = vpop.f32.mrb[248].mxu0  ;;  %9099 = vmatprep.mubr.bf16.mxu1 %v13090_v56 }
 0x8dd   : > { %v7972_v52 = vadd.f32 %v7802_v16, %v18135_v5  ;;  %v12896_v0 = vpop.f32.mrb[249].mxu0  ;;  %v8251_v17 = vpack.c.bf16 %v8188_v25, %v8187_v14  ;;  %v10156_v14 = vcombine.low %v8360_v29, %v8360_v29  ;;  %v13098_v16 = vld [vmem:[%s17664_s3 + $0x14] ss:$28 sps:$4 sm:$0xff]  }
 0x8de   : > { %v7805_v39 = vpop.f32.mrb[250].mxu0 }
 0x8df   : > { %v8084_v10 = vadd.f32 %v17023_v36, %v7972_v52  ;;  %v7973_v48 = vadd.f32 %v7805_v39, %v18136_v43  ;;  %10902 = vmatprep.subr.bf16.mxu1 %v8251_v17  ;;  %v12897_v30 = vpop.f32.mrb[251].mxu0 }
 0x8e0   : > { %10903 = vmatpush3.bf16.msra.mxu1 %v17064_v47  ;;  %v18141_v30 = vld [vmem:[#allocation43_spill] sm:$0xff] }
 0x8e1   : > { %v8085_v33 = vadd.f32 %v17023_v36, %v7973_v48  ;;  %v8189_v46 = vmax.f32 %v8084_v10, 0.0 }
 0x8e3   : > { %v8190_v63 = vmax.f32 %v8085_v33, 0.0  ;;  %9100 = vmatmul.mubr.bf16.gmra.mrb[172].mxu1 %v13088_v37 }
 0x8e4   : > { %v7810_v42 = vpop.f32.mrb[252].mxu0  ;;  %9107 = vmatprep.mubr.bf16.mxu1 %v13093_v44 }
 0x8e5   : > { %v7974_v54 = vadd.f32 %v7810_v42, %v18137_v12  ;;  %v12900_v59 = vpop.f32.mrb[253].mxu0  ;;  %v8252_v4 = vpack.c.bf16 %v8190_v63, %v8189_v46  ;;  %v18142_v42 = vld [vmem:[#allocation44_spill] sm:$0xff] }
 0x8e6   : > { %v7813_v47 = vpop.f32.mrb[254].mxu0  ;;  %v10728_v9 = vpop.f32.mrb[80].mxu1 }
 0x8e7   : > { %v8086_v27 = vadd.f32 %v17023_v36, %v7974_v54  ;;  %v7975_v38 = vadd.f32 %v7813_v47, %v18138_v60  ;;  %10904 = vmatprep.subr.bf16.mxu1 %v8252_v4  ;;  %v12901_v26 = vpop.f32.mrb[255].mxu0  ;;  %v10729_v3 = vpop.f32.mrb[81].mxu1 }
 0x8e8   : > { %10905 = vmatpush3.bf16.msra.mxu1 %v17076_v21  ;;  %v17180_v15 = vadd.f32 %v10729_v3, %v10728_v9  ;;  %v10731_v31 = vpop.f32.mrb[82].mxu1 }
 0x8e9   : > { %v8087_v53 = vadd.f32 %v17023_v36, %v7975_v38  ;;  %v10732_v61 = vpop.f32.mrb[83].mxu1  ;;  %v8191_v41 = vmax.f32 %v8086_v27, 0.0 }
 0x8ea   : > { %v17183_v24 = vadd.f32 %v10732_v61, %v10731_v31 }
 0x8eb   : > { %v8192_v22 = vmax.f32 %v8087_v53, 0.0  ;;  %9108 = vmatmul.mubr.bf16.gmra.mrb[176].mxu1 %v13091_v28  ;;  %v18143_v28 = vld [vmem:[#allocation45_spill] sm:$0xff] }
 0x8ec   : > { %v7818_v2 = vpop.f32.mrb[0].mxu0  ;;  %9115 = vmatprep.mubr.bf16.mxu1 %v10157_v7 }
 0x8ed   : > { %v7976_v20 = vadd.f32 %v7818_v2, %v18139_v6  ;;  %v12904_v40 = vpop.f32.mrb[1].mxu0  ;;  %v8253_v58 = vpack.c.bf16 %v8192_v22, %v8191_v41 }
 0x8ee   : > { %v7821_v23 = vpop.f32.mrb[2].mxu0  ;;  %v10734_v21 = vpop.f32.mrb[84].mxu1 }
 0x8ef   : > { %v8088_v19 = vadd.f32 %v17023_v36, %v7976_v20  ;;  %v7977_v56 = vadd.f32 %v7821_v23, %v18140_v1  ;;  %10906 = vmatprep.subr.bf16.mxu1 %v8253_v58  ;;  %v12905_v35 = vpop.f32.mrb[3].mxu0  ;;  %v10735_v25 = vpop.f32.mrb[85].mxu1 }
 0x8f0   : > { %10907 = vmatpush3.bf16.msra.mxu1 %v17088_v18  ;;  %v17192_v5 = vadd.f32 %v10735_v25, %v10734_v21  ;;  %v10737_v52 = vpop.f32.mrb[86].mxu1  ;;  %v18145_v35 = vld [vmem:[#allocation47_spill] sm:$0xff] }
 0x8f1   : > { %v8089_v0 = vadd.f32 %v17023_v36, %v7977_v56  ;;  %v10738_v17 = vpop.f32.mrb[87].mxu1  ;;  %v8193_v10 = vmax.f32 %v8088_v19, 0.0 }
 0x8f2   : > { %v17195_v39 = vadd.f32 %v10738_v17, %v10737_v52 }
 0x8f3   : > { %v8194_v43 = vmax.f32 %v8089_v0, 0.0  ;;  %9116 = vmatmul.mubr.bf16.gmra.mrb[180].mxu1 %v10156_v14 }
 0x8f4   : > { %v7826_v48 = vpop.f32.mrb[4].mxu0  ;;  %9155 = vmatprep.mubr.bf16.mxu1 %v13098_v16 }
 0x8f5   : > { %v7978_v37 = vadd.f32 %v7826_v48, %v18141_v30  ;;  %v12908_v18 = vpop.f32.mrb[5].mxu0  ;;  %v8254_v44 = vpack.c.bf16 %v8194_v43, %v8193_v10 }
 0x8f6   : > { %v7829_v33 = vpop.f32.mrb[6].mxu0  ;;  %v10740_v46 = vpop.f32.mrb[88].mxu1 }
 0x8f7   : > { %v8090_v63 = vadd.f32 %v17023_v36, %v7978_v37  ;;  %v7979_v12 = vadd.f32 %v7829_v33, %v18142_v42  ;;  %10908 = vmatprep.subr.bf16.mxu1 %v8254_v44  ;;  %v12909_v54 = vpop.f32.mrb[7].mxu0  ;;  %v10741_v59 = vpop.f32.mrb[89].mxu1 }
 0x8f8   : > { %10909 = vmatpush3.bf16.msra.mxu1 %v17100_v45  ;;  %v17201_v4 = vadd.f32 %v10741_v59, %v10740_v46  ;;  %v10743_v29 = vpop.f32.mrb[90].mxu1  ;;  %v18144_v45 = vld [vmem:[#allocation46_spill] sm:$0xff] }
 0x8f9   : > { %v8091_v47 = vadd.f32 %v17023_v36, %v7979_v12  ;;  %v10744_v9 = vpop.f32.mrb[91].mxu1  ;;  %v8195_v60 = vmax.f32 %v8090_v63, 0.0  ;;  %v18147_v12 = vld [vmem:[#allocation49_spill] sm:$0xff] }
 0x8fa   : > { %v17204_v27 = vadd.f32 %v10744_v9, %v10743_v29 }
 0x8fb   : > { %v8196_v38 = vmax.f32 %v8091_v47, 0.0 }
 0x8fc   : > { %v7834_v26 = vpop.f32.mrb[8].mxu0 }
 0x8fd   : > { %v7980_v3 = vadd.f32 %v7834_v26, %v18143_v28  ;;  %v12912_v7 = vpop.f32.mrb[9].mxu0  ;;  %v8255_v31 = vpack.c.bf16 %v8196_v38, %v8195_v60  ;;  %v13096_v28 = vld [vmem:[%s17664_s3 + $0x10] ss:$28 sps:$4 sm:$0xff]  }
 0x8fe   : > { %v7837_v53 = vpop.f32.mrb[10].mxu0  ;;  %v10746_v61 = vpop.f32.mrb[92].mxu1  ;;  %v13101_v7 = vld [vmem:[%s17664_s3 + $0x4c] ss:$28 sps:$4 sm:$0xff]  }
 0x8ff   : > { %v8092_v41 = vadd.f32 %v17023_v36, %v7980_v3  ;;  %v7981_v22 = vadd.f32 %v7837_v53, %v18144_v45  ;;  %10910 = vmatprep.subr.bf16.mxu1 %v8255_v31  ;;  %v12913_v2 = vpop.f32.mrb[11].mxu0  ;;  %v10747_v6 = vpop.f32.mrb[93].mxu1 }
 0x900   : > { %10911 = vmatpush3.bf16.msra.mxu1 %v17112_v11  ;;  %v17210_v20 = vadd.f32 %v10747_v6, %v10746_v61  ;;  %v10749_v40 = vpop.f32.mrb[94].mxu1  ;;  %v18146_v11 = vld [vmem:[#allocation48_spill] sm:$0xff] }
 0x901   : > { %v8093_v58 = vadd.f32 %v17023_v36, %v7981_v22  ;;  %v10750_v23 = vpop.f32.mrb[95].mxu1  ;;  %v8197_v19 = vmax.f32 %v8092_v41, 0.0 }
 0x902   : > { %v17213_v21 = vadd.f32 %v10750_v23, %v10749_v40 }
 0x903   : > { %v8198_v1 = vmax.f32 %v8093_v58, 0.0 }
 0x904   : > { %v7842_v56 = vpop.f32.mrb[12].mxu0 }
 0x905   : > { %v7982_v14 = vadd.f32 %v7842_v56, %v18145_v35  ;;  %v12916_v25 = vpop.f32.mrb[13].mxu0  ;;  %v8256_v16 = vpack.c.bf16 %v8198_v1, %v8197_v19 }
 0x906   : > { %v7845_v52 = vpop.f32.mrb[14].mxu0  ;;  %v10752_v0 = vpop.f32.mrb[96].mxu1 }
 0x907   : > { %v8094_v17 = vadd.f32 %v17023_v36, %v7982_v14  ;;  %v7983_v10 = vadd.f32 %v7845_v52, %v18146_v11  ;;  %10912 = vmatprep.subr.bf16.mxu1 %v8256_v16  ;;  %v12917_v43 = vpop.f32.mrb[15].mxu0  ;;  %v10753_v48 = vpop.f32.mrb[97].mxu1  ;;  %v13099_v14 = vld [vmem:[%s17664_s3 + $0x48] ss:$28 sps:$4 sm:$0xff]  }
 0x908   : > { %10913 = vmatpush3.bf16.msra.mxu1 %v17124_v13  ;;  %v17219_v30 = vadd.f32 %v10753_v48, %v10752_v0  ;;  %v10755_v37 = vpop.f32.mrb[98].mxu1  ;;  %v18148_v13 = vld [vmem:[#allocation50_spill] sm:$0xff] }
 0x909   : > { %v8095_v18 = vadd.f32 %v17023_v36, %v7983_v10  ;;  %v10756_v44 = vpop.f32.mrb[99].mxu1  ;;  %v8199_v46 = vmax.f32 %v8094_v17, 0.0 }
 0x90a   : > { %v17222_v33 = vadd.f32 %v10756_v44, %v10755_v37 }
 0x90b   : > { %v8200_v63 = vmax.f32 %v8095_v18, 0.0 }
 0x90c   : > { %v7850_v42 = vpop.f32.mrb[16].mxu0 }
 0x90d   : > { %v7984_v54 = vadd.f32 %v7850_v42, %v18147_v12  ;;  %v12920_v59 = vpop.f32.mrb[17].mxu0  ;;  %v8257_v29 = vpack.c.bf16 %v8200_v63, %v8199_v46 }
 0x90e   : > { %v7853_v47 = vpop.f32.mrb[18].mxu0  ;;  %v10758_v9 = vpop.f32.mrb[100].mxu1 }
 0x90f   : > { %v8096_v60 = vadd.f32 %v17023_v36, %v7984_v54  ;;  %v7985_v38 = vadd.f32 %v7853_v47, %v18148_v13  ;;  %10914 = vmatprep.subr.bf16.mxu1 %v8257_v29  ;;  %v12921_v26 = vpop.f32.mrb[19].mxu0  ;;  %v10759_v3 = vpop.f32.mrb[101].mxu1  ;;  %v13102_v54 = vld [vmem:[%s17664_s3 + $0x80] ss:$28 sps:$4 sm:$0xff]  }
 0x910   : > { %10915 = vmatpush3.bf16.msra.mxu1 %v17136_v55  ;;  %v17234_v31 = vadd.f32 %v10759_v3, %v10758_v9  ;;  %v10761_v53 = vpop.f32.mrb[102].mxu1 }
 0x911   : > { %v8097_v61 = vadd.f32 %v17023_v36, %v7985_v38  ;;  %12938 = vmatprep.subr.bf16.mxu1 %v17672_v57  ;;  %v10762_v41 = vpop.f32.mrb[103].mxu1  ;;  %v8201_v22 = vmax.f32 %v8096_v60, 0.0 }
 0x912   : > { %v17238_v45 = vadd.f32 %v10762_v41, %v10761_v53 }
 0x913   : > { %v8202_v2 = vmax.f32 %v8097_v61, 0.0  ;;  %9156 = vmatmul.mubr.bf16.vlgmr.msra.gmra.mrb[184].mxu1 %v13096_v28 }
 0x914   : > { %v7858_v6 = vpop.f32.mrb[20].mxu0  ;;  %9163 = vmatprep.mubr.bf16.mxu1 %v13101_v7 }
 0x915   : > { %v8258_v55 = vpack.c.bf16 %v8202_v2, %v8201_v22  ;;  %v7986_v40 = vadd.f32 %v7858_v6, %v16614_v50  ;;  %v12924_v58 = vpop.f32.mrb[21].mxu0  ;;  %v13104_v50 = vld [vmem:[%s17664_s3 + $0x84] ss:$28 sps:$4 sm:$0xff]   ;;  %v13105_v6 = vld [vmem:[%s17664_s3 + $0xb8] ss:$28 sps:$4 sm:$0xff]  }
 0x916   : > { %v7861_v23 = vpop.f32.mrb[22].mxu0  ;;  %v10764_v19 = vpop.f32.mrb[104].mxu1 }
 0x917   : > { %v8098_v1 = vadd.f32 %v17023_v36, %v7986_v40  ;;  %v7987_v56 = vadd.f32 %v7861_v23, %v16616_v8  ;;  %12939 = vmatpush3.bf16.msra.mxu1 %v8258_v55  ;;  %v12925_v35 = vpop.f32.mrb[23].mxu0  ;;  %v10765_v25 = vpop.f32.mrb[105].mxu1 }
 0x918   : > { %12940 = vmatprep.subr.bf16.mxu1 %v17672_v57  ;;  %v17250_v16 = vadd.f32 %v10765_v25, %v10764_v19  ;;  %v10767_v52 = vpop.f32.mrb[106].mxu1 }
 0x919   : > { %v8099_v0 = vadd.f32 %v17023_v36, %v7987_v56  ;;  %v10768_v17 = vpop.f32.mrb[107].mxu1  ;;  %v8203_v11 = vmax.f32 %v8098_v1, 0.0 }
 0x91a   : > { %v17253_v8 = vadd.f32 %v10768_v17, %v10767_v52 }
 0x91b   : > { %v8204_v10 = vmax.f32 %v8099_v0, 0.0  ;;  %9164 = vmatmul.mubr.bf16.gmra.mrb[188].mxu1 %v13099_v14 }
 0x91c   : > { %v7866_v43 = vpop.f32.mrb[24].mxu0  ;;  %9171 = vmatprep.mubr.bf16.mxu1 %v13104_v50 }
 0x91d   : > { %v8259_v48 = vpack.c.bf16 %v8204_v10, %v8203_v11  ;;  %v7988_v37 = vadd.f32 %v7866_v43, %v16625_v49  ;;  %v12928_v18 = vpop.f32.mrb[25].mxu0  ;;  %v13107_v49 = vld [vmem:[%s17664_s3 + $0xbc] ss:$28 sps:$4 sm:$0xff]   ;;  %v13108_v11 = vld [vmem:[%s17664_s3 + $0xf0] ss:$28 sps:$4 sm:$0xff]  }
 0x91e   : > { %v7869_v44 = vpop.f32.mrb[26].mxu0  ;;  %v10770_v46 = vpop.f32.mrb[108].mxu1 }
 0x91f   : > { %v8100_v63 = vadd.f32 %v17023_v36, %v7988_v37  ;;  %v7989_v42 = vadd.f32 %v7869_v44, %v16627_v32  ;;  %12941 = vmatpush3.bf16.msra.mxu1 %v8259_v48  ;;  %v12929_v12 = vpop.f32.mrb[27].mxu0  ;;  %v10771_v59 = vpop.f32.mrb[109].mxu1  ;;  %v13113_v48 = vld [vmem:[%s17664_s3 + $0x12c] ss:$28 sps:$4 sm:$0xff]  }
 0x920   : > { %12942 = vmatprep.subr.bf16.mxu1 %v17672_v57  ;;  %v17265_v29 = vadd.f32 %v10771_v59, %v10770_v46  ;;  %v10773_v47 = vpop.f32.mrb[110].mxu1  ;;  %v13111_v12 = vld [vmem:[%s17664_s3 + $0x128] ss:$28 sps:$4 sm:$0xff]  }
 0x921   : > { %v8101_v9 = vadd.f32 %v17023_v36, %v7989_v42  ;;  %v10774_v60 = vpop.f32.mrb[111].mxu1  ;;  %v8205_v13 = vmax.f32 %v8100_v63, 0.0  ;;  %v13116_v59 = vld [vmem:[%s17664_s3 + $0x164] ss:$28 sps:$4 sm:$0xff]  }
 0x922   : > { %v17268_v32 = vadd.f32 %v10774_v60, %v10773_v47 }
 0x923   : > { %v8206_v38 = vmax.f32 %v8101_v9, 0.0  ;;  %9172 = vmatmul.mubr.bf16.gmra.mrb[192].mxu1 %v13102_v54 }
 0x924   : > { %v7874_v26 = vpop.f32.mrb[28].mxu0  ;;  %9179 = vmatprep.mubr.bf16.mxu1 %v13107_v49 }
 0x925   : > { %v8260_v28 = vpack.c.bf16 %v8206_v38, %v8205_v13  ;;  %v7990_v3 = vadd.f32 %v7874_v26, %v16636_v51  ;;  %v12932_v7 = vpop.f32.mrb[29].mxu0  ;;  %v13110_v51 = vld [vmem:[%s17664_s3 + $0xf4] ss:$28 sps:$4 sm:$0xff]   ;;  %v13114_v38 = vld [vmem:[%s17664_s3 + $0x160] ss:$28 sps:$4 sm:$0xff]  }
 0x926   : > { %v7877_v53 = vpop.f32.mrb[30].mxu0  ;;  %v10776_v61 = vpop.f32.mrb[112].mxu1 }
 0x927   : > { %v8102_v41 = vadd.f32 %v17023_v36, %v7990_v3  ;;  %v7991_v22 = vadd.f32 %v7877_v53, %v16638_v34  ;;  %12943 = vmatpush3.bf16.msra.mxu1 %v8260_v28  ;;  %v12933_v2 = vpop.f32.mrb[31].mxu0  ;;  %v10777_v55 = vpop.f32.mrb[113].mxu1  ;;  %v13119_v28 = vld [vmem:[%s17664_s3 + $0x19c] ss:$28 sps:$4 sm:$0xff]  }
 0x928   : > { %12944 = vmatprep.subr.bf16.mxu1 %v17672_v57  ;;  %v17280_v40 = vadd.f32 %v10777_v55, %v10776_v61  ;;  %v10779_v58 = vpop.f32.mrb[114].mxu1 }
 0x929   : > { %v8103_v23 = vadd.f32 %v17023_v36, %v7991_v22  ;;  %v10780_v19 = vpop.f32.mrb[115].mxu1  ;;  %v8207_v1 = vmax.f32 %v8102_v41, 0.0  ;;  %v13117_v22 = vld [vmem:[%s17664_s3 + $0x198] ss:$28 sps:$4 sm:$0xff]  }
 0x92a   : > { %v17283_v34 = vadd.f32 %v10780_v19, %v10779_v58  ;;  %v13125_v19 = vld [vmem:[%s17664_s3 + $0x20c] ss:$28 sps:$4 sm:$0xff]  }
 0x92b   : > { %v8208_v56 = vmax.f32 %v8103_v23, 0.0  ;;  %9180 = vmatmul.mubr.bf16.gmra.mrb[196].mxu1 %v13105_v6  ;;  %v13122_v6 = vld [vmem:[%s17664_s3 + $0x1d4] ss:$28 sps:$4 sm:$0xff]  }
 0x92c   : > { %v7882_v35 = vpop.f32.mrb[32].mxu0  ;;  %9187 = vmatprep.mubr.bf16.mxu1 %v13110_v51  ;;  %v13120_v23 = vld [vmem:[%s17664_s3 + $0x1d0] ss:$28 sps:$4 sm:$0xff]  }
 0x92d   : > { %v8261_v14 = vpack.c.bf16 %v8208_v56, %v8207_v1  ;;  %v7992_v25 = vadd.f32 %v7882_v35, %v16646_v62  ;;  %v12936_v50 = vpop.f32.mrb[33].mxu0  ;;  %v13123_v1 = vld [vmem:[%s17664_s3 + $0x208] ss:$28 sps:$4 sm:$0xff]   ;;  %v13126_v35 = vld [vmem:[%s17664_s3 + $0x240] ss:$28 sps:$4 sm:$0xff]  }
 0x92e   : > { %v10782_v52 = vpop.f32.mrb[116].mxu1  ;;  %v7885_v0 = vpop.f32.mrb[34].mxu0  ;;  %v13128_v56 = vld [vmem:[%s17664_s3 + $0x244] ss:$28 sps:$4 sm:$0xff]  }
 0x92f   : > { %v8104_v17 = vadd.f32 %v17023_v36, %v7992_v25  ;;  %12945 = vmatpush3.bf16.msra.mxu1 %v8261_v14  ;;  %v10783_v10 = vpop.f32.mrb[117].mxu1  ;;  %v12937_v43 = vpop.f32.mrb[35].mxu0  ;;  %v13131_v14 = vld [vmem:[%s17664_s3 + $0x27c] ss:$28 sps:$4 sm:$0xff]   ;;  %v8361_v25 = vld [vmem:[%s17664_s3 + $0x2b0] sm:$0x33] }
 0x930   : > { %12946 = vmatprep.subr.bf16.mxu1 %v17672_v57  ;;  %v17294_v37 = vadd.f32 %v10783_v10, %v10782_v52  ;;  %v10785_v62 = vpop.f32.mrb[118].mxu1  ;;  %v13129_v52 = vld [vmem:[%s17664_s3 + $0x278] ss:$28 sps:$4 sm:$0xff]  }
 0x931   : > { %v8209_v18 = vmax.f32 %v8104_v17, 0.0  ;;  %v10786_v44 = vpop.f32.mrb[119].mxu1  ;;  %v10159_v17 = vcombine.high %v8361_v25, %v8361_v25 }
 0x932   : > { %v17296_v36 = vadd.f32 %v10786_v44, %v10785_v62 }
 0x933   : > { %v8262_v46 = vpack.c.bf16 %v8209_v18, %v8209_v18  ;;  %9188 = vmatmul.mubr.bf16.gmra.mrb[200].mxu1 %v13108_v11 }
 0x934   : > { %9195 = vmatprep.mubr.bf16.mxu1 %v13113_v48 }
 0x935   : > { %v8849_v63 = vsel %vm8847_vm4, %v8262_v46, 0  ;;  %v10158_v46 = vcombine.low %v8361_v25, %v8361_v25 }
 0x936   : > { %12947 = vmatpush3.bf16.msra.mxu1 %v8849_v63  ;;  %v10788_v42 = vpop.f32.mrb[120].mxu1 }
 0x937   : > { %v10789_v54 = vpop.f32.mrb[121].mxu1 }
 0x938   : > { %v17304_v49 = vadd.f32 %v10789_v54, %v10788_v42  ;;  %v10791_v47 = vpop.f32.mrb[122].mxu1 }
 0x939   : > { %v10792_v9 = vpop.f32.mrb[123].mxu1 }
 0x93a   : > { %v17306_v60 = vadd.f32 %v10792_v9, %v10791_v47 }
 0x93b   : > { %9196 = vmatmul.mubr.bf16.gmra.mrb[204].mxu1 %v13111_v12 }
 0x93c   : > { %9203 = vmatprep.mubr.bf16.mxu1 %v13116_v59 }
 0x93e   : > { %v10794_v13 = vpop.f32.mrb[124].mxu1 }
 0x93f   : > { %v10795_v26 = vpop.f32.mrb[125].mxu1 }
 0x940   : > { %v17314_v3 = vadd.f32 %v10795_v26, %v10794_v13  ;;  %v10797_v7 = vpop.f32.mrb[126].mxu1 }
 0x941   : > { %v10798_v53 = vpop.f32.mrb[127].mxu1 }
 0x942   : > { %v17316_v61 = vadd.f32 %v10798_v53, %v10797_v7 }
 0x943   : > { %9204 = vmatmul.mubr.bf16.gmra.mrb[208].mxu1 %v13114_v38 }
 0x944   : > { %9211 = vmatprep.mubr.bf16.mxu1 %v13119_v28 }
 0x946   : > { %v10800_v41 = vpop.f32.mrb[128].mxu1 }
 0x947   : > { %v10801_v2 = vpop.f32.mrb[129].mxu1 }
 0x948   : > { %v17324_v55 = vadd.f32 %v10801_v2, %v10800_v41  ;;  %v10803_v51 = vpop.f32.mrb[130].mxu1  ;;  %v13135_v41 = vld [vmem:[%s17664_s3 + $0x50] ss:$28 sps:$4 sm:$0xff]  }
 0x949   : > { %v10804_v58 = vpop.f32.mrb[131].mxu1 }
 0x94b   : > { %9212 = vmatmul.mubr.bf16.gmra.mrb[212].mxu1 %v13117_v22 }
 0x94c   : > { %9219 = vmatprep.mubr.bf16.mxu1 %v13122_v6 }
 0x953   : > { %9220 = vmatmul.mubr.bf16.gmra.mrb[216].mxu1 %v13120_v23 }
 0x954   : > { %9227 = vmatprep.mubr.bf16.mxu1 %v13125_v19  ;;  %v13136_v19 = vld [vmem:[%s17664_s3 + $0x88] ss:$28 sps:$4 sm:$0xff]  }
 0x95b   : > { %9228 = vmatmul.mubr.bf16.gmra.mrb[220].mxu1 %v13123_v1 }
 0x95c   : > { %9235 = vmatprep.mubr.bf16.mxu1 %v13128_v56 }
 0x963   : > { %9236 = vmatmul.mubr.bf16.gmra.mrb[224].mxu1 %v13126_v35 }
 0x964   : > { %9243 = vmatprep.mubr.bf16.mxu1 %v13131_v14 }
 0x966   : > { %v10822_v50 = vpop.f32.mrb[132].mxu1 }
 0x967   : > { %v10823_v0 = vpop.f32.mrb[133].mxu1 }
 0x968   : > { %v10824_v11 = vadd.f32 %v10823_v0, %v10822_v50  ;;  %v10825_v10 = vpop.f32.mrb[134].mxu1 }
 0x969   : > { %v10826_v43 = vpop.f32.mrb[135].mxu1 }
 0x96a   : > { %v17351_v48 = vadd.f32 %v10824_v11, %v17180_v15  ;;  %v10827_v62 = vadd.f32 %v10826_v43, %v10825_v10 }
 0x96b   : > { %9244 = vmatmul.mubr.bf16.gmra.mrb[228].mxu1 %v13129_v52  ;;  %v13137_v52 = vld [vmem:[%s17664_s3 + $0xc0] ss:$28 sps:$4 sm:$0xff]  }
 0x96c   : > { %9251 = vmatprep.mubr.bf16.mxu1 %v10159_v17  ;;  %v17354_v18 = vadd.f32 %v10827_v62, %v17183_v24  ;;  %v13134_v24 = vld [vmem:[%s17664_s3 + $0x18] ss:$28 sps:$4 sm:$0xff]  }
 0x96e   : > { %v10828_v44 = vpop.f32.mrb[136].mxu1 }
 0x96f   : > { %v10829_v63 = vpop.f32.mrb[137].mxu1 }
 0x970   : > { %v10830_v42 = vadd.f32 %v10829_v63, %v10828_v44  ;;  %v10831_v12 = vpop.f32.mrb[138].mxu1  ;;  %v13138_v44 = vld [vmem:[%s17664_s3 + $0xf8] ss:$28 sps:$4 sm:$0xff]  }
 0x971   : > { %v10832_v54 = vpop.f32.mrb[139].mxu1 }
 0x972   : > { %v17357_v59 = vadd.f32 %v10830_v42, %v17192_v5  ;;  %v10833_v47 = vadd.f32 %v10832_v54, %v10831_v12 }
 0x973   : > { %9252 = vmatmul.mubr.bf16.gmra.mrb[232].mxu1 %v10158_v46 }
 0x974   : > { %12948 = vmatprep.mubr.msk.bf16.mxu1 %vm13158_vm2, %v17672_v57  ;;  %v17362_v15 = vadd.f32 %v10833_v47, %v17195_v39 }
 0x976   : > { %v10834_v9 = vpop.f32.mrb[140].mxu1 }
 0x977   : > { %v10835_v13 = vpop.f32.mrb[141].mxu1 }
 0x978   : > { %v10836_v38 = vadd.f32 %v10835_v13, %v10834_v9  ;;  %v10837_v26 = vpop.f32.mrb[142].mxu1  ;;  %v13139_v9 = vld [vmem:[%s17664_s3 + $0x130] ss:$28 sps:$4 sm:$0xff]  }
 0x979   : > { %v10838_v28 = vpop.f32.mrb[143].mxu1 }
 0x97a   : > { %v17368_v5 = vadd.f32 %v10836_v38, %v17201_v4  ;;  %v10839_v7 = vadd.f32 %v10838_v28, %v10837_v26 }
 0x97b   : > { %12949 = vmatmul.mubr.msk.bf16.vlgmr.msra.gmra.mrb[236].mxu1 %vm8807_vm5, %v13134_v24 }
 0x97c   : > { %12952 = vmatprep.mubr.msk.bf16.mxu1 %vm13158_vm2, %v17672_v57  ;;  %v17374_v39 = vadd.f32 %v10839_v7, %v17204_v27 }
 0x97e   : > { %v10840_v53 = vpop.f32.mrb[144].mxu1 }
 0x97f   : > { %v10841_v22 = vpop.f32.mrb[145].mxu1 }
 0x980   : > { %v10842_v2 = vadd.f32 %v10841_v22, %v10840_v53  ;;  %v10843_v6 = vpop.f32.mrb[146].mxu1  ;;  %v13140_v53 = vld [vmem:[%s17664_s3 + $0x168] ss:$28 sps:$4 sm:$0xff]  }
 0x981   : > { %v10844_v51 = vpop.f32.mrb[147].mxu1 }
 0x982   : > { %v17380_v4 = vadd.f32 %v10842_v2, %v17210_v20  ;;  %v10845_v58 = vadd.f32 %v10844_v51, %v10843_v6 }
 0x983   : > { %12953 = vmatmul.mubr.msk.bf16.gmra.mrb[240].mxu1 %vm8807_vm5, %v13135_v41 }
 0x984   : > { %12956 = vmatprep.mubr.msk.bf16.mxu1 %vm13158_vm2, %v17672_v57  ;;  %v17386_v27 = vadd.f32 %v10845_v58, %v17213_v21 }
 0x986   : > { %v10846_v23 = vpop.f32.mrb[148].mxu1 }
 0x987   : > { %v10847_v1 = vpop.f32.mrb[149].mxu1 }
 0x988   : > { %v10848_v56 = vadd.f32 %v10847_v1, %v10846_v23  ;;  %v10849_v35 = vpop.f32.mrb[150].mxu1  ;;  %v13141_v23 = vld [vmem:[%s17664_s3 + $0x1a0] ss:$28 sps:$4 sm:$0xff]  }
 0x989   : > { %v10850_v14 = vpop.f32.mrb[151].mxu1 }
 0x98a   : > { %v17392_v20 = vadd.f32 %v10848_v56, %v17219_v30  ;;  %v10851_v25 = vadd.f32 %v10850_v14, %v10849_v35 }
 0x98b   : > { %12957 = vmatmul.mubr.msk.bf16.gmra.mrb[244].mxu1 %vm8807_vm5, %v13136_v19 }
 0x98c   : > { %12960 = vmatprep.mubr.msk.bf16.mxu1 %vm13158_vm2, %v17672_v57  ;;  %v17398_v21 = vadd.f32 %v10851_v25, %v17222_v33 }
 0x98e   : > { %v10852_v50 = vpop.f32.mrb[152].mxu1 }
 0x98f   : > { %v10853_v0 = vpop.f32.mrb[153].mxu1 }
 0x990   : > { %v10854_v17 = vadd.f32 %v10853_v0, %v10852_v50  ;;  %v10855_v11 = vpop.f32.mrb[154].mxu1  ;;  %v13142_v50 = vld [vmem:[%s17664_s3 + $0x1d8] ss:$28 sps:$4 sm:$0xff]  }
 0x991   : > { %v10856_v10 = vpop.f32.mrb[155].mxu1 }
 0x992   : > { %v17404_v30 = vadd.f32 %v10854_v17, %v17234_v31  ;;  %v10857_v43 = vadd.f32 %v10856_v10, %v10855_v11 }
 0x993   : > { %12961 = vmatmul.mubr.msk.bf16.gmra.mrb[248].mxu1 %vm8807_vm5, %v13137_v52 }
 0x994   : > { %12964 = vmatprep.mubr.msk.bf16.mxu1 %vm13158_vm2, %v17672_v57  ;;  %v17410_v33 = vadd.f32 %v10857_v43, %v17238_v45 }
 0x996   : > { %v10858_v62 = vpop.f32.mrb[156].mxu1 }
 0x997   : > { %v10859_v46 = vpop.f32.mrb[157].mxu1 }
 0x998   : > { %v10860_v63 = vadd.f32 %v10859_v46, %v10858_v62  ;;  %v10861_v42 = vpop.f32.mrb[158].mxu1  ;;  %v13143_v62 = vld [vmem:[%s17664_s3 + $0x210] ss:$28 sps:$4 sm:$0xff]  }
 0x999   : > { %v10862_v12 = vpop.f32.mrb[159].mxu1 }
 0x99a   : > { %v17416_v31 = vadd.f32 %v10860_v63, %v17250_v16  ;;  %v10863_v54 = vadd.f32 %v10862_v12, %v10861_v42 }
 0x99b   : > { %12965 = vmatmul.mubr.msk.bf16.gmra.mrb[252].mxu1 %vm8807_vm5, %v13138_v44 }
 0x99c   : > { %12968 = vmatprep.mubr.msk.bf16.mxu1 %vm13158_vm2, %v17672_v57  ;;  %v17422_v45 = vadd.f32 %v10863_v54, %v17253_v8 }
 0x99e   : > { %v10864_v47 = vpop.f32.mrb[160].mxu1 }
 0x99f   : > { %v10865_v24 = vpop.f32.mrb[161].mxu1 }
 0x9a0   : > { %v10866_v13 = vadd.f32 %v10865_v24, %v10864_v47  ;;  %v10867_v38 = vpop.f32.mrb[162].mxu1  ;;  %v13144_v47 = vld [vmem:[%s17664_s3 + $0x248] ss:$28 sps:$4 sm:$0xff]  }
 0x9a1   : > { %v10868_v26 = vpop.f32.mrb[163].mxu1 }
 0x9a2   : > { %v17428_v16 = vadd.f32 %v10866_v13, %v17265_v29  ;;  %v10869_v28 = vadd.f32 %v10868_v26, %v10867_v38  ;;  %v13146_v26 = vld [vmem:[%s17664_s3 + $0x2b8] ss:$0 sps:$4 sm:$0x33]  }
 0x9a3   : > { %12969 = vmatmul.mubr.msk.bf16.gmra.mrb[0].mxu1 %vm8807_vm5, %v13139_v9 }
 0x9a4   : > { %12972 = vmatprep.mubr.msk.bf16.mxu1 %vm13158_vm2, %v17672_v57  ;;  %v17434_v8 = vadd.f32 %v10869_v28, %v17268_v32 }
 0x9a6   : > { %v10870_v7 = vpop.f32.mrb[164].mxu1 }
 0x9a7   : > { %v10871_v41 = vpop.f32.mrb[165].mxu1 }
 0x9a8   : > { %v10872_v22 = vadd.f32 %v10871_v41, %v10870_v7  ;;  %v10873_v2 = vpop.f32.mrb[166].mxu1 }
 0x9a9   : > { %v10874_v6 = vpop.f32.mrb[167].mxu1 }
 0x9aa   : > { %v17440_v29 = vadd.f32 %v10872_v22, %v17280_v40  ;;  %v10875_v51 = vadd.f32 %v10874_v6, %v10873_v2 }
 0x9ab   : > { %12973 = vmatmul.mubr.msk.bf16.gmra.mrb[4].mxu1 %vm8807_vm5, %v13140_v53 }
 0x9ac   : > { %12976 = vmatprep.mubr.msk.bf16.mxu1 %vm13158_vm2, %v17672_v57  ;;  %v17446_v32 = vadd.f32 %v10875_v51, %v17283_v34 }
 0x9ae   : > { %v10876_v58 = vpop.f32.mrb[168].mxu1 }
 0x9af   : > { %v10877_v19 = vpop.f32.mrb[169].mxu1 }
 0x9b0   : > { %v10878_v1 = vadd.f32 %v10877_v19, %v10876_v58  ;;  %v10879_v56 = vpop.f32.mrb[170].mxu1 }
 0x9b1   : > { %v10880_v35 = vpop.f32.mrb[171].mxu1 }
 0x9b2   : > { %v17452_v40 = vadd.f32 %v10878_v1, %v17294_v37  ;;  %v10881_v14 = vadd.f32 %v10880_v35, %v10879_v56 }
 0x9b3   : > { %12977 = vmatmul.mubr.msk.bf16.gmra.mrb[8].mxu1 %vm8807_vm5, %v13141_v23 }
 0x9b4   : > { %12980 = vmatprep.mubr.msk.bf16.mxu1 %vm13158_vm2, %v17672_v57  ;;  %v17458_v34 = vadd.f32 %v10881_v14, %v17296_v36 }
 0x9b6   : > { %v10882_v25 = vpop.f32.mrb[172].mxu1 }
 0x9b7   : > { %v10883_v52 = vpop.f32.mrb[173].mxu1 }
 0x9b8   : > { %v10884_v0 = vadd.f32 %v10883_v52, %v10882_v25  ;;  %v10885_v17 = vpop.f32.mrb[174].mxu1 }
 0x9b9   : > { %v10886_v11 = vpop.f32.mrb[175].mxu1 }
 0x9ba   : > { %v17464_v37 = vadd.f32 %v10884_v0, %v17304_v49  ;;  %v10887_v10 = vadd.f32 %v10886_v11, %v10885_v17 }
 0x9bb   : > { %12981 = vmatmul.mubr.msk.bf16.gmra.mrb[12].mxu1 %vm8807_vm5, %v13142_v50 }
 0x9bc   : > { %12984 = vmatprep.mubr.msk.bf16.mxu1 %vm13158_vm2, %v17672_v57  ;;  %v17470_v36 = vadd.f32 %v10887_v10, %v17306_v60 }
 0x9be   : > { %v10888_v43 = vpop.f32.mrb[176].mxu1 }
 0x9bf   : > { %v10889_v44 = vpop.f32.mrb[177].mxu1 }
 0x9c0   : > { %v10890_v46 = vadd.f32 %v10889_v44, %v10888_v43  ;;  %v10891_v63 = vpop.f32.mrb[178].mxu1 }
 0x9c1   : > { %v10892_v42 = vpop.f32.mrb[179].mxu1 }
 0x9c2   : > { %v17476_v49 = vadd.f32 %v10890_v46, %v17314_v3  ;;  %v10893_v12 = vadd.f32 %v10892_v42, %v10891_v63 }
 0x9c3   : > { %12985 = vmatmul.mubr.msk.bf16.gmra.mrb[16].mxu1 %vm8807_vm5, %v13143_v62 }
 0x9c4   : > { %12988 = vmatprep.mubr.msk.bf16.mxu1 %vm13158_vm2, %v17672_v57  ;;  %v17482_v60 = vadd.f32 %v10893_v12, %v17316_v61  ;;  %v13145_v61 = vld [vmem:[%s17664_s3 + $0x280] ss:$28 sps:$4 sm:$0xff]  }
 0x9c6   : > { %v10894_v54 = vpop.f32.mrb[180].mxu1 }
 0x9c7   : > { %v10895_v9 = vpop.f32.mrb[181].mxu1 }
 0x9c8   : > { %v10896_v24 = vadd.f32 %v10895_v9, %v10894_v54  ;;  %v10897_v13 = vpop.f32.mrb[182].mxu1 }
 0x9c9   : > { %v10898_v38 = vpop.f32.mrb[183].mxu1 }
 0x9ca   : > { %v17488_v3 = vadd.f32 %v10896_v24, %v17324_v55 }
 0x9cb   : > { %12989 = vmatmul.mubr.msk.bf16.gmra.mrb[20].mxu1 %vm8807_vm5, %v13144_v47 }
 0x9cc   : > { %12992 = vmatprep.mubr.msk.bf16.mxu1 %vm13158_vm2, %v17672_v57 }
 0x9d3   : > { %12993 = vmatmul.mubr.msk.bf16.gmra.mrb[24].mxu1 %vm8807_vm5, %v13145_v61 }
 0x9d4   : > { %12996 = vmatprep.mubr.msk.bf16.mxu1 %vm13158_vm2, %v17672_v57 }
 0x9db   : > { %12997 = vmatmul.mubr.msk.bf16.gmra.mrb[28].mxu1 %vm8807_vm5, %v13146_v26 }
 0x9e6   : > { %v10916_v55 = vpop.f32.mrb[184].mxu1 }
 0x9e7   : > { %v10917_v28 = vpop.f32.mrb[185].mxu1 }
 0x9e8   : > { %v10918_v7 = vadd.f32 %v10917_v28, %v10916_v55  ;;  %v10919_v53 = vpop.f32.mrb[186].mxu1 }
 0x9e9   : > { %v10920_v41 = vpop.f32.mrb[187].mxu1 }
 0x9ea   : > { %v10921_v22 = vadd.f32 %v10920_v41, %v10919_v53  ;;  %v17504_v2 = vadd.f32 %v10918_v7, %v17351_v48 }
 0x9ec   : > { %v17507_v6 = vadd.f32 %v10921_v22, %v17354_v18 }
 0x9ee   : > { %v10922_v51 = vpop.f32.mrb[188].mxu1 }
 0x9ef   : > { %v10923_v57 = vpop.f32.mrb[189].mxu1 }
 0x9f0   : > { %v10924_v58 = vadd.f32 %v10923_v57, %v10922_v51  ;;  %v10925_v23 = vpop.f32.mrb[190].mxu1 }
 0x9f1   : > { %v10926_v19 = vpop.f32.mrb[191].mxu1 }
 0x9f2   : > { %v10927_v1 = vadd.f32 %v10926_v19, %v10925_v23  ;;  %v17510_v56 = vadd.f32 %v10924_v58, %v17357_v59 }
 0x9f4   : > { %v17513_v35 = vadd.f32 %v10927_v1, %v17362_v15 }
 0x9f6   : > { %v10928_v14 = vpop.f32.mrb[192].mxu1 }
 0x9f7   : > { %v10929_v25 = vpop.f32.mrb[193].mxu1 }
 0x9f8   : > { %v10930_v50 = vadd.f32 %v10929_v25, %v10928_v14  ;;  %v10931_v48 = vpop.f32.mrb[194].mxu1 }
 0x9f9   : > { %v10932_v52 = vpop.f32.mrb[195].mxu1 }
 0x9fa   : > { %v10933_v0 = vadd.f32 %v10932_v52, %v10931_v48  ;;  %v17516_v18 = vadd.f32 %v10930_v50, %v17368_v5 }
 0x9fc   : > { %v17519_v17 = vadd.f32 %v10933_v0, %v17374_v39 }
 0x9fe   : > { %v10934_v11 = vpop.f32.mrb[196].mxu1 }
 0x9ff   : > { %v10935_v10 = vpop.f32.mrb[197].mxu1 }
 0xa00   : > { %v10936_v43 = vadd.f32 %v10935_v10, %v10934_v11  ;;  %v10937_v59 = vpop.f32.mrb[198].mxu1 }
 0xa01   : > { %v10938_v62 = vpop.f32.mrb[199].mxu1 }
 0xa02   : > { %v10939_v44 = vadd.f32 %v10938_v62, %v10937_v59  ;;  %v17522_v15 = vadd.f32 %v10936_v43, %v17380_v4 }
 0xa04   : > { %v17525_v46 = vadd.f32 %v10939_v44, %v17386_v27 }
 0xa06   : > { %v10940_v63 = vpop.f32.mrb[200].mxu1 }
 0xa07   : > { %v10941_v42 = vpop.f32.mrb[201].mxu1 }
 0xa08   : > { %v10942_v12 = vadd.f32 %v10941_v42, %v10940_v63  ;;  %v10943_v5 = vpop.f32.mrb[202].mxu1 }
 0xa09   : > { %v10944_v54 = vpop.f32.mrb[203].mxu1 }
 0xa0a   : > { %v10945_v47 = vadd.f32 %v10944_v54, %v10943_v5  ;;  %v17528_v39 = vadd.f32 %v10942_v12, %v17392_v20 }
 0xa0c   : > { %v17531_v9 = vadd.f32 %v10945_v47, %v17398_v21 }
 0xa0e   : > { %v10946_v24 = vpop.f32.mrb[204].mxu1 }
 0xa0f   : > { %v10947_v13 = vpop.f32.mrb[205].mxu1 }
 0xa10   : > { %v10948_v38 = vadd.f32 %v10947_v13, %v10946_v24  ;;  %v10949_v4 = vpop.f32.mrb[206].mxu1 }
 0xa11   : > { %v10950_v61 = vpop.f32.mrb[207].mxu1 }
 0xa12   : > { %v10951_v26 = vadd.f32 %v10950_v61, %v10949_v4  ;;  %v17534_v27 = vadd.f32 %v10948_v38, %v17404_v30 }
 0xa14   : > { %v17537_v55 = vadd.f32 %v10951_v26, %v17410_v33 }
 0xa16   : > { %v10952_v28 = vpop.f32.mrb[208].mxu1 }
 0xa17   : > { %v10953_v7 = vpop.f32.mrb[209].mxu1 }
 0xa18   : > { %v10954_v53 = vadd.f32 %v10953_v7, %v10952_v28  ;;  %v10955_v20 = vpop.f32.mrb[210].mxu1 }
 0xa19   : > { %v10956_v41 = vpop.f32.mrb[211].mxu1 }
 0xa1a   : > { %v10957_v22 = vadd.f32 %v10956_v41, %v10955_v20  ;;  %v17540_v21 = vadd.f32 %v10954_v53, %v17416_v31 }
 0xa1c   : > { %v17543_v51 = vadd.f32 %v10957_v22, %v17422_v45 }
 0xa1e   : > { %v10958_v57 = vpop.f32.mrb[212].mxu1 }
 0xa1f   : > { %v10959_v58 = vpop.f32.mrb[213].mxu1 }
 0xa20   : > { %v10960_v23 = vadd.f32 %v10959_v58, %v10958_v57  ;;  %v10961_v30 = vpop.f32.mrb[214].mxu1 }
 0xa21   : > { %v10962_v19 = vpop.f32.mrb[215].mxu1 }
 0xa22   : > { %v10963_v1 = vadd.f32 %v10962_v19, %v10961_v30  ;;  %v17546_v33 = vadd.f32 %v10960_v23, %v17428_v16 }
 0xa24   : > { %v17549_v14 = vadd.f32 %v10963_v1, %v17434_v8 }
 0xa26   : > { %v10964_v25 = vpop.f32.mrb[216].mxu1 }
 0xa27   : > { %v10965_v50 = vpop.f32.mrb[217].mxu1 }
 0xa28   : > { %v10966_v48 = vadd.f32 %v10965_v50, %v10964_v25  ;;  %v10967_v31 = vpop.f32.mrb[218].mxu1 }
 0xa29   : > { %v10968_v52 = vpop.f32.mrb[219].mxu1 }
 0xa2a   : > { %v10969_v0 = vadd.f32 %v10968_v52, %v10967_v31  ;;  %v17552_v45 = vadd.f32 %v10966_v48, %v17440_v29 }
 0xa2c   : > { %v17555_v11 = vadd.f32 %v10969_v0, %v17446_v32 }
 0xa2e   : > { %v10970_v10 = vpop.f32.mrb[220].mxu1 }
 0xa2f   : > { %v10971_v43 = vpop.f32.mrb[221].mxu1 }
 0xa30   : > { %v10972_v59 = vadd.f32 %v10971_v43, %v10970_v10  ;;  %v10973_v16 = vpop.f32.mrb[222].mxu1 }
 0xa31   : > { %v10974_v62 = vpop.f32.mrb[223].mxu1 }
 0xa32   : > { %v10975_v44 = vadd.f32 %v10974_v62, %v10973_v16  ;;  %v17558_v8 = vadd.f32 %v10972_v59, %v17452_v40 }
 0xa34   : > { %v17561_v63 = vadd.f32 %v10975_v44, %v17458_v34 }
 0xa36   : > { %v10976_v42 = vpop.f32.mrb[224].mxu1 }
 0xa37   : > { %v10977_v12 = vpop.f32.mrb[225].mxu1 }
 0xa38   : > { %v10978_v5 = vadd.f32 %v10977_v12, %v10976_v42  ;;  %v10979_v29 = vpop.f32.mrb[226].mxu1 }
 0xa39   : > { %v10980_v54 = vpop.f32.mrb[227].mxu1 }
 0xa3a   : > { %v10981_v47 = vadd.f32 %v10980_v54, %v10979_v29  ;;  %v17564_v32 = vadd.f32 %v10978_v5, %v17464_v37 }
 0xa3c   : > { %v17567_v24 = vadd.f32 %v10981_v47, %v17470_v36 }
 0xa3e   : > { %v10982_v13 = vpop.f32.mrb[228].mxu1 }
 0xa3f   : > { %v10983_v38 = vpop.f32.mrb[229].mxu1 }
 0xa40   : > { %v10984_v40 = vadd.f32 %v10983_v38, %v10982_v13  ;;  %v10985_v4 = vpop.f32.mrb[230].mxu1 }
 0xa41   : > { %v10986_v61 = vpop.f32.mrb[231].mxu1 }
 0xa42   : > { %v10987_v34 = vadd.f32 %v10986_v61, %v10985_v4  ;;  %v17570_v26 = vadd.f32 %v10984_v40, %v17476_v49 }
 0xa44   : > { %v17573_v28 = vadd.f32 %v10987_v34, %v17482_v60 }
 0xa46   : > { %v10988_v7 = vpop.f32.mrb[232].mxu1 }
 0xa47   : > { %v10989_v53 = vpop.f32.mrb[233].mxu1 }
 0xa48   : > { %v10990_v37 = vadd.f32 %v10989_v53, %v10988_v7  ;;  %v10991_v20 = vpop.f32.mrb[234].mxu1 }
 0xa49   : > { %v10992_v41 = vpop.f32.mrb[235].mxu1 }
 0xa4a   : > { %v17576_v36 = vadd.f32 %v10990_v37, %v17488_v3 }
 0xa4e   : > { %v9293_v22 = vpop.f32.mrb[236].mxu1 }
 0xa4f   : > { %v9294_v57 = vadd.f32 %v9293_v22, %v17504_v2  ;;  %v12950_v58 = vpop.f32.mrb[237].mxu1 }
 0xa50   : > { %v9296_v49 = vpop.f32.mrb[238].mxu1 }
 0xa51   : > { %v10201_v60 = vpack.c.bf16 %v9294_v57, %v9294_v57  ;;  %v9297_v3 = vadd.f32 %v9296_v49, %v17507_v6  ;;  %v12951_v23 = vpop.f32.mrb[239].mxu1 }
 0xa53   : > { %9497 = vst.msk [vmem:[%s17583_s6] sm:$0xf] %vm9496_vm6, %v10201_v60  ;;  %v10202_v30 = vpack.c.bf16 %v9297_v3, %v9297_v3 }
 0xa55   : > { %9498 = vst.msk [vmem:[%s17583_s6 + $0x4] sm:$0xf] %vm9496_vm6, %v10202_v30 }
 0xa56   : > { %v9301_v2 = vpop.f32.mrb[240].mxu1 }
 0xa57   : > { %v9302_v19 = vadd.f32 %v9301_v2, %v17510_v56  ;;  %v12954_v1 = vpop.f32.mrb[241].mxu1 }
 0xa58   : > { %v9304_v25 = vpop.f32.mrb[242].mxu1 }
 0xa59   : > { %v10203_v50 = vpack.c.bf16 %v9302_v19, %v9302_v19  ;;  %v9305_v48 = vadd.f32 %v9304_v25, %v17513_v35  ;;  %v12955_v31 = vpop.f32.mrb[243].mxu1 }
 0xa5b   : > { %9499 = vst.msk [vmem:[%s17583_s6 + $0x8] sm:$0xf] %vm9496_vm6, %v10203_v50  ;;  %v10204_v6 = vpack.c.bf16 %v9305_v48, %v9305_v48 }
 0xa5d   : > { %9500 = vst.msk [vmem:[%s17583_s6 + $0xc] sm:$0xf] %vm9496_vm6, %v10204_v6 }
 0xa5e   : > { %v9309_v52 = vpop.f32.mrb[244].mxu1 }
 0xa5f   : > { %v9310_v0 = vadd.f32 %v9309_v52, %v17516_v18  ;;  %v12958_v10 = vpop.f32.mrb[245].mxu1 }
 0xa60   : > { %v9312_v43 = vpop.f32.mrb[246].mxu1 }
 0xa61   : > { %v10205_v56 = vpack.c.bf16 %v9310_v0, %v9310_v0  ;;  %v9313_v59 = vadd.f32 %v9312_v43, %v17519_v17  ;;  %v12959_v16 = vpop.f32.mrb[247].mxu1 }
 0xa63   : > { %9501 = vst.msk [vmem:[%s17583_s6 + $0x10] sm:$0xf] %vm9496_vm6, %v10205_v56  ;;  %v10206_v35 = vpack.c.bf16 %v9313_v59, %v9313_v59 }
 0xa65   : > { %9502 = vst.msk [vmem:[%s17583_s6 + $0x14] sm:$0xf] %vm9496_vm6, %v10206_v35 }
 0xa66   : > { %v9317_v62 = vpop.f32.mrb[248].mxu1 }
 0xa67   : > { %v9318_v44 = vadd.f32 %v9317_v62, %v17522_v15  ;;  %v12962_v42 = vpop.f32.mrb[249].mxu1 }
 0xa68   : > { %v9320_v12 = vpop.f32.mrb[250].mxu1 }
 0xa69   : > { %v10207_v18 = vpack.c.bf16 %v9318_v44, %v9318_v44  ;;  %v9321_v5 = vadd.f32 %v9320_v12, %v17525_v46  ;;  %v12963_v29 = vpop.f32.mrb[251].mxu1 }
 0xa6b   : > { %9503 = vst.msk [vmem:[%s17583_s6 + $0x18] sm:$0xf] %vm9496_vm6, %v10207_v18  ;;  %v10208_v17 = vpack.c.bf16 %v9321_v5, %v9321_v5 }
 0xa6d   : > { %9504 = vst.msk [vmem:[%s17583_s6 + $0x1c] sm:$0xf] %vm9496_vm6, %v10208_v17 }
 0xa6e   : > { %v9325_v54 = vpop.f32.mrb[252].mxu1 }
 0xa6f   : > { %v9326_v47 = vadd.f32 %v9325_v54, %v17528_v39  ;;  %v12966_v13 = vpop.f32.mrb[253].mxu1 }
 0xa70   : > { %v9328_v38 = vpop.f32.mrb[254].mxu1 }
 0xa71   : > { %v10209_v15 = vpack.c.bf16 %v9326_v47, %v9326_v47  ;;  %v9329_v40 = vadd.f32 %v9328_v38, %v17531_v9  ;;  %v12967_v4 = vpop.f32.mrb[255].mxu1 }
 0xa73   : > { %9505 = vst.msk [vmem:[%s17583_s6 + $0x20] sm:$0xf] %vm9496_vm6, %v10209_v15  ;;  %v10210_v46 = vpack.c.bf16 %v9329_v40, %v9329_v40 }
 0xa75   : > { %9506 = vst.msk [vmem:[%s17583_s6 + $0x24] sm:$0xf] %vm9496_vm6, %v10210_v46 }
 0xa76   : > { %v9333_v61 = vpop.f32.mrb[0].mxu1 }
 0xa77   : > { %v9334_v34 = vadd.f32 %v9333_v61, %v17534_v27  ;;  %v12970_v7 = vpop.f32.mrb[1].mxu1 }
 0xa78   : > { %v9336_v53 = vpop.f32.mrb[2].mxu1 }
 0xa79   : > { %v10211_v39 = vpack.c.bf16 %v9334_v34, %v9334_v34  ;;  %v9337_v37 = vadd.f32 %v9336_v53, %v17537_v55  ;;  %v12971_v20 = vpop.f32.mrb[3].mxu1 }
 0xa7b   : > { %9507 = vst.msk [vmem:[%s17583_s6 + $0x28] sm:$0xf] %vm9496_vm6, %v10211_v39  ;;  %v10212_v9 = vpack.c.bf16 %v9337_v37, %v9337_v37 }
 0xa7d   : > { %9508 = vst.msk [vmem:[%s17583_s6 + $0x2c] sm:$0xf] %vm9496_vm6, %v10212_v9 }
 0xa7e   : > { %v9341_v41 = vpop.f32.mrb[4].mxu1 }
 0xa7f   : > { %v9342_v22 = vadd.f32 %v9341_v41, %v17540_v21  ;;  %v12974_v57 = vpop.f32.mrb[5].mxu1 }
 0xa80   : > { %v9344_v58 = vpop.f32.mrb[6].mxu1 }
 0xa81   : > { %v10213_v27 = vpack.c.bf16 %v9342_v22, %v9342_v22  ;;  %v9345_v49 = vadd.f32 %v9344_v58, %v17543_v51  ;;  %v12975_v60 = vpop.f32.mrb[7].mxu1 }
 0xa83   : > { %9509 = vst.msk [vmem:[%s17583_s6 + $0x30] sm:$0xf] %vm9496_vm6, %v10213_v27  ;;  %v10214_v55 = vpack.c.bf16 %v9345_v49, %v9345_v49 }
 0xa85   : > { %9510 = vst.msk [vmem:[%s17583_s6 + $0x34] sm:$0xf] %vm9496_vm6, %v10214_v55 }
 0xa86   : > { %v9349_v3 = vpop.f32.mrb[8].mxu1 }
 0xa87   : > { %v9350_v23 = vadd.f32 %v9349_v3, %v17546_v33  ;;  %v12978_v30 = vpop.f32.mrb[9].mxu1 }
 0xa88   : > { %v9352_v2 = vpop.f32.mrb[10].mxu1 }
 0xa89   : > { %v10215_v21 = vpack.c.bf16 %v9350_v23, %v9350_v23  ;;  %v9353_v19 = vadd.f32 %v9352_v2, %v17549_v14  ;;  %v12979_v1 = vpop.f32.mrb[11].mxu1 }
 0xa8b   : > { %9511 = vst.msk [vmem:[%s17583_s6 + $0x38] sm:$0xf] %vm9496_vm6, %v10215_v21  ;;  %v10216_v51 = vpack.c.bf16 %v9353_v19, %v9353_v19 }
 0xa8d   : > { %9512 = vst.msk [vmem:[%s17583_s6 + $0x3c] sm:$0xf] %vm9496_vm6, %v10216_v51 }
 0xa8e   : > { %v9357_v25 = vpop.f32.mrb[12].mxu1 }
 0xa8f   : > { %v9358_v50 = vadd.f32 %v9357_v25, %v17552_v45  ;;  %v12982_v48 = vpop.f32.mrb[13].mxu1 }
 0xa90   : > { %v9360_v31 = vpop.f32.mrb[14].mxu1 }
 0xa91   : > { %v10217_v33 = vpack.c.bf16 %v9358_v50, %v9358_v50  ;;  %v9361_v6 = vadd.f32 %v9360_v31, %v17555_v11  ;;  %v12983_v52 = vpop.f32.mrb[15].mxu1 }
 0xa93   : > { %9513 = vst.msk [vmem:[%s17583_s6 + $0x40] sm:$0xf] %vm9496_vm6, %v10217_v33  ;;  %v10218_v14 = vpack.c.bf16 %v9361_v6, %v9361_v6 }
 0xa95   : > { %9514 = vst.msk [vmem:[%s17583_s6 + $0x44] sm:$0xf] %vm9496_vm6, %v10218_v14 }
 0xa96   : > { %v9365_v0 = vpop.f32.mrb[16].mxu1 }
 0xa97   : > { %v9366_v10 = vadd.f32 %v9365_v0, %v17558_v8  ;;  %v12986_v43 = vpop.f32.mrb[17].mxu1 }
 0xa98   : > { %v9368_v56 = vpop.f32.mrb[18].mxu1 }
 0xa99   : > { %v10219_v45 = vpack.c.bf16 %v9366_v10, %v9366_v10  ;;  %v9369_v59 = vadd.f32 %v9368_v56, %v17561_v63  ;;  %v12987_v16 = vpop.f32.mrb[19].mxu1 }
 0xa9b   : > { %9515 = vst.msk [vmem:[%s17583_s6 + $0x48] sm:$0xf] %vm9496_vm6, %v10219_v45  ;;  %v10220_v11 = vpack.c.bf16 %v9369_v59, %v9369_v59 }
 0xa9d   : > { %9516 = vst.msk [vmem:[%s17583_s6 + $0x4c] sm:$0xf] %vm9496_vm6, %v10220_v11 }
 0xa9e   : > { %v9373_v35 = vpop.f32.mrb[20].mxu1 }
 0xa9f   : > { %v9374_v62 = vadd.f32 %v9373_v35, %v17564_v32  ;;  %v12990_v44 = vpop.f32.mrb[21].mxu1 }
 0xaa0   : > { %v9376_v42 = vpop.f32.mrb[22].mxu1 }
 0xaa1   : > { %v10221_v8 = vpack.c.bf16 %v9374_v62, %v9374_v62  ;;  %v9377_v12 = vadd.f32 %v9376_v42, %v17567_v24  ;;  %v12991_v18 = vpop.f32.mrb[23].mxu1 }
 0xaa3   : > { %9517 = vst.msk [vmem:[%s17583_s6 + $0x50] sm:$0xf] %vm9496_vm6, %v10221_v8  ;;  %v10222_v63 = vpack.c.bf16 %v9377_v12, %v9377_v12 }
 0xaa5   : > { %9518 = vst.msk [vmem:[%s17583_s6 + $0x54] sm:$0xf] %vm9496_vm6, %v10222_v63 }
 0xaa6   : > { %v9381_v5 = vpop.f32.mrb[24].mxu1 }
 0xaa7   : > { %v9382_v29 = vadd.f32 %v9381_v5, %v17570_v26  ;;  %v12994_v17 = vpop.f32.mrb[25].mxu1 }
 0xaa8   : > { %v9384_v54 = vpop.f32.mrb[26].mxu1 }
 0xaa9   : > { %v10223_v32 = vpack.c.bf16 %v9382_v29, %v9382_v29  ;;  %v9385_v47 = vadd.f32 %v9384_v54, %v17573_v28  ;;  %v12995_v13 = vpop.f32.mrb[27].mxu1 }
 0xaab   : > { %9519 = vst.msk [vmem:[%s17583_s6 + $0x58] sm:$0xf] %vm9496_vm6, %v10223_v32  ;;  %v10224_v38 = vpack.c.bf16 %v9385_v47, %v9385_v47 }
 0xaad   : > { %9520 = vst.msk [vmem:[%s17583_s6 + $0x5c] sm:$0xf] %vm9496_vm6, %v10224_v38 }
 0xaae   : > { %v9389_v24 = vpop.f32.mrb[28].mxu1 }
 0xaaf   : > { %v9390_v15 = vadd.f32 %v9389_v24, %v17576_v36  ;;  %v12998_v40 = vpop.f32.mrb[29].mxu1 }
 0xab0   : > { %v9392_v4 = vpop.f32.mrb[30].mxu1 }
 0xab1   : > { %v10225_v46 = vpack.c.bf16 %v9390_v15, %v9390_v15  ;;  %v12999_v26 = vpop.f32.mrb[31].mxu1 }
 0xab3   : > { %9522 = vst.msk [vmem:[%s17583_s6 + $0x60] sm:$0x3] %vm9521_vm7, %v10225_v46 }
 0xab4 PF: > { %s14_s15 = sadd.s32 1, %s13154_s15  }
 0xab5   : > { %p11_p4 = scmp.ge.s32.totalorder %s14_s15, 8  }
 0xab7   :  { %13 = sbr.rel (!%p11_p4) target bundleno = 1 (0x1), region = 66 }

</bundles_post_ra>
